<compile_context>
chip_gen: v6e
topology: v6e:2x2x1
jax: 0.10.0
libtpu: 0.0.40
codegen_flags: <defaults>
</compile_context>

<pallas_src>
import functools

import jax
import jax.numpy as jnp
from jax.experimental import pallas as pl
from jax.experimental.pallas import tpu as pltpu


# ----------------------------- Pallas kernel --------------------------------
def _encoding_block_kernel(
    row_ref, col_ref, cost_ref,                      # data blocks (bt, ., .)
    wq_ref, wkv_ref,                                 # Wq (scaled), [Wk|Wv]
    m1w0_ref, m1w1_ref, m1b_ref, m2w_ref, m2b_ref,   # mixed-score MLP params
    wcomb_ref, bcomb_ref,                            # multi_head_combine
    g1_ref, be1_ref,                                 # instance-norm 1 affine
    wff1_ref, bff1_ref, wff2_ref, bff2_ref,          # feed-forward
    g2_ref, be2_ref,                                 # instance-norm 2 affine
    o_ref,                                           # output block (bt, N, E)
    *, head_num, qkv_dim, ms_hidden, bt, n, m,
):
    f32 = jnp.float32
    mm_dt = wq_ref.dtype                 # bf16 (MXU-native) unless disabled
    e_dim = row_ref.shape[-1]
    hd = head_num * qkv_dim
    grp = bt * head_num

    row = row_ref[...]                                # (bt, N, E) f32
    row2 = row.reshape(bt * n, e_dim)                 # fold batches into MXU rows
    col2 = col_ref[...].reshape(bt * m, e_dim)

    # ---- QKV projections: one wide matmul each (Wk|Wv fused; the 1/sqrt(d)
    #      score scale is already folded into Wq by the wrapper) ----
    q_all = jnp.dot(row2.astype(mm_dt), wq_ref[...], preferred_element_type=f32)
    kv_all = jnp.dot(col2.astype(mm_dt), wkv_ref[...], preferred_element_type=f32)
    q3 = q_all.reshape(bt, n, hd)
    kv3 = kv_all.reshape(bt, m, 2 * hd)

    # ---- one-time repack into head-major groups (g = b*H + h).  These lane
    #      slices are a single O(bt*(N+2M)*HD) repack; every heavy op below is
    #      batched over all heads at once (no per-head matmuls / relayouts). ----
    def head_major(x3, base, length):
        parts = [x3[:, :, base + h * qkv_dim: base + (h + 1) * qkv_dim]
                 for h in range(head_num)]
        return jnp.stack(parts, axis=1).reshape(grp, length, qkv_dim)

    qg = head_major(q3, 0, n)                         # (bt*H, N, D)
    kg = head_major(kv3, 0, m)                        # (bt*H, M, D)
    vg = head_major(kv3, hd, m)                       # (bt*H, M, D)

    # ---- scores for every head with one batched einsum ----
    dot_g = jnp.einsum("gnd,gmd->gnm", qg.astype(mm_dt), kg.astype(mm_dt),
                       preferred_element_type=f32)    # (bt*H, N, M)
    dot4 = dot_g.reshape(bt, head_num, n, m)

    # ---- mixed-score MLP, vectorized over (bt, H, N, M) with M on lanes.
    #      The MS hidden dim is reduced by accumulation: no (...,MS)-on-lanes
    #      vregs and no cross-lane XLU reduce.  The Python loop carries only
    #      the `mixed` accumulator, so live ranges stay bounded. ----
    cost4 = cost_ref[...][:, None, :, :]              # (bt, 1, N, M)
    w0 = m1w0_ref[...]                                # (MS, H, 1, 1)
    w1 = m1w1_ref[...]
    b1 = m1b_ref[...]
    w2 = m2w_ref[...]
    mixed = jnp.zeros_like(dot4)                      # (bt, H, N, M)
    for s in range(ms_hidden):
        pre = dot4 * w0[s] + cost4 * w1[s] + b1[s]    # per-head scalar splats
        mixed = mixed + jnp.maximum(pre, 0.0) * w2[s]
    mixed = mixed + m2b_ref[...]                      # (H, 1, 1) bias

    # ---- softmax over columns (per batch / head / row); EUP reciprocal ----
    mx = jnp.max(mixed, axis=-1, keepdims=True)
    ex = jnp.exp(mixed - mx)
    attn = ex * pl.reciprocal(jnp.sum(ex, axis=-1, keepdims=True), approx=True)

    # ---- attention output for all heads + single K=HD combine matmul ----
    ctx_g = jnp.einsum("gnm,gmd->gnd",
                       attn.reshape(grp, n, m).astype(mm_dt), vg.astype(mm_dt),
                       preferred_element_type=f32)    # (bt*H, N, D)
    ctx4 = ctx_g.reshape(bt, head_num, n, qkv_dim)
    ctx_cat = jnp.concatenate([ctx4[:, h] for h in range(head_num)], axis=-1)
    mh = (jnp.dot(ctx_cat.reshape(bt * n, hd).astype(mm_dt), wcomb_ref[...],
                  preferred_element_type=f32).reshape(bt, n, e_dim)
          + bcomb_ref[...])

    # ---- add & instance norm (two-pass mean/var, per batch over seq dim) ----
    def inorm(x, gamma_ref, beta_ref):
        mean = jnp.mean(x, axis=1, keepdims=True)
        cent = x - mean
        var = jnp.mean(cent * cent, axis=1, keepdims=True)
        scale = jax.lax.rsqrt(var + 1e-5) * gamma_ref[...]
        return cent * scale + beta_ref[...]

    out1 = inorm(row + mh, g1_ref, be1_ref)           # (bt, N, E)

    # ---- feed forward on the folded (bt*N, E) slab ----
    out1_2d = out1.reshape(bt * n, e_dim)
    hid = jnp.maximum(
        jnp.dot(out1_2d.astype(mm_dt), wff1_ref[...], preferred_element_type=f32)
        + bff1_ref[...], 0.0)
    out2 = (jnp.dot(hid.astype(mm_dt), wff2_ref[...], preferred_element_type=f32)
            + bff2_ref[...]).reshape(bt, n, e_dim)

    # ---- add & instance norm 2 ----
    out3 = inorm(out1 + out2, g2_ref, be2_ref)
    o_ref[...] = out3.astype(o_ref.dtype)


# ------------------------------- wrapper -------------------------------------
def encoding_block2(row_emb, col_emb, cost_mat, p, *, head_num, qkv_dim,
                    ms_hidden_dim, block_batch=None, use_bf16_matmul=True,
                    single_buffer_weights=True):
    B, N, E = row_emb.shape
    M = col_emb.shape[1]
    H, D, MS = head_num, qkv_dim, ms_hidden_dim
    HD = H * D
    FF = p["wff1"].shape[1]
    mm_dtype = jnp.bfloat16 if use_bf16_matmul else jnp.float32

    # MXU weights (bf16), with the 1/sqrt(qkv_dim) scale folded into Wq and
    # Wk|Wv fused into a single column-side projection.
    wq = (p["wq"] * (float(D) ** -0.5)).astype(mm_dtype)
    wkv = jnp.concatenate([p["wk"], p["wv"]], axis=1).astype(mm_dtype)
    wcomb = p["w_comb"].astype(mm_dtype)
    wff1 = p["wff1"].astype(mm_dtype)
    wff2 = p["wff2"].astype(mm_dtype)

    # Mixed-score MLP parameters as (MS, H, 1, 1): slicing the leading MS dim
    # in-kernel yields per-head scalar tiles that splat over the (N, M) score
    # tile (no lane-sparse weight layouts, no per-iteration SMEM reads).
    def mlp_param(x_hm):                                 # (H, MS) -> (MS, H, 1, 1)
        return jnp.transpose(x_hm.astype(jnp.float32), (1, 0)).reshape(MS, H, 1, 1)

    m1w0 = mlp_param(p["mix1_w"][:, 0, :])
    m1w1 = mlp_param(p["mix1_w"][:, 1, :])
    m1b = mlp_param(p["mix1_b"].reshape(H, MS))
    m2w = mlp_param(p["mix2_w"].reshape(H, MS))
    m2b = p["mix2_b"].reshape(H, 1, 1).astype(jnp.float32)

    # ---- per-chip VMEM budget (64 MiB physical on v7x, 128 MiB on v5e/v6e)
    #      and batch-fold (block_batch) selection ----
    try:
        info = pltpu.get_tpu_info()
        vmem_cap = int(getattr(info, "vmem_capacity_bytes", 0)) or (64 << 20)
    except Exception:
        vmem_cap = 64 << 20                              # conservative fallback
    vmem_limit = int(min(0.75 * vmem_cap, 100 * (1 << 20)))
    budget = int(0.6 * vmem_limit)

    weight_bytes = (
        (E * HD + E * 2 * HD + HD * E + E * FF + FF * E) * jnp.dtype(mm_dtype).itemsize
        + (4 * MS * H + H) * 8 * 128 * 4      # (...,1,1) MLP params incl. tile padding
        + 8 * (6 * E + FF) * 4)               # bias / affine rows (padded)

    def est_bytes(bt):
        f4 = 4
        io = 2 * (2 * bt * N * E + bt * M * E + bt * N * M) * f4   # dbl-buffered blocks
        inter = (bt * N * HD + bt * M * 2 * HD           # q / kv projections
                 + bt * (N + 2 * M) * HD                 # head-major q/k/v
                 + 4 * bt * H * N * M                    # scores / MLP temps / attn
                 + bt * N * HD                           # attention output
                 + 6 * bt * N * E + bt * N * FF) * f4    # combine / norm / FF slabs
        return io + 2 * weight_bytes + int(1.5 * inter)

    if block_batch is None:
        divs = [d for d in range(1, B + 1) if B % d == 0]
        ok = [d for d in divs if est_bytes(d) <= budget] or [1]
        big = [d for d in ok if d * N >= 256]            # fill MXU rows in one pass
        bt = min(big) if big else max(ok)
        if B // bt < 2:                                  # keep both v7x cores fed
            alt = [d for d in ok if B // d >= 2]
            if alt:
                bt = max(alt)
    else:
        bt = int(block_batch)
    assert B % bt == 0, "batch must be divisible by block_batch"

    kernel = functools.partial(
        _encoding_block_kernel, head_num=H, qkv_dim=D, ms_hidden=MS,
        bt=bt, n=N, m=M)

    args = (row_emb, col_emb, cost_mat,
            wq, wkv, m1w0, m1w1, m1b, m2w, m2b,
            wcomb, p["b_comb"].reshape(1, E),
            p["gamma1"].reshape(1, E), p["beta1"].reshape(1, E),
            wff1, p["bff1"].reshape(1, FF),
            wff2, p["bff2"].reshape(1, E),
            p["gamma2"].reshape(1, E), p["beta2"].reshape(1, E))

    def run(single_buffer):
        def const_spec(shape):
            nd = len(shape)
            kw = {"pipeline_mode": pl.Buffered(1)} if single_buffer else {}
            return pl.BlockSpec(shape, lambda b, _nd=nd: (0,) * _nd, **kw)

        in_specs = [
            pl.BlockSpec((bt, N, E), lambda b: (b, 0, 0)),    # row_emb
            pl.BlockSpec((bt, M, E), lambda b: (b, 0, 0)),    # col_emb
            pl.BlockSpec((bt, N, M), lambda b: (b, 0, 0)),    # cost_mat
            const_spec((E, HD)), const_spec((E, 2 * HD)),     # Wq, [Wk|Wv]
            const_spec((MS, H, 1, 1)), const_spec((MS, H, 1, 1)),
            const_spec((MS, H, 1, 1)), const_spec((MS, H, 1, 1)),
            const_spec((H, 1, 1)),                            # mixed-MLP params
            const_spec((HD, E)), const_spec((1, E)),          # combine W, b
            const_spec((1, E)), const_spec((1, E)),           # gamma1, beta1
            const_spec((E, FF)), const_spec((1, FF)),         # ff W1, b1
            const_spec((FF, E)), const_spec((1, E)),          # ff W2, b2
            const_spec((1, E)), const_spec((1, E)),           # gamma2, beta2
        ]
        return pl.pallas_call(
            kernel,
            out_shape=jax.ShapeDtypeStruct((B, N, E), jnp.float32),
            grid=(B // bt,),
            in_specs=in_specs,
            out_specs=pl.BlockSpec((bt, N, E), lambda b: (b, 0, 0)),
            compiler_params=pltpu.CompilerParams(
                dimension_semantics=("parallel",),
                vmem_limit_bytes=vmem_limit),
        )(*args)

    if single_buffer_weights:
        try:
            return run(True)
        except Exception:
            # pl.Buffered(1) single-buffering unavailable on this jax version;
            # fall back to default (double-buffered) weight blocks.
            pass
    return run(False)


# -------------------------- pure-JAX reference --------------------------------
def encoding_block2_ref(row_emb, col_emb, cost_mat, p, *, head_num, qkv_dim):
    B, N, E = row_emb.shape
    M = col_emb.shape[1]
    H, D = head_num, qkv_dim

    def by_heads(x):
        return x.reshape(B, -1, H, D).transpose(0, 2, 1, 3)

    q = by_heads(row_emb @ p["wq"])
    k = by_heads(col_emb @ p["wk"])
    v = by_heads(col_emb @ p["wv"])

    dot = jnp.einsum("bhnd,bhmd->bhnm", q, k) / (qkv_dim ** 0.5)
    cost = jnp.broadcast_to(cost_mat[:, None], (B, H, N, M))
    two = jnp.stack([dot, cost], axis=-1)                       # (B,H,N,M,2)
    two_t = two.transpose(0, 2, 1, 3, 4)                        # (B,N,H,M,2)
    ms1 = jnp.einsum("bnhmt,hts->bnhms", two_t, p["mix1_w"]) + p["mix1_b"][None, None]
    ms1 = jax.nn.relu(ms1)
    ms2 = jnp.einsum("bnhms,hso->bnhmo", ms1, p["mix2_w"]) + p["mix2_b"][None, None]
    mixed = ms2.transpose(0, 2, 1, 3, 4)[..., 0]                # (B,H,N,M)
    attn = jax.nn.softmax(mixed, axis=-1)
    out = jnp.einsum("bhnm,bhmd->bhnd", attn, v)
    out_concat = out.transpose(0, 2, 1, 3).reshape(B, N, H * D)

    mh = out_concat @ p["w_comb"] + p["b_comb"]

    def inorm(x, g, b):
        mean = x.mean(axis=1, keepdims=True)
        var = ((x - mean) ** 2).mean(axis=1, keepdims=True)
        return (x - mean) / jnp.sqrt(var + 1e-5) * g + b

    out1 = inorm(row_emb + mh, p["gamma1"], p["beta1"])
    out2 = jax.nn.relu(out1 @ p["wff1"] + p["bff1"]) @ p["wff2"] + p["bff2"]
    return inorm(out1 + out2, p["gamma2"], p["beta2"])


# ---------------------------------- main --------------------------------------
if __name__ == "__main__":
    B, N, M = 2, 8, 8
    E, H, D = 32, 4, 8           # embedding_dim, head_num, qkv_dim
    MS, FF = 16, 64              # ms_hidden_dim, ff_hidden_dim
    HD = H * D

    key = jax.random.PRNGKey(0)
    ks = jax.random.split(key, 24)

    def u(k, shape, bound):
        return jax.random.uniform(k, shape, jnp.float32, -bound, bound)

    p = {
        "wq": u(ks[0], (E, HD), E ** -0.5),
        "wk": u(ks[1], (E, HD), E ** -0.5),
        "wv": u(ks[2], (E, HD), E ** -0.5),
        "mix1_w": u(ks[3], (H, 2, MS), (1 / 2) ** 0.5),
        "mix1_b": u(ks[4], (H, 1, MS), (1 / 2) ** 0.5),
        "mix2_w": u(ks[5], (H, MS, 1), (1 / 16) ** 0.5),
        "mix2_b": u(ks[6], (H, 1, 1), (1 / 16) ** 0.5),
        "w_comb": u(ks[7], (HD, E), HD ** -0.5),
        "b_comb": u(ks[8], (E,), HD ** -0.5),
        "gamma1": 1.0 + 0.1 * jax.random.normal(ks[9], (E,), jnp.float32),
        "beta1": 0.1 * jax.random.normal(ks[10], (E,), jnp.float32),
        "wff1": u(ks[11], (E, FF), E ** -0.5),
        "bff1": u(ks[12], (FF,), E ** -0.5),
        "wff2": u(ks[13], (FF, E), FF ** -0.5),
        "bff2": u(ks[14], (E,), FF ** -0.5),
        "gamma2": 1.0 + 0.1 * jax.random.normal(ks[15], (E,), jnp.float32),
        "beta2": 0.1 * jax.random.normal(ks[16], (E,), jnp.float32),
    }

    row_emb = jax.random.normal(ks[17], (B, N, E), jnp.float32)
    col_emb = jax.random.normal(ks[18], (B, M, E), jnp.float32)
    cost_mat = jax.random.uniform(ks[19], (B, N, M), jnp.float32)

    out = encoding_block2(row_emb, col_emb, cost_mat, p,
                          head_num=H, qkv_dim=D, ms_hidden_dim=MS)
    out = jax.block_until_ready(out)

    ref = encoding_block2_ref(row_emb, col_emb, cost_mat, p, head_num=H, qkv_dim=D)
    assert out.shape == (B, N, E)
    # Tolerance covers bf16 MXU operands (review-recommended), the approximate
    # EUP reciprocal in the softmax, and bf16 weight conversion; the f32
    # reference above is exact.  Observed error is well below this bound.
    err = float(jnp.max(jnp.abs(out - ref)))
    assert bool(jnp.allclose(out, ref, atol=2e-2, rtol=2e-2)), f"max abs err {err}"

    print("KERNEL_OK")
</pallas_src>

<mosaic_0001>
module attributes {stable_mosaic.version = 11 : i64} {
  func.func @_encoding_block_kernel(%arg0: i32, %arg1: memref<1x8x32xf32, #tpu.memory_space<vmem>>, %arg2: memref<1x8x32xf32, #tpu.memory_space<vmem>>, %arg3: memref<1x8x8xf32, #tpu.memory_space<vmem>>, %arg4: memref<32x32xbf16, #tpu.memory_space<vmem>>, %arg5: memref<32x64xbf16, #tpu.memory_space<vmem>>, %arg6: memref<16x4x1x1xf32, #tpu.memory_space<vmem>>, %arg7: memref<16x4x1x1xf32, #tpu.memory_space<vmem>>, %arg8: memref<16x4x1x1xf32, #tpu.memory_space<vmem>>, %arg9: memref<16x4x1x1xf32, #tpu.memory_space<vmem>>, %arg10: memref<4x1x1xf32, #tpu.memory_space<vmem>>, %arg11: memref<32x32xbf16, #tpu.memory_space<vmem>>, %arg12: memref<1x32xf32, #tpu.memory_space<vmem>>, %arg13: memref<1x32xf32, #tpu.memory_space<vmem>>, %arg14: memref<1x32xf32, #tpu.memory_space<vmem>>, %arg15: memref<32x64xbf16, #tpu.memory_space<vmem>>, %arg16: memref<1x64xf32, #tpu.memory_space<vmem>>, %arg17: memref<64x32xbf16, #tpu.memory_space<vmem>>, %arg18: memref<1x32xf32, #tpu.memory_space<vmem>>, %arg19: memref<1x32xf32, #tpu.memory_space<vmem>>, %arg20: memref<1x32xf32, #tpu.memory_space<vmem>>, %arg21: memref<1x8x32xf32, #tpu.memory_space<vmem>>) attributes {dimension_semantics = [#tpu.dimension_semantics<parallel>], iteration_bounds = array<i64: 2>, scalar_prefetch = 0 : i64, scratch_operands = 0 : i64, tpu.core_type = #tpu.core_type<tc>, window_params = [{transform_indices = @transform_0, window_bounds = array<i64: 1, 8, 32>}, {transform_indices = @transform_1, window_bounds = array<i64: 1, 8, 32>}, {transform_indices = @transform_2, window_bounds = array<i64: 1, 8, 8>}, {pipeline_mode = #tpu.pipeline_mode<synchronous>, transform_indices = @transform_3, window_bounds = array<i64: 32, 32>}, {pipeline_mode = #tpu.pipeline_mode<synchronous>, transform_indices = @transform_4, window_bounds = array<i64: 32, 64>}, {pipeline_mode = #tpu.pipeline_mode<synchronous>, transform_indices = @transform_5, window_bounds = array<i64: 16, 4, 1, 1>}, {pipeline_mode = #tpu.pipeline_mode<synchronous>, transform_indices = @transform_6, window_bounds = array<i64: 16, 4, 1, 1>}, {pipeline_mode = #tpu.pipeline_mode<synchronous>, transform_indices = @transform_7, window_bounds = array<i64: 16, 4, 1, 1>}, {pipeline_mode = #tpu.pipeline_mode<synchronous>, transform_indices = @transform_8, window_bounds = array<i64: 16, 4, 1, 1>}, {pipeline_mode = #tpu.pipeline_mode<synchronous>, transform_indices = @transform_9, window_bounds = array<i64: 4, 1, 1>}, {pipeline_mode = #tpu.pipeline_mode<synchronous>, transform_indices = @transform_10, window_bounds = array<i64: 32, 32>}, {pipeline_mode = #tpu.pipeline_mode<synchronous>, transform_indices = @transform_11, window_bounds = array<i64: 1, 32>}, {pipeline_mode = #tpu.pipeline_mode<synchronous>, transform_indices = @transform_12, window_bounds = array<i64: 1, 32>}, {pipeline_mode = #tpu.pipeline_mode<synchronous>, transform_indices = @transform_13, window_bounds = array<i64: 1, 32>}, {pipeline_mode = #tpu.pipeline_mode<synchronous>, transform_indices = @transform_14, window_bounds = array<i64: 32, 64>}, {pipeline_mode = #tpu.pipeline_mode<synchronous>, transform_indices = @transform_15, window_bounds = array<i64: 1, 64>}, {pipeline_mode = #tpu.pipeline_mode<synchronous>, transform_indices = @transform_16, window_bounds = array<i64: 64, 32>}, {pipeline_mode = #tpu.pipeline_mode<synchronous>, transform_indices = @transform_17, window_bounds = array<i64: 1, 32>}, {pipeline_mode = #tpu.pipeline_mode<synchronous>, transform_indices = @transform_18, window_bounds = array<i64: 1, 32>}, {pipeline_mode = #tpu.pipeline_mode<synchronous>, transform_indices = @transform_19, window_bounds = array<i64: 1, 32>}, {transform_indices = @transform_20, window_bounds = array<i64: 1, 8, 32>}]} {
    %c0 = arith.constant 0 : index
    %c0_0 = arith.constant 0 : index
    %c0_1 = arith.constant 0 : index
    %0 = vector.load %arg1[%c0, %c0_0, %c0_1] : memref<1x8x32xf32, #tpu.memory_space<vmem>>, vector<1x8x32xf32>
    %1 = vector.shape_cast %0 : vector<1x8x32xf32> to vector<8x32xf32>
    %c0_2 = arith.constant 0 : index
    %c0_3 = arith.constant 0 : index
    %c0_4 = arith.constant 0 : index
    %2 = vector.load %arg2[%c0_2, %c0_3, %c0_4] : memref<1x8x32xf32, #tpu.memory_space<vmem>>, vector<1x8x32xf32>
    %3 = vector.shape_cast %2 : vector<1x8x32xf32> to vector<8x32xf32>
    %4 = arith.truncf %1 : vector<8x32xf32> to vector<8x32xbf16>
    %c0_5 = arith.constant 0 : index
    %c0_6 = arith.constant 0 : index
    %5 = vector.load %arg4[%c0_5, %c0_6] : memref<32x32xbf16, #tpu.memory_space<vmem>>, vector<32x32xbf16>
    %cst = arith.constant dense<0.000000e+00> : vector<8x32xf32>
    %6 = tpu.matmul %4, %5, %cst {dimension_numbers = #tpu.dot_dimension_numbers<[1], [0], [0], [1], [0, 0, 1, 1], [], []>} : vector<8x32xbf16>, vector<32x32xbf16>, vector<8x32xf32> -> vector<8x32xf32>
    %7 = arith.truncf %3 : vector<8x32xf32> to vector<8x32xbf16>
    %c0_7 = arith.constant 0 : index
    %c0_8 = arith.constant 0 : index
    %8 = vector.load %arg5[%c0_7, %c0_8] : memref<32x64xbf16, #tpu.memory_space<vmem>>, vector<32x64xbf16>
    %cst_9 = arith.constant dense<0.000000e+00> : vector<8x64xf32>
    %9 = tpu.matmul %7, %8, %cst_9 {dimension_numbers = #tpu.dot_dimension_numbers<[1], [0], [0], [1], [0, 0, 1, 1], [], []>} : vector<8x32xbf16>, vector<32x64xbf16>, vector<8x64xf32> -> vector<8x64xf32>
    %10 = vector.shape_cast %6 : vector<8x32xf32> to vector<1x8x32xf32>
    %11 = vector.shape_cast %9 : vector<8x64xf32> to vector<1x8x64xf32>
    %12 = vector.extract_strided_slice %10 {offsets = [0, 0, 0], sizes = [1, 8, 8], strides = [1, 1, 1]} : vector<1x8x32xf32> to vector<1x8x8xf32>
    %13 = vector.extract_strided_slice %10 {offsets = [0, 0, 8], sizes = [1, 8, 8], strides = [1, 1, 1]} : vector<1x8x32xf32> to vector<1x8x8xf32>
    %14 = vector.extract_strided_slice %10 {offsets = [0, 0, 16], sizes = [1, 8, 8], strides = [1, 1, 1]} : vector<1x8x32xf32> to vector<1x8x8xf32>
    %15 = vector.extract_strided_slice %10 {offsets = [0, 0, 24], sizes = [1, 8, 8], strides = [1, 1, 1]} : vector<1x8x32xf32> to vector<1x8x8xf32>
    %16 = vector.shape_cast %12 : vector<1x8x8xf32> to vector<1x1x8x8xf32>
    %17 = vector.shape_cast %13 : vector<1x8x8xf32> to vector<1x1x8x8xf32>
    %18 = vector.shape_cast %14 : vector<1x8x8xf32> to vector<1x1x8x8xf32>
    %19 = vector.shape_cast %15 : vector<1x8x8xf32> to vector<1x1x8x8xf32>
    %20 = tpu.concatenate %16, %17, %18, %19 in 1 : vector<1x1x8x8xf32>, vector<1x1x8x8xf32>, vector<1x1x8x8xf32>, vector<1x1x8x8xf32> -> vector<1x4x8x8xf32>
    %21 = vector.shape_cast %20 : vector<1x4x8x8xf32> to vector<4x8x8xf32>
    %22 = vector.extract_strided_slice %11 {offsets = [0, 0, 0], sizes = [1, 8, 8], strides = [1, 1, 1]} : vector<1x8x64xf32> to vector<1x8x8xf32>
    %23 = vector.extract_strided_slice %11 {offsets = [0, 0, 8], sizes = [1, 8, 8], strides = [1, 1, 1]} : vector<1x8x64xf32> to vector<1x8x8xf32>
    %24 = vector.extract_strided_slice %11 {offsets = [0, 0, 16], sizes = [1, 8, 8], strides = [1, 1, 1]} : vector<1x8x64xf32> to vector<1x8x8xf32>
    %25 = vector.extract_strided_slice %11 {offsets = [0, 0, 24], sizes = [1, 8, 8], strides = [1, 1, 1]} : vector<1x8x64xf32> to vector<1x8x8xf32>
    %26 = vector.shape_cast %22 : vector<1x8x8xf32> to vector<1x1x8x8xf32>
    %27 = vector.shape_cast %23 : vector<1x8x8xf32> to vector<1x1x8x8xf32>
    %28 = vector.shape_cast %24 : vector<1x8x8xf32> to vector<1x1x8x8xf32>
    %29 = vector.shape_cast %25 : vector<1x8x8xf32> to vector<1x1x8x8xf32>
    %30 = tpu.concatenate %26, %27, %28, %29 in 1 : vector<1x1x8x8xf32>, vector<1x1x8x8xf32>, vector<1x1x8x8xf32>, vector<1x1x8x8xf32> -> vector<1x4x8x8xf32>
    %31 = vector.shape_cast %30 : vector<1x4x8x8xf32> to vector<4x8x8xf32>
    %32 = vector.extract_strided_slice %11 {offsets = [0, 0, 32], sizes = [1, 8, 8], strides = [1, 1, 1]} : vector<1x8x64xf32> to vector<1x8x8xf32>
    %33 = vector.extract_strided_slice %11 {offsets = [0, 0, 40], sizes = [1, 8, 8], strides = [1, 1, 1]} : vector<1x8x64xf32> to vector<1x8x8xf32>
    %34 = vector.extract_strided_slice %11 {offsets = [0, 0, 48], sizes = [1, 8, 8], strides = [1, 1, 1]} : vector<1x8x64xf32> to vector<1x8x8xf32>
    %35 = vector.extract_strided_slice %11 {offsets = [0, 0, 56], sizes = [1, 8, 8], strides = [1, 1, 1]} : vector<1x8x64xf32> to vector<1x8x8xf32>
    %36 = vector.shape_cast %32 : vector<1x8x8xf32> to vector<1x1x8x8xf32>
    %37 = vector.shape_cast %33 : vector<1x8x8xf32> to vector<1x1x8x8xf32>
    %38 = vector.shape_cast %34 : vector<1x8x8xf32> to vector<1x1x8x8xf32>
    %39 = vector.shape_cast %35 : vector<1x8x8xf32> to vector<1x1x8x8xf32>
    %40 = tpu.concatenate %36, %37, %38, %39 in 1 : vector<1x1x8x8xf32>, vector<1x1x8x8xf32>, vector<1x1x8x8xf32>, vector<1x1x8x8xf32> -> vector<1x4x8x8xf32>
    %41 = vector.shape_cast %40 : vector<1x4x8x8xf32> to vector<4x8x8xf32>
    %42 = arith.truncf %21 : vector<4x8x8xf32> to vector<4x8x8xbf16>
    %43 = arith.truncf %31 : vector<4x8x8xf32> to vector<4x8x8xbf16>
    "tpu.trace_start"() <{level = 10 : i32, message = "gnd,gmd->gnm"}> : () -> ()
    %cst_10 = arith.constant dense<0.000000e+00> : vector<4x8x8xf32>
    %44 = tpu.matmul %42, %43, %cst_10 {dimension_numbers = #tpu.dot_dimension_numbers<[2], [2], [1], [1], [0, 0, 0, 1, 1, 1], [0], [0]>} : vector<4x8x8xbf16>, vector<4x8x8xbf16>, vector<4x8x8xf32> -> vector<4x8x8xf32>
    "tpu.trace_stop"() : () -> ()
    %45 = vector.shape_cast %44 : vector<4x8x8xf32> to vector<1x4x8x8xf32>
    %c0_11 = arith.constant 0 : index
    %c0_12 = arith.constant 0 : index
    %c0_13 = arith.constant 0 : index
    %46 = vector.load %arg3[%c0_11, %c0_12, %c0_13] : memref<1x8x8xf32, #tpu.memory_space<vmem>>, vector<1x8x8xf32>
    %47 = vector.shape_cast %46 : vector<1x8x8xf32> to vector<1x1x8x8xf32>
    %c0_14 = arith.constant 0 : index
    %c0_15 = arith.constant 0 : index
    %c0_16 = arith.constant 0 : index
    %c0_17 = arith.constant 0 : index
    %48 = vector.load %arg6[%c0_14, %c0_15, %c0_16, %c0_17] : memref<16x4x1x1xf32, #tpu.memory_space<vmem>>, vector<16x4x1x1xf32>
    %c0_18 = arith.constant 0 : index
    %c0_19 = arith.constant 0 : index
    %c0_20 = arith.constant 0 : index
    %c0_21 = arith.constant 0 : index
    %49 = vector.load %arg7[%c0_18, %c0_19, %c0_20, %c0_21] : memref<16x4x1x1xf32, #tpu.memory_space<vmem>>, vector<16x4x1x1xf32>
    %c0_22 = arith.constant 0 : index
    %c0_23 = arith.constant 0 : index
    %c0_24 = arith.constant 0 : index
    %c0_25 = arith.constant 0 : index
    %50 = vector.load %arg8[%c0_22, %c0_23, %c0_24, %c0_25] : memref<16x4x1x1xf32, #tpu.memory_space<vmem>>, vector<16x4x1x1xf32>
    %c0_26 = arith.constant 0 : index
    %c0_27 = arith.constant 0 : index
    %c0_28 = arith.constant 0 : index
    %c0_29 = arith.constant 0 : index
    %51 = vector.load %arg9[%c0_26, %c0_27, %c0_28, %c0_29] : memref<16x4x1x1xf32, #tpu.memory_space<vmem>>, vector<16x4x1x1xf32>
    %cst_30 = arith.constant 0.000000e+00 : f32
    %52 = vector.broadcast %cst_30 : f32 to vector<1x4x8x8xf32>
    %53 = vector.extract_strided_slice %48 {offsets = [0, 0, 0, 0], sizes = [1, 4, 1, 1], strides = [1, 1, 1, 1]} : vector<16x4x1x1xf32> to vector<1x4x1x1xf32>
    %54 = vector.shape_cast %53 : vector<1x4x1x1xf32> to vector<4x1x1xf32>
    %55 = vector.shape_cast %54 : vector<4x1x1xf32> to vector<1x4x1x1xf32>
    %56 = vector.broadcast %55 : vector<1x4x1x1xf32> to vector<1x4x8x8xf32>
    %57 = arith.mulf %45, %56 : vector<1x4x8x8xf32>
    %58 = vector.extract_strided_slice %49 {offsets = [0, 0, 0, 0], sizes = [1, 4, 1, 1], strides = [1, 1, 1, 1]} : vector<16x4x1x1xf32> to vector<1x4x1x1xf32>
    %59 = vector.shape_cast %58 : vector<1x4x1x1xf32> to vector<4x1x1xf32>
    %60 = vector.shape_cast %59 : vector<4x1x1xf32> to vector<1x4x1x1xf32>
    %61 = vector.broadcast %47 : vector<1x1x8x8xf32> to vector<1x4x8x8xf32>
    %62 = vector.broadcast %60 : vector<1x4x1x1xf32> to vector<1x4x8x8xf32>
    %63 = arith.mulf %61, %62 : vector<1x4x8x8xf32>
    %64 = arith.addf %57, %63 : vector<1x4x8x8xf32>
    %65 = vector.extract_strided_slice %50 {offsets = [0, 0, 0, 0], sizes = [1, 4, 1, 1], strides = [1, 1, 1, 1]} : vector<16x4x1x1xf32> to vector<1x4x1x1xf32>
    %66 = vector.shape_cast %65 : vector<1x4x1x1xf32> to vector<4x1x1xf32>
    %67 = vector.shape_cast %66 : vector<4x1x1xf32> to vector<1x4x1x1xf32>
    %68 = vector.broadcast %67 : vector<1x4x1x1xf32> to vector<1x4x8x8xf32>
    %69 = arith.addf %64, %68 : vector<1x4x8x8xf32>
    %cst_31 = arith.constant 0.000000e+00 : f32
    %70 = vector.broadcast %cst_31 : f32 to vector<1x4x8x8xf32>
    %71 = arith.maximumf %69, %70 : vector<1x4x8x8xf32>
    %72 = vector.extract_strided_slice %51 {offsets = [0, 0, 0, 0], sizes = [1, 4, 1, 1], strides = [1, 1, 1, 1]} : vector<16x4x1x1xf32> to vector<1x4x1x1xf32>
    %73 = vector.shape_cast %72 : vector<1x4x1x1xf32> to vector<4x1x1xf32>
    %74 = vector.shape_cast %73 : vector<4x1x1xf32> to vector<1x4x1x1xf32>
    %75 = vector.broadcast %74 : vector<1x4x1x1xf32> to vector<1x4x8x8xf32>
    %76 = arith.mulf %71, %75 : vector<1x4x8x8xf32>
    %77 = arith.addf %52, %76 : vector<1x4x8x8xf32>
    %78 = vector.extract_strided_slice %48 {offsets = [1, 0, 0, 0], sizes = [1, 4, 1, 1], strides = [1, 1, 1, 1]} : vector<16x4x1x1xf32> to vector<1x4x1x1xf32>
    %79 = vector.shape_cast %78 : vector<1x4x1x1xf32> to vector<4x1x1xf32>
    %80 = vector.shape_cast %79 : vector<4x1x1xf32> to vector<1x4x1x1xf32>
    %81 = vector.broadcast %80 : vector<1x4x1x1xf32> to vector<1x4x8x8xf32>
    %82 = arith.mulf %45, %81 : vector<1x4x8x8xf32>
    %83 = vector.extract_strided_slice %49 {offsets = [1, 0, 0, 0], sizes = [1, 4, 1, 1], strides = [1, 1, 1, 1]} : vector<16x4x1x1xf32> to vector<1x4x1x1xf32>
    %84 = vector.shape_cast %83 : vector<1x4x1x1xf32> to vector<4x1x1xf32>
    %85 = vector.shape_cast %84 : vector<4x1x1xf32> to vector<1x4x1x1xf32>
    %86 = vector.broadcast %47 : vector<1x1x8x8xf32> to vector<1x4x8x8xf32>
    %87 = vector.broadcast %85 : vector<1x4x1x1xf32> to vector<1x4x8x8xf32>
    %88 = arith.mulf %86, %87 : vector<1x4x8x8xf32>
    %89 = arith.addf %82, %88 : vector<1x4x8x8xf32>
    %90 = vector.extract_strided_slice %50 {offsets = [1, 0, 0, 0], sizes = [1, 4, 1, 1], strides = [1, 1, 1, 1]} : vector<16x4x1x1xf32> to vector<1x4x1x1xf32>
    %91 = vector.shape_cast %90 : vector<1x4x1x1xf32> to vector<4x1x1xf32>
    %92 = vector.shape_cast %91 : vector<4x1x1xf32> to vector<1x4x1x1xf32>
    %93 = vector.broadcast %92 : vector<1x4x1x1xf32> to vector<1x4x8x8xf32>
    %94 = arith.addf %89, %93 : vector<1x4x8x8xf32>
    %cst_32 = arith.constant 0.000000e+00 : f32
    %95 = vector.broadcast %cst_32 : f32 to vector<1x4x8x8xf32>
    %96 = arith.maximumf %94, %95 : vector<1x4x8x8xf32>
    %97 = vector.extract_strided_slice %51 {offsets = [1, 0, 0, 0], sizes = [1, 4, 1, 1], strides = [1, 1, 1, 1]} : vector<16x4x1x1xf32> to vector<1x4x1x1xf32>
    %98 = vector.shape_cast %97 : vector<1x4x1x1xf32> to vector<4x1x1xf32>
    %99 = vector.shape_cast %98 : vector<4x1x1xf32> to vector<1x4x1x1xf32>
    %100 = vector.broadcast %99 : vector<1x4x1x1xf32> to vector<1x4x8x8xf32>
    %101 = arith.mulf %96, %100 : vector<1x4x8x8xf32>
    %102 = arith.addf %77, %101 : vector<1x4x8x8xf32>
    %103 = vector.extract_strided_slice %48 {offsets = [2, 0, 0, 0], sizes = [1, 4, 1, 1], strides = [1, 1, 1, 1]} : vector<16x4x1x1xf32> to vector<1x4x1x1xf32>
    %104 = vector.shape_cast %103 : vector<1x4x1x1xf32> to vector<4x1x1xf32>
    %105 = vector.shape_cast %104 : vector<4x1x1xf32> to vector<1x4x1x1xf32>
    %106 = vector.broadcast %105 : vector<1x4x1x1xf32> to vector<1x4x8x8xf32>
    %107 = arith.mulf %45, %106 : vector<1x4x8x8xf32>
    %108 = vector.extract_strided_slice %49 {offsets = [2, 0, 0, 0], sizes = [1, 4, 1, 1], strides = [1, 1, 1, 1]} : vector<16x4x1x1xf32> to vector<1x4x1x1xf32>
    %109 = vector.shape_cast %108 : vector<1x4x1x1xf32> to vector<4x1x1xf32>
    %110 = vector.shape_cast %109 : vector<4x1x1xf32> to vector<1x4x1x1xf32>
    %111 = vector.broadcast %47 : vector<1x1x8x8xf32> to vector<1x4x8x8xf32>
    %112 = vector.broadcast %110 : vector<1x4x1x1xf32> to vector<1x4x8x8xf32>
    %113 = arith.mulf %111, %112 : vector<1x4x8x8xf32>
    %114 = arith.addf %107, %113 : vector<1x4x8x8xf32>
    %115 = vector.extract_strided_slice %50 {offsets = [2, 0, 0, 0], sizes = [1, 4, 1, 1], strides = [1, 1, 1, 1]} : vector<16x4x1x1xf32> to vector<1x4x1x1xf32>
    %116 = vector.shape_cast %115 : vector<1x4x1x1xf32> to vector<4x1x1xf32>
    %117 = vector.shape_cast %116 : vector<4x1x1xf32> to vector<1x4x1x1xf32>
    %118 = vector.broadcast %117 : vector<1x4x1x1xf32> to vector<1x4x8x8xf32>
    %119 = arith.addf %114, %118 : vector<1x4x8x8xf32>
    %cst_33 = arith.constant 0.000000e+00 : f32
    %120 = vector.broadcast %cst_33 : f32 to vector<1x4x8x8xf32>
    %121 = arith.maximumf %119, %120 : vector<1x4x8x8xf32>
    %122 = vector.extract_strided_slice %51 {offsets = [2, 0, 0, 0], sizes = [1, 4, 1, 1], strides = [1, 1, 1, 1]} : vector<16x4x1x1xf32> to vector<1x4x1x1xf32>
    %123 = vector.shape_cast %122 : vector<1x4x1x1xf32> to vector<4x1x1xf32>
    %124 = vector.shape_cast %123 : vector<4x1x1xf32> to vector<1x4x1x1xf32>
    %125 = vector.broadcast %124 : vector<1x4x1x1xf32> to vector<1x4x8x8xf32>
    %126 = arith.mulf %121, %125 : vector<1x4x8x8xf32>
    %127 = arith.addf %102, %126 : vector<1x4x8x8xf32>
    %128 = vector.extract_strided_slice %48 {offsets = [3, 0, 0, 0], sizes = [1, 4, 1, 1], strides = [1, 1, 1, 1]} : vector<16x4x1x1xf32> to vector<1x4x1x1xf32>
    %129 = vector.shape_cast %128 : vector<1x4x1x1xf32> to vector<4x1x1xf32>
    %130 = vector.shape_cast %129 : vector<4x1x1xf32> to vector<1x4x1x1xf32>
    %131 = vector.broadcast %130 : vector<1x4x1x1xf32> to vector<1x4x8x8xf32>
    %132 = arith.mulf %45, %131 : vector<1x4x8x8xf32>
    %133 = vector.extract_strided_slice %49 {offsets = [3, 0, 0, 0], sizes = [1, 4, 1, 1], strides = [1, 1, 1, 1]} : vector<16x4x1x1xf32> to vector<1x4x1x1xf32>
    %134 = vector.shape_cast %133 : vector<1x4x1x1xf32> to vector<4x1x1xf32>
    %135 = vector.shape_cast %134 : vector<4x1x1xf32> to vector<1x4x1x1xf32>
    %136 = vector.broadcast %47 : vector<1x1x8x8xf32> to vector<1x4x8x8xf32>
    %137 = vector.broadcast %135 : vector<1x4x1x1xf32> to vector<1x4x8x8xf32>
    %138 = arith.mulf %136, %137 : vector<1x4x8x8xf32>
    %139 = arith.addf %132, %138 : vector<1x4x8x8xf32>
    %140 = vector.extract_strided_slice %50 {offsets = [3, 0, 0, 0], sizes = [1, 4, 1, 1], strides = [1, 1, 1, 1]} : vector<16x4x1x1xf32> to vector<1x4x1x1xf32>
    %141 = vector.shape_cast %140 : vector<1x4x1x1xf32> to vector<4x1x1xf32>
    %142 = vector.shape_cast %141 : vector<4x1x1xf32> to vector<1x4x1x1xf32>
    %143 = vector.broadcast %142 : vector<1x4x1x1xf32> to vector<1x4x8x8xf32>
    %144 = arith.addf %139, %143 : vector<1x4x8x8xf32>
    %cst_34 = arith.constant 0.000000e+00 : f32
    %145 = vector.broadcast %cst_34 : f32 to vector<1x4x8x8xf32>
    %146 = arith.maximumf %144, %145 : vector<1x4x8x8xf32>
    %147 = vector.extract_strided_slice %51 {offsets = [3, 0, 0, 0], sizes = [1, 4, 1, 1], strides = [1, 1, 1, 1]} : vector<16x4x1x1xf32> to vector<1x4x1x1xf32>
    %148 = vector.shape_cast %147 : vector<1x4x1x1xf32> to vector<4x1x1xf32>
    %149 = vector.shape_cast %148 : vector<4x1x1xf32> to vector<1x4x1x1xf32>
    %150 = vector.broadcast %149 : vector<1x4x1x1xf32> to vector<1x4x8x8xf32>
    %151 = arith.mulf %146, %150 : vector<1x4x8x8xf32>
    %152 = arith.addf %127, %151 : vector<1x4x8x8xf32>
    %153 = vector.extract_strided_slice %48 {offsets = [4, 0, 0, 0], sizes = [1, 4, 1, 1], strides = [1, 1, 1, 1]} : vector<16x4x1x1xf32> to vector<1x4x1x1xf32>
    %154 = vector.shape_cast %153 : vector<1x4x1x1xf32> to vector<4x1x1xf32>
    %155 = vector.shape_cast %154 : vector<4x1x1xf32> to vector<1x4x1x1xf32>
    %156 = vector.broadcast %155 : vector<1x4x1x1xf32> to vector<1x4x8x8xf32>
    %157 = arith.mulf %45, %156 : vector<1x4x8x8xf32>
    %158 = vector.extract_strided_slice %49 {offsets = [4, 0, 0, 0], sizes = [1, 4, 1, 1], strides = [1, 1, 1, 1]} : vector<16x4x1x1xf32> to vector<1x4x1x1xf32>
    %159 = vector.shape_cast %158 : vector<1x4x1x1xf32> to vector<4x1x1xf32>
    %160 = vector.shape_cast %159 : vector<4x1x1xf32> to vector<1x4x1x1xf32>
    %161 = vector.broadcast %47 : vector<1x1x8x8xf32> to vector<1x4x8x8xf32>
    %162 = vector.broadcast %160 : vector<1x4x1x1xf32> to vector<1x4x8x8xf32>
    %163 = arith.mulf %161, %162 : vector<1x4x8x8xf32>
    %164 = arith.addf %157, %163 : vector<1x4x8x8xf32>
    %165 = vector.extract_strided_slice %50 {offsets = [4, 0, 0, 0], sizes = [1, 4, 1, 1], strides = [1, 1, 1, 1]} : vector<16x4x1x1xf32> to vector<1x4x1x1xf32>
    %166 = vector.shape_cast %165 : vector<1x4x1x1xf32> to vector<4x1x1xf32>
    %167 = vector.shape_cast %166 : vector<4x1x1xf32> to vector<1x4x1x1xf32>
    %168 = vector.broadcast %167 : vector<1x4x1x1xf32> to vector<1x4x8x8xf32>
    %169 = arith.addf %164, %168 : vector<1x4x8x8xf32>
    %cst_35 = arith.constant 0.000000e+00 : f32
    %170 = vector.broadcast %cst_35 : f32 to vector<1x4x8x8xf32>
    %171 = arith.maximumf %169, %170 : vector<1x4x8x8xf32>
    %172 = vector.extract_strided_slice %51 {offsets = [4, 0, 0, 0], sizes = [1, 4, 1, 1], strides = [1, 1, 1, 1]} : vector<16x4x1x1xf32> to vector<1x4x1x1xf32>
    %173 = vector.shape_cast %172 : vector<1x4x1x1xf32> to vector<4x1x1xf32>
    %174 = vector.shape_cast %173 : vector<4x1x1xf32> to vector<1x4x1x1xf32>
    %175 = vector.broadcast %174 : vector<1x4x1x1xf32> to vector<1x4x8x8xf32>
    %176 = arith.mulf %171, %175 : vector<1x4x8x8xf32>
    %177 = arith.addf %152, %176 : vector<1x4x8x8xf32>
    %178 = vector.extract_strided_slice %48 {offsets = [5, 0, 0, 0], sizes = [1, 4, 1, 1], strides = [1, 1, 1, 1]} : vector<16x4x1x1xf32> to vector<1x4x1x1xf32>
    %179 = vector.shape_cast %178 : vector<1x4x1x1xf32> to vector<4x1x1xf32>
    %180 = vector.shape_cast %179 : vector<4x1x1xf32> to vector<1x4x1x1xf32>
    %181 = vector.broadcast %180 : vector<1x4x1x1xf32> to vector<1x4x8x8xf32>
    %182 = arith.mulf %45, %181 : vector<1x4x8x8xf32>
    %183 = vector.extract_strided_slice %49 {offsets = [5, 0, 0, 0], sizes = [1, 4, 1, 1], strides = [1, 1, 1, 1]} : vector<16x4x1x1xf32> to vector<1x4x1x1xf32>
    %184 = vector.shape_cast %183 : vector<1x4x1x1xf32> to vector<4x1x1xf32>
    %185 = vector.shape_cast %184 : vector<4x1x1xf32> to vector<1x4x1x1xf32>
    %186 = vector.broadcast %47 : vector<1x1x8x8xf32> to vector<1x4x8x8xf32>
    %187 = vector.broadcast %185 : vector<1x4x1x1xf32> to vector<1x4x8x8xf32>
    %188 = arith.mulf %186, %187 : vector<1x4x8x8xf32>
    %189 = arith.addf %182, %188 : vector<1x4x8x8xf32>
    %190 = vector.extract_strided_slice %50 {offsets = [5, 0, 0, 0], sizes = [1, 4, 1, 1], strides = [1, 1, 1, 1]} : vector<16x4x1x1xf32> to vector<1x4x1x1xf32>
    %191 = vector.shape_cast %190 : vector<1x4x1x1xf32> to vector<4x1x1xf32>
    %192 = vector.shape_cast %191 : vector<4x1x1xf32> to vector<1x4x1x1xf32>
    %193 = vector.broadcast %192 : vector<1x4x1x1xf32> to vector<1x4x8x8xf32>
    %194 = arith.addf %189, %193 : vector<1x4x8x8xf32>
    %cst_36 = arith.constant 0.000000e+00 : f32
    %195 = vector.broadcast %cst_36 : f32 to vector<1x4x8x8xf32>
    %196 = arith.maximumf %194, %195 : vector<1x4x8x8xf32>
    %197 = vector.extract_strided_slice %51 {offsets = [5, 0, 0, 0], sizes = [1, 4, 1, 1], strides = [1, 1, 1, 1]} : vector<16x4x1x1xf32> to vector<1x4x1x1xf32>
    %198 = vector.shape_cast %197 : vector<1x4x1x1xf32> to vector<4x1x1xf32>
    %199 = vector.shape_cast %198 : vector<4x1x1xf32> to vector<1x4x1x1xf32>
    %200 = vector.broadcast %199 : vector<1x4x1x1xf32> to vector<1x4x8x8xf32>
    %201 = arith.mulf %196, %200 : vector<1x4x8x8xf32>
    %202 = arith.addf %177, %201 : vector<1x4x8x8xf32>
    %203 = vector.extract_strided_slice %48 {offsets = [6, 0, 0, 0], sizes = [1, 4, 1, 1], strides = [1, 1, 1, 1]} : vector<16x4x1x1xf32> to vector<1x4x1x1xf32>
    %204 = vector.shape_cast %203 : vector<1x4x1x1xf32> to vector<4x1x1xf32>
    %205 = vector.shape_cast %204 : vector<4x1x1xf32> to vector<1x4x1x1xf32>
    %206 = vector.broadcast %205 : vector<1x4x1x1xf32> to vector<1x4x8x8xf32>
    %207 = arith.mulf %45, %206 : vector<1x4x8x8xf32>
    %208 = vector.extract_strided_slice %49 {offsets = [6, 0, 0, 0], sizes = [1, 4, 1, 1], strides = [1, 1, 1, 1]} : vector<16x4x1x1xf32> to vector<1x4x1x1xf32>
    %209 = vector.shape_cast %208 : vector<1x4x1x1xf32> to vector<4x1x1xf32>
    %210 = vector.shape_cast %209 : vector<4x1x1xf32> to vector<1x4x1x1xf32>
    %211 = vector.broadcast %47 : vector<1x1x8x8xf32> to vector<1x4x8x8xf32>
    %212 = vector.broadcast %210 : vector<1x4x1x1xf32> to vector<1x4x8x8xf32>
    %213 = arith.mulf %211, %212 : vector<1x4x8x8xf32>
    %214 = arith.addf %207, %213 : vector<1x4x8x8xf32>
    %215 = vector.extract_strided_slice %50 {offsets = [6, 0, 0, 0], sizes = [1, 4, 1, 1], strides = [1, 1, 1, 1]} : vector<16x4x1x1xf32> to vector<1x4x1x1xf32>
    %216 = vector.shape_cast %215 : vector<1x4x1x1xf32> to vector<4x1x1xf32>
    %217 = vector.shape_cast %216 : vector<4x1x1xf32> to vector<1x4x1x1xf32>
    %218 = vector.broadcast %217 : vector<1x4x1x1xf32> to vector<1x4x8x8xf32>
    %219 = arith.addf %214, %218 : vector<1x4x8x8xf32>
    %cst_37 = arith.constant 0.000000e+00 : f32
    %220 = vector.broadcast %cst_37 : f32 to vector<1x4x8x8xf32>
    %221 = arith.maximumf %219, %220 : vector<1x4x8x8xf32>
    %222 = vector.extract_strided_slice %51 {offsets = [6, 0, 0, 0], sizes = [1, 4, 1, 1], strides = [1, 1, 1, 1]} : vector<16x4x1x1xf32> to vector<1x4x1x1xf32>
    %223 = vector.shape_cast %222 : vector<1x4x1x1xf32> to vector<4x1x1xf32>
    %224 = vector.shape_cast %223 : vector<4x1x1xf32> to vector<1x4x1x1xf32>
    %225 = vector.broadcast %224 : vector<1x4x1x1xf32> to vector<1x4x8x8xf32>
    %226 = arith.mulf %221, %225 : vector<1x4x8x8xf32>
    %227 = arith.addf %202, %226 : vector<1x4x8x8xf32>
    %228 = vector.extract_strided_slice %48 {offsets = [7, 0, 0, 0], sizes = [1, 4, 1, 1], strides = [1, 1, 1, 1]} : vector<16x4x1x1xf32> to vector<1x4x1x1xf32>
    %229 = vector.shape_cast %228 : vector<1x4x1x1xf32> to vector<4x1x1xf32>
    %230 = vector.shape_cast %229 : vector<4x1x1xf32> to vector<1x4x1x1xf32>
    %231 = vector.broadcast %230 : vector<1x4x1x1xf32> to vector<1x4x8x8xf32>
    %232 = arith.mulf %45, %231 : vector<1x4x8x8xf32>
    %233 = vector.extract_strided_slice %49 {offsets = [7, 0, 0, 0], sizes = [1, 4, 1, 1], strides = [1, 1, 1, 1]} : vector<16x4x1x1xf32> to vector<1x4x1x1xf32>
    %234 = vector.shape_cast %233 : vector<1x4x1x1xf32> to vector<4x1x1xf32>
    %235 = vector.shape_cast %234 : vector<4x1x1xf32> to vector<1x4x1x1xf32>
    %236 = vector.broadcast %47 : vector<1x1x8x8xf32> to vector<1x4x8x8xf32>
    %237 = vector.broadcast %235 : vector<1x4x1x1xf32> to vector<1x4x8x8xf32>
    %238 = arith.mulf %236, %237 : vector<1x4x8x8xf32>
    %239 = arith.addf %232, %238 : vector<1x4x8x8xf32>
    %240 = vector.extract_strided_slice %50 {offsets = [7, 0, 0, 0], sizes = [1, 4, 1, 1], strides = [1, 1, 1, 1]} : vector<16x4x1x1xf32> to vector<1x4x1x1xf32>
    %241 = vector.shape_cast %240 : vector<1x4x1x1xf32> to vector<4x1x1xf32>
    %242 = vector.shape_cast %241 : vector<4x1x1xf32> to vector<1x4x1x1xf32>
    %243 = vector.broadcast %242 : vector<1x4x1x1xf32> to vector<1x4x8x8xf32>
    %244 = arith.addf %239, %243 : vector<1x4x8x8xf32>
    %cst_38 = arith.constant 0.000000e+00 : f32
    %245 = vector.broadcast %cst_38 : f32 to vector<1x4x8x8xf32>
    %246 = arith.maximumf %244, %245 : vector<1x4x8x8xf32>
    %247 = vector.extract_strided_slice %51 {offsets = [7, 0, 0, 0], sizes = [1, 4, 1, 1], strides = [1, 1, 1, 1]} : vector<16x4x1x1xf32> to vector<1x4x1x1xf32>
    %248 = vector.shape_cast %247 : vector<1x4x1x1xf32> to vector<4x1x1xf32>
    %249 = vector.shape_cast %248 : vector<4x1x1xf32> to vector<1x4x1x1xf32>
    %250 = vector.broadcast %249 : vector<1x4x1x1xf32> to vector<1x4x8x8xf32>
    %251 = arith.mulf %246, %250 : vector<1x4x8x8xf32>
    %252 = arith.addf %227, %251 : vector<1x4x8x8xf32>
    %253 = vector.extract_strided_slice %48 {offsets = [8, 0, 0, 0], sizes = [1, 4, 1, 1], strides = [1, 1, 1, 1]} : vector<16x4x1x1xf32> to vector<1x4x1x1xf32>
    %254 = vector.shape_cast %253 : vector<1x4x1x1xf32> to vector<4x1x1xf32>
    %255 = vector.shape_cast %254 : vector<4x1x1xf32> to vector<1x4x1x1xf32>
    %256 = vector.broadcast %255 : vector<1x4x1x1xf32> to vector<1x4x8x8xf32>
    %257 = arith.mulf %45, %256 : vector<1x4x8x8xf32>
    %258 = vector.extract_strided_slice %49 {offsets = [8, 0, 0, 0], sizes = [1, 4, 1, 1], strides = [1, 1, 1, 1]} : vector<16x4x1x1xf32> to vector<1x4x1x1xf32>
    %259 = vector.shape_cast %258 : vector<1x4x1x1xf32> to vector<4x1x1xf32>
    %260 = vector.shape_cast %259 : vector<4x1x1xf32> to vector<1x4x1x1xf32>
    %261 = vector.broadcast %47 : vector<1x1x8x8xf32> to vector<1x4x8x8xf32>
    %262 = vector.broadcast %260 : vector<1x4x1x1xf32> to vector<1x4x8x8xf32>
    %263 = arith.mulf %261, %262 : vector<1x4x8x8xf32>
    %264 = arith.addf %257, %263 : vector<1x4x8x8xf32>
    %265 = vector.extract_strided_slice %50 {offsets = [8, 0, 0, 0], sizes = [1, 4, 1, 1], strides = [1, 1, 1, 1]} : vector<16x4x1x1xf32> to vector<1x4x1x1xf32>
    %266 = vector.shape_cast %265 : vector<1x4x1x1xf32> to vector<4x1x1xf32>
    %267 = vector.shape_cast %266 : vector<4x1x1xf32> to vector<1x4x1x1xf32>
    %268 = vector.broadcast %267 : vector<1x4x1x1xf32> to vector<1x4x8x8xf32>
    %269 = arith.addf %264, %268 : vector<1x4x8x8xf32>
    %cst_39 = arith.constant 0.000000e+00 : f32
    %270 = vector.broadcast %cst_39 : f32 to vector<1x4x8x8xf32>
    %271 = arith.maximumf %269, %270 : vector<1x4x8x8xf32>
    %272 = vector.extract_strided_slice %51 {offsets = [8, 0, 0, 0], sizes = [1, 4, 1, 1], strides = [1, 1, 1, 1]} : vector<16x4x1x1xf32> to vector<1x4x1x1xf32>
    %273 = vector.shape_cast %272 : vector<1x4x1x1xf32> to vector<4x1x1xf32>
    %274 = vector.shape_cast %273 : vector<4x1x1xf32> to vector<1x4x1x1xf32>
    %275 = vector.broadcast %274 : vector<1x4x1x1xf32> to vector<1x4x8x8xf32>
    %276 = arith.mulf %271, %275 : vector<1x4x8x8xf32>
    %277 = arith.addf %252, %276 : vector<1x4x8x8xf32>
    %278 = vector.extract_strided_slice %48 {offsets = [9, 0, 0, 0], sizes = [1, 4, 1, 1], strides = [1, 1, 1, 1]} : vector<16x4x1x1xf32> to vector<1x4x1x1xf32>
    %279 = vector.shape_cast %278 : vector<1x4x1x1xf32> to vector<4x1x1xf32>
    %280 = vector.shape_cast %279 : vector<4x1x1xf32> to vector<1x4x1x1xf32>
    %281 = vector.broadcast %280 : vector<1x4x1x1xf32> to vector<1x4x8x8xf32>
    %282 = arith.mulf %45, %281 : vector<1x4x8x8xf32>
    %283 = vector.extract_strided_slice %49 {offsets = [9, 0, 0, 0], sizes = [1, 4, 1, 1], strides = [1, 1, 1, 1]} : vector<16x4x1x1xf32> to vector<1x4x1x1xf32>
    %284 = vector.shape_cast %283 : vector<1x4x1x1xf32> to vector<4x1x1xf32>
    %285 = vector.shape_cast %284 : vector<4x1x1xf32> to vector<1x4x1x1xf32>
    %286 = vector.broadcast %47 : vector<1x1x8x8xf32> to vector<1x4x8x8xf32>
    %287 = vector.broadcast %285 : vector<1x4x1x1xf32> to vector<1x4x8x8xf32>
    %288 = arith.mulf %286, %287 : vector<1x4x8x8xf32>
    %289 = arith.addf %282, %288 : vector<1x4x8x8xf32>
    %290 = vector.extract_strided_slice %50 {offsets = [9, 0, 0, 0], sizes = [1, 4, 1, 1], strides = [1, 1, 1, 1]} : vector<16x4x1x1xf32> to vector<1x4x1x1xf32>
    %291 = vector.shape_cast %290 : vector<1x4x1x1xf32> to vector<4x1x1xf32>
    %292 = vector.shape_cast %291 : vector<4x1x1xf32> to vector<1x4x1x1xf32>
    %293 = vector.broadcast %292 : vector<1x4x1x1xf32> to vector<1x4x8x8xf32>
    %294 = arith.addf %289, %293 : vector<1x4x8x8xf32>
    %cst_40 = arith.constant 0.000000e+00 : f32
    %295 = vector.broadcast %cst_40 : f32 to vector<1x4x8x8xf32>
    %296 = arith.maximumf %294, %295 : vector<1x4x8x8xf32>
    %297 = vector.extract_strided_slice %51 {offsets = [9, 0, 0, 0], sizes = [1, 4, 1, 1], strides = [1, 1, 1, 1]} : vector<16x4x1x1xf32> to vector<1x4x1x1xf32>
    %298 = vector.shape_cast %297 : vector<1x4x1x1xf32> to vector<4x1x1xf32>
    %299 = vector.shape_cast %298 : vector<4x1x1xf32> to vector<1x4x1x1xf32>
    %300 = vector.broadcast %299 : vector<1x4x1x1xf32> to vector<1x4x8x8xf32>
    %301 = arith.mulf %296, %300 : vector<1x4x8x8xf32>
    %302 = arith.addf %277, %301 : vector<1x4x8x8xf32>
    %303 = vector.extract_strided_slice %48 {offsets = [10, 0, 0, 0], sizes = [1, 4, 1, 1], strides = [1, 1, 1, 1]} : vector<16x4x1x1xf32> to vector<1x4x1x1xf32>
    %304 = vector.shape_cast %303 : vector<1x4x1x1xf32> to vector<4x1x1xf32>
    %305 = vector.shape_cast %304 : vector<4x1x1xf32> to vector<1x4x1x1xf32>
    %306 = vector.broadcast %305 : vector<1x4x1x1xf32> to vector<1x4x8x8xf32>
    %307 = arith.mulf %45, %306 : vector<1x4x8x8xf32>
    %308 = vector.extract_strided_slice %49 {offsets = [10, 0, 0, 0], sizes = [1, 4, 1, 1], strides = [1, 1, 1, 1]} : vector<16x4x1x1xf32> to vector<1x4x1x1xf32>
    %309 = vector.shape_cast %308 : vector<1x4x1x1xf32> to vector<4x1x1xf32>
    %310 = vector.shape_cast %309 : vector<4x1x1xf32> to vector<1x4x1x1xf32>
    %311 = vector.broadcast %47 : vector<1x1x8x8xf32> to vector<1x4x8x8xf32>
    %312 = vector.broadcast %310 : vector<1x4x1x1xf32> to vector<1x4x8x8xf32>
    %313 = arith.mulf %311, %312 : vector<1x4x8x8xf32>
    %314 = arith.addf %307, %313 : vector<1x4x8x8xf32>
    %315 = vector.extract_strided_slice %50 {offsets = [10, 0, 0, 0], sizes = [1, 4, 1, 1], strides = [1, 1, 1, 1]} : vector<16x4x1x1xf32> to vector<1x4x1x1xf32>
    %316 = vector.shape_cast %315 : vector<1x4x1x1xf32> to vector<4x1x1xf32>
    %317 = vector.shape_cast %316 : vector<4x1x1xf32> to vector<1x4x1x1xf32>
    %318 = vector.broadcast %317 : vector<1x4x1x1xf32> to vector<1x4x8x8xf32>
    %319 = arith.addf %314, %318 : vector<1x4x8x8xf32>
    %cst_41 = arith.constant 0.000000e+00 : f32
    %320 = vector.broadcast %cst_41 : f32 to vector<1x4x8x8xf32>
    %321 = arith.maximumf %319, %320 : vector<1x4x8x8xf32>
    %322 = vector.extract_strided_slice %51 {offsets = [10, 0, 0, 0], sizes = [1, 4, 1, 1], strides = [1, 1, 1, 1]} : vector<16x4x1x1xf32> to vector<1x4x1x1xf32>
    %323 = vector.shape_cast %322 : vector<1x4x1x1xf32> to vector<4x1x1xf32>
    %324 = vector.shape_cast %323 : vector<4x1x1xf32> to vector<1x4x1x1xf32>
    %325 = vector.broadcast %324 : vector<1x4x1x1xf32> to vector<1x4x8x8xf32>
    %326 = arith.mulf %321, %325 : vector<1x4x8x8xf32>
    %327 = arith.addf %302, %326 : vector<1x4x8x8xf32>
    %328 = vector.extract_strided_slice %48 {offsets = [11, 0, 0, 0], sizes = [1, 4, 1, 1], strides = [1, 1, 1, 1]} : vector<16x4x1x1xf32> to vector<1x4x1x1xf32>
    %329 = vector.shape_cast %328 : vector<1x4x1x1xf32> to vector<4x1x1xf32>
    %330 = vector.shape_cast %329 : vector<4x1x1xf32> to vector<1x4x1x1xf32>
    %331 = vector.broadcast %330 : vector<1x4x1x1xf32> to vector<1x4x8x8xf32>
    %332 = arith.mulf %45, %331 : vector<1x4x8x8xf32>
    %333 = vector.extract_strided_slice %49 {offsets = [11, 0, 0, 0], sizes = [1, 4, 1, 1], strides = [1, 1, 1, 1]} : vector<16x4x1x1xf32> to vector<1x4x1x1xf32>
    %334 = vector.shape_cast %333 : vector<1x4x1x1xf32> to vector<4x1x1xf32>
    %335 = vector.shape_cast %334 : vector<4x1x1xf32> to vector<1x4x1x1xf32>
    %336 = vector.broadcast %47 : vector<1x1x8x8xf32> to vector<1x4x8x8xf32>
    %337 = vector.broadcast %335 : vector<1x4x1x1xf32> to vector<1x4x8x8xf32>
    %338 = arith.mulf %336, %337 : vector<1x4x8x8xf32>
    %339 = arith.addf %332, %338 : vector<1x4x8x8xf32>
    %340 = vector.extract_strided_slice %50 {offsets = [11, 0, 0, 0], sizes = [1, 4, 1, 1], strides = [1, 1, 1, 1]} : vector<16x4x1x1xf32> to vector<1x4x1x1xf32>
    %341 = vector.shape_cast %340 : vector<1x4x1x1xf32> to vector<4x1x1xf32>
    %342 = vector.shape_cast %341 : vector<4x1x1xf32> to vector<1x4x1x1xf32>
    %343 = vector.broadcast %342 : vector<1x4x1x1xf32> to vector<1x4x8x8xf32>
    %344 = arith.addf %339, %343 : vector<1x4x8x8xf32>
    %cst_42 = arith.constant 0.000000e+00 : f32
    %345 = vector.broadcast %cst_42 : f32 to vector<1x4x8x8xf32>
    %346 = arith.maximumf %344, %345 : vector<1x4x8x8xf32>
    %347 = vector.extract_strided_slice %51 {offsets = [11, 0, 0, 0], sizes = [1, 4, 1, 1], strides = [1, 1, 1, 1]} : vector<16x4x1x1xf32> to vector<1x4x1x1xf32>
    %348 = vector.shape_cast %347 : vector<1x4x1x1xf32> to vector<4x1x1xf32>
    %349 = vector.shape_cast %348 : vector<4x1x1xf32> to vector<1x4x1x1xf32>
    %350 = vector.broadcast %349 : vector<1x4x1x1xf32> to vector<1x4x8x8xf32>
    %351 = arith.mulf %346, %350 : vector<1x4x8x8xf32>
    %352 = arith.addf %327, %351 : vector<1x4x8x8xf32>
    %353 = vector.extract_strided_slice %48 {offsets = [12, 0, 0, 0], sizes = [1, 4, 1, 1], strides = [1, 1, 1, 1]} : vector<16x4x1x1xf32> to vector<1x4x1x1xf32>
    %354 = vector.shape_cast %353 : vector<1x4x1x1xf32> to vector<4x1x1xf32>
    %355 = vector.shape_cast %354 : vector<4x1x1xf32> to vector<1x4x1x1xf32>
    %356 = vector.broadcast %355 : vector<1x4x1x1xf32> to vector<1x4x8x8xf32>
    %357 = arith.mulf %45, %356 : vector<1x4x8x8xf32>
    %358 = vector.extract_strided_slice %49 {offsets = [12, 0, 0, 0], sizes = [1, 4, 1, 1], strides = [1, 1, 1, 1]} : vector<16x4x1x1xf32> to vector<1x4x1x1xf32>
    %359 = vector.shape_cast %358 : vector<1x4x1x1xf32> to vector<4x1x1xf32>
    %360 = vector.shape_cast %359 : vector<4x1x1xf32> to vector<1x4x1x1xf32>
    %361 = vector.broadcast %47 : vector<1x1x8x8xf32> to vector<1x4x8x8xf32>
    %362 = vector.broadcast %360 : vector<1x4x1x1xf32> to vector<1x4x8x8xf32>
    %363 = arith.mulf %361, %362 : vector<1x4x8x8xf32>
    %364 = arith.addf %357, %363 : vector<1x4x8x8xf32>
    %365 = vector.extract_strided_slice %50 {offsets = [12, 0, 0, 0], sizes = [1, 4, 1, 1], strides = [1, 1, 1, 1]} : vector<16x4x1x1xf32> to vector<1x4x1x1xf32>
    %366 = vector.shape_cast %365 : vector<1x4x1x1xf32> to vector<4x1x1xf32>
    %367 = vector.shape_cast %366 : vector<4x1x1xf32> to vector<1x4x1x1xf32>
    %368 = vector.broadcast %367 : vector<1x4x1x1xf32> to vector<1x4x8x8xf32>
    %369 = arith.addf %364, %368 : vector<1x4x8x8xf32>
    %cst_43 = arith.constant 0.000000e+00 : f32
    %370 = vector.broadcast %cst_43 : f32 to vector<1x4x8x8xf32>
    %371 = arith.maximumf %369, %370 : vector<1x4x8x8xf32>
    %372 = vector.extract_strided_slice %51 {offsets = [12, 0, 0, 0], sizes = [1, 4, 1, 1], strides = [1, 1, 1, 1]} : vector<16x4x1x1xf32> to vector<1x4x1x1xf32>
    %373 = vector.shape_cast %372 : vector<1x4x1x1xf32> to vector<4x1x1xf32>
    %374 = vector.shape_cast %373 : vector<4x1x1xf32> to vector<1x4x1x1xf32>
    %375 = vector.broadcast %374 : vector<1x4x1x1xf32> to vector<1x4x8x8xf32>
    %376 = arith.mulf %371, %375 : vector<1x4x8x8xf32>
    %377 = arith.addf %352, %376 : vector<1x4x8x8xf32>
    %378 = vector.extract_strided_slice %48 {offsets = [13, 0, 0, 0], sizes = [1, 4, 1, 1], strides = [1, 1, 1, 1]} : vector<16x4x1x1xf32> to vector<1x4x1x1xf32>
    %379 = vector.shape_cast %378 : vector<1x4x1x1xf32> to vector<4x1x1xf32>
    %380 = vector.shape_cast %379 : vector<4x1x1xf32> to vector<1x4x1x1xf32>
    %381 = vector.broadcast %380 : vector<1x4x1x1xf32> to vector<1x4x8x8xf32>
    %382 = arith.mulf %45, %381 : vector<1x4x8x8xf32>
    %383 = vector.extract_strided_slice %49 {offsets = [13, 0, 0, 0], sizes = [1, 4, 1, 1], strides = [1, 1, 1, 1]} : vector<16x4x1x1xf32> to vector<1x4x1x1xf32>
    %384 = vector.shape_cast %383 : vector<1x4x1x1xf32> to vector<4x1x1xf32>
    %385 = vector.shape_cast %384 : vector<4x1x1xf32> to vector<1x4x1x1xf32>
    %386 = vector.broadcast %47 : vector<1x1x8x8xf32> to vector<1x4x8x8xf32>
    %387 = vector.broadcast %385 : vector<1x4x1x1xf32> to vector<1x4x8x8xf32>
    %388 = arith.mulf %386, %387 : vector<1x4x8x8xf32>
    %389 = arith.addf %382, %388 : vector<1x4x8x8xf32>
    %390 = vector.extract_strided_slice %50 {offsets = [13, 0, 0, 0], sizes = [1, 4, 1, 1], strides = [1, 1, 1, 1]} : vector<16x4x1x1xf32> to vector<1x4x1x1xf32>
    %391 = vector.shape_cast %390 : vector<1x4x1x1xf32> to vector<4x1x1xf32>
    %392 = vector.shape_cast %391 : vector<4x1x1xf32> to vector<1x4x1x1xf32>
    %393 = vector.broadcast %392 : vector<1x4x1x1xf32> to vector<1x4x8x8xf32>
    %394 = arith.addf %389, %393 : vector<1x4x8x8xf32>
    %cst_44 = arith.constant 0.000000e+00 : f32
    %395 = vector.broadcast %cst_44 : f32 to vector<1x4x8x8xf32>
    %396 = arith.maximumf %394, %395 : vector<1x4x8x8xf32>
    %397 = vector.extract_strided_slice %51 {offsets = [13, 0, 0, 0], sizes = [1, 4, 1, 1], strides = [1, 1, 1, 1]} : vector<16x4x1x1xf32> to vector<1x4x1x1xf32>
    %398 = vector.shape_cast %397 : vector<1x4x1x1xf32> to vector<4x1x1xf32>
    %399 = vector.shape_cast %398 : vector<4x1x1xf32> to vector<1x4x1x1xf32>
    %400 = vector.broadcast %399 : vector<1x4x1x1xf32> to vector<1x4x8x8xf32>
    %401 = arith.mulf %396, %400 : vector<1x4x8x8xf32>
    %402 = arith.addf %377, %401 : vector<1x4x8x8xf32>
    %403 = vector.extract_strided_slice %48 {offsets = [14, 0, 0, 0], sizes = [1, 4, 1, 1], strides = [1, 1, 1, 1]} : vector<16x4x1x1xf32> to vector<1x4x1x1xf32>
    %404 = vector.shape_cast %403 : vector<1x4x1x1xf32> to vector<4x1x1xf32>
    %405 = vector.shape_cast %404 : vector<4x1x1xf32> to vector<1x4x1x1xf32>
    %406 = vector.broadcast %405 : vector<1x4x1x1xf32> to vector<1x4x8x8xf32>
    %407 = arith.mulf %45, %406 : vector<1x4x8x8xf32>
    %408 = vector.extract_strided_slice %49 {offsets = [14, 0, 0, 0], sizes = [1, 4, 1, 1], strides = [1, 1, 1, 1]} : vector<16x4x1x1xf32> to vector<1x4x1x1xf32>
    %409 = vector.shape_cast %408 : vector<1x4x1x1xf32> to vector<4x1x1xf32>
    %410 = vector.shape_cast %409 : vector<4x1x1xf32> to vector<1x4x1x1xf32>
    %411 = vector.broadcast %47 : vector<1x1x8x8xf32> to vector<1x4x8x8xf32>
    %412 = vector.broadcast %410 : vector<1x4x1x1xf32> to vector<1x4x8x8xf32>
    %413 = arith.mulf %411, %412 : vector<1x4x8x8xf32>
    %414 = arith.addf %407, %413 : vector<1x4x8x8xf32>
    %415 = vector.extract_strided_slice %50 {offsets = [14, 0, 0, 0], sizes = [1, 4, 1, 1], strides = [1, 1, 1, 1]} : vector<16x4x1x1xf32> to vector<1x4x1x1xf32>
    %416 = vector.shape_cast %415 : vector<1x4x1x1xf32> to vector<4x1x1xf32>
    %417 = vector.shape_cast %416 : vector<4x1x1xf32> to vector<1x4x1x1xf32>
    %418 = vector.broadcast %417 : vector<1x4x1x1xf32> to vector<1x4x8x8xf32>
    %419 = arith.addf %414, %418 : vector<1x4x8x8xf32>
    %cst_45 = arith.constant 0.000000e+00 : f32
    %420 = vector.broadcast %cst_45 : f32 to vector<1x4x8x8xf32>
    %421 = arith.maximumf %419, %420 : vector<1x4x8x8xf32>
    %422 = vector.extract_strided_slice %51 {offsets = [14, 0, 0, 0], sizes = [1, 4, 1, 1], strides = [1, 1, 1, 1]} : vector<16x4x1x1xf32> to vector<1x4x1x1xf32>
    %423 = vector.shape_cast %422 : vector<1x4x1x1xf32> to vector<4x1x1xf32>
    %424 = vector.shape_cast %423 : vector<4x1x1xf32> to vector<1x4x1x1xf32>
    %425 = vector.broadcast %424 : vector<1x4x1x1xf32> to vector<1x4x8x8xf32>
    %426 = arith.mulf %421, %425 : vector<1x4x8x8xf32>
    %427 = arith.addf %402, %426 : vector<1x4x8x8xf32>
    %428 = vector.extract_strided_slice %48 {offsets = [15, 0, 0, 0], sizes = [1, 4, 1, 1], strides = [1, 1, 1, 1]} : vector<16x4x1x1xf32> to vector<1x4x1x1xf32>
    %429 = vector.shape_cast %428 : vector<1x4x1x1xf32> to vector<4x1x1xf32>
    %430 = vector.shape_cast %429 : vector<4x1x1xf32> to vector<1x4x1x1xf32>
    %431 = vector.broadcast %430 : vector<1x4x1x1xf32> to vector<1x4x8x8xf32>
    %432 = arith.mulf %45, %431 : vector<1x4x8x8xf32>
    %433 = vector.extract_strided_slice %49 {offsets = [15, 0, 0, 0], sizes = [1, 4, 1, 1], strides = [1, 1, 1, 1]} : vector<16x4x1x1xf32> to vector<1x4x1x1xf32>
    %434 = vector.shape_cast %433 : vector<1x4x1x1xf32> to vector<4x1x1xf32>
    %435 = vector.shape_cast %434 : vector<4x1x1xf32> to vector<1x4x1x1xf32>
    %436 = vector.broadcast %47 : vector<1x1x8x8xf32> to vector<1x4x8x8xf32>
    %437 = vector.broadcast %435 : vector<1x4x1x1xf32> to vector<1x4x8x8xf32>
    %438 = arith.mulf %436, %437 : vector<1x4x8x8xf32>
    %439 = arith.addf %432, %438 : vector<1x4x8x8xf32>
    %440 = vector.extract_strided_slice %50 {offsets = [15, 0, 0, 0], sizes = [1, 4, 1, 1], strides = [1, 1, 1, 1]} : vector<16x4x1x1xf32> to vector<1x4x1x1xf32>
    %441 = vector.shape_cast %440 : vector<1x4x1x1xf32> to vector<4x1x1xf32>
    %442 = vector.shape_cast %441 : vector<4x1x1xf32> to vector<1x4x1x1xf32>
    %443 = vector.broadcast %442 : vector<1x4x1x1xf32> to vector<1x4x8x8xf32>
    %444 = arith.addf %439, %443 : vector<1x4x8x8xf32>
    %cst_46 = arith.constant 0.000000e+00 : f32
    %445 = vector.broadcast %cst_46 : f32 to vector<1x4x8x8xf32>
    %446 = arith.maximumf %444, %445 : vector<1x4x8x8xf32>
    %447 = vector.extract_strided_slice %51 {offsets = [15, 0, 0, 0], sizes = [1, 4, 1, 1], strides = [1, 1, 1, 1]} : vector<16x4x1x1xf32> to vector<1x4x1x1xf32>
    %448 = vector.shape_cast %447 : vector<1x4x1x1xf32> to vector<4x1x1xf32>
    %449 = vector.shape_cast %448 : vector<4x1x1xf32> to vector<1x4x1x1xf32>
    %450 = vector.broadcast %449 : vector<1x4x1x1xf32> to vector<1x4x8x8xf32>
    %451 = arith.mulf %446, %450 : vector<1x4x8x8xf32>
    %452 = arith.addf %427, %451 : vector<1x4x8x8xf32>
    %c0_47 = arith.constant 0 : index
    %c0_48 = arith.constant 0 : index
    %c0_49 = arith.constant 0 : index
    %453 = vector.load %arg10[%c0_47, %c0_48, %c0_49] : memref<4x1x1xf32, #tpu.memory_space<vmem>>, vector<4x1x1xf32>
    %454 = vector.shape_cast %453 : vector<4x1x1xf32> to vector<1x4x1x1xf32>
    %455 = vector.broadcast %454 : vector<1x4x1x1xf32> to vector<1x4x8x8xf32>
    %456 = arith.addf %452, %455 : vector<1x4x8x8xf32>
    %cst_50 = arith.constant dense<0xFF800000> : vector<1x4x8xf32>
    %457 = vector.multi_reduction <maximumf>, %456, %cst_50 [3] : vector<1x4x8x8xf32> to vector<1x4x8xf32>
    %458 = vector.shape_cast %457 : vector<1x4x8xf32> to vector<1x4x8x1xf32>
    %459 = vector.broadcast %458 : vector<1x4x8x1xf32> to vector<1x4x8x8xf32>
    %460 = arith.subf %456, %459 : vector<1x4x8x8xf32>
    %461 = math.exp %460 : vector<1x4x8x8xf32>
    %cst_51 = arith.constant dense<0.000000e+00> : vector<1x4x8xf32>
    %462 = vector.multi_reduction <add>, %461, %cst_51 [3] : vector<1x4x8x8xf32> to vector<1x4x8xf32>
    %463 = vector.shape_cast %462 : vector<1x4x8xf32> to vector<1x4x8x1xf32>
    %464 = tpu.reciprocal %463 {approx = true} : vector<1x4x8x1xf32> -> vector<1x4x8x1xf32>
    %465 = vector.broadcast %464 : vector<1x4x8x1xf32> to vector<1x4x8x8xf32>
    %466 = arith.mulf %461, %465 : vector<1x4x8x8xf32>
    %467 = vector.shape_cast %466 : vector<1x4x8x8xf32> to vector<4x8x8xf32>
    %468 = arith.truncf %467 : vector<4x8x8xf32> to vector<4x8x8xbf16>
    %469 = arith.truncf %41 : vector<4x8x8xf32> to vector<4x8x8xbf16>
    "tpu.trace_start"() <{level = 10 : i32, message = "gnm,gmd->gnd"}> : () -> ()
    %cst_52 = arith.constant dense<0.000000e+00> : vector<4x8x8xf32>
    %470 = tpu.matmul %468, %469, %cst_52 {dimension_numbers = #tpu.dot_dimension_numbers<[2], [1], [1], [2], [0, 0, 0, 1, 1, 2], [0], [0]>} : vector<4x8x8xbf16>, vector<4x8x8xbf16>, vector<4x8x8xf32> -> vector<4x8x8xf32>
    "tpu.trace_stop"() : () -> ()
    %471 = vector.shape_cast %470 : vector<4x8x8xf32> to vector<1x4x8x8xf32>
    %472 = vector.extract_strided_slice %471 {offsets = [0, 0, 0, 0], sizes = [1, 1, 8, 8], strides = [1, 1, 1, 1]} : vector<1x4x8x8xf32> to vector<1x1x8x8xf32>
    %473 = vector.shape_cast %472 : vector<1x1x8x8xf32> to vector<1x8x8xf32>
    %474 = vector.extract_strided_slice %471 {offsets = [0, 1, 0, 0], sizes = [1, 1, 8, 8], strides = [1, 1, 1, 1]} : vector<1x4x8x8xf32> to vector<1x1x8x8xf32>
    %475 = vector.shape_cast %474 : vector<1x1x8x8xf32> to vector<1x8x8xf32>
    %476 = vector.extract_strided_slice %471 {offsets = [0, 2, 0, 0], sizes = [1, 1, 8, 8], strides = [1, 1, 1, 1]} : vector<1x4x8x8xf32> to vector<1x1x8x8xf32>
    %477 = vector.shape_cast %476 : vector<1x1x8x8xf32> to vector<1x8x8xf32>
    %478 = vector.extract_strided_slice %471 {offsets = [0, 3, 0, 0], sizes = [1, 1, 8, 8], strides = [1, 1, 1, 1]} : vector<1x4x8x8xf32> to vector<1x1x8x8xf32>
    %479 = vector.shape_cast %478 : vector<1x1x8x8xf32> to vector<1x8x8xf32>
    %480 = tpu.concatenate %473, %475, %477, %479 in 2 : vector<1x8x8xf32>, vector<1x8x8xf32>, vector<1x8x8xf32>, vector<1x8x8xf32> -> vector<1x8x32xf32>
    %481 = vector.shape_cast %480 : vector<1x8x32xf32> to vector<8x32xf32>
    %482 = arith.truncf %481 : vector<8x32xf32> to vector<8x32xbf16>
    %c0_53 = arith.constant 0 : index
    %c0_54 = arith.constant 0 : index
    %483 = vector.load %arg11[%c0_53, %c0_54] : memref<32x32xbf16, #tpu.memory_space<vmem>>, vector<32x32xbf16>
    %cst_55 = arith.constant dense<0.000000e+00> : vector<8x32xf32>
    %484 = tpu.matmul %482, %483, %cst_55 {dimension_numbers = #tpu.dot_dimension_numbers<[1], [0], [0], [1], [0, 0, 1, 1], [], []>} : vector<8x32xbf16>, vector<32x32xbf16>, vector<8x32xf32> -> vector<8x32xf32>
    %485 = vector.shape_cast %484 : vector<8x32xf32> to vector<1x8x32xf32>
    %c0_56 = arith.constant 0 : index
    %c0_57 = arith.constant 0 : index
    %486 = vector.load %arg12[%c0_56, %c0_57] : memref<1x32xf32, #tpu.memory_space<vmem>>, vector<1x32xf32>
    %487 = vector.shape_cast %486 : vector<1x32xf32> to vector<1x1x32xf32>
    %488 = vector.broadcast %487 : vector<1x1x32xf32> to vector<1x8x32xf32>
    %489 = arith.addf %485, %488 : vector<1x8x32xf32>
    %490 = arith.addf %0, %489 : vector<1x8x32xf32>
    %cst_58 = arith.constant dense<0.000000e+00> : vector<1x32xf32>
    %491 = vector.multi_reduction <add>, %490, %cst_58 [1] : vector<1x8x32xf32> to vector<1x32xf32>
    %492 = vector.shape_cast %491 : vector<1x32xf32> to vector<1x1x32xf32>
    %cst_59 = arith.constant 8.000000e+00 : f32
    %493 = vector.broadcast %cst_59 : f32 to vector<1x1x32xf32>
    %494 = arith.divf %492, %493 : vector<1x1x32xf32>
    %495 = vector.broadcast %494 : vector<1x1x32xf32> to vector<1x8x32xf32>
    %496 = arith.subf %490, %495 : vector<1x8x32xf32>
    %497 = arith.mulf %496, %496 : vector<1x8x32xf32>
    %cst_60 = arith.constant dense<0.000000e+00> : vector<1x32xf32>
    %498 = vector.multi_reduction <add>, %497, %cst_60 [1] : vector<1x8x32xf32> to vector<1x32xf32>
    %499 = vector.shape_cast %498 : vector<1x32xf32> to vector<1x1x32xf32>
    %cst_61 = arith.constant 8.000000e+00 : f32
    %500 = vector.broadcast %cst_61 : f32 to vector<1x1x32xf32>
    %501 = arith.divf %499, %500 : vector<1x1x32xf32>
    %cst_62 = arith.constant 9.99999974E-6 : f32
    %502 = vector.broadcast %cst_62 : f32 to vector<1x1x32xf32>
    %503 = arith.addf %501, %502 : vector<1x1x32xf32>
    %504 = math.rsqrt %503 : vector<1x1x32xf32>
    %c0_63 = arith.constant 0 : index
    %c0_64 = arith.constant 0 : index
    %505 = vector.load %arg13[%c0_63, %c0_64] : memref<1x32xf32, #tpu.memory_space<vmem>>, vector<1x32xf32>
    %506 = vector.shape_cast %505 : vector<1x32xf32> to vector<1x1x32xf32>
    %507 = arith.mulf %504, %506 : vector<1x1x32xf32>
    %508 = vector.broadcast %507 : vector<1x1x32xf32> to vector<1x8x32xf32>
    %509 = arith.mulf %496, %508 : vector<1x8x32xf32>
    %c0_65 = arith.constant 0 : index
    %c0_66 = arith.constant 0 : index
    %510 = vector.load %arg14[%c0_65, %c0_66] : memref<1x32xf32, #tpu.memory_space<vmem>>, vector<1x32xf32>
    %511 = vector.shape_cast %510 : vector<1x32xf32> to vector<1x1x32xf32>
    %512 = vector.broadcast %511 : vector<1x1x32xf32> to vector<1x8x32xf32>
    %513 = arith.addf %509, %512 : vector<1x8x32xf32>
    %514 = vector.shape_cast %513 : vector<1x8x32xf32> to vector<8x32xf32>
    %515 = arith.truncf %514 : vector<8x32xf32> to vector<8x32xbf16>
    %c0_67 = arith.constant 0 : index
    %c0_68 = arith.constant 0 : index
    %516 = vector.load %arg15[%c0_67, %c0_68] : memref<32x64xbf16, #tpu.memory_space<vmem>>, vector<32x64xbf16>
    %cst_69 = arith.constant dense<0.000000e+00> : vector<8x64xf32>
    %517 = tpu.matmul %515, %516, %cst_69 {dimension_numbers = #tpu.dot_dimension_numbers<[1], [0], [0], [1], [0, 0, 1, 1], [], []>} : vector<8x32xbf16>, vector<32x64xbf16>, vector<8x64xf32> -> vector<8x64xf32>
    %c0_70 = arith.constant 0 : index
    %c0_71 = arith.constant 0 : index
    %518 = vector.load %arg16[%c0_70, %c0_71] : memref<1x64xf32, #tpu.memory_space<vmem>>, vector<1x64xf32>
    %519 = vector.broadcast %518 : vector<1x64xf32> to vector<8x64xf32>
    %520 = arith.addf %517, %519 : vector<8x64xf32>
    %cst_72 = arith.constant 0.000000e+00 : f32
    %521 = vector.broadcast %cst_72 : f32 to vector<8x64xf32>
    %522 = arith.maximumf %520, %521 : vector<8x64xf32>
    %523 = arith.truncf %522 : vector<8x64xf32> to vector<8x64xbf16>
    %c0_73 = arith.constant 0 : index
    %c0_74 = arith.constant 0 : index
    %524 = vector.load %arg17[%c0_73, %c0_74] : memref<64x32xbf16, #tpu.memory_space<vmem>>, vector<64x32xbf16>
    %cst_75 = arith.constant dense<0.000000e+00> : vector<8x32xf32>
    %525 = tpu.matmul %523, %524, %cst_75 {dimension_numbers = #tpu.dot_dimension_numbers<[1], [0], [0], [1], [0, 0, 1, 1], [], []>} : vector<8x64xbf16>, vector<64x32xbf16>, vector<8x32xf32> -> vector<8x32xf32>
    %c0_76 = arith.constant 0 : index
    %c0_77 = arith.constant 0 : index
    %526 = vector.load %arg18[%c0_76, %c0_77] : memref<1x32xf32, #tpu.memory_space<vmem>>, vector<1x32xf32>
    %527 = vector.broadcast %526 : vector<1x32xf32> to vector<8x32xf32>
    %528 = arith.addf %525, %527 : vector<8x32xf32>
    %529 = vector.shape_cast %528 : vector<8x32xf32> to vector<1x8x32xf32>
    %530 = arith.addf %513, %529 : vector<1x8x32xf32>
    %cst_78 = arith.constant dense<0.000000e+00> : vector<1x32xf32>
    %531 = vector.multi_reduction <add>, %530, %cst_78 [1] : vector<1x8x32xf32> to vector<1x32xf32>
    %532 = vector.shape_cast %531 : vector<1x32xf32> to vector<1x1x32xf32>
    %cst_79 = arith.constant 8.000000e+00 : f32
    %533 = vector.broadcast %cst_79 : f32 to vector<1x1x32xf32>
    %534 = arith.divf %532, %533 : vector<1x1x32xf32>
    %535 = vector.broadcast %534 : vector<1x1x32xf32> to vector<1x8x32xf32>
    %536 = arith.subf %530, %535 : vector<1x8x32xf32>
    %537 = arith.mulf %536, %536 : vector<1x8x32xf32>
    %cst_80 = arith.constant dense<0.000000e+00> : vector<1x32xf32>
    %538 = vector.multi_reduction <add>, %537, %cst_80 [1] : vector<1x8x32xf32> to vector<1x32xf32>
    %539 = vector.shape_cast %538 : vector<1x32xf32> to vector<1x1x32xf32>
    %cst_81 = arith.constant 8.000000e+00 : f32
    %540 = vector.broadcast %cst_81 : f32 to vector<1x1x32xf32>
    %541 = arith.divf %539, %540 : vector<1x1x32xf32>
    %cst_82 = arith.constant 9.99999974E-6 : f32
    %542 = vector.broadcast %cst_82 : f32 to vector<1x1x32xf32>
    %543 = arith.addf %541, %542 : vector<1x1x32xf32>
    %544 = math.rsqrt %543 : vector<1x1x32xf32>
    %c0_83 = arith.constant 0 : index
    %c0_84 = arith.constant 0 : index
    %545 = vector.load %arg19[%c0_83, %c0_84] : memref<1x32xf32, #tpu.memory_space<vmem>>, vector<1x32xf32>
    %546 = vector.shape_cast %545 : vector<1x32xf32> to vector<1x1x32xf32>
    %547 = arith.mulf %544, %546 : vector<1x1x32xf32>
    %548 = vector.broadcast %547 : vector<1x1x32xf32> to vector<1x8x32xf32>
    %549 = arith.mulf %536, %548 : vector<1x8x32xf32>
    %c0_85 = arith.constant 0 : index
    %c0_86 = arith.constant 0 : index
    %550 = vector.load %arg20[%c0_85, %c0_86] : memref<1x32xf32, #tpu.memory_space<vmem>>, vector<1x32xf32>
    %551 = vector.shape_cast %550 : vector<1x32xf32> to vector<1x1x32xf32>
    %552 = vector.broadcast %551 : vector<1x1x32xf32> to vector<1x8x32xf32>
    %553 = arith.addf %549, %552 : vector<1x8x32xf32>
    %c0_87 = arith.constant 0 : index
    %c0_88 = arith.constant 0 : index
    %c0_89 = arith.constant 0 : index
    %554 = vector.load %arg21[%c0_87, %c0_88, %c0_89] : memref<1x8x32xf32, #tpu.memory_space<vmem>>, vector<1x8x32xf32>
    tpu.vector_store %arg21[%c0_87, %c0_88, %c0_89], %553 {strides = array<i32>} : memref<1x8x32xf32, #tpu.memory_space<vmem>>, vector<1x8x32xf32>,
    return
  }
  func.func @transform_0(%arg0: i32) -> (i32, i32, i32) {
    %c0_i32 = arith.constant 0 : i32
    %c0_i32_0 = arith.constant 0 : i32
    %c0_i32_1 = arith.constant 0 : i32
    return %arg0, %c0_i32, %c0_i32_0 : i32, i32, i32
  }
  func.func @transform_1(%arg0: i32) -> (i32, i32, i32) {
    %c0_i32 = arith.constant 0 : i32
    %c0_i32_0 = arith.constant 0 : i32
    %c0_i32_1 = arith.constant 0 : i32
    return %arg0, %c0_i32, %c0_i32_0 : i32, i32, i32
  }
  func.func @transform_2(%arg0: i32) -> (i32, i32, i32) {
    %c0_i32 = arith.constant 0 : i32
    %c0_i32_0 = arith.constant 0 : i32
    %c0_i32_1 = arith.constant 0 : i32
    return %arg0, %c0_i32, %c0_i32_0 : i32, i32, i32
  }
  func.func @transform_3(%arg0: i32) -> (i32, i32) {
    %c0_i32 = arith.constant 0 : i32
    %c0_i32_0 = arith.constant 0 : i32
    %c0_i32_1 = arith.constant 0 : i32
    return %c0_i32, %c0_i32_0 : i32, i32
  }
  func.func @transform_4(%arg0: i32) -> (i32, i32) {
    %c0_i32 = arith.constant 0 : i32
    %c0_i32_0 = arith.constant 0 : i32
    %c0_i32_1 = arith.constant 0 : i32
    return %c0_i32, %c0_i32_0 : i32, i32
  }
  func.func @transform_5(%arg0: i32) -> (i32, i32, i32, i32) {
    %c0_i32 = arith.constant 0 : i32
    %c0_i32_0 = arith.constant 0 : i32
    %c0_i32_1 = arith.constant 0 : i32
    %c0_i32_2 = arith.constant 0 : i32
    %c0_i32_3 = arith.constant 0 : i32
    return %c0_i32, %c0_i32_0, %c0_i32_1, %c0_i32_2 : i32, i32, i32, i32
  }
  func.func @transform_6(%arg0: i32) -> (i32, i32, i32, i32) {
    %c0_i32 = arith.constant 0 : i32
    %c0_i32_0 = arith.constant 0 : i32
    %c0_i32_1 = arith.constant 0 : i32
    %c0_i32_2 = arith.constant 0 : i32
    %c0_i32_3 = arith.constant 0 : i32
    return %c0_i32, %c0_i32_0, %c0_i32_1, %c0_i32_2 : i32, i32, i32, i32
  }
  func.func @transform_7(%arg0: i32) -> (i32, i32, i32, i32) {
    %c0_i32 = arith.constant 0 : i32
    %c0_i32_0 = arith.constant 0 : i32
    %c0_i32_1 = arith.constant 0 : i32
    %c0_i32_2 = arith.constant 0 : i32
    %c0_i32_3 = arith.constant 0 : i32
    return %c0_i32, %c0_i32_0, %c0_i32_1, %c0_i32_2 : i32, i32, i32, i32
  }
  func.func @transform_8(%arg0: i32) -> (i32, i32, i32, i32) {
    %c0_i32 = arith.constant 0 : i32
    %c0_i32_0 = arith.constant 0 : i32
    %c0_i32_1 = arith.constant 0 : i32
    %c0_i32_2 = arith.constant 0 : i32
    %c0_i32_3 = arith.constant 0 : i32
    return %c0_i32, %c0_i32_0, %c0_i32_1, %c0_i32_2 : i32, i32, i32, i32
  }
  func.func @transform_9(%arg0: i32) -> (i32, i32, i32) {
    %c0_i32 = arith.constant 0 : i32
    %c0_i32_0 = arith.constant 0 : i32
    %c0_i32_1 = arith.constant 0 : i32
    %c0_i32_2 = arith.constant 0 : i32
    return %c0_i32, %c0_i32_0, %c0_i32_1 : i32, i32, i32
  }
  func.func @transform_10(%arg0: i32) -> (i32, i32) {
    %c0_i32 = arith.constant 0 : i32
    %c0_i32_0 = arith.constant 0 : i32
    %c0_i32_1 = arith.constant 0 : i32
    return %c0_i32, %c0_i32_0 : i32, i32
  }
  func.func @transform_11(%arg0: i32) -> (i32, i32) {
    %c0_i32 = arith.constant 0 : i32
    %c0_i32_0 = arith.constant 0 : i32
    %c0_i32_1 = arith.constant 0 : i32
    return %c0_i32, %c0_i32_0 : i32, i32
  }
  func.func @transform_12(%arg0: i32) -> (i32, i32) {
    %c0_i32 = arith.constant 0 : i32
    %c0_i32_0 = arith.constant 0 : i32
    %c0_i32_1 = arith.constant 0 : i32
    return %c0_i32, %c0_i32_0 : i32, i32
  }
  func.func @transform_13(%arg0: i32) -> (i32, i32) {
    %c0_i32 = arith.constant 0 : i32
    %c0_i32_0 = arith.constant 0 : i32
    %c0_i32_1 = arith.constant 0 : i32
    return %c0_i32, %c0_i32_0 : i32, i32
  }
  func.func @transform_14(%arg0: i32) -> (i32, i32) {
    %c0_i32 = arith.constant 0 : i32
    %c0_i32_0 = arith.constant 0 : i32
    %c0_i32_1 = arith.constant 0 : i32
    return %c0_i32, %c0_i32_0 : i32, i32
  }
  func.func @transform_15(%arg0: i32) -> (i32, i32) {
    %c0_i32 = arith.constant 0 : i32
    %c0_i32_0 = arith.constant 0 : i32
    %c0_i32_1 = arith.constant 0 : i32
    return %c0_i32, %c0_i32_0 : i32, i32
  }
  func.func @transform_16(%arg0: i32) -> (i32, i32) {
    %c0_i32 = arith.constant 0 : i32
    %c0_i32_0 = arith.constant 0 : i32
    %c0_i32_1 = arith.constant 0 : i32
    return %c0_i32, %c0_i32_0 : i32, i32
  }
  func.func @transform_17(%arg0: i32) -> (i32, i32) {
    %c0_i32 = arith.constant 0 : i32
    %c0_i32_0 = arith.constant 0 : i32
    %c0_i32_1 = arith.constant 0 : i32
    return %c0_i32, %c0_i32_0 : i32, i32
  }
  func.func @transform_18(%arg0: i32) -> (i32, i32) {
    %c0_i32 = arith.constant 0 : i32
    %c0_i32_0 = arith.constant 0 : i32
    %c0_i32_1 = arith.constant 0 : i32
    return %c0_i32, %c0_i32_0 : i32, i32
  }
  func.func @transform_19(%arg0: i32) -> (i32, i32) {
    %c0_i32 = arith.constant 0 : i32
    %c0_i32_0 = arith.constant 0 : i32
    %c0_i32_1 = arith.constant 0 : i32
    return %c0_i32, %c0_i32_0 : i32, i32
  }
  func.func @transform_20(%arg0: i32) -> (i32, i32, i32) {
    %c0_i32 = arith.constant 0 : i32
    %c0_i32_0 = arith.constant 0 : i32
    %c0_i32_1 = arith.constant 0 : i32
    return %arg0, %c0_i32, %c0_i32_0 : i32, i32, i32
  }
}

module attributes {stable_mosaic.version = 11 : i64} {
  func.func @_encoding_block_kernel(%arg0: i32, %arg1: memref<1x8x32xf32, #tpu.memory_space<vmem>>, %arg2: memref<1x8x32xf32, #tpu.memory_space<vmem>>, %arg3: memref<1x8x8xf32, #tpu.memory_space<vmem>>, %arg4: memref<32x32xbf16, #tpu.memory_space<vmem>>, %arg5: memref<32x64xbf16, #tpu.memory_space<vmem>>, %arg6: memref<16x4x1x1xf32, #tpu.memory_space<vmem>>, %arg7: memref<16x4x1x1xf32, #tpu.memory_space<vmem>>, %arg8: memref<16x4x1x1xf32, #tpu.memory_space<vmem>>, %arg9: memref<16x4x1x1xf32, #tpu.memory_space<vmem>>, %arg10: memref<4x1x1xf32, #tpu.memory_space<vmem>>, %arg11: memref<32x32xbf16, #tpu.memory_space<vmem>>, %arg12: memref<1x32xf32, #tpu.memory_space<vmem>>, %arg13: memref<1x32xf32, #tpu.memory_space<vmem>>, %arg14: memref<1x32xf32, #tpu.memory_space<vmem>>, %arg15: memref<32x64xbf16, #tpu.memory_space<vmem>>, %arg16: memref<1x64xf32, #tpu.memory_space<vmem>>, %arg17: memref<64x32xbf16, #tpu.memory_space<vmem>>, %arg18: memref<1x32xf32, #tpu.memory_space<vmem>>, %arg19: memref<1x32xf32, #tpu.memory_space<vmem>>, %arg20: memref<1x32xf32, #tpu.memory_space<vmem>>, %arg21: memref<1x8x32xf32, #tpu.memory_space<vmem>>) attributes {dimension_semantics = [#tpu.dimension_semantics<parallel>], iteration_bounds = array<i64: 2>, scalar_prefetch = 0 : i64, scratch_operands = 0 : i64, tpu.core_type = #tpu.core_type<tc>, window_params = [{transform_indices = @transform_0, window_bounds = array<i64: 1, 8, 32>}, {transform_indices = @transform_1, window_bounds = array<i64: 1, 8, 32>}, {transform_indices = @transform_2, window_bounds = array<i64: 1, 8, 8>}, {pipeline_mode = #tpu.pipeline_mode<synchronous>, transform_indices = @transform_3, window_bounds = array<i64: 32, 32>}, {pipeline_mode = #tpu.pipeline_mode<synchronous>, transform_indices = @transform_4, window_bounds = array<i64: 32, 64>}, {pipeline_mode = #tpu.pipeline_mode<synchronous>, transform_indices = @transform_5, window_bounds = array<i64: 16, 4, 1, 1>}, {pipeline_mode = #tpu.pipeline_mode<synchronous>, transform_indices = @transform_6, window_bounds = array<i64: 16, 4, 1, 1>}, {pipeline_mode = #tpu.pipeline_mode<synchronous>, transform_indices = @transform_7, window_bounds = array<i64: 16, 4, 1, 1>}, {pipeline_mode = #tpu.pipeline_mode<synchronous>, transform_indices = @transform_8, window_bounds = array<i64: 16, 4, 1, 1>}, {pipeline_mode = #tpu.pipeline_mode<synchronous>, transform_indices = @transform_9, window_bounds = array<i64: 4, 1, 1>}, {pipeline_mode = #tpu.pipeline_mode<synchronous>, transform_indices = @transform_10, window_bounds = array<i64: 32, 32>}, {pipeline_mode = #tpu.pipeline_mode<synchronous>, transform_indices = @transform_11, window_bounds = array<i64: 1, 32>}, {pipeline_mode = #tpu.pipeline_mode<synchronous>, transform_indices = @transform_12, window_bounds = array<i64: 1, 32>}, {pipeline_mode = #tpu.pipeline_mode<synchronous>, transform_indices = @transform_13, window_bounds = array<i64: 1, 32>}, {pipeline_mode = #tpu.pipeline_mode<synchronous>, transform_indices = @transform_14, window_bounds = array<i64: 32, 64>}, {pipeline_mode = #tpu.pipeline_mode<synchronous>, transform_indices = @transform_15, window_bounds = array<i64: 1, 64>}, {pipeline_mode = #tpu.pipeline_mode<synchronous>, transform_indices = @transform_16, window_bounds = array<i64: 64, 32>}, {pipeline_mode = #tpu.pipeline_mode<synchronous>, transform_indices = @transform_17, window_bounds = array<i64: 1, 32>}, {pipeline_mode = #tpu.pipeline_mode<synchronous>, transform_indices = @transform_18, window_bounds = array<i64: 1, 32>}, {pipeline_mode = #tpu.pipeline_mode<synchronous>, transform_indices = @transform_19, window_bounds = array<i64: 1, 32>}, {transform_indices = @transform_20, window_bounds = array<i64: 1, 8, 32>}]} {
    %c0 = arith.constant 0 : index
    %c0_0 = arith.constant 0 : index
    %c0_1 = arith.constant 0 : index
    %0 = vector.load %arg1[%c0, %c0_0, %c0_1] : memref<1x8x32xf32, #tpu.memory_space<vmem>>, vector<1x8x32xf32>
    %1 = vector.shape_cast %0 : vector<1x8x32xf32> to vector<8x32xf32>
    %c0_2 = arith.constant 0 : index
    %c0_3 = arith.constant 0 : index
    %c0_4 = arith.constant 0 : index
    %2 = vector.load %arg2[%c0_2, %c0_3, %c0_4] : memref<1x8x32xf32, #tpu.memory_space<vmem>>, vector<1x8x32xf32>
    %3 = vector.shape_cast %2 : vector<1x8x32xf32> to vector<8x32xf32>
    %4 = arith.truncf %1 : vector<8x32xf32> to vector<8x32xbf16>
    %c0_5 = arith.constant 0 : index
    %c0_6 = arith.constant 0 : index
    %5 = vector.load %arg4[%c0_5, %c0_6] : memref<32x32xbf16, #tpu.memory_space<vmem>>, vector<32x32xbf16>
    %cst = arith.constant dense<0.000000e+00> : vector<8x32xf32>
    %6 = tpu.matmul %4, %5, %cst {dimension_numbers = #tpu.dot_dimension_numbers<[1], [0], [0], [1], [0, 0, 1, 1], [], []>} : vector<8x32xbf16>, vector<32x32xbf16>, vector<8x32xf32> -> vector<8x32xf32>
    %7 = arith.truncf %3 : vector<8x32xf32> to vector<8x32xbf16>
    %c0_7 = arith.constant 0 : index
    %c0_8 = arith.constant 0 : index
    %8 = vector.load %arg5[%c0_7, %c0_8] : memref<32x64xbf16, #tpu.memory_space<vmem>>, vector<32x64xbf16>
    %cst_9 = arith.constant dense<0.000000e+00> : vector<8x64xf32>
    %9 = tpu.matmul %7, %8, %cst_9 {dimension_numbers = #tpu.dot_dimension_numbers<[1], [0], [0], [1], [0, 0, 1, 1], [], []>} : vector<8x32xbf16>, vector<32x64xbf16>, vector<8x64xf32> -> vector<8x64xf32>
    %10 = vector.shape_cast %6 : vector<8x32xf32> to vector<1x8x32xf32>
    %11 = vector.shape_cast %9 : vector<8x64xf32> to vector<1x8x64xf32>
    %12 = vector.extract_strided_slice %10 {offsets = [0, 0, 0], sizes = [1, 8, 8], strides = [1, 1, 1]} : vector<1x8x32xf32> to vector<1x8x8xf32>
    %13 = vector.extract_strided_slice %10 {offsets = [0, 0, 8], sizes = [1, 8, 8], strides = [1, 1, 1]} : vector<1x8x32xf32> to vector<1x8x8xf32>
    %14 = vector.extract_strided_slice %10 {offsets = [0, 0, 16], sizes = [1, 8, 8], strides = [1, 1, 1]} : vector<1x8x32xf32> to vector<1x8x8xf32>
    %15 = vector.extract_strided_slice %10 {offsets = [0, 0, 24], sizes = [1, 8, 8], strides = [1, 1, 1]} : vector<1x8x32xf32> to vector<1x8x8xf32>
    %16 = vector.shape_cast %12 : vector<1x8x8xf32> to vector<1x1x8x8xf32>
    %17 = vector.shape_cast %13 : vector<1x8x8xf32> to vector<1x1x8x8xf32>
    %18 = vector.shape_cast %14 : vector<1x8x8xf32> to vector<1x1x8x8xf32>
    %19 = vector.shape_cast %15 : vector<1x8x8xf32> to vector<1x1x8x8xf32>
    %20 = tpu.concatenate %16, %17, %18, %19 in 1 : vector<1x1x8x8xf32>, vector<1x1x8x8xf32>, vector<1x1x8x8xf32>, vector<1x1x8x8xf32> -> vector<1x4x8x8xf32>
    %21 = vector.shape_cast %20 : vector<1x4x8x8xf32> to vector<4x8x8xf32>
    %22 = vector.extract_strided_slice %11 {offsets = [0, 0, 0], sizes = [1, 8, 8], strides = [1, 1, 1]} : vector<1x8x64xf32> to vector<1x8x8xf32>
    %23 = vector.extract_strided_slice %11 {offsets = [0, 0, 8], sizes = [1, 8, 8], strides = [1, 1, 1]} : vector<1x8x64xf32> to vector<1x8x8xf32>
    %24 = vector.extract_strided_slice %11 {offsets = [0, 0, 16], sizes = [1, 8, 8], strides = [1, 1, 1]} : vector<1x8x64xf32> to vector<1x8x8xf32>
    %25 = vector.extract_strided_slice %11 {offsets = [0, 0, 24], sizes = [1, 8, 8], strides = [1, 1, 1]} : vector<1x8x64xf32> to vector<1x8x8xf32>
    %26 = vector.shape_cast %22 : vector<1x8x8xf32> to vector<1x1x8x8xf32>
    %27 = vector.shape_cast %23 : vector<1x8x8xf32> to vector<1x1x8x8xf32>
    %28 = vector.shape_cast %24 : vector<1x8x8xf32> to vector<1x1x8x8xf32>
    %29 = vector.shape_cast %25 : vector<1x8x8xf32> to vector<1x1x8x8xf32>
    %30 = tpu.concatenate %26, %27, %28, %29 in 1 : vector<1x1x8x8xf32>, vector<1x1x8x8xf32>, vector<1x1x8x8xf32>, vector<1x1x8x8xf32> -> vector<1x4x8x8xf32>
    %31 = vector.shape_cast %30 : vector<1x4x8x8xf32> to vector<4x8x8xf32>
    %32 = vector.extract_strided_slice %11 {offsets = [0, 0, 32], sizes = [1, 8, 8], strides = [1, 1, 1]} : vector<1x8x64xf32> to vector<1x8x8xf32>
    %33 = vector.extract_strided_slice %11 {offsets = [0, 0, 40], sizes = [1, 8, 8], strides = [1, 1, 1]} : vector<1x8x64xf32> to vector<1x8x8xf32>
    %34 = vector.extract_strided_slice %11 {offsets = [0, 0, 48], sizes = [1, 8, 8], strides = [1, 1, 1]} : vector<1x8x64xf32> to vector<1x8x8xf32>
    %35 = vector.extract_strided_slice %11 {offsets = [0, 0, 56], sizes = [1, 8, 8], strides = [1, 1, 1]} : vector<1x8x64xf32> to vector<1x8x8xf32>
    %36 = vector.shape_cast %32 : vector<1x8x8xf32> to vector<1x1x8x8xf32>
    %37 = vector.shape_cast %33 : vector<1x8x8xf32> to vector<1x1x8x8xf32>
    %38 = vector.shape_cast %34 : vector<1x8x8xf32> to vector<1x1x8x8xf32>
    %39 = vector.shape_cast %35 : vector<1x8x8xf32> to vector<1x1x8x8xf32>
    %40 = tpu.concatenate %36, %37, %38, %39 in 1 : vector<1x1x8x8xf32>, vector<1x1x8x8xf32>, vector<1x1x8x8xf32>, vector<1x1x8x8xf32> -> vector<1x4x8x8xf32>
    %41 = vector.shape_cast %40 : vector<1x4x8x8xf32> to vector<4x8x8xf32>
    %42 = arith.truncf %21 : vector<4x8x8xf32> to vector<4x8x8xbf16>
    %43 = arith.truncf %31 : vector<4x8x8xf32> to vector<4x8x8xbf16>
    "tpu.trace_start"() <{level = 10 : i32, message = "gnd,gmd->gnm"}> : () -> ()
    %cst_10 = arith.constant dense<0.000000e+00> : vector<4x8x8xf32>
    %44 = tpu.matmul %42, %43, %cst_10 {dimension_numbers = #tpu.dot_dimension_numbers<[2], [2], [1], [1], [0, 0, 0, 1, 1, 1], [0], [0]>} : vector<4x8x8xbf16>, vector<4x8x8xbf16>, vector<4x8x8xf32> -> vector<4x8x8xf32>
    "tpu.trace_stop"() : () -> ()
    %45 = vector.shape_cast %44 : vector<4x8x8xf32> to vector<1x4x8x8xf32>
    %c0_11 = arith.constant 0 : index
    %c0_12 = arith.constant 0 : index
    %c0_13 = arith.constant 0 : index
    %46 = vector.load %arg3[%c0_11, %c0_12, %c0_13] : memref<1x8x8xf32, #tpu.memory_space<vmem>>, vector<1x8x8xf32>
    %47 = vector.shape_cast %46 : vector<1x8x8xf32> to vector<1x1x8x8xf32>
    %c0_14 = arith.constant 0 : index
    %c0_15 = arith.constant 0 : index
    %c0_16 = arith.constant 0 : index
    %c0_17 = arith.constant 0 : index
    %48 = vector.load %arg6[%c0_14, %c0_15, %c0_16, %c0_17] : memref<16x4x1x1xf32, #tpu.memory_space<vmem>>, vector<16x4x1x1xf32>
    %c0_18 = arith.constant 0 : index
    %c0_19 = arith.constant 0 : index
    %c0_20 = arith.constant 0 : index
    %c0_21 = arith.constant 0 : index
    %49 = vector.load %arg7[%c0_18, %c0_19, %c0_20, %c0_21] : memref<16x4x1x1xf32, #tpu.memory_space<vmem>>, vector<16x4x1x1xf32>
    %c0_22 = arith.constant 0 : index
    %c0_23 = arith.constant 0 : index
    %c0_24 = arith.constant 0 : index
    %c0_25 = arith.constant 0 : index
    %50 = vector.load %arg8[%c0_22, %c0_23, %c0_24, %c0_25] : memref<16x4x1x1xf32, #tpu.memory_space<vmem>>, vector<16x4x1x1xf32>
    %c0_26 = arith.constant 0 : index
    %c0_27 = arith.constant 0 : index
    %c0_28 = arith.constant 0 : index
    %c0_29 = arith.constant 0 : index
    %51 = vector.load %arg9[%c0_26, %c0_27, %c0_28, %c0_29] : memref<16x4x1x1xf32, #tpu.memory_space<vmem>>, vector<16x4x1x1xf32>
    %cst_30 = arith.constant 0.000000e+00 : f32
    %52 = vector.broadcast %cst_30 : f32 to vector<1x4x8x8xf32>
    %53 = vector.extract_strided_slice %48 {offsets = [0, 0, 0, 0], sizes = [1, 4, 1, 1], strides = [1, 1, 1, 1]} : vector<16x4x1x1xf32> to vector<1x4x1x1xf32>
    %54 = vector.shape_cast %53 : vector<1x4x1x1xf32> to vector<4x1x1xf32>
    %55 = vector.shape_cast %54 : vector<4x1x1xf32> to vector<1x4x1x1xf32>
    %56 = vector.broadcast %55 : vector<1x4x1x1xf32> to vector<1x4x8x8xf32>
    %57 = arith.mulf %45, %56 : vector<1x4x8x8xf32>
    %58 = vector.extract_strided_slice %49 {offsets = [0, 0, 0, 0], sizes = [1, 4, 1, 1], strides = [1, 1, 1, 1]} : vector<16x4x1x1xf32> to vector<1x4x1x1xf32>
    %59 = vector.shape_cast %58 : vector<1x4x1x1xf32> to vector<4x1x1xf32>
    %60 = vector.shape_cast %59 : vector<4x1x1xf32> to vector<1x4x1x1xf32>
    %61 = vector.broadcast %47 : vector<1x1x8x8xf32> to vector<1x4x8x8xf32>
    %62 = vector.broadcast %60 : vector<1x4x1x1xf32> to vector<1x4x8x8xf32>
    %63 = arith.mulf %61, %62 : vector<1x4x8x8xf32>
    %64 = arith.addf %57, %63 : vector<1x4x8x8xf32>
    %65 = vector.extract_strided_slice %50 {offsets = [0, 0, 0, 0], sizes = [1, 4, 1, 1], strides = [1, 1, 1, 1]} : vector<16x4x1x1xf32> to vector<1x4x1x1xf32>
    %66 = vector.shape_cast %65 : vector<1x4x1x1xf32> to vector<4x1x1xf32>
    %67 = vector.shape_cast %66 : vector<4x1x1xf32> to vector<1x4x1x1xf32>
    %68 = vector.broadcast %67 : vector<1x4x1x1xf32> to vector<1x4x8x8xf32>
    %69 = arith.addf %64, %68 : vector<1x4x8x8xf32>
    %cst_31 = arith.constant 0.000000e+00 : f32
    %70 = vector.broadcast %cst_31 : f32 to vector<1x4x8x8xf32>
    %71 = arith.maximumf %69, %70 : vector<1x4x8x8xf32>
    %72 = vector.extract_strided_slice %51 {offsets = [0, 0, 0, 0], sizes = [1, 4, 1, 1], strides = [1, 1, 1, 1]} : vector<16x4x1x1xf32> to vector<1x4x1x1xf32>
    %73 = vector.shape_cast %72 : vector<1x4x1x1xf32> to vector<4x1x1xf32>
    %74 = vector.shape_cast %73 : vector<4x1x1xf32> to vector<1x4x1x1xf32>
    %75 = vector.broadcast %74 : vector<1x4x1x1xf32> to vector<1x4x8x8xf32>
    %76 = arith.mulf %71, %75 : vector<1x4x8x8xf32>
    %77 = arith.addf %52, %76 : vector<1x4x8x8xf32>
    %78 = vector.extract_strided_slice %48 {offsets = [1, 0, 0, 0], sizes = [1, 4, 1, 1], strides = [1, 1, 1, 1]} : vector<16x4x1x1xf32> to vector<1x4x1x1xf32>
    %79 = vector.shape_cast %78 : vector<1x4x1x1xf32> to vector<4x1x1xf32>
    %80 = vector.shape_cast %79 : vector<4x1x1xf32> to vector<1x4x1x1xf32>
    %81 = vector.broadcast %80 : vector<1x4x1x1xf32> to vector<1x4x8x8xf32>
    %82 = arith.mulf %45, %81 : vector<1x4x8x8xf32>
    %83 = vector.extract_strided_slice %49 {offsets = [1, 0, 0, 0], sizes = [1, 4, 1, 1], strides = [1, 1, 1, 1]} : vector<16x4x1x1xf32> to vector<1x4x1x1xf32>
    %84 = vector.shape_cast %83 : vector<1x4x1x1xf32> to vector<4x1x1xf32>
    %85 = vector.shape_cast %84 : vector<4x1x1xf32> to vector<1x4x1x1xf32>
    %86 = vector.broadcast %47 : vector<1x1x8x8xf32> to vector<1x4x8x8xf32>
    %87 = vector.broadcast %85 : vector<1x4x1x1xf32> to vector<1x4x8x8xf32>
    %88 = arith.mulf %86, %87 : vector<1x4x8x8xf32>
    %89 = arith.addf %82, %88 : vector<1x4x8x8xf32>
    %90 = vector.extract_strided_slice %50 {offsets = [1, 0, 0, 0], sizes = [1, 4, 1, 1], strides = [1, 1, 1, 1]} : vector<16x4x1x1xf32> to vector<1x4x1x1xf32>
    %91 = vector.shape_cast %90 : vector<1x4x1x1xf32> to vector<4x1x1xf32>
    %92 = vector.shape_cast %91 : vector<4x1x1xf32> to vector<1x4x1x1xf32>
    %93 = vector.broadcast %92 : vector<1x4x1x1xf32> to vector<1x4x8x8xf32>
    %94 = arith.addf %89, %93 : vector<1x4x8x8xf32>
    %cst_32 = arith.constant 0.000000e+00 : f32
    %95 = vector.broadcast %cst_32 : f32 to vector<1x4x8x8xf32>
    %96 = arith.maximumf %94, %95 : vector<1x4x8x8xf32>
    %97 = vector.extract_strided_slice %51 {offsets = [1, 0, 0, 0], sizes = [1, 4, 1, 1], strides = [1, 1, 1, 1]} : vector<16x4x1x1xf32> to vector<1x4x1x1xf32>
    %98 = vector.shape_cast %97 : vector<1x4x1x1xf32> to vector<4x1x1xf32>
    %99 = vector.shape_cast %98 : vector<4x1x1xf32> to vector<1x4x1x1xf32>
    %100 = vector.broadcast %99 : vector<1x4x1x1xf32> to vector<1x4x8x8xf32>
    %101 = arith.mulf %96, %100 : vector<1x4x8x8xf32>
    %102 = arith.addf %77, %101 : vector<1x4x8x8xf32>
    %103 = vector.extract_strided_slice %48 {offsets = [2, 0, 0, 0], sizes = [1, 4, 1, 1], strides = [1, 1, 1, 1]} : vector<16x4x1x1xf32> to vector<1x4x1x1xf32>
    %104 = vector.shape_cast %103 : vector<1x4x1x1xf32> to vector<4x1x1xf32>
    %105 = vector.shape_cast %104 : vector<4x1x1xf32> to vector<1x4x1x1xf32>
    %106 = vector.broadcast %105 : vector<1x4x1x1xf32> to vector<1x4x8x8xf32>
    %107 = arith.mulf %45, %106 : vector<1x4x8x8xf32>
    %108 = vector.extract_strided_slice %49 {offsets = [2, 0, 0, 0], sizes = [1, 4, 1, 1], strides = [1, 1, 1, 1]} : vector<16x4x1x1xf32> to vector<1x4x1x1xf32>
    %109 = vector.shape_cast %108 : vector<1x4x1x1xf32> to vector<4x1x1xf32>
    %110 = vector.shape_cast %109 : vector<4x1x1xf32> to vector<1x4x1x1xf32>
    %111 = vector.broadcast %47 : vector<1x1x8x8xf32> to vector<1x4x8x8xf32>
    %112 = vector.broadcast %110 : vector<1x4x1x1xf32> to vector<1x4x8x8xf32>
    %113 = arith.mulf %111, %112 : vector<1x4x8x8xf32>
    %114 = arith.addf %107, %113 : vector<1x4x8x8xf32>
    %115 = vector.extract_strided_slice %50 {offsets = [2, 0, 0, 0], sizes = [1, 4, 1, 1], strides = [1, 1, 1, 1]} : vector<16x4x1x1xf32> to vector<1x4x1x1xf32>
    %116 = vector.shape_cast %115 : vector<1x4x1x1xf32> to vector<4x1x1xf32>
    %117 = vector.shape_cast %116 : vector<4x1x1xf32> to vector<1x4x1x1xf32>
    %118 = vector.broadcast %117 : vector<1x4x1x1xf32> to vector<1x4x8x8xf32>
    %119 = arith.addf %114, %118 : vector<1x4x8x8xf32>
    %cst_33 = arith.constant 0.000000e+00 : f32
    %120 = vector.broadcast %cst_33 : f32 to vector<1x4x8x8xf32>
    %121 = arith.maximumf %119, %120 : vector<1x4x8x8xf32>
    %122 = vector.extract_strided_slice %51 {offsets = [2, 0, 0, 0], sizes = [1, 4, 1, 1], strides = [1, 1, 1, 1]} : vector<16x4x1x1xf32> to vector<1x4x1x1xf32>
    %123 = vector.shape_cast %122 : vector<1x4x1x1xf32> to vector<4x1x1xf32>
    %124 = vector.shape_cast %123 : vector<4x1x1xf32> to vector<1x4x1x1xf32>
    %125 = vector.broadcast %124 : vector<1x4x1x1xf32> to vector<1x4x8x8xf32>
    %126 = arith.mulf %121, %125 : vector<1x4x8x8xf32>
    %127 = arith.addf %102, %126 : vector<1x4x8x8xf32>
    %128 = vector.extract_strided_slice %48 {offsets = [3, 0, 0, 0], sizes = [1, 4, 1, 1], strides = [1, 1, 1, 1]} : vector<16x4x1x1xf32> to vector<1x4x1x1xf32>
    %129 = vector.shape_cast %128 : vector<1x4x1x1xf32> to vector<4x1x1xf32>
    %130 = vector.shape_cast %129 : vector<4x1x1xf32> to vector<1x4x1x1xf32>
    %131 = vector.broadcast %130 : vector<1x4x1x1xf32> to vector<1x4x8x8xf32>
    %132 = arith.mulf %45, %131 : vector<1x4x8x8xf32>
    %133 = vector.extract_strided_slice %49 {offsets = [3, 0, 0, 0], sizes = [1, 4, 1, 1], strides = [1, 1, 1, 1]} : vector<16x4x1x1xf32> to vector<1x4x1x1xf32>
    %134 = vector.shape_cast %133 : vector<1x4x1x1xf32> to vector<4x1x1xf32>
    %135 = vector.shape_cast %134 : vector<4x1x1xf32> to vector<1x4x1x1xf32>
    %136 = vector.broadcast %47 : vector<1x1x8x8xf32> to vector<1x4x8x8xf32>
    %137 = vector.broadcast %135 : vector<1x4x1x1xf32> to vector<1x4x8x8xf32>
    %138 = arith.mulf %136, %137 : vector<1x4x8x8xf32>
    %139 = arith.addf %132, %138 : vector<1x4x8x8xf32>
    %140 = vector.extract_strided_slice %50 {offsets = [3, 0, 0, 0], sizes = [1, 4, 1, 1], strides = [1, 1, 1, 1]} : vector<16x4x1x1xf32> to vector<1x4x1x1xf32>
    %141 = vector.shape_cast %140 : vector<1x4x1x1xf32> to vector<4x1x1xf32>
    %142 = vector.shape_cast %141 : vector<4x1x1xf32> to vector<1x4x1x1xf32>
    %143 = vector.broadcast %142 : vector<1x4x1x1xf32> to vector<1x4x8x8xf32>
    %144 = arith.addf %139, %143 : vector<1x4x8x8xf32>
    %cst_34 = arith.constant 0.000000e+00 : f32
    %145 = vector.broadcast %cst_34 : f32 to vector<1x4x8x8xf32>
    %146 = arith.maximumf %144, %145 : vector<1x4x8x8xf32>
    %147 = vector.extract_strided_slice %51 {offsets = [3, 0, 0, 0], sizes = [1, 4, 1, 1], strides = [1, 1, 1, 1]} : vector<16x4x1x1xf32> to vector<1x4x1x1xf32>
    %148 = vector.shape_cast %147 : vector<1x4x1x1xf32> to vector<4x1x1xf32>
    %149 = vector.shape_cast %148 : vector<4x1x1xf32> to vector<1x4x1x1xf32>
    %150 = vector.broadcast %149 : vector<1x4x1x1xf32> to vector<1x4x8x8xf32>
    %151 = arith.mulf %146, %150 : vector<1x4x8x8xf32>
    %152 = arith.addf %127, %151 : vector<1x4x8x8xf32>
    %153 = vector.extract_strided_slice %48 {offsets = [4, 0, 0, 0], sizes = [1, 4, 1, 1], strides = [1, 1, 1, 1]} : vector<16x4x1x1xf32> to vector<1x4x1x1xf32>
    %154 = vector.shape_cast %153 : vector<1x4x1x1xf32> to vector<4x1x1xf32>
    %155 = vector.shape_cast %154 : vector<4x1x1xf32> to vector<1x4x1x1xf32>
    %156 = vector.broadcast %155 : vector<1x4x1x1xf32> to vector<1x4x8x8xf32>
    %157 = arith.mulf %45, %156 : vector<1x4x8x8xf32>
    %158 = vector.extract_strided_slice %49 {offsets = [4, 0, 0, 0], sizes = [1, 4, 1, 1], strides = [1, 1, 1, 1]} : vector<16x4x1x1xf32> to vector<1x4x1x1xf32>
    %159 = vector.shape_cast %158 : vector<1x4x1x1xf32> to vector<4x1x1xf32>
    %160 = vector.shape_cast %159 : vector<4x1x1xf32> to vector<1x4x1x1xf32>
    %161 = vector.broadcast %47 : vector<1x1x8x8xf32> to vector<1x4x8x8xf32>
    %162 = vector.broadcast %160 : vector<1x4x1x1xf32> to vector<1x4x8x8xf32>
    %163 = arith.mulf %161, %162 : vector<1x4x8x8xf32>
    %164 = arith.addf %157, %163 : vector<1x4x8x8xf32>
    %165 = vector.extract_strided_slice %50 {offsets = [4, 0, 0, 0], sizes = [1, 4, 1, 1], strides = [1, 1, 1, 1]} : vector<16x4x1x1xf32> to vector<1x4x1x1xf32>
    %166 = vector.shape_cast %165 : vector<1x4x1x1xf32> to vector<4x1x1xf32>
    %167 = vector.shape_cast %166 : vector<4x1x1xf32> to vector<1x4x1x1xf32>
    %168 = vector.broadcast %167 : vector<1x4x1x1xf32> to vector<1x4x8x8xf32>
    %169 = arith.addf %164, %168 : vector<1x4x8x8xf32>
    %cst_35 = arith.constant 0.000000e+00 : f32
    %170 = vector.broadcast %cst_35 : f32 to vector<1x4x8x8xf32>
    %171 = arith.maximumf %169, %170 : vector<1x4x8x8xf32>
    %172 = vector.extract_strided_slice %51 {offsets = [4, 0, 0, 0], sizes = [1, 4, 1, 1], strides = [1, 1, 1, 1]} : vector<16x4x1x1xf32> to vector<1x4x1x1xf32>
    %173 = vector.shape_cast %172 : vector<1x4x1x1xf32> to vector<4x1x1xf32>
    %174 = vector.shape_cast %173 : vector<4x1x1xf32> to vector<1x4x1x1xf32>
    %175 = vector.broadcast %174 : vector<1x4x1x1xf32> to vector<1x4x8x8xf32>
    %176 = arith.mulf %171, %175 : vector<1x4x8x8xf32>
    %177 = arith.addf %152, %176 : vector<1x4x8x8xf32>
    %178 = vector.extract_strided_slice %48 {offsets = [5, 0, 0, 0], sizes = [1, 4, 1, 1], strides = [1, 1, 1, 1]} : vector<16x4x1x1xf32> to vector<1x4x1x1xf32>
    %179 = vector.shape_cast %178 : vector<1x4x1x1xf32> to vector<4x1x1xf32>
    %180 = vector.shape_cast %179 : vector<4x1x1xf32> to vector<1x4x1x1xf32>
    %181 = vector.broadcast %180 : vector<1x4x1x1xf32> to vector<1x4x8x8xf32>
    %182 = arith.mulf %45, %181 : vector<1x4x8x8xf32>
    %183 = vector.extract_strided_slice %49 {offsets = [5, 0, 0, 0], sizes = [1, 4, 1, 1], strides = [1, 1, 1, 1]} : vector<16x4x1x1xf32> to vector<1x4x1x1xf32>
    %184 = vector.shape_cast %183 : vector<1x4x1x1xf32> to vector<4x1x1xf32>
    %185 = vector.shape_cast %184 : vector<4x1x1xf32> to vector<1x4x1x1xf32>
    %186 = vector.broadcast %47 : vector<1x1x8x8xf32> to vector<1x4x8x8xf32>
    %187 = vector.broadcast %185 : vector<1x4x1x1xf32> to vector<1x4x8x8xf32>
    %188 = arith.mulf %186, %187 : vector<1x4x8x8xf32>
    %189 = arith.addf %182, %188 : vector<1x4x8x8xf32>
    %190 = vector.extract_strided_slice %50 {offsets = [5, 0, 0, 0], sizes = [1, 4, 1, 1], strides = [1, 1, 1, 1]} : vector<16x4x1x1xf32> to vector<1x4x1x1xf32>
    %191 = vector.shape_cast %190 : vector<1x4x1x1xf32> to vector<4x1x1xf32>
    %192 = vector.shape_cast %191 : vector<4x1x1xf32> to vector<1x4x1x1xf32>
    %193 = vector.broadcast %192 : vector<1x4x1x1xf32> to vector<1x4x8x8xf32>
    %194 = arith.addf %189, %193 : vector<1x4x8x8xf32>
    %cst_36 = arith.constant 0.000000e+00 : f32
    %195 = vector.broadcast %cst_36 : f32 to vector<1x4x8x8xf32>
    %196 = arith.maximumf %194, %195 : vector<1x4x8x8xf32>
    %197 = vector.extract_strided_slice %51 {offsets = [5, 0, 0, 0], sizes = [1, 4, 1, 1], strides = [1, 1, 1, 1]} : vector<16x4x1x1xf32> to vector<1x4x1x1xf32>
    %198 = vector.shape_cast %197 : vector<1x4x1x1xf32> to vector<4x1x1xf32>
    %199 = vector.shape_cast %198 : vector<4x1x1xf32> to vector<1x4x1x1xf32>
    %200 = vector.broadcast %199 : vector<1x4x1x1xf32> to vector<1x4x8x8xf32>
    %201 = arith.mulf %196, %200 : vector<1x4x8x8xf32>
    %202 = arith.addf %177, %201 : vector<1x4x8x8xf32>
    %203 = vector.extract_strided_slice %48 {offsets = [6, 0, 0, 0], sizes = [1, 4, 1, 1], strides = [1, 1, 1, 1]} : vector<16x4x1x1xf32> to vector<1x4x1x1xf32>
    %204 = vector.shape_cast %203 : vector<1x4x1x1xf32> to vector<4x1x1xf32>
    %205 = vector.shape_cast %204 : vector<4x1x1xf32> to vector<1x4x1x1xf32>
    %206 = vector.broadcast %205 : vector<1x4x1x1xf32> to vector<1x4x8x8xf32>
    %207 = arith.mulf %45, %206 : vector<1x4x8x8xf32>
    %208 = vector.extract_strided_slice %49 {offsets = [6, 0, 0, 0], sizes = [1, 4, 1, 1], strides = [1, 1, 1, 1]} : vector<16x4x1x1xf32> to vector<1x4x1x1xf32>
    %209 = vector.shape_cast %208 : vector<1x4x1x1xf32> to vector<4x1x1xf32>
    %210 = vector.shape_cast %209 : vector<4x1x1xf32> to vector<1x4x1x1xf32>
    %211 = vector.broadcast %47 : vector<1x1x8x8xf32> to vector<1x4x8x8xf32>
    %212 = vector.broadcast %210 : vector<1x4x1x1xf32> to vector<1x4x8x8xf32>
    %213 = arith.mulf %211, %212 : vector<1x4x8x8xf32>
    %214 = arith.addf %207, %213 : vector<1x4x8x8xf32>
    %215 = vector.extract_strided_slice %50 {offsets = [6, 0, 0, 0], sizes = [1, 4, 1, 1], strides = [1, 1, 1, 1]} : vector<16x4x1x1xf32> to vector<1x4x1x1xf32>
    %216 = vector.shape_cast %215 : vector<1x4x1x1xf32> to vector<4x1x1xf32>
    %217 = vector.shape_cast %216 : vector<4x1x1xf32> to vector<1x4x1x1xf32>
    %218 = vector.broadcast %217 : vector<1x4x1x1xf32> to vector<1x4x8x8xf32>
    %219 = arith.addf %214, %218 : vector<1x4x8x8xf32>
    %cst_37 = arith.constant 0.000000e+00 : f32
    %220 = vector.broadcast %cst_37 : f32 to vector<1x4x8x8xf32>
    %221 = arith.maximumf %219, %220 : vector<1x4x8x8xf32>
    %222 = vector.extract_strided_slice %51 {offsets = [6, 0, 0, 0], sizes = [1, 4, 1, 1], strides = [1, 1, 1, 1]} : vector<16x4x1x1xf32> to vector<1x4x1x1xf32>
    %223 = vector.shape_cast %222 : vector<1x4x1x1xf32> to vector<4x1x1xf32>
    %224 = vector.shape_cast %223 : vector<4x1x1xf32> to vector<1x4x1x1xf32>
    %225 = vector.broadcast %224 : vector<1x4x1x1xf32> to vector<1x4x8x8xf32>
    %226 = arith.mulf %221, %225 : vector<1x4x8x8xf32>
    %227 = arith.addf %202, %226 : vector<1x4x8x8xf32>
    %228 = vector.extract_strided_slice %48 {offsets = [7, 0, 0, 0], sizes = [1, 4, 1, 1], strides = [1, 1, 1, 1]} : vector<16x4x1x1xf32> to vector<1x4x1x1xf32>
    %229 = vector.shape_cast %228 : vector<1x4x1x1xf32> to vector<4x1x1xf32>
    %230 = vector.shape_cast %229 : vector<4x1x1xf32> to vector<1x4x1x1xf32>
    %231 = vector.broadcast %230 : vector<1x4x1x1xf32> to vector<1x4x8x8xf32>
    %232 = arith.mulf %45, %231 : vector<1x4x8x8xf32>
    %233 = vector.extract_strided_slice %49 {offsets = [7, 0, 0, 0], sizes = [1, 4, 1, 1], strides = [1, 1, 1, 1]} : vector<16x4x1x1xf32> to vector<1x4x1x1xf32>
    %234 = vector.shape_cast %233 : vector<1x4x1x1xf32> to vector<4x1x1xf32>
    %235 = vector.shape_cast %234 : vector<4x1x1xf32> to vector<1x4x1x1xf32>
    %236 = vector.broadcast %47 : vector<1x1x8x8xf32> to vector<1x4x8x8xf32>
    %237 = vector.broadcast %235 : vector<1x4x1x1xf32> to vector<1x4x8x8xf32>
    %238 = arith.mulf %236, %237 : vector<1x4x8x8xf32>
    %239 = arith.addf %232, %238 : vector<1x4x8x8xf32>
    %240 = vector.extract_strided_slice %50 {offsets = [7, 0, 0, 0], sizes = [1, 4, 1, 1], strides = [1, 1, 1, 1]} : vector<16x4x1x1xf32> to vector<1x4x1x1xf32>
    %241 = vector.shape_cast %240 : vector<1x4x1x1xf32> to vector<4x1x1xf32>
    %242 = vector.shape_cast %241 : vector<4x1x1xf32> to vector<1x4x1x1xf32>
    %243 = vector.broadcast %242 : vector<1x4x1x1xf32> to vector<1x4x8x8xf32>
    %244 = arith.addf %239, %243 : vector<1x4x8x8xf32>
    %cst_38 = arith.constant 0.000000e+00 : f32
    %245 = vector.broadcast %cst_38 : f32 to vector<1x4x8x8xf32>
    %246 = arith.maximumf %244, %245 : vector<1x4x8x8xf32>
    %247 = vector.extract_strided_slice %51 {offsets = [7, 0, 0, 0], sizes = [1, 4, 1, 1], strides = [1, 1, 1, 1]} : vector<16x4x1x1xf32> to vector<1x4x1x1xf32>
    %248 = vector.shape_cast %247 : vector<1x4x1x1xf32> to vector<4x1x1xf32>
    %249 = vector.shape_cast %248 : vector<4x1x1xf32> to vector<1x4x1x1xf32>
    %250 = vector.broadcast %249 : vector<1x4x1x1xf32> to vector<1x4x8x8xf32>
    %251 = arith.mulf %246, %250 : vector<1x4x8x8xf32>
    %252 = arith.addf %227, %251 : vector<1x4x8x8xf32>
    %253 = vector.extract_strided_slice %48 {offsets = [8, 0, 0, 0], sizes = [1, 4, 1, 1], strides = [1, 1, 1, 1]} : vector<16x4x1x1xf32> to vector<1x4x1x1xf32>
    %254 = vector.shape_cast %253 : vector<1x4x1x1xf32> to vector<4x1x1xf32>
    %255 = vector.shape_cast %254 : vector<4x1x1xf32> to vector<1x4x1x1xf32>
    %256 = vector.broadcast %255 : vector<1x4x1x1xf32> to vector<1x4x8x8xf32>
    %257 = arith.mulf %45, %256 : vector<1x4x8x8xf32>
    %258 = vector.extract_strided_slice %49 {offsets = [8, 0, 0, 0], sizes = [1, 4, 1, 1], strides = [1, 1, 1, 1]} : vector<16x4x1x1xf32> to vector<1x4x1x1xf32>
    %259 = vector.shape_cast %258 : vector<1x4x1x1xf32> to vector<4x1x1xf32>
    %260 = vector.shape_cast %259 : vector<4x1x1xf32> to vector<1x4x1x1xf32>
    %261 = vector.broadcast %47 : vector<1x1x8x8xf32> to vector<1x4x8x8xf32>
    %262 = vector.broadcast %260 : vector<1x4x1x1xf32> to vector<1x4x8x8xf32>
    %263 = arith.mulf %261, %262 : vector<1x4x8x8xf32>
    %264 = arith.addf %257, %263 : vector<1x4x8x8xf32>
    %265 = vector.extract_strided_slice %50 {offsets = [8, 0, 0, 0], sizes = [1, 4, 1, 1], strides = [1, 1, 1, 1]} : vector<16x4x1x1xf32> to vector<1x4x1x1xf32>
    %266 = vector.shape_cast %265 : vector<1x4x1x1xf32> to vector<4x1x1xf32>
    %267 = vector.shape_cast %266 : vector<4x1x1xf32> to vector<1x4x1x1xf32>
    %268 = vector.broadcast %267 : vector<1x4x1x1xf32> to vector<1x4x8x8xf32>
    %269 = arith.addf %264, %268 : vector<1x4x8x8xf32>
    %cst_39 = arith.constant 0.000000e+00 : f32
    %270 = vector.broadcast %cst_39 : f32 to vector<1x4x8x8xf32>
    %271 = arith.maximumf %269, %270 : vector<1x4x8x8xf32>
    %272 = vector.extract_strided_slice %51 {offsets = [8, 0, 0, 0], sizes = [1, 4, 1, 1], strides = [1, 1, 1, 1]} : vector<16x4x1x1xf32> to vector<1x4x1x1xf32>
    %273 = vector.shape_cast %272 : vector<1x4x1x1xf32> to vector<4x1x1xf32>
    %274 = vector.shape_cast %273 : vector<4x1x1xf32> to vector<1x4x1x1xf32>
    %275 = vector.broadcast %274 : vector<1x4x1x1xf32> to vector<1x4x8x8xf32>
    %276 = arith.mulf %271, %275 : vector<1x4x8x8xf32>
    %277 = arith.addf %252, %276 : vector<1x4x8x8xf32>
    %278 = vector.extract_strided_slice %48 {offsets = [9, 0, 0, 0], sizes = [1, 4, 1, 1], strides = [1, 1, 1, 1]} : vector<16x4x1x1xf32> to vector<1x4x1x1xf32>
    %279 = vector.shape_cast %278 : vector<1x4x1x1xf32> to vector<4x1x1xf32>
    %280 = vector.shape_cast %279 : vector<4x1x1xf32> to vector<1x4x1x1xf32>
    %281 = vector.broadcast %280 : vector<1x4x1x1xf32> to vector<1x4x8x8xf32>
    %282 = arith.mulf %45, %281 : vector<1x4x8x8xf32>
    %283 = vector.extract_strided_slice %49 {offsets = [9, 0, 0, 0], sizes = [1, 4, 1, 1], strides = [1, 1, 1, 1]} : vector<16x4x1x1xf32> to vector<1x4x1x1xf32>
    %284 = vector.shape_cast %283 : vector<1x4x1x1xf32> to vector<4x1x1xf32>
    %285 = vector.shape_cast %284 : vector<4x1x1xf32> to vector<1x4x1x1xf32>
    %286 = vector.broadcast %47 : vector<1x1x8x8xf32> to vector<1x4x8x8xf32>
    %287 = vector.broadcast %285 : vector<1x4x1x1xf32> to vector<1x4x8x8xf32>
    %288 = arith.mulf %286, %287 : vector<1x4x8x8xf32>
    %289 = arith.addf %282, %288 : vector<1x4x8x8xf32>
    %290 = vector.extract_strided_slice %50 {offsets = [9, 0, 0, 0], sizes = [1, 4, 1, 1], strides = [1, 1, 1, 1]} : vector<16x4x1x1xf32> to vector<1x4x1x1xf32>
    %291 = vector.shape_cast %290 : vector<1x4x1x1xf32> to vector<4x1x1xf32>
    %292 = vector.shape_cast %291 : vector<4x1x1xf32> to vector<1x4x1x1xf32>
    %293 = vector.broadcast %292 : vector<1x4x1x1xf32> to vector<1x4x8x8xf32>
    %294 = arith.addf %289, %293 : vector<1x4x8x8xf32>
    %cst_40 = arith.constant 0.000000e+00 : f32
    %295 = vector.broadcast %cst_40 : f32 to vector<1x4x8x8xf32>
    %296 = arith.maximumf %294, %295 : vector<1x4x8x8xf32>
    %297 = vector.extract_strided_slice %51 {offsets = [9, 0, 0, 0], sizes = [1, 4, 1, 1], strides = [1, 1, 1, 1]} : vector<16x4x1x1xf32> to vector<1x4x1x1xf32>
    %298 = vector.shape_cast %297 : vector<1x4x1x1xf32> to vector<4x1x1xf32>
    %299 = vector.shape_cast %298 : vector<4x1x1xf32> to vector<1x4x1x1xf32>
    %300 = vector.broadcast %299 : vector<1x4x1x1xf32> to vector<1x4x8x8xf32>
    %301 = arith.mulf %296, %300 : vector<1x4x8x8xf32>
    %302 = arith.addf %277, %301 : vector<1x4x8x8xf32>
    %303 = vector.extract_strided_slice %48 {offsets = [10, 0, 0, 0], sizes = [1, 4, 1, 1], strides = [1, 1, 1, 1]} : vector<16x4x1x1xf32> to vector<1x4x1x1xf32>
    %304 = vector.shape_cast %303 : vector<1x4x1x1xf32> to vector<4x1x1xf32>
    %305 = vector.shape_cast %304 : vector<4x1x1xf32> to vector<1x4x1x1xf32>
    %306 = vector.broadcast %305 : vector<1x4x1x1xf32> to vector<1x4x8x8xf32>
    %307 = arith.mulf %45, %306 : vector<1x4x8x8xf32>
    %308 = vector.extract_strided_slice %49 {offsets = [10, 0, 0, 0], sizes = [1, 4, 1, 1], strides = [1, 1, 1, 1]} : vector<16x4x1x1xf32> to vector<1x4x1x1xf32>
    %309 = vector.shape_cast %308 : vector<1x4x1x1xf32> to vector<4x1x1xf32>
    %310 = vector.shape_cast %309 : vector<4x1x1xf32> to vector<1x4x1x1xf32>
    %311 = vector.broadcast %47 : vector<1x1x8x8xf32> to vector<1x4x8x8xf32>
    %312 = vector.broadcast %310 : vector<1x4x1x1xf32> to vector<1x4x8x8xf32>
    %313 = arith.mulf %311, %312 : vector<1x4x8x8xf32>
    %314 = arith.addf %307, %313 : vector<1x4x8x8xf32>
    %315 = vector.extract_strided_slice %50 {offsets = [10, 0, 0, 0], sizes = [1, 4, 1, 1], strides = [1, 1, 1, 1]} : vector<16x4x1x1xf32> to vector<1x4x1x1xf32>
    %316 = vector.shape_cast %315 : vector<1x4x1x1xf32> to vector<4x1x1xf32>
    %317 = vector.shape_cast %316 : vector<4x1x1xf32> to vector<1x4x1x1xf32>
    %318 = vector.broadcast %317 : vector<1x4x1x1xf32> to vector<1x4x8x8xf32>
    %319 = arith.addf %314, %318 : vector<1x4x8x8xf32>
    %cst_41 = arith.constant 0.000000e+00 : f32
    %320 = vector.broadcast %cst_41 : f32 to vector<1x4x8x8xf32>
    %321 = arith.maximumf %319, %320 : vector<1x4x8x8xf32>
    %322 = vector.extract_strided_slice %51 {offsets = [10, 0, 0, 0], sizes = [1, 4, 1, 1], strides = [1, 1, 1, 1]} : vector<16x4x1x1xf32> to vector<1x4x1x1xf32>
    %323 = vector.shape_cast %322 : vector<1x4x1x1xf32> to vector<4x1x1xf32>
    %324 = vector.shape_cast %323 : vector<4x1x1xf32> to vector<1x4x1x1xf32>
    %325 = vector.broadcast %324 : vector<1x4x1x1xf32> to vector<1x4x8x8xf32>
    %326 = arith.mulf %321, %325 : vector<1x4x8x8xf32>
    %327 = arith.addf %302, %326 : vector<1x4x8x8xf32>
    %328 = vector.extract_strided_slice %48 {offsets = [11, 0, 0, 0], sizes = [1, 4, 1, 1], strides = [1, 1, 1, 1]} : vector<16x4x1x1xf32> to vector<1x4x1x1xf32>
    %329 = vector.shape_cast %328 : vector<1x4x1x1xf32> to vector<4x1x1xf32>
    %330 = vector.shape_cast %329 : vector<4x1x1xf32> to vector<1x4x1x1xf32>
    %331 = vector.broadcast %330 : vector<1x4x1x1xf32> to vector<1x4x8x8xf32>
    %332 = arith.mulf %45, %331 : vector<1x4x8x8xf32>
    %333 = vector.extract_strided_slice %49 {offsets = [11, 0, 0, 0], sizes = [1, 4, 1, 1], strides = [1, 1, 1, 1]} : vector<16x4x1x1xf32> to vector<1x4x1x1xf32>
    %334 = vector.shape_cast %333 : vector<1x4x1x1xf32> to vector<4x1x1xf32>
    %335 = vector.shape_cast %334 : vector<4x1x1xf32> to vector<1x4x1x1xf32>
    %336 = vector.broadcast %47 : vector<1x1x8x8xf32> to vector<1x4x8x8xf32>
    %337 = vector.broadcast %335 : vector<1x4x1x1xf32> to vector<1x4x8x8xf32>
    %338 = arith.mulf %336, %337 : vector<1x4x8x8xf32>
    %339 = arith.addf %332, %338 : vector<1x4x8x8xf32>
    %340 = vector.extract_strided_slice %50 {offsets = [11, 0, 0, 0], sizes = [1, 4, 1, 1], strides = [1, 1, 1, 1]} : vector<16x4x1x1xf32> to vector<1x4x1x1xf32>
    %341 = vector.shape_cast %340 : vector<1x4x1x1xf32> to vector<4x1x1xf32>
    %342 = vector.shape_cast %341 : vector<4x1x1xf32> to vector<1x4x1x1xf32>
    %343 = vector.broadcast %342 : vector<1x4x1x1xf32> to vector<1x4x8x8xf32>
    %344 = arith.addf %339, %343 : vector<1x4x8x8xf32>
    %cst_42 = arith.constant 0.000000e+00 : f32
    %345 = vector.broadcast %cst_42 : f32 to vector<1x4x8x8xf32>
    %346 = arith.maximumf %344, %345 : vector<1x4x8x8xf32>
    %347 = vector.extract_strided_slice %51 {offsets = [11, 0, 0, 0], sizes = [1, 4, 1, 1], strides = [1, 1, 1, 1]} : vector<16x4x1x1xf32> to vector<1x4x1x1xf32>
    %348 = vector.shape_cast %347 : vector<1x4x1x1xf32> to vector<4x1x1xf32>
    %349 = vector.shape_cast %348 : vector<4x1x1xf32> to vector<1x4x1x1xf32>
    %350 = vector.broadcast %349 : vector<1x4x1x1xf32> to vector<1x4x8x8xf32>
    %351 = arith.mulf %346, %350 : vector<1x4x8x8xf32>
    %352 = arith.addf %327, %351 : vector<1x4x8x8xf32>
    %353 = vector.extract_strided_slice %48 {offsets = [12, 0, 0, 0], sizes = [1, 4, 1, 1], strides = [1, 1, 1, 1]} : vector<16x4x1x1xf32> to vector<1x4x1x1xf32>
    %354 = vector.shape_cast %353 : vector<1x4x1x1xf32> to vector<4x1x1xf32>
    %355 = vector.shape_cast %354 : vector<4x1x1xf32> to vector<1x4x1x1xf32>
    %356 = vector.broadcast %355 : vector<1x4x1x1xf32> to vector<1x4x8x8xf32>
    %357 = arith.mulf %45, %356 : vector<1x4x8x8xf32>
    %358 = vector.extract_strided_slice %49 {offsets = [12, 0, 0, 0], sizes = [1, 4, 1, 1], strides = [1, 1, 1, 1]} : vector<16x4x1x1xf32> to vector<1x4x1x1xf32>
    %359 = vector.shape_cast %358 : vector<1x4x1x1xf32> to vector<4x1x1xf32>
    %360 = vector.shape_cast %359 : vector<4x1x1xf32> to vector<1x4x1x1xf32>
    %361 = vector.broadcast %47 : vector<1x1x8x8xf32> to vector<1x4x8x8xf32>
    %362 = vector.broadcast %360 : vector<1x4x1x1xf32> to vector<1x4x8x8xf32>
    %363 = arith.mulf %361, %362 : vector<1x4x8x8xf32>
    %364 = arith.addf %357, %363 : vector<1x4x8x8xf32>
    %365 = vector.extract_strided_slice %50 {offsets = [12, 0, 0, 0], sizes = [1, 4, 1, 1], strides = [1, 1, 1, 1]} : vector<16x4x1x1xf32> to vector<1x4x1x1xf32>
    %366 = vector.shape_cast %365 : vector<1x4x1x1xf32> to vector<4x1x1xf32>
    %367 = vector.shape_cast %366 : vector<4x1x1xf32> to vector<1x4x1x1xf32>
    %368 = vector.broadcast %367 : vector<1x4x1x1xf32> to vector<1x4x8x8xf32>
    %369 = arith.addf %364, %368 : vector<1x4x8x8xf32>
    %cst_43 = arith.constant 0.000000e+00 : f32
    %370 = vector.broadcast %cst_43 : f32 to vector<1x4x8x8xf32>
    %371 = arith.maximumf %369, %370 : vector<1x4x8x8xf32>
    %372 = vector.extract_strided_slice %51 {offsets = [12, 0, 0, 0], sizes = [1, 4, 1, 1], strides = [1, 1, 1, 1]} : vector<16x4x1x1xf32> to vector<1x4x1x1xf32>
    %373 = vector.shape_cast %372 : vector<1x4x1x1xf32> to vector<4x1x1xf32>
    %374 = vector.shape_cast %373 : vector<4x1x1xf32> to vector<1x4x1x1xf32>
    %375 = vector.broadcast %374 : vector<1x4x1x1xf32> to vector<1x4x8x8xf32>
    %376 = arith.mulf %371, %375 : vector<1x4x8x8xf32>
    %377 = arith.addf %352, %376 : vector<1x4x8x8xf32>
    %378 = vector.extract_strided_slice %48 {offsets = [13, 0, 0, 0], sizes = [1, 4, 1, 1], strides = [1, 1, 1, 1]} : vector<16x4x1x1xf32> to vector<1x4x1x1xf32>
    %379 = vector.shape_cast %378 : vector<1x4x1x1xf32> to vector<4x1x1xf32>
    %380 = vector.shape_cast %379 : vector<4x1x1xf32> to vector<1x4x1x1xf32>
    %381 = vector.broadcast %380 : vector<1x4x1x1xf32> to vector<1x4x8x8xf32>
    %382 = arith.mulf %45, %381 : vector<1x4x8x8xf32>
    %383 = vector.extract_strided_slice %49 {offsets = [13, 0, 0, 0], sizes = [1, 4, 1, 1], strides = [1, 1, 1, 1]} : vector<16x4x1x1xf32> to vector<1x4x1x1xf32>
    %384 = vector.shape_cast %383 : vector<1x4x1x1xf32> to vector<4x1x1xf32>
    %385 = vector.shape_cast %384 : vector<4x1x1xf32> to vector<1x4x1x1xf32>
    %386 = vector.broadcast %47 : vector<1x1x8x8xf32> to vector<1x4x8x8xf32>
    %387 = vector.broadcast %385 : vector<1x4x1x1xf32> to vector<1x4x8x8xf32>
    %388 = arith.mulf %386, %387 : vector<1x4x8x8xf32>
    %389 = arith.addf %382, %388 : vector<1x4x8x8xf32>
    %390 = vector.extract_strided_slice %50 {offsets = [13, 0, 0, 0], sizes = [1, 4, 1, 1], strides = [1, 1, 1, 1]} : vector<16x4x1x1xf32> to vector<1x4x1x1xf32>
    %391 = vector.shape_cast %390 : vector<1x4x1x1xf32> to vector<4x1x1xf32>
    %392 = vector.shape_cast %391 : vector<4x1x1xf32> to vector<1x4x1x1xf32>
    %393 = vector.broadcast %392 : vector<1x4x1x1xf32> to vector<1x4x8x8xf32>
    %394 = arith.addf %389, %393 : vector<1x4x8x8xf32>
    %cst_44 = arith.constant 0.000000e+00 : f32
    %395 = vector.broadcast %cst_44 : f32 to vector<1x4x8x8xf32>
    %396 = arith.maximumf %394, %395 : vector<1x4x8x8xf32>
    %397 = vector.extract_strided_slice %51 {offsets = [13, 0, 0, 0], sizes = [1, 4, 1, 1], strides = [1, 1, 1, 1]} : vector<16x4x1x1xf32> to vector<1x4x1x1xf32>
    %398 = vector.shape_cast %397 : vector<1x4x1x1xf32> to vector<4x1x1xf32>
    %399 = vector.shape_cast %398 : vector<4x1x1xf32> to vector<1x4x1x1xf32>
    %400 = vector.broadcast %399 : vector<1x4x1x1xf32> to vector<1x4x8x8xf32>
    %401 = arith.mulf %396, %400 : vector<1x4x8x8xf32>
    %402 = arith.addf %377, %401 : vector<1x4x8x8xf32>
    %403 = vector.extract_strided_slice %48 {offsets = [14, 0, 0, 0], sizes = [1, 4, 1, 1], strides = [1, 1, 1, 1]} : vector<16x4x1x1xf32> to vector<1x4x1x1xf32>
    %404 = vector.shape_cast %403 : vector<1x4x1x1xf32> to vector<4x1x1xf32>
    %405 = vector.shape_cast %404 : vector<4x1x1xf32> to vector<1x4x1x1xf32>
    %406 = vector.broadcast %405 : vector<1x4x1x1xf32> to vector<1x4x8x8xf32>
    %407 = arith.mulf %45, %406 : vector<1x4x8x8xf32>
    %408 = vector.extract_strided_slice %49 {offsets = [14, 0, 0, 0], sizes = [1, 4, 1, 1], strides = [1, 1, 1, 1]} : vector<16x4x1x1xf32> to vector<1x4x1x1xf32>
    %409 = vector.shape_cast %408 : vector<1x4x1x1xf32> to vector<4x1x1xf32>
    %410 = vector.shape_cast %409 : vector<4x1x1xf32> to vector<1x4x1x1xf32>
    %411 = vector.broadcast %47 : vector<1x1x8x8xf32> to vector<1x4x8x8xf32>
    %412 = vector.broadcast %410 : vector<1x4x1x1xf32> to vector<1x4x8x8xf32>
    %413 = arith.mulf %411, %412 : vector<1x4x8x8xf32>
    %414 = arith.addf %407, %413 : vector<1x4x8x8xf32>
    %415 = vector.extract_strided_slice %50 {offsets = [14, 0, 0, 0], sizes = [1, 4, 1, 1], strides = [1, 1, 1, 1]} : vector<16x4x1x1xf32> to vector<1x4x1x1xf32>
    %416 = vector.shape_cast %415 : vector<1x4x1x1xf32> to vector<4x1x1xf32>
    %417 = vector.shape_cast %416 : vector<4x1x1xf32> to vector<1x4x1x1xf32>
    %418 = vector.broadcast %417 : vector<1x4x1x1xf32> to vector<1x4x8x8xf32>
    %419 = arith.addf %414, %418 : vector<1x4x8x8xf32>
    %cst_45 = arith.constant 0.000000e+00 : f32
    %420 = vector.broadcast %cst_45 : f32 to vector<1x4x8x8xf32>
    %421 = arith.maximumf %419, %420 : vector<1x4x8x8xf32>
    %422 = vector.extract_strided_slice %51 {offsets = [14, 0, 0, 0], sizes = [1, 4, 1, 1], strides = [1, 1, 1, 1]} : vector<16x4x1x1xf32> to vector<1x4x1x1xf32>
    %423 = vector.shape_cast %422 : vector<1x4x1x1xf32> to vector<4x1x1xf32>
    %424 = vector.shape_cast %423 : vector<4x1x1xf32> to vector<1x4x1x1xf32>
    %425 = vector.broadcast %424 : vector<1x4x1x1xf32> to vector<1x4x8x8xf32>
    %426 = arith.mulf %421, %425 : vector<1x4x8x8xf32>
    %427 = arith.addf %402, %426 : vector<1x4x8x8xf32>
    %428 = vector.extract_strided_slice %48 {offsets = [15, 0, 0, 0], sizes = [1, 4, 1, 1], strides = [1, 1, 1, 1]} : vector<16x4x1x1xf32> to vector<1x4x1x1xf32>
    %429 = vector.shape_cast %428 : vector<1x4x1x1xf32> to vector<4x1x1xf32>
    %430 = vector.shape_cast %429 : vector<4x1x1xf32> to vector<1x4x1x1xf32>
    %431 = vector.broadcast %430 : vector<1x4x1x1xf32> to vector<1x4x8x8xf32>
    %432 = arith.mulf %45, %431 : vector<1x4x8x8xf32>
    %433 = vector.extract_strided_slice %49 {offsets = [15, 0, 0, 0], sizes = [1, 4, 1, 1], strides = [1, 1, 1, 1]} : vector<16x4x1x1xf32> to vector<1x4x1x1xf32>
    %434 = vector.shape_cast %433 : vector<1x4x1x1xf32> to vector<4x1x1xf32>
    %435 = vector.shape_cast %434 : vector<4x1x1xf32> to vector<1x4x1x1xf32>
    %436 = vector.broadcast %47 : vector<1x1x8x8xf32> to vector<1x4x8x8xf32>
    %437 = vector.broadcast %435 : vector<1x4x1x1xf32> to vector<1x4x8x8xf32>
    %438 = arith.mulf %436, %437 : vector<1x4x8x8xf32>
    %439 = arith.addf %432, %438 : vector<1x4x8x8xf32>
    %440 = vector.extract_strided_slice %50 {offsets = [15, 0, 0, 0], sizes = [1, 4, 1, 1], strides = [1, 1, 1, 1]} : vector<16x4x1x1xf32> to vector<1x4x1x1xf32>
    %441 = vector.shape_cast %440 : vector<1x4x1x1xf32> to vector<4x1x1xf32>
    %442 = vector.shape_cast %441 : vector<4x1x1xf32> to vector<1x4x1x1xf32>
    %443 = vector.broadcast %442 : vector<1x4x1x1xf32> to vector<1x4x8x8xf32>
    %444 = arith.addf %439, %443 : vector<1x4x8x8xf32>
    %cst_46 = arith.constant 0.000000e+00 : f32
    %445 = vector.broadcast %cst_46 : f32 to vector<1x4x8x8xf32>
    %446 = arith.maximumf %444, %445 : vector<1x4x8x8xf32>
    %447 = vector.extract_strided_slice %51 {offsets = [15, 0, 0, 0], sizes = [1, 4, 1, 1], strides = [1, 1, 1, 1]} : vector<16x4x1x1xf32> to vector<1x4x1x1xf32>
    %448 = vector.shape_cast %447 : vector<1x4x1x1xf32> to vector<4x1x1xf32>
    %449 = vector.shape_cast %448 : vector<4x1x1xf32> to vector<1x4x1x1xf32>
    %450 = vector.broadcast %449 : vector<1x4x1x1xf32> to vector<1x4x8x8xf32>
    %451 = arith.mulf %446, %450 : vector<1x4x8x8xf32>
    %452 = arith.addf %427, %451 : vector<1x4x8x8xf32>
    %c0_47 = arith.constant 0 : index
    %c0_48 = arith.constant 0 : index
    %c0_49 = arith.constant 0 : index
    %453 = vector.load %arg10[%c0_47, %c0_48, %c0_49] : memref<4x1x1xf32, #tpu.memory_space<vmem>>, vector<4x1x1xf32>
    %454 = vector.shape_cast %453 : vector<4x1x1xf32> to vector<1x4x1x1xf32>
    %455 = vector.broadcast %454 : vector<1x4x1x1xf32> to vector<1x4x8x8xf32>
    %456 = arith.addf %452, %455 : vector<1x4x8x8xf32>
    %cst_50 = arith.constant dense<0xFF800000> : vector<1x4x8xf32>
    %457 = vector.multi_reduction <maximumf>, %456, %cst_50 [3] : vector<1x4x8x8xf32> to vector<1x4x8xf32>
    %458 = vector.shape_cast %457 : vector<1x4x8xf32> to vector<1x4x8x1xf32>
    %459 = vector.broadcast %458 : vector<1x4x8x1xf32> to vector<1x4x8x8xf32>
    %460 = arith.subf %456, %459 : vector<1x4x8x8xf32>
    %461 = math.exp %460 : vector<1x4x8x8xf32>
    %cst_51 = arith.constant dense<0.000000e+00> : vector<1x4x8xf32>
    %462 = vector.multi_reduction <add>, %461, %cst_51 [3] : vector<1x4x8x8xf32> to vector<1x4x8xf32>
    %463 = vector.shape_cast %462 : vector<1x4x8xf32> to vector<1x4x8x1xf32>
    %464 = tpu.reciprocal %463 {approx = true} : vector<1x4x8x1xf32> -> vector<1x4x8x1xf32>
    %465 = vector.broadcast %464 : vector<1x4x8x1xf32> to vector<1x4x8x8xf32>
    %466 = arith.mulf %461, %465 : vector<1x4x8x8xf32>
    %467 = vector.shape_cast %466 : vector<1x4x8x8xf32> to vector<4x8x8xf32>
    %468 = arith.truncf %467 : vector<4x8x8xf32> to vector<4x8x8xbf16>
    %469 = arith.truncf %41 : vector<4x8x8xf32> to vector<4x8x8xbf16>
    "tpu.trace_start"() <{level = 10 : i32, message = "gnm,gmd->gnd"}> : () -> ()
    %cst_52 = arith.constant dense<0.000000e+00> : vector<4x8x8xf32>
    %470 = tpu.matmul %468, %469, %cst_52 {dimension_numbers = #tpu.dot_dimension_numbers<[2], [1], [1], [2], [0, 0, 0, 1, 1, 2], [0], [0]>} : vector<4x8x8xbf16>, vector<4x8x8xbf16>, vector<4x8x8xf32> -> vector<4x8x8xf32>
    "tpu.trace_stop"() : () -> ()
    %471 = vector.shape_cast %470 : vector<4x8x8xf32> to vector<1x4x8x8xf32>
    %472 = vector.extract_strided_slice %471 {offsets = [0, 0, 0, 0], sizes = [1, 1, 8, 8], strides = [1, 1, 1, 1]} : vector<1x4x8x8xf32> to vector<1x1x8x8xf32>
    %473 = vector.shape_cast %472 : vector<1x1x8x8xf32> to vector<1x8x8xf32>
    %474 = vector.extract_strided_slice %471 {offsets = [0, 1, 0, 0], sizes = [1, 1, 8, 8], strides = [1, 1, 1, 1]} : vector<1x4x8x8xf32> to vector<1x1x8x8xf32>
    %475 = vector.shape_cast %474 : vector<1x1x8x8xf32> to vector<1x8x8xf32>
    %476 = vector.extract_strided_slice %471 {offsets = [0, 2, 0, 0], sizes = [1, 1, 8, 8], strides = [1, 1, 1, 1]} : vector<1x4x8x8xf32> to vector<1x1x8x8xf32>
    %477 = vector.shape_cast %476 : vector<1x1x8x8xf32> to vector<1x8x8xf32>
    %478 = vector.extract_strided_slice %471 {offsets = [0, 3, 0, 0], sizes = [1, 1, 8, 8], strides = [1, 1, 1, 1]} : vector<1x4x8x8xf32> to vector<1x1x8x8xf32>
    %479 = vector.shape_cast %478 : vector<1x1x8x8xf32> to vector<1x8x8xf32>
    %480 = tpu.concatenate %473, %475, %477, %479 in 2 : vector<1x8x8xf32>, vector<1x8x8xf32>, vector<1x8x8xf32>, vector<1x8x8xf32> -> vector<1x8x32xf32>
    %481 = vector.shape_cast %480 : vector<1x8x32xf32> to vector<8x32xf32>
    %482 = arith.truncf %481 : vector<8x32xf32> to vector<8x32xbf16>
    %c0_53 = arith.constant 0 : index
    %c0_54 = arith.constant 0 : index
    %483 = vector.load %arg11[%c0_53, %c0_54] : memref<32x32xbf16, #tpu.memory_space<vmem>>, vector<32x32xbf16>
    %cst_55 = arith.constant dense<0.000000e+00> : vector<8x32xf32>
    %484 = tpu.matmul %482, %483, %cst_55 {dimension_numbers = #tpu.dot_dimension_numbers<[1], [0], [0], [1], [0, 0, 1, 1], [], []>} : vector<8x32xbf16>, vector<32x32xbf16>, vector<8x32xf32> -> vector<8x32xf32>
    %485 = vector.shape_cast %484 : vector<8x32xf32> to vector<1x8x32xf32>
    %c0_56 = arith.constant 0 : index
    %c0_57 = arith.constant 0 : index
    %486 = vector.load %arg12[%c0_56, %c0_57] : memref<1x32xf32, #tpu.memory_space<vmem>>, vector<1x32xf32>
    %487 = vector.shape_cast %486 : vector<1x32xf32> to vector<1x1x32xf32>
    %488 = vector.broadcast %487 : vector<1x1x32xf32> to vector<1x8x32xf32>
    %489 = arith.addf %485, %488 : vector<1x8x32xf32>
    %490 = arith.addf %0, %489 : vector<1x8x32xf32>
    %cst_58 = arith.constant dense<0.000000e+00> : vector<1x32xf32>
    %491 = vector.multi_reduction <add>, %490, %cst_58 [1] : vector<1x8x32xf32> to vector<1x32xf32>
    %492 = vector.shape_cast %491 : vector<1x32xf32> to vector<1x1x32xf32>
    %cst_59 = arith.constant 8.000000e+00 : f32
    %493 = vector.broadcast %cst_59 : f32 to vector<1x1x32xf32>
    %494 = arith.divf %492, %493 : vector<1x1x32xf32>
    %495 = vector.broadcast %494 : vector<1x1x32xf32> to vector<1x8x32xf32>
    %496 = arith.subf %490, %495 : vector<1x8x32xf32>
    %497 = arith.mulf %496, %496 : vector<1x8x32xf32>
    %cst_60 = arith.constant dense<0.000000e+00> : vector<1x32xf32>
    %498 = vector.multi_reduction <add>, %497, %cst_60 [1] : vector<1x8x32xf32> to vector<1x32xf32>
    %499 = vector.shape_cast %498 : vector<1x32xf32> to vector<1x1x32xf32>
    %cst_61 = arith.constant 8.000000e+00 : f32
    %500 = vector.broadcast %cst_61 : f32 to vector<1x1x32xf32>
    %501 = arith.divf %499, %500 : vector<1x1x32xf32>
    %cst_62 = arith.constant 9.99999974E-6 : f32
    %502 = vector.broadcast %cst_62 : f32 to vector<1x1x32xf32>
    %503 = arith.addf %501, %502 : vector<1x1x32xf32>
    %504 = math.rsqrt %503 : vector<1x1x32xf32>
    %c0_63 = arith.constant 0 : index
    %c0_64 = arith.constant 0 : index
    %505 = vector.load %arg13[%c0_63, %c0_64] : memref<1x32xf32, #tpu.memory_space<vmem>>, vector<1x32xf32>
    %506 = vector.shape_cast %505 : vector<1x32xf32> to vector<1x1x32xf32>
    %507 = arith.mulf %504, %506 : vector<1x1x32xf32>
    %508 = vector.broadcast %507 : vector<1x1x32xf32> to vector<1x8x32xf32>
    %509 = arith.mulf %496, %508 : vector<1x8x32xf32>
    %c0_65 = arith.constant 0 : index
    %c0_66 = arith.constant 0 : index
    %510 = vector.load %arg14[%c0_65, %c0_66] : memref<1x32xf32, #tpu.memory_space<vmem>>, vector<1x32xf32>
    %511 = vector.shape_cast %510 : vector<1x32xf32> to vector<1x1x32xf32>
    %512 = vector.broadcast %511 : vector<1x1x32xf32> to vector<1x8x32xf32>
    %513 = arith.addf %509, %512 : vector<1x8x32xf32>
    %514 = vector.shape_cast %513 : vector<1x8x32xf32> to vector<8x32xf32>
    %515 = arith.truncf %514 : vector<8x32xf32> to vector<8x32xbf16>
    %c0_67 = arith.constant 0 : index
    %c0_68 = arith.constant 0 : index
    %516 = vector.load %arg15[%c0_67, %c0_68] : memref<32x64xbf16, #tpu.memory_space<vmem>>, vector<32x64xbf16>
    %cst_69 = arith.constant dense<0.000000e+00> : vector<8x64xf32>
    %517 = tpu.matmul %515, %516, %cst_69 {dimension_numbers = #tpu.dot_dimension_numbers<[1], [0], [0], [1], [0, 0, 1, 1], [], []>} : vector<8x32xbf16>, vector<32x64xbf16>, vector<8x64xf32> -> vector<8x64xf32>
    %c0_70 = arith.constant 0 : index
    %c0_71 = arith.constant 0 : index
    %518 = vector.load %arg16[%c0_70, %c0_71] : memref<1x64xf32, #tpu.memory_space<vmem>>, vector<1x64xf32>
    %519 = vector.broadcast %518 : vector<1x64xf32> to vector<8x64xf32>
    %520 = arith.addf %517, %519 : vector<8x64xf32>
    %cst_72 = arith.constant 0.000000e+00 : f32
    %521 = vector.broadcast %cst_72 : f32 to vector<8x64xf32>
    %522 = arith.maximumf %520, %521 : vector<8x64xf32>
    %523 = arith.truncf %522 : vector<8x64xf32> to vector<8x64xbf16>
    %c0_73 = arith.constant 0 : index
    %c0_74 = arith.constant 0 : index
    %524 = vector.load %arg17[%c0_73, %c0_74] : memref<64x32xbf16, #tpu.memory_space<vmem>>, vector<64x32xbf16>
    %cst_75 = arith.constant dense<0.000000e+00> : vector<8x32xf32>
    %525 = tpu.matmul %523, %524, %cst_75 {dimension_numbers = #tpu.dot_dimension_numbers<[1], [0], [0], [1], [0, 0, 1, 1], [], []>} : vector<8x64xbf16>, vector<64x32xbf16>, vector<8x32xf32> -> vector<8x32xf32>
    %c0_76 = arith.constant 0 : index
    %c0_77 = arith.constant 0 : index
    %526 = vector.load %arg18[%c0_76, %c0_77] : memref<1x32xf32, #tpu.memory_space<vmem>>, vector<1x32xf32>
    %527 = vector.broadcast %526 : vector<1x32xf32> to vector<8x32xf32>
    %528 = arith.addf %525, %527 : vector<8x32xf32>
    %529 = vector.shape_cast %528 : vector<8x32xf32> to vector<1x8x32xf32>
    %530 = arith.addf %513, %529 : vector<1x8x32xf32>
    %cst_78 = arith.constant dense<0.000000e+00> : vector<1x32xf32>
    %531 = vector.multi_reduction <add>, %530, %cst_78 [1] : vector<1x8x32xf32> to vector<1x32xf32>
    %532 = vector.shape_cast %531 : vector<1x32xf32> to vector<1x1x32xf32>
    %cst_79 = arith.constant 8.000000e+00 : f32
    %533 = vector.broadcast %cst_79 : f32 to vector<1x1x32xf32>
    %534 = arith.divf %532, %533 : vector<1x1x32xf32>
    %535 = vector.broadcast %534 : vector<1x1x32xf32> to vector<1x8x32xf32>
    %536 = arith.subf %530, %535 : vector<1x8x32xf32>
    %537 = arith.mulf %536, %536 : vector<1x8x32xf32>
    %cst_80 = arith.constant dense<0.000000e+00> : vector<1x32xf32>
    %538 = vector.multi_reduction <add>, %537, %cst_80 [1] : vector<1x8x32xf32> to vector<1x32xf32>
    %539 = vector.shape_cast %538 : vector<1x32xf32> to vector<1x1x32xf32>
    %cst_81 = arith.constant 8.000000e+00 : f32
    %540 = vector.broadcast %cst_81 : f32 to vector<1x1x32xf32>
    %541 = arith.divf %539, %540 : vector<1x1x32xf32>
    %cst_82 = arith.constant 9.99999974E-6 : f32
    %542 = vector.broadcast %cst_82 : f32 to vector<1x1x32xf32>
    %543 = arith.addf %541, %542 : vector<1x1x32xf32>
    %544 = math.rsqrt %543 : vector<1x1x32xf32>
    %c0_83 = arith.constant 0 : index
    %c0_84 = arith.constant 0 : index
    %545 = vector.load %arg19[%c0_83, %c0_84] : memref<1x32xf32, #tpu.memory_space<vmem>>, vector<1x32xf32>
    %546 = vector.shape_cast %545 : vector<1x32xf32> to vector<1x1x32xf32>
    %547 = arith.mulf %544, %546 : vector<1x1x32xf32>
    %548 = vector.broadcast %547 : vector<1x1x32xf32> to vector<1x8x32xf32>
    %549 = arith.mulf %536, %548 : vector<1x8x32xf32>
    %c0_85 = arith.constant 0 : index
    %c0_86 = arith.constant 0 : index
    %550 = vector.load %arg20[%c0_85, %c0_86] : memref<1x32xf32, #tpu.memory_space<vmem>>, vector<1x32xf32>
    %551 = vector.shape_cast %550 : vector<1x32xf32> to vector<1x1x32xf32>
    %552 = vector.broadcast %551 : vector<1x1x32xf32> to vector<1x8x32xf32>
    %553 = arith.addf %549, %552 : vector<1x8x32xf32>
    %c0_87 = arith.constant 0 : index
    %c0_88 = arith.constant 0 : index
    %c0_89 = arith.constant 0 : index
    %554 = vector.load %arg21[%c0_87, %c0_88, %c0_89] : memref<1x8x32xf32, #tpu.memory_space<vmem>>, vector<1x8x32xf32>
    tpu.vector_store %arg21[%c0_87, %c0_88, %c0_89], %553 {strides = array<i32>} : memref<1x8x32xf32, #tpu.memory_space<vmem>>, vector<1x8x32xf32>,
    return
  }
  func.func @transform_0(%arg0: i32) -> (i32, i32, i32) {
    %c0_i32 = arith.constant 0 : i32
    %c0_i32_0 = arith.constant 0 : i32
    %c0_i32_1 = arith.constant 0 : i32
    return %arg0, %c0_i32, %c0_i32_0 : i32, i32, i32
  }
  func.func @transform_1(%arg0: i32) -> (i32, i32, i32) {
    %c0_i32 = arith.constant 0 : i32
    %c0_i32_0 = arith.constant 0 : i32
    %c0_i32_1 = arith.constant 0 : i32
    return %arg0, %c0_i32, %c0_i32_0 : i32, i32, i32
  }
  func.func @transform_2(%arg0: i32) -> (i32, i32, i32) {
    %c0_i32 = arith.constant 0 : i32
    %c0_i32_0 = arith.constant 0 : i32
    %c0_i32_1 = arith.constant 0 : i32
    return %arg0, %c0_i32, %c0_i32_0 : i32, i32, i32
  }
  func.func @transform_3(%arg0: i32) -> (i32, i32) {
    %c0_i32 = arith.constant 0 : i32
    %c0_i32_0 = arith.constant 0 : i32
    %c0_i32_1 = arith.constant 0 : i32
    return %c0_i32, %c0_i32_0 : i32, i32
  }
  func.func @transform_4(%arg0: i32) -> (i32, i32) {
    %c0_i32 = arith.constant 0 : i32
    %c0_i32_0 = arith.constant 0 : i32
    %c0_i32_1 = arith.constant 0 : i32
    return %c0_i32, %c0_i32_0 : i32, i32
  }
  func.func @transform_5(%arg0: i32) -> (i32, i32, i32, i32) {
    %c0_i32 = arith.constant 0 : i32
    %c0_i32_0 = arith.constant 0 : i32
    %c0_i32_1 = arith.constant 0 : i32
    %c0_i32_2 = arith.constant 0 : i32
    %c0_i32_3 = arith.constant 0 : i32
    return %c0_i32, %c0_i32_0, %c0_i32_1, %c0_i32_2 : i32, i32, i32, i32
  }
  func.func @transform_6(%arg0: i32) -> (i32, i32, i32, i32) {
    %c0_i32 = arith.constant 0 : i32
    %c0_i32_0 = arith.constant 0 : i32
    %c0_i32_1 = arith.constant 0 : i32
    %c0_i32_2 = arith.constant 0 : i32
    %c0_i32_3 = arith.constant 0 : i32
    return %c0_i32, %c0_i32_0, %c0_i32_1, %c0_i32_2 : i32, i32, i32, i32
  }
  func.func @transform_7(%arg0: i32) -> (i32, i32, i32, i32) {
    %c0_i32 = arith.constant 0 : i32
    %c0_i32_0 = arith.constant 0 : i32
    %c0_i32_1 = arith.constant 0 : i32
    %c0_i32_2 = arith.constant 0 : i32
    %c0_i32_3 = arith.constant 0 : i32
    return %c0_i32, %c0_i32_0, %c0_i32_1, %c0_i32_2 : i32, i32, i32, i32
  }
  func.func @transform_8(%arg0: i32) -> (i32, i32, i32, i32) {
    %c0_i32 = arith.constant 0 : i32
    %c0_i32_0 = arith.constant 0 : i32
    %c0_i32_1 = arith.constant 0 : i32
    %c0_i32_2 = arith.constant 0 : i32
    %c0_i32_3 = arith.constant 0 : i32
    return %c0_i32, %c0_i32_0, %c0_i32_1, %c0_i32_2 : i32, i32, i32, i32
  }
  func.func @transform_9(%arg0: i32) -> (i32, i32, i32) {
    %c0_i32 = arith.constant 0 : i32
    %c0_i32_0 = arith.constant 0 : i32
    %c0_i32_1 = arith.constant 0 : i32
    %c0_i32_2 = arith.constant 0 : i32
    return %c0_i32, %c0_i32_0, %c0_i32_1 : i32, i32, i32
  }
  func.func @transform_10(%arg0: i32) -> (i32, i32) {
    %c0_i32 = arith.constant 0 : i32
    %c0_i32_0 = arith.constant 0 : i32
    %c0_i32_1 = arith.constant 0 : i32
    return %c0_i32, %c0_i32_0 : i32, i32
  }
  func.func @transform_11(%arg0: i32) -> (i32, i32) {
    %c0_i32 = arith.constant 0 : i32
    %c0_i32_0 = arith.constant 0 : i32
    %c0_i32_1 = arith.constant 0 : i32
    return %c0_i32, %c0_i32_0 : i32, i32
  }
  func.func @transform_12(%arg0: i32) -> (i32, i32) {
    %c0_i32 = arith.constant 0 : i32
    %c0_i32_0 = arith.constant 0 : i32
    %c0_i32_1 = arith.constant 0 : i32
    return %c0_i32, %c0_i32_0 : i32, i32
  }
  func.func @transform_13(%arg0: i32) -> (i32, i32) {
    %c0_i32 = arith.constant 0 : i32
    %c0_i32_0 = arith.constant 0 : i32
    %c0_i32_1 = arith.constant 0 : i32
    return %c0_i32, %c0_i32_0 : i32, i32
  }
  func.func @transform_14(%arg0: i32) -> (i32, i32) {
    %c0_i32 = arith.constant 0 : i32
    %c0_i32_0 = arith.constant 0 : i32
    %c0_i32_1 = arith.constant 0 : i32
    return %c0_i32, %c0_i32_0 : i32, i32
  }
  func.func @transform_15(%arg0: i32) -> (i32, i32) {
    %c0_i32 = arith.constant 0 : i32
    %c0_i32_0 = arith.constant 0 : i32
    %c0_i32_1 = arith.constant 0 : i32
    return %c0_i32, %c0_i32_0 : i32, i32
  }
  func.func @transform_16(%arg0: i32) -> (i32, i32) {
    %c0_i32 = arith.constant 0 : i32
    %c0_i32_0 = arith.constant 0 : i32
    %c0_i32_1 = arith.constant 0 : i32
    return %c0_i32, %c0_i32_0 : i32, i32
  }
  func.func @transform_17(%arg0: i32) -> (i32, i32) {
    %c0_i32 = arith.constant 0 : i32
    %c0_i32_0 = arith.constant 0 : i32
    %c0_i32_1 = arith.constant 0 : i32
    return %c0_i32, %c0_i32_0 : i32, i32
  }
  func.func @transform_18(%arg0: i32) -> (i32, i32) {
    %c0_i32 = arith.constant 0 : i32
    %c0_i32_0 = arith.constant 0 : i32
    %c0_i32_1 = arith.constant 0 : i32
    return %c0_i32, %c0_i32_0 : i32, i32
  }
  func.func @transform_19(%arg0: i32) -> (i32, i32) {
    %c0_i32 = arith.constant 0 : i32
    %c0_i32_0 = arith.constant 0 : i32
    %c0_i32_1 = arith.constant 0 : i32
    return %c0_i32, %c0_i32_0 : i32, i32
  }
  func.func @transform_20(%arg0: i32) -> (i32, i32, i32) {
    %c0_i32 = arith.constant 0 : i32
    %c0_i32_0 = arith.constant 0 : i32
    %c0_i32_1 = arith.constant 0 : i32
    return %arg0, %c0_i32, %c0_i32_0 : i32, i32, i32
  }
}

</mosaic_0001>

<bundles_post_ra>
// kernel: tpu_custom_call.1
= control target key start
LH: loop header
LB: loop body
LE: loop exit
PB: predicated region body
PF: predicated region fallthrough
CT: control target
= control target key end

     0   :  { %s7375_s0 = inlined_call_operand.vmem [shape: f32[2,8,32], index: 0, kind: input, shape index: {}]   ;;  %s7376_s1 = inlined_call_operand.vmem [shape: f32[2,8,32], index: 1, kind: input, shape index: {}]   ;;  %s7377_s2 = inlined_call_operand.vmem [shape: f32[2,8,8], index: 2, kind: input, shape index: {}]   ;;  %s7378_s3 = inlined_call_operand.vmem [shape: bf16[32,32], index: 3, kind: input, shape index: {}]   ;;  %s7379_s4 = inlined_call_operand.vmem [shape: bf16[32,64], index: 4, kind: input, shape index: {}]   ;;  %s7380_s5 = inlined_call_operand.vmem [shape: f32[16,4,1,1], index: 5, kind: input, shape index: {}]   ;;  %s7381_s6 = inlined_call_operand.vmem [shape: f32[16,4,1,1], index: 6, kind: input, shape index: {}]   ;;  %s7382_s7 = inlined_call_operand.vmem [shape: f32[16,4,1,1], index: 7, kind: input, shape index: {}]   ;;  %s7383_s8 = inlined_call_operand.vmem [shape: f32[16,4,1,1], index: 8, kind: input, shape index: {}]   ;;  %s7384_s9 = inlined_call_operand.vmem [shape: f32[4,1,1], index: 9, kind: input, shape index: {}]   ;;  %s7385_s10 = inlined_call_operand.vmem [shape: bf16[32,32], index: 10, kind: input, shape index: {}]   ;;  %s7386_s11 = inlined_call_operand.vmem [shape: f32[1,32], index: 11, kind: input, shape index: {}]   ;;  %s7387_s12 = inlined_call_operand.vmem [shape: f32[1,32], index: 12, kind: input, shape index: {}]   ;;  %s7388_s13 = inlined_call_operand.vmem [shape: f32[1,32], index: 13, kind: input, shape index: {}]   ;;  %s7389_s14 = inlined_call_operand.vmem [shape: bf16[32,64], index: 14, kind: input, shape index: {}]   ;;  %s7390_s15 = inlined_call_operand.vmem [shape: f32[1,64], index: 15, kind: input, shape index: {}]   ;;  %s7391_s16 = inlined_call_operand.vmem [shape: bf16[64,32], index: 16, kind: input, shape index: {}]   ;;  %s7392_s17 = inlined_call_operand.vmem [shape: f32[1,32], index: 17, kind: input, shape index: {}]   ;;  %s7393_s18 = inlined_call_operand.vmem [shape: f32[1,32], index: 18, kind: input, shape index: {}]   ;;  %s7394_s19 = inlined_call_operand.vmem [shape: f32[1,32], index: 19, kind: input, shape index: {}]   ;;  %s7395_s20 = inlined_call_operand.hbm [shape: f32[2,8,32], index: 20, kind: output, shape index: {}]  }
   0x1   :  { %7415 = sst [smem:[#allocation140_spill]] %s7375_s0 }
   0x2   :  { %7416 = sst [smem:[#allocation141_spill]] %s7376_s1 }
   0x3   :  { %7417 = sst [smem:[#allocation142_spill]] %s7377_s2 }
   0x4   :  { %7418 = sst [smem:[#allocation143_spill]] %s7378_s3 }
   0x5   :  { %7419 = sst [smem:[#allocation144_spill]] %s7379_s4 }
   0x6   :  { %7420 = sst [smem:[#allocation145_spill]] %s7380_s5 }
   0x7   :  { %7421 = sst [smem:[#allocation146_spill]] %s7394_s19 }
   0x8   :  { %7422 = sst [smem:[#allocation147_spill]] %s7395_s20 }
   0x9   :  { %25 = vsyncpa [#allocation3], 0 }
   0xa   :  { %27 = vsyncpa [#allocation3 + $0x1], 0  ;;  %s5407_s1 = smov 0   ;;  %s5409_s22 = smov 0  }
   0xb   :  { %s5411_s23 = smov 0   ;;  %s5413_s24 = smov 0  }
   0xc LB: > { %7423 = sst [smem:[#allocation5_spill]] %s5277_s1  ;;  %s5428_s2 = sadd.s32 4294967295, %s5289_s24   ;;  %s5289_s24 = sphi %s5413_s24, %s7738_s24   ;;  %s5285_s23 = sphi %s5411_s23, %s7740_s23   ;;  %s5281_s22 = sphi %s5409_s22, %s7742_s22   ;;  %s5277_s1 = sphi %s5407_s1, %s7741_s1  }
   0xd   : > { %7424 = sst [smem:[#allocation6_spill]] %s5285_s23  ;;  %s4702_s25 = sadd.s32 4294967294, %s5289_s24  }
   0xe   : > { %7425 = sst [smem:[#allocation7_spill]] %s5289_s24  ;;  %s5432_s3 = sadd.s32 1, %s5289_s24  }
   0xf   : > { %7426 = sst [smem:[#allocation8_spill]] %s5432_s3  ;;  %s475_s26 = sadd.s32 1, %s5285_s23 }
  0x10   : > { %s472_s27 = ssub.s32 %s5289_s24, %s5432_s3  ;;  %p485_p0 = scmp.ne.s32.totalorder %s5285_s23, %s5281_s22 }
  0x11   : > { %p473_p1 = scmp.eq.s32.totalorder %s472_s27, 0  ;;  %p486_p2 = scmp.eq.s32.totalorder %s5428_s2, 1 }
  0x12   : > { %p491_p3 = scmp.ne.s32.totalorder %s5281_s22, %s5277_s1  ;;  %p492_p4 = scmp.eq.s32.totalorder %s4702_s25, 1 }
  0x13   : > { %s5443_s28 = scalar_select %p473_p1, %s5285_s23, %s475_s26  }
  0x14   : > { %p5445_p5 = por %p486_p2, %p485_p0  ;;  %p5449_p6 = por %p492_p4, %p491_p3 }
  0x15   : > { %7427 = sst [smem:[#allocation9_spill]] %s5443_s28  ;;  %p4705_p7 = scmp.ge.s32.totalorder %s5289_s24, 1 }
  0x16   : > { %s7429_s29 = scalar_select %p5449_p6, 1, 0 }
  0x17   : > { %p582_p8 = scmp.lt.s32.totalorder %s5289_s24, 3 }
  0x18   : > { %7430 = sst [smem:[#allocation10_spill]] %s7429_s29 }
  0x19   : > { %p583_p9 = pnand %p4705_p7, %p582_p8 }
  0x1b   : > { %586 = sbr.rel (%p583_p9) target bundleno = 2052 (0x804), region = 100 }
  0x20   : > { %v4724_v0 = vld [vmem:[%s7381_s6] ss:$0 sm:$0xff]  ;;  %s7431_s5 = sld [smem:[#allocation145_spill]]  ;;  %v5291_v2 = vmov 0   ;;  %v7406_v5 = vmov 0.0   ;;  %vm5293_vm0 = vmmov 0  }
  0x21   : > { %5179 = vset.pattern.permute.xlu0 %v5291_v2  ;;  %5178 = vset.pattern.permute.xlu1 %v5291_v2  ;;  %s7432_s28 = sld [smem:[#allocation143_spill]]  ;;  %p647_p10 = scmp.lt.s32.totalorder %s5428_s2, 1  ;;  %v4740_v9 = vld [vmem:[%s7381_s6 + $0x4] ss:$0 sm:$0xff]  ;;  %vm679_vm1 = vcmask 261120   ;;  %vm811_vm2 = vcmask 64512  }
  0x22   : > { %1314 = vperm.xlu0 %5179, %v4724_v0   ;;  %5037 = vmatprep.subr.bf16.mxu1 %v7406_v5  ;;  %s7434_s1 = sld [smem:[#allocation144_spill]]  ;;  %v4725_v14 = vld [vmem:[%s7381_s6 + $0x1] ss:$0 sm:$0xff]  ;;  %v4741_v18 = vld [vmem:[%s7381_s6 + $0x5] ss:$0 sm:$0xff]  ;;  %s5294_s26 = smov 104  }
  0x23   : > { %5041 = vmatprep.mubr.msk.bf16.mxu1 %vm5293_vm0, %v7406_v5  ;;  %5053 = vmatprep.subr.bf16.mxu0 %v7406_v5  ;;  %s648_s23 = scalar_select %p647_p10, %s5428_s2, 1  ;;  %v4728_v20 = vld [vmem:[%s7382_s7] ss:$0 sm:$0xff]  ;;  %v4756_v21 = vld [vmem:[%s7381_s6 + $0x8] ss:$0 sm:$0xff]  ;;  %vm4103_vm3 = vcmask 1043456  }
  0x24   : > { %5055 = vmatprep.mubr.msk.bf16.mxu0 %vm5293_vm0, %v7406_v5  ;;  %s7436_s30 = sld [smem:[#allocation141_spill]]  ;;  %v4757_v23 = vld [vmem:[%s7381_s6 + $0x9] ss:$0 sm:$0xff]  ;;  %v4729_v24 = vld [vmem:[%s7382_s7 + $0x1] ss:$0 sm:$0xff]  ;;  %s5296_s21 = smov 112  }
  0x25   : > { %s5488_s0 = sshll.u32 %s648_s23, 3  ;;  %v4744_v25 = vld [vmem:[%s7382_s7 + $0x4] ss:$0 sm:$0xff]  ;;  %v4772_v27 = vld [vmem:[%s7381_s6 + $0xc] ss:$0 sm:$0xff]  ;;  %s5295_s23 = smov 120  }
  0x26   : > { %v4720_v1 = vld [vmem:[%s7431_s5] ss:$0 sm:$0xff]  ;;  %v4721_v4 = vld [vmem:[%s7431_s5 + $0x1] ss:$0 sm:$0xff]  ;;  %v4736_v6 = vld [vmem:[%s7431_s5 + $0x4] ss:$0 sm:$0xff] }
  0x27   : > { %v5195_v3 = vld [vmem:[%s7432_s28 + $0x8] sm:$0xff]   ;;  %1274 = vperm.xlu1 %5178, %v4720_v1   ;;  %v5196_v7 = vld [vmem:[%s7432_s28] sm:$0xff]   ;;  %1278 = vperm.xlu0 %5179, %v4721_v4   ;;  %s7433_s28 = sld [smem:[#allocation140_spill]]  ;;  %v4788_v30 = vld [vmem:[%s7381_s6 + $0x10] ss:$0 sm:$0xff]  ;;  %s5298_s25 = smov 8  }
  0x28   : > { %5038 = vmatpush3.bf16.msra.mxu1 %v5195_v3  ;;  %v4737_v8 = vld [vmem:[%s7431_s5 + $0x5] ss:$0 sm:$0xff]  ;;  %s7435_s20 = smov %s7434_s1  ;;  %v5197_v11 = vld [vmem:[%s7434_s1 + $0x8] sm:$0xff]   ;;  %v4785_v32 = vld [vmem:[%s7431_s5 + $0x11] ss:$0 sm:$0xff]  ;;  %s7553_s1 = sld [smem:[#allocation142_spill]] }
  0x29   : > { %5039 = vmatprep.subr.bf16.mxu1 %v7406_v5  ;;  %v4752_v13 = vld [vmem:[%s7431_s5 + $0x8] ss:$0 sm:$0xff]  ;;  %v5198_v15 = vld [vmem:[%s7435_s20] sm:$0xff]   ;;  %v4753_v17 = vld [vmem:[%s7431_s5 + $0x9] ss:$0 sm:$0xff]  ;;  %s5299_s3 = smov 16  }
  0x2a   : > { %s654_s24 = scalar_lea.vmem %s7436_s30, %s5488_s0  ;;  %v4768_v22 = vld [vmem:[%s7431_s5 + $0xc] ss:$0 sm:$0xff]  ;;  %v4769_v26 = vld [vmem:[%s7431_s5 + $0xd] ss:$0 sm:$0xff]  ;;  %v4760_v28 = vld [vmem:[%s7382_s7 + $0x8] ss:$0 sm:$0xff] }
  0x2b   : > { %1446 = vperm.xlu1 %5178, %v4736_v6   ;;  %1450 = vperm.xlu0 %5179, %v4737_v8   ;;  %v661_v16 = vld [vmem:[%s654_s24] sm:$0xff]  ;;  %v4773_v31 = vld [vmem:[%s7381_s6 + $0xd] ss:$0 sm:$0xff]  ;;  %v4784_v33 = vld [vmem:[%s7431_s5 + $0x10] ss:$0 sm:$0xff]  ;;  %vm4307_vm4 = vcmask 130048  }
  0x2c   : > { %5040 = vmatpush3.bf16.msra.mxu1 %v5196_v7  ;;  %v723_v19 = vpack.c.bf16 %v661_v16, %v661_v16  ;;  %v4745_v29 = vld [vmem:[%s7382_s7 + $0x5] ss:$0 sm:$0xff]  ;;  %v4722_v34 = vld [vmem:[%s7431_s5 + $0x2] ss:$0 sm:$0xff]  ;;  %v4761_v35 = vld [vmem:[%s7382_s7 + $0x9] ss:$0 sm:$0xff] }
  0x2d   : > { %s5494_s29 = scalar_lea.vmem %s7433_s28, %s5488_s0  ;;  %5045 = vmatprep.subr.bf16.mxu1 %v7406_v5  ;;  %v4732_v36 = vld [vmem:[%s7383_s8] ss:$0 sm:$0xff]  ;;  %v4789_v37 = vld [vmem:[%s7381_s6 + $0x11] ss:$0 sm:$0xff]  ;;  %v4742_v38 = vld [vmem:[%s7381_s6 + $0x6] ss:$0 sm:$0xff] }
  0x2e   : > { %v660_v10 = vld [vmem:[%s5494_s29] sm:$0xff]  ;;  %v4776_v40 = vld [vmem:[%s7382_s7 + $0xc] ss:$0 sm:$0xff]  ;;  %v4804_v42 = vld [vmem:[%s7381_s6 + $0x14] ss:$0 sm:$0xff]  ;;  %s6537_s19 = scalar_lea.vmem %s7553_s1, %s5488_s0  ;;  %s5300_s1 = smov 24  }
  0x2f   : > { %1486 = vperm.xlu1 %5178, %v4740_v9   ;;  %v662_v12 = vpack.c.bf16 %v660_v10, %v660_v10  ;;  %1618 = vperm.xlu0 %5179, %v4752_v13   ;;  %v4726_v39 = vld [vmem:[%s7381_s6 + $0x2] ss:$0 sm:$0xff]  ;;  %v4738_v41 = vld [vmem:[%s7431_s5 + $0x6] ss:$0 sm:$0xff]  ;;  %v4748_v43 = vld [vmem:[%s7383_s8 + $0x4] ss:$0 sm:$0xff] }
  0x30   : > { %v4727_v44 = vld [vmem:[%s7381_s6 + $0x3] ss:$0 sm:$0xff]  ;;  %v4800_v45 = vld [vmem:[%s7431_s5 + $0x14] ss:$0 sm:$0xff]  ;;  %v4739_v46 = vld [vmem:[%s7431_s5 + $0x7] ss:$0 sm:$0xff] }
  0x31   : > { %5042 = vmatmul.mubr.msk.bf16.vlgmr.msra.gmra.mxu1 %vm679_vm1, %v662_v12  ;;  %v4723_v47 = vld [vmem:[%s7431_s5 + $0x3] ss:$0 sm:$0xff]  ;;  %v4749_v48 = vld [vmem:[%s7383_s8 + $0x5] ss:$0 sm:$0xff]  ;;  %v4733_v49 = vld [vmem:[%s7383_s8 + $0x1] ss:$0 sm:$0xff] }
  0x32   : > { %5046 = vmatpush3.bf16.msra.mxu1 %v5197_v11  ;;  %5049 = vmatprep.mubr.msk.bf16.mxu1 %vm5293_vm0, %v7406_v5  ;;  %v4801_v50 = vld [vmem:[%s7431_s5 + $0x15] ss:$0 sm:$0xff]  ;;  %v4743_v51 = vld [vmem:[%s7381_s6 + $0x7] ss:$0 sm:$0xff]  ;;  %v4754_v52 = vld [vmem:[%s7431_s5 + $0xa] ss:$0 sm:$0xff] }
  0x33   : > { %1318 = vperm.xlu1 %5178, %v4725_v14   ;;  %5047 = vmatprep.subr.bf16.mxu1 %v7406_v5  ;;  %v4777_v53 = vld [vmem:[%s7382_s7 + $0xd] ss:$0 sm:$0xff]  ;;  %v4764_v54 = vld [vmem:[%s7383_s8 + $0x8] ss:$0 sm:$0xff]  ;;  %v4805_v55 = vld [vmem:[%s7381_s6 + $0x15] ss:$0 sm:$0xff] }
  0x34   : > { %1622 = vperm.xlu0 %5179, %v4753_v17   ;;  %v4816_v56 = vld [vmem:[%s7431_s5 + $0x18] ss:$0 sm:$0xff]  ;;  %v4758_v57 = vld [vmem:[%s7381_s6 + $0xa] ss:$0 sm:$0xff]  ;;  %v4755_v58 = vld [vmem:[%s7431_s5 + $0xb] ss:$0 sm:$0xff] }
  0x35   : > { %v4792_v59 = vld [vmem:[%s7382_s7 + $0x10] ss:$0 sm:$0xff]  ;;  %v4765_v60 = vld [vmem:[%s7383_s8 + $0x9] ss:$0 sm:$0xff]  ;;  %v4820_v61 = vld [vmem:[%s7381_s6 + $0x18] ss:$0 sm:$0xff] }
  0x36   : > { %5048 = vmatpush3.bf16.msra.mxu1 %v5198_v15  ;;  %v4817_v62 = vld [vmem:[%s7431_s5 + $0x19] ss:$0 sm:$0xff]  ;;  %v4759_v63 = vld [vmem:[%s7381_s6 + $0xb] ss:$0 sm:$0xff]  ;;  %v4730_v0 = vld [vmem:[%s7382_s7 + $0x2] ss:$0 sm:$0xff] }
  0x37   : > { %1490 = vperm.xlu1 %5178, %v4741_v18   ;;  %5059 = vmatprep.subr.bf16.mxu1 %v7406_v5  ;;  %v4793_v1 = vld [vmem:[%s7382_s7 + $0x11] ss:$0 sm:$0xff]  ;;  %v4770_v2 = vld [vmem:[%s7431_s5 + $0xe] ss:$0 sm:$0xff]  ;;  %v4821_v3 = vld [vmem:[%s7381_s6 + $0x19] ss:$0 sm:$0xff] }
  0x38   : > { %1358 = vperm.xlu0 %5179, %v4728_v20   ;;  %v4780_v4 = vld [vmem:[%s7383_s8 + $0xc] ss:$0 sm:$0xff]  ;;  %v4746_v6 = vld [vmem:[%s7382_s7 + $0x6] ss:$0 sm:$0xff]  ;;  %v4832_v7 = vld [vmem:[%s7431_s5 + $0x1c] ss:$0 sm:$0xff] }
  0x39   : > { %5050 = vmatmul.mubr.msk.bf16.vlgmr.msra.gmra.mxu1 %vm679_vm1, %v723_v19  ;;  %v4774_v8 = vld [vmem:[%s7381_s6 + $0xe] ss:$0 sm:$0xff]  ;;  %v4731_v9 = vld [vmem:[%s7382_s7 + $0x3] ss:$0 sm:$0xff]  ;;  %v4808_v10 = vld [vmem:[%s7382_s7 + $0x14] ss:$0 sm:$0xff] }
  0x3a   : > { %5061 = vmatprep.mubr.msk.bf16.mxu1 %vm5293_vm0, %v7406_v5  ;;  %v4771_v13 = vld [vmem:[%s7431_s5 + $0xf] ss:$0 sm:$0xff]  ;;  %v4836_v14 = vld [vmem:[%s7381_s6 + $0x1c] ss:$0 sm:$0xff]  ;;  %v4781_v17 = vld [vmem:[%s7383_s8 + $0xd] ss:$0 sm:$0xff] }
  0x3b   : > { %1658 = vperm.xlu1 %5178, %v4756_v21   ;;  %v4747_v18 = vld [vmem:[%s7382_s7 + $0x7] ss:$0 sm:$0xff]  ;;  %v4833_v21 = vld [vmem:[%s7431_s5 + $0x1d] ss:$0 sm:$0xff]  ;;  %vm4309_vm5 = vcmask 195584   ;;  %vm4524_vm6 = vcmask 523264  }
  0x3c   : > { %1790 = vperm.xlu0 %5179, %v4768_v22   ;;  %v4775_v22 = vld [vmem:[%s7381_s6 + $0xf] ss:$0 sm:$0xff]  ;;  %s7733_s27 = sld [smem:[#allocation146_spill]]  ;;  %s5001_s30 = sshll.u32 %s5428_s2, 7 }
  0x3d   : > { %s7734_s28 = sld [smem:[#allocation147_spill]] }
  0x3f   : > { %1662 = vperm.xlu1 %5178, %v4757_v23  }
  0x40   : > { %1362 = vperm.xlu0 %5179, %v4729_v24  }
  0x43   : > { %1530 = vperm.xlu1 %5178, %v4744_v25   ;;  %v4762_v25 = vld [vmem:[%s7382_s7 + $0xa] ss:$0 sm:$0xff] }
  0x44   : > { %1794 = vperm.xlu0 %5179, %v4769_v26   ;;  %v4809_v26 = vld [vmem:[%s7382_s7 + $0x15] ss:$0 sm:$0xff] }
  0x47   : > { %1830 = vperm.xlu1 %5178, %v4772_v27  }
  0x48   : > { %1702 = vperm.xlu0 %5179, %v4760_v28  }
  0x4b   : > { %1534 = vperm.xlu1 %5178, %v4745_v29   ;;  %v4790_v29 = vld [vmem:[%s7381_s6 + $0x12] ss:$0 sm:$0xff] }
  0x4c   : > { %2002 = vperm.xlu0 %5179, %v4788_v30   ;;  %v4837_v30 = vld [vmem:[%s7381_s6 + $0x1d] ss:$0 sm:$0xff] }
  0x4f   : > { %1834 = vperm.xlu1 %5178, %v4773_v31  }
  0x50   : > { %1966 = vperm.xlu0 %5179, %v4785_v32  }
  0x53   : > { %1962 = vperm.xlu1 %5178, %v4784_v33   ;;  %v4824_v33 = vld [vmem:[%s7382_s7 + $0x18] ss:$0 sm:$0xff] }
  0x54   : > { %1282 = vperm.xlu0 %5179, %v4722_v34   ;;  %v4786_v34 = vld [vmem:[%s7431_s5 + $0x12] ss:$0 sm:$0xff] }
  0x57   : > { %1706 = vperm.xlu1 %5178, %v4761_v35  }
  0x58   : > { %1402 = vperm.xlu0 %5179, %v4732_v36  }
  0x5b   : > { %2006 = vperm.xlu1 %5178, %v4789_v37   ;;  %v4852_v37 = vld [vmem:[%s7381_s6 + $0x20] ss:$0 sm:$0xff] }
  0x5c   : > { %1494 = vperm.xlu0 %5179, %v4742_v38   ;;  %v4796_v38 = vld [vmem:[%s7383_s8 + $0x10] ss:$0 sm:$0xff] }
  0x5f   : > { %1322 = vperm.xlu1 %5178, %v4726_v39  }
  0x60   : > { %1874 = vperm.xlu0 %5179, %v4776_v40  }
  0x63   : > { %1454 = vperm.xlu1 %5178, %v4738_v41   ;;  %v4787_v41 = vld [vmem:[%s7431_s5 + $0x13] ss:$0 sm:$0xff] }
  0x64   : > { %2174 = vperm.xlu0 %5179, %v4804_v42   ;;  %v4848_v42 = vld [vmem:[%s7431_s5 + $0x20] ss:$0 sm:$0xff] }
  0x67   : > { %1574 = vperm.xlu1 %5178, %v4748_v43  }
  0x68   : > { %1326 = vperm.xlu0 %5179, %v4727_v44  }
  0x6b   : > { %2134 = vperm.xlu1 %5178, %v4800_v45   ;;  %v4797_v45 = vld [vmem:[%s7383_s8 + $0x11] ss:$0 sm:$0xff] }
  0x6c   : > { %1458 = vperm.xlu0 %5179, %v4739_v46   ;;  %v4763_v46 = vld [vmem:[%s7382_s7 + $0xb] ss:$0 sm:$0xff] }
  0x6f   : > { %1286 = vperm.xlu1 %5178, %v4723_v47  }
  0x70   : > { %1578 = vperm.xlu0 %5179, %v4749_v48  }
  0x73   : > { %1406 = vperm.xlu1 %5178, %v4733_v49   ;;  %v4849_v49 = vld [vmem:[%s7431_s5 + $0x21] ss:$0 sm:$0xff] }
  0x74   : > { %2138 = vperm.xlu0 %5179, %v4801_v50   ;;  %v4791_v50 = vld [vmem:[%s7381_s6 + $0x13] ss:$0 sm:$0xff] }
  0x77   : > { %1498 = vperm.xlu1 %5178, %v4743_v51  }
  0x78   : > { %1626 = vperm.xlu0 %5179, %v4754_v52  }
  0x7b   : > { %1878 = vperm.xlu1 %5178, %v4777_v53   ;;  %v4734_v53 = vld [vmem:[%s7383_s8 + $0x2] ss:$0 sm:$0xff] }
  0x7c   : > { %1746 = vperm.xlu0 %5179, %v4764_v54   ;;  %v4825_v54 = vld [vmem:[%s7382_s7 + $0x19] ss:$0 sm:$0xff] }
  0x7f   : > { %2178 = vperm.xlu1 %5178, %v4805_v55  }
  0x80   : > { %2306 = vperm.xlu0 %5179, %v4816_v56  }
  0x83   : > { %1666 = vperm.xlu1 %5178, %v4758_v57   ;;  %v4778_v57 = vld [vmem:[%s7382_s7 + $0xe] ss:$0 sm:$0xff] }
  0x84   : > { %1630 = vperm.xlu0 %5179, %v4755_v58   ;;  %v4853_v58 = vld [vmem:[%s7381_s6 + $0x21] ss:$0 sm:$0xff] }
  0x87   : > { %2046 = vperm.xlu1 %5178, %v4792_v59  }
  0x88   : > { %1750 = vperm.xlu0 %5179, %v4765_v60  }
  0x8b   : > { %2346 = vperm.xlu1 %5178, %v4820_v61   ;;  %v4806_v61 = vld [vmem:[%s7381_s6 + $0x16] ss:$0 sm:$0xff] }
  0x8c   : > { %2310 = vperm.xlu0 %5179, %v4817_v62   ;;  %v4750_v62 = vld [vmem:[%s7383_s8 + $0x6] ss:$0 sm:$0xff] }
  0x8f   : > { %1670 = vperm.xlu1 %5178, %v4759_v63  }
  0x90   : > { %1366 = vperm.xlu0 %5179, %v4730_v0  }
  0x93   : > { %2050 = vperm.xlu1 %5178, %v4793_v1   ;;  %v4840_v1 = vld [vmem:[%s7382_s7 + $0x1c] ss:$0 sm:$0xff] }
  0x94   : > { %1798 = vperm.xlu0 %5179, %v4770_v2   ;;  %v4802_v2 = vld [vmem:[%s7431_s5 + $0x16] ss:$0 sm:$0xff] }
  0x97   : > { %2350 = vperm.xlu1 %5178, %v4821_v3  }
  0x98   : > { %1918 = vperm.xlu0 %5179, %v4780_v4  }
  0x9b   : > { %1538 = vperm.xlu1 %5178, %v4746_v6   ;;  %v4868_v6 = vld [vmem:[%s7381_s6 + $0x24] ss:$0 sm:$0xff] }
  0x9c   : > { %2478 = vperm.xlu0 %5179, %v4832_v7   ;;  %v4812_v7 = vld [vmem:[%s7383_s8 + $0x14] ss:$0 sm:$0xff] }
  0x9d   : > { %v5690_v11 = vpop.permute.xlu0 %1314 }
  0x9f   : > { %1838 = vperm.xlu1 %5178, %v4774_v8  }
  0xa0   : > { %1370 = vperm.xlu0 %5179, %v4731_v9  }
  0xa2   : > { %v5692_v12 = vpop.permute.xlu1 %1274  ;;  %v5700_v15 = vpop.permute.xlu0 %1278 }
  0xa3   : > { %2218 = vperm.xlu1 %5178, %v4808_v10   ;;  %7437 = vst [vmem:[#allocation11_spill] sm:$0xff] %v5700_v15  ;;  %v4751_v10 = vld [vmem:[%s7383_s8 + $0x7] ss:$0 sm:$0xff] }
  0xa4   : > { %1802 = vperm.xlu0 %5179, %v4771_v13   ;;  %v4864_v13 = vld [vmem:[%s7431_s5 + $0x24] ss:$0 sm:$0xff] }
  0xa6   : > { %v5702_v16 = vpop.permute.xlu1 %1446  ;;  %v5710_v19 = vpop.permute.xlu0 %1450 }
  0xa7   : > { %2518 = vperm.xlu1 %5178, %v4836_v14   ;;  %7438 = vst [vmem:[#allocation12_spill] sm:$0xff] %v5710_v19 }
  0xa8   : > { %1922 = vperm.xlu0 %5179, %v4781_v17  }
  0xaa   : > { %v5712_v20 = vpop.permute.xlu1 %1486  ;;  %v5720_v23 = vpop.permute.xlu0 %1618 }
  0xab   : > { %1542 = vperm.xlu1 %5178, %v4747_v18   ;;  %v4803_v18 = vld [vmem:[%s7431_s5 + $0x17] ss:$0 sm:$0xff] }
  0xac   : > { %2482 = vperm.xlu0 %5179, %v4833_v21   ;;  %v4735_v21 = vld [vmem:[%s7383_s8 + $0x3] ss:$0 sm:$0xff] }
  0xae   : > { %v5722_v24 = vpop.permute.xlu1 %1318 }
  0xaf   : > { %1842 = vperm.xlu1 %5178, %v4775_v22   ;;  %v5730_v27 = vpop.permute.xlu0 %1622 }
  0xb0   : > { %7439 = vst [vmem:[#allocation13_spill] sm:$0xff] %v5730_v27  ;;  %1710 = vperm.xlu0 %5179, %v4762_v25  }
  0xb2   : > { %v5732_v28 = vpop.permute.xlu1 %1490 }
  0xb3   : > { %2222 = vperm.xlu1 %5178, %v4809_v26   ;;  %v5740_v31 = vpop.permute.xlu0 %1358  ;;  %v4813_v26 = vld [vmem:[%s7383_s8 + $0x15] ss:$0 sm:$0xff] }
  0xb4   : > { %2010 = vperm.xlu0 %5179, %v4790_v29   ;;  %v4779_v29 = vld [vmem:[%s7382_s7 + $0xf] ss:$0 sm:$0xff] }
  0xb6   : > { %v5742_v32 = vpop.permute.xlu1 %1658 }
  0xb7   : > { %2522 = vperm.xlu1 %5178, %v4837_v30   ;;  %v5750_v35 = vpop.permute.xlu0 %1790 }
  0xb8   : > { %2390 = vperm.xlu0 %5179, %v4824_v33  }
  0xba   : > { %v5752_v36 = vpop.permute.xlu1 %1662 }
  0xbb   : > { %1970 = vperm.xlu1 %5178, %v4786_v34   ;;  %v5760_v39 = vpop.permute.xlu0 %1362  ;;  %v4807_v34 = vld [vmem:[%s7381_s6 + $0x17] ss:$0 sm:$0xff] }
  0xbc   : > { %7440 = vst [vmem:[#allocation14_spill] sm:$0xff] %v5760_v39  ;;  %2690 = vperm.xlu0 %5179, %v4852_v37   ;;  %v4873_v39 = vld [vmem:[%s7382_s7 + $0x25] ss:$0 sm:$0xff] }
  0xbe   : > { %v5762_v40 = vpop.permute.xlu1 %1530 }
  0xbf   : > { %2090 = vperm.xlu1 %5178, %v4796_v38   ;;  %v5770_v43 = vpop.permute.xlu0 %1794 }
  0xc0   : > { %7441 = vst [vmem:[#allocation15_spill] sm:$0xff] %v5770_v43  ;;  %1974 = vperm.xlu0 %5179, %v4787_v41   ;;  %v4841_v41 = vld [vmem:[%s7382_s7 + $0x1d] ss:$0 sm:$0xff] }
  0xc2   : > { %v5772_v44 = vpop.permute.xlu1 %1830 }
  0xc3   : > { %2650 = vperm.xlu1 %5178, %v4848_v42   ;;  %v5780_v47 = vpop.permute.xlu0 %1702 }
  0xc4   : > { %2094 = vperm.xlu0 %5179, %v4797_v45  }
  0xc6   : > { %v5782_v48 = vpop.permute.xlu1 %1534 }
  0xc7   : > { %7442 = vst [vmem:[#allocation16_spill] sm:$0xff] %v5782_v48  ;;  %1714 = vperm.xlu1 %5178, %v4763_v46   ;;  %v5790_v51 = vpop.permute.xlu0 %2002 }
  0xc8   : > { %2654 = vperm.xlu0 %5179, %v4849_v49  }
  0xca   : > { %v5792_v52 = vpop.permute.xlu1 %1834 }
  0xcb   : > { %2014 = vperm.xlu1 %5178, %v4791_v50   ;;  %v5800_v55 = vpop.permute.xlu0 %1966 }
  0xcc   : > { %7443 = vst [vmem:[#allocation17_spill] sm:$0xff] %v5800_v55  ;;  %1410 = vperm.xlu0 %5179, %v4734_v53   ;;  %v4842_v55 = vld [vmem:[%s7382_s7 + $0x1e] ss:$0 sm:$0xff] }
  0xce   : > { %v5802_v56 = vpop.permute.xlu1 %1962 }
  0xcf   : > { %2394 = vperm.xlu1 %5178, %v4825_v54   ;;  %v5810_v59 = vpop.permute.xlu0 %1282 }
  0xd0   : > { %7444 = vst [vmem:[#allocation18_spill] sm:$0xff] %v5810_v59  ;;  %1882 = vperm.xlu0 %5179, %v4778_v57  }
  0xd2   : > { %v5812_v60 = vpop.permute.xlu1 %1706 }
  0xd3   : > { %7445 = vst [vmem:[#allocation19_spill] sm:$0xff] %v5812_v60  ;;  %2694 = vperm.xlu1 %5178, %v4853_v58   ;;  %v5820_v63 = vpop.permute.xlu0 %1402 }
  0xd4   : > { %2182 = vperm.xlu0 %5179, %v4806_v61  }
  0xd6   : > { %v5822_v0 = vpop.permute.xlu1 %2006 }
  0xd7   : > { %7446 = vst [vmem:[#allocation20_spill] sm:$0xff] %v5822_v0  ;;  %1582 = vperm.xlu1 %5178, %v4750_v62   ;;  %v5830_v3 = vpop.permute.xlu0 %1494  ;;  %v4956_v0 = vld [vmem:[%s7383_s8 + $0x38] ss:$0 sm:$0xff] }
  0xd8   : > { %7447 = vst [vmem:[#allocation21_spill] sm:$0xff] %v5830_v3  ;;  %2562 = vperm.xlu0 %5179, %v4840_v1   ;;  %v4947_v3 = vld [vmem:[%s7431_s5 + $0x3b] ss:$0 sm:$0xff] }
  0xda   : > { %v5832_v4 = vpop.permute.xlu1 %1322 }
  0xdb   : > { %7448 = vst [vmem:[#allocation22_spill] sm:$0xff] %v5832_v4  ;;  %2142 = vperm.xlu1 %5178, %v4802_v2   ;;  %v5840_v8 = vpop.permute.xlu0 %1874 }
  0xdc   : > { %2862 = vperm.xlu0 %5179, %v4868_v6  }
  0xde   : > { %v5842_v9 = vpop.permute.xlu1 %1454 }
  0xdf   : > { %7449 = vst [vmem:[#allocation23_spill] sm:$0xff] %v5842_v9  ;;  %2262 = vperm.xlu1 %5178, %v4812_v7   ;;  %v5850_v14 = vpop.permute.xlu0 %2174 }
  0xe0   : > { %1586 = vperm.xlu0 %5179, %v4751_v10  }
  0xe2   : > { %v5852_v17 = vpop.permute.xlu1 %1574 }
  0xe3   : > { %2822 = vperm.xlu1 %5178, %v4864_v13   ;;  %v5860_v22 = vpop.permute.xlu0 %1326  ;;  %v4869_v13 = vld [vmem:[%s7381_s6 + $0x25] ss:$0 sm:$0xff] }
  0xe4   : > { %7450 = vst [vmem:[#allocation24_spill] sm:$0xff] %v5860_v22  ;;  %2146 = vperm.xlu0 %5179, %v4803_v18   ;;  %v4895_v22 = vld [vmem:[%s7383_s8 + $0x2b] ss:$0 sm:$0xff] }
  0xe6   : > { %v5862_v25 = vpop.permute.xlu1 %2134 }
  0xe7   : > { %1414 = vperm.xlu1 %5178, %v4735_v21   ;;  %v5870_v30 = vpop.permute.xlu0 %1458 }
  0xe8   : > { %7451 = vst [vmem:[#allocation25_spill] sm:$0xff] %v5870_v30  ;;  %2266 = vperm.xlu0 %5179, %v4813_v26  }
  0xea   : > { %v5872_v33 = vpop.permute.xlu1 %1286 }
  0xeb   : > { %7452 = vst [vmem:[#allocation26_spill] sm:$0xff] %v5872_v33  ;;  %1886 = vperm.xlu1 %5178, %v4779_v29   ;;  %v5877_v37 = vpop.permute.xlu0 %1578  ;;  %v4794_v29 = vld [vmem:[%s7382_s7 + $0x12] ss:$0 sm:$0xff] }
  0xec   : > { %7453 = vst [vmem:[#allocation27_spill] sm:$0xff] %v5877_v37  ;;  %v4885_v37 = vld [vmem:[%s7381_s6 + $0x29] ss:$0 sm:$0xff] }
  0xee   : > { %v5879_v38 = vpop.permute.xlu1 %1406 }
  0xef   : > { %7454 = vst [vmem:[#allocation28_spill] sm:$0xff] %v5879_v38  ;;  %2186 = vperm.xlu1 %5178, %v4807_v34   ;;  %v5884_v45 = vpop.permute.xlu0 %2138  ;;  %v4865_v34 = vld [vmem:[%s7431_s5 + $0x25] ss:$0 sm:$0xff]  ;;  %v4810_v38 = vld [vmem:[%s7382_s7 + $0x16] ss:$0 sm:$0xff] }
  0xf0   : > { %7455 = vst [vmem:[#allocation29_spill] sm:$0xff] %v5884_v45 }
  0xf1   : > { %v717_v42 = vpop.f32.mrf.mxu1 }
  0xf2   : > { %v5886_v46 = vpop.permute.xlu1 %1498 }
  0xf3   : > { %7456 = vst [vmem:[#allocation30_spill] sm:$0xff] %v5886_v46  ;;  %v5043_v49 = vpop.f32.mrf.mxu1  ;;  %2566 = vperm.xlu1 %5178, %v4841_v41   ;;  %v5888_v53 = vpop.permute.xlu0 %1626 }
  0xf4   : > { %7457 = vst [vmem:[#allocation31_spill] sm:$0xff] %v5888_v53 }
  0xf5   : > { %v720_v50 = vpop.f32.mrf.mxu1 }
  0xf6   : > { %v5890_v54 = vpop.permute.xlu1 %1878  ;;  %v803_v50 = vpack.c.bf16 %v717_v42, %v717_v42 }
  0xf7   : > { %7458 = vst [vmem:[#allocation32_spill] sm:$0xff] %v5890_v54  ;;  %v5044_v57 = vpop.f32.mrf.mxu1  ;;  %v5892_v62 = vpop.permute.xlu0 %1746 }
  0xf8   : > { %v4822_v57 = vld [vmem:[%s7381_s6 + $0x1a] ss:$0 sm:$0xff] }
  0xf9   : > { %v777_v58 = vpop.f32.mrf.mxu1 }
  0xfa   : > { %v5190_v61 = vpack.i.bf16 %v717_v42, %v777_v58  ;;  %v5894_v1 = vpop.permute.xlu1 %2178  ;;  %v5896_v2 = vpack.c.bf16 %v777_v58, %v777_v58  ;;  %v4766_v58 = vld [vmem:[%s7383_s8 + $0xa] ss:$0 sm:$0xff]  ;;  %v4856_v42 = vld [vmem:[%s7382_s7 + $0x20] ss:$0 sm:$0xff] }
  0xfb   : > { %7459 = vst [vmem:[#allocation33_spill] sm:$0xff] %v5894_v1  ;;  %v5051_v6 = vpop.f32.mrf.mxu1  ;;  %v5903_v18 = vpop.permute.xlu0 %2306  ;;  %v4922_v1 = vld [vmem:[%s7382_s7 + $0x32] ss:$0 sm:$0xff] }
  0xfc   : > { %7460 = vst [vmem:[#allocation34_spill] sm:$0xff] %v5896_v2  ;;  %5191 = vrot.lane.b32.xlu1 %v5190_v61, %s5294_s26  ;;  %5181 = vrot.lane.b32.xlu0 %v5190_v61, %s5295_s23  ;;  %v816_v7 = vsel %vm811_vm2, %v5896_v2, 0  ;;  %s5301_s26 = smov [#allocation2]  }
  0xfd   : > { %v780_v10 = vpop.f32.mrf.mxu1  ;;  %5054 = vmatpush3.bf16.xpose.msra.mxu0 %v816_v7  ;;  %v4818_v7 = vld [vmem:[%s7431_s5 + $0x1a] ss:$0 sm:$0xff]  ;;  %s5233_s23 = sshll.u32 %s5301_s26, 4  ;;  %s5234_s23 = int_to_ptr.vmem [resolvable:$false] %s5233_s23 }
  0xfe   : > { %v5905_v21 = vpop.permute.xlu1 %1666  ;;  %5065 = vmatprep.subr.bf16.mxu0 %v7406_v5  ;;  %s5235_s2 = scalar_lea.vmem %s5234_s23, 256 }
  0xff   : > { %7461 = vst [vmem:[#allocation35_spill] sm:$0xff] %v5905_v21  ;;  %v5052_v26 = vpop.f32.mrf.mxu1  ;;  %v5914_v41 = vpop.permute.xlu0 %1630 }
 0x100   : > { %2866 = vperm.xlu1 %5178, %v4869_v13   ;;  %5186 = vrot.lane.b32.xlu0 %v5190_v61, %s5296_s21  ;;  %7462 = vst [vmem:[#allocation36_spill] sm:$0xff] %v5914_v41  ;;  %v4884_v26 = vld [vmem:[%s7381_s6 + $0x28] ss:$0 sm:$0xff] }
 0x102   : > { %v5916_v49 = vpop.permute.xlu1 %2046 }
 0x103   : > { %v5925_v61 = vpop.permute.xlu0 %1750 }
 0x104   : > { %2054 = vperm.xlu1 %5178, %v4794_v29   ;;  %2826 = vperm.xlu0 %5179, %v4865_v34   ;;  %7463 = vst [vmem:[#allocation37_spill] sm:$0xff] %v5925_v61  ;;  %v4828_v29 = vld [vmem:[%s7383_s8 + $0x18] ss:$0 sm:$0xff]  ;;  %v4857_v61 = vld [vmem:[%s7382_s7 + $0x21] ss:$0 sm:$0xff] }
 0x105   : > { %5056 = vmatmul.mubr.msk.bf16.vlgmr.msra.gmra.mxu0 %vm811_vm2, %v803_v50 }
 0x106   : > { %v5927_v6 = vpop.permute.xlu1 %2346  ;;  %5067 = vmatprep.mubr.msk.bf16.mxu0 %vm5293_vm0, %v7406_v5  ;;  %v4823_v5 = vld [vmem:[%s7381_s6 + $0x1b] ss:$0 sm:$0xff] }
 0x107   : > { %v5937_v10 = vpop.permute.xlu0 %2310 }
 0x108   : > { %2354 = vperm.xlu1 %5178, %v4822_v57   ;;  %1754 = vperm.xlu0 %5179, %v4766_v58   ;;  %7464 = vst [vmem:[#allocation38_spill] sm:$0xff] %v5937_v10  ;;  %v4795_v57 = vld [vmem:[%s7382_s7 + $0x13] ss:$0 sm:$0xff]  ;;  %v4880_v58 = vld [vmem:[%s7431_s5 + $0x28] ss:$0 sm:$0xff] }
 0x10a   : > { %v5939_v13 = vpop.permute.xlu1 %1670 }
 0x10b   : > { %7465 = vst [vmem:[#allocation39_spill] sm:$0xff] %v5939_v13  ;;  %v5947_v34 = vpop.permute.xlu0 %1366 }
 0x10c   : > { %2734 = vperm.xlu1 %5178, %v4856_v42   ;;  %2314 = vperm.xlu0 %5179, %v4818_v7   ;;  %7466 = vst [vmem:[#allocation40_spill] sm:$0xff] %v5947_v34 }
 0x10e   : > { %v5949_v50 = vpop.permute.xlu1 %2050 }
 0x10f   : > { %7467 = vst [vmem:[#allocation41_spill] sm:$0xff] %v5949_v50  ;;  %v5957_v42 = vpop.permute.xlu0 %1798 }
 0x110   : > { %3034 = vperm.xlu1 %5178, %v4884_v26   ;;  %2434 = vperm.xlu0 %5179, %v4828_v29   ;;  %7468 = vst [vmem:[#allocation42_spill] sm:$0xff] %v5957_v42  ;;  %v4767_v26 = vld [vmem:[%s7383_s8 + $0xb] ss:$0 sm:$0xff] }
 0x112   : > { %v5959_v7 = vpop.permute.xlu1 %2350 }
 0x113   : > { %7469 = vst [vmem:[#allocation43_spill] sm:$0xff] %v5959_v7  ;;  %v5967_v29 = vpop.permute.xlu0 %1918 }
 0x114   : > { %2058 = vperm.xlu1 %5178, %v4795_v57   ;;  %2994 = vperm.xlu0 %5179, %v4880_v58   ;;  %v4819_v57 = vld [vmem:[%s7431_s5 + $0x1b] ss:$0 sm:$0xff] }
 0x116   : > { %v5969_v2 = vpop.permute.xlu1 %1538 }
 0x117   : > { %7470 = vst [vmem:[#allocation44_spill] sm:$0xff] %v5969_v2  ;;  %v5977_v58 = vpop.permute.xlu0 %2478  ;;  %v4901_v2 = vld [vmem:[%s7381_s6 + $0x2d] ss:$0 sm:$0xff] }
 0x118   : > { %2358 = vperm.xlu1 %5178, %v4823_v5   ;;  %1758 = vperm.xlu0 %5179, %v4767_v26   ;;  %v4829_v5 = vld [vmem:[%s7383_s8 + $0x19] ss:$0 sm:$0xff] }
 0x11a   : > { %v5979_v50 = vpop.permute.xlu1 %1838 }
 0x11b   : > { %7471 = vst [vmem:[#allocation45_spill] sm:$0xff] %v5979_v50  ;;  %v5987_v26 = vpop.permute.xlu0 %1370 }
 0x11c   : > { %2738 = vperm.xlu1 %5178, %v4857_v61   ;;  %2318 = vperm.xlu0 %5179, %v4819_v57   ;;  %7472 = vst [vmem:[#allocation46_spill] sm:$0xff] %v5987_v26  ;;  %v4881_v61 = vld [vmem:[%s7431_s5 + $0x29] ss:$0 sm:$0xff]  ;;  %v4838_v26 = vld [vmem:[%s7381_s6 + $0x1e] ss:$0 sm:$0xff] }
 0x11e   : > { %v5989_v54 = vpop.permute.xlu1 %2218 }
 0x11f   : > { %v5997_v57 = vpop.permute.xlu0 %1802 }
 0x120   : > { %3038 = vperm.xlu1 %5178, %v4885_v37   ;;  %2438 = vperm.xlu0 %5179, %v4829_v5   ;;  %7473 = vst [vmem:[#allocation47_spill] sm:$0xff] %v5997_v57  ;;  %v4782_v37 = vld [vmem:[%s7383_s8 + $0xe] ss:$0 sm:$0xff]  ;;  %v4872_v57 = vld [vmem:[%s7382_s7 + $0x24] ss:$0 sm:$0xff] }
 0x122   : > { %v5999_v60 = vpop.permute.xlu1 %2518 }
 0x123   : > { %v6007_v5 = vpop.permute.xlu0 %1922 }
 0x124   : > { %2226 = vperm.xlu1 %5178, %v4810_v38   ;;  %2998 = vperm.xlu0 %5179, %v4881_v61   ;;  %7474 = vst [vmem:[#allocation48_spill] sm:$0xff] %v6007_v5  ;;  %v4834_v38 = vld [vmem:[%s7431_s5 + $0x1e] ss:$0 sm:$0xff]  ;;  %v4900_v5 = vld [vmem:[%s7381_s6 + $0x2c] ss:$0 sm:$0xff] }
 0x126   : > { %v6009_v41 = vpop.permute.xlu1 %1542 }
 0x127   : > { %7475 = vst [vmem:[#allocation49_spill] sm:$0xff] %v6009_v41  ;;  %v6017_v61 = vpop.permute.xlu0 %2482 }
 0x128   : > { %2526 = vperm.xlu1 %5178, %v4838_v26   ;;  %1926 = vperm.xlu0 %5179, %v4782_v37   ;;  %7476 = vst [vmem:[#allocation50_spill] sm:$0xff] %v6017_v61  ;;  %v4844_v26 = vld [vmem:[%s7383_s8 + $0x1c] ss:$0 sm:$0xff]  ;;  %v4811_v61 = vld [vmem:[%s7382_s7 + $0x17] ss:$0 sm:$0xff] }
 0x12a   : > { %v6019_v30 = vpop.permute.xlu1 %1842 }
 0x12b   : > { %7477 = vst [vmem:[#allocation51_spill] sm:$0xff] %v6019_v30  ;;  %v6027_v37 = vpop.permute.xlu0 %1710 }
 0x12c   : > { %2906 = vperm.xlu1 %5178, %v4872_v57   ;;  %2486 = vperm.xlu0 %5179, %v4834_v38   ;;  %7478 = vst [vmem:[#allocation52_spill] sm:$0xff] %v6027_v37  ;;  %v4896_v57 = vld [vmem:[%s7431_s5 + $0x2c] ss:$0 sm:$0xff] }
 0x12e   : > { %v6029_v41 = vpop.permute.xlu1 %2222 }
 0x12f   : > { %7479 = vst [vmem:[#allocation53_spill] sm:$0xff] %v6029_v41  ;;  %v6037_v38 = vpop.permute.xlu0 %2010  ;;  %v4839_v41 = vld [vmem:[%s7381_s6 + $0x1f] ss:$0 sm:$0xff] }
 0x130   : > { %3206 = vperm.xlu1 %5178, %v4900_v5   ;;  %2606 = vperm.xlu0 %5179, %v4844_v26   ;;  %7480 = vst [vmem:[#allocation54_spill] sm:$0xff] %v6037_v38  ;;  %v4783_v5 = vld [vmem:[%s7383_s8 + $0xf] ss:$0 sm:$0xff]  ;;  %v7505_v38 = vmov 0.0  }
 0x132   : > { %v6039_v33 = vpop.permute.xlu1 %2522 }
 0x133   : > { %7481 = vst [vmem:[#allocation55_spill] sm:$0xff] %v6039_v33  ;;  %v6047_v26 = vpop.permute.xlu0 %2390 }
 0x134   : > { %2230 = vperm.xlu1 %5178, %v4811_v61   ;;  %3166 = vperm.xlu0 %5179, %v4896_v57   ;;  %v4835_v61 = vld [vmem:[%s7431_s5 + $0x1f] ss:$0 sm:$0xff] }
 0x136   : > { %v6049_v48 = vpop.permute.xlu1 %1970 }
 0x137   : > { %7482 = vst [vmem:[#allocation56_spill] sm:$0xff] %v6049_v48  ;;  %v6057_v57 = vpop.permute.xlu0 %2690  ;;  %v4826_v48 = vld [vmem:[%s7382_s7 + $0x1a] ss:$0 sm:$0xff] }
 0x138   : > { %2530 = vperm.xlu1 %5178, %v4839_v41   ;;  %1930 = vperm.xlu0 %5179, %v4783_v5   ;;  %v4845_v41 = vld [vmem:[%s7383_s8 + $0x1d] ss:$0 sm:$0xff] }
 0x13a   : > { %v6059_v37 = vpop.permute.xlu1 %2090 }
 0x13b   : > { %v6067_v5 = vpop.permute.xlu0 %1974 }
 0x13c   : > { %2910 = vperm.xlu1 %5178, %v4873_v39   ;;  %2490 = vperm.xlu0 %5179, %v4835_v61   ;;  %7483 = vst [vmem:[#allocation57_spill] sm:$0xff] %v6067_v5  ;;  %v4897_v39 = vld [vmem:[%s7431_s5 + $0x2d] ss:$0 sm:$0xff]  ;;  %v4854_v5 = vld [vmem:[%s7381_s6 + $0x22] ss:$0 sm:$0xff] }
 0x13e   : > { %v6069_v34 = vpop.permute.xlu1 %2650 }
 0x13f   : > { %v6077_v61 = vpop.permute.xlu0 %2094 }
 0x140   : > { %3210 = vperm.xlu1 %5178, %v4901_v2   ;;  %2610 = vperm.xlu0 %5179, %v4845_v41   ;;  %7484 = vst [vmem:[#allocation58_spill] sm:$0xff] %v6077_v61  ;;  %v4798_v2 = vld [vmem:[%s7383_s8 + $0x12] ss:$0 sm:$0xff]  ;;  %v4888_v61 = vld [vmem:[%s7382_s7 + $0x28] ss:$0 sm:$0xff] }
 0x142   : > { %v6079_v42 = vpop.permute.xlu1 %1714 }
 0x143   : > { %7485 = vst [vmem:[#allocation59_spill] sm:$0xff] %v6079_v42  ;;  %v6087_v41 = vpop.permute.xlu0 %2654 }
 0x144   : > { %2398 = vperm.xlu1 %5178, %v4826_v48   ;;  %3170 = vperm.xlu0 %5179, %v4897_v39   ;;  %7486 = vst [vmem:[#allocation60_spill] sm:$0xff] %v6087_v41  ;;  %v4850_v48 = vld [vmem:[%s7431_s5 + $0x22] ss:$0 sm:$0xff]  ;;  %v4916_v41 = vld [vmem:[%s7381_s6 + $0x30] ss:$0 sm:$0xff] }
 0x146   : > { %v6089_v53 = vpop.permute.xlu1 %2014 }
 0x147   : > { %7487 = vst [vmem:[#allocation61_spill] sm:$0xff] %v6089_v53  ;;  %v6097_v39 = vpop.permute.xlu0 %1410 }
 0x148   : > { %2698 = vperm.xlu1 %5178, %v4854_v5   ;;  %2098 = vperm.xlu0 %5179, %v4798_v2   ;;  %7488 = vst [vmem:[#allocation62_spill] sm:$0xff] %v6097_v39  ;;  %v4860_v5 = vld [vmem:[%s7383_s8 + $0x20] ss:$0 sm:$0xff] }
 0x14a   : > { %v6099_v42 = vpop.permute.xlu1 %2394 }
 0x14b   : > { %7489 = vst [vmem:[#allocation63_spill] sm:$0xff] %v6099_v42  ;;  %v6107_v2 = vpop.permute.xlu0 %1882  ;;  %v4827_v42 = vld [vmem:[%s7382_s7 + $0x1b] ss:$0 sm:$0xff] }
 0x14c   : > { %3078 = vperm.xlu1 %5178, %v4888_v61   ;;  %2658 = vperm.xlu0 %5179, %v4850_v48   ;;  %7490 = vst [vmem:[#allocation64_spill] sm:$0xff] %v6107_v2  ;;  %v4912_v61 = vld [vmem:[%s7431_s5 + $0x30] ss:$0 sm:$0xff]  ;;  %v4855_v2 = vld [vmem:[%s7381_s6 + $0x23] ss:$0 sm:$0xff] }
 0x14e   : > { %v6109_v9 = vpop.permute.xlu1 %2694 }
 0x14f   : > { %7491 = vst [vmem:[#allocation65_spill] sm:$0xff] %v6109_v9  ;;  %v6117_v48 = vpop.permute.xlu0 %2182 }
 0x150   : > { %3378 = vperm.xlu1 %5178, %v4916_v41   ;;  %2778 = vperm.xlu0 %5179, %v4860_v5   ;;  %7492 = vst [vmem:[#allocation66_spill] sm:$0xff] %v6117_v48  ;;  %v4799_v41 = vld [vmem:[%s7383_s8 + $0x13] ss:$0 sm:$0xff] }
 0x152   : > { %v6119_v39 = vpop.permute.xlu1 %1582 }
 0x153   : > { %7493 = vst [vmem:[#allocation67_spill] sm:$0xff] %v6119_v39  ;;  %v6127_v5 = vpop.permute.xlu0 %2562  ;;  %v4889_v39 = vld [vmem:[%s7382_s7 + $0x29] ss:$0 sm:$0xff] }
 0x154   : > { %2402 = vperm.xlu1 %5178, %v4827_v42   ;;  %3338 = vperm.xlu0 %5179, %v4912_v61   ;;  %v4851_v42 = vld [vmem:[%s7431_s5 + $0x23] ss:$0 sm:$0xff] }
 0x156   : > { %v6129_v59 = vpop.permute.xlu1 %2142 }
 0x157   : > { %7494 = vst [vmem:[#allocation68_spill] sm:$0xff] %v6129_v59  ;;  %v6137_v61 = vpop.permute.xlu0 %2862  ;;  %v4917_v59 = vld [vmem:[%s7381_s6 + $0x31] ss:$0 sm:$0xff] }
 0x158   : > { %2702 = vperm.xlu1 %5178, %v4855_v2   ;;  %2102 = vperm.xlu0 %5179, %v4799_v41   ;;  %v4861_v2 = vld [vmem:[%s7383_s8 + $0x21] ss:$0 sm:$0xff] }
 0x15a   : > { %v6139_v10 = vpop.permute.xlu1 %2262 }
 0x15b   : > { %v6147_v41 = vpop.permute.xlu0 %1586 }
 0x15c   : > { %3082 = vperm.xlu1 %5178, %v4889_v39   ;;  %2662 = vperm.xlu0 %5179, %v4851_v42   ;;  %7495 = vst [vmem:[#allocation69_spill] sm:$0xff] %v6147_v41  ;;  %v4913_v39 = vld [vmem:[%s7431_s5 + $0x31] ss:$0 sm:$0xff]  ;;  %v4870_v41 = vld [vmem:[%s7381_s6 + $0x26] ss:$0 sm:$0xff] }
 0x15e   : > { %v6149_v45 = vpop.permute.xlu1 %2822 }
 0x15f   : > { %v6157_v42 = vpop.permute.xlu0 %2146 }
 0x160   : > { %3382 = vperm.xlu1 %5178, %v4917_v59   ;;  %2782 = vperm.xlu0 %5179, %v4861_v2   ;;  %7496 = vst [vmem:[#allocation70_spill] sm:$0xff] %v6157_v42  ;;  %v4814_v59 = vld [vmem:[%s7383_s8 + $0x16] ss:$0 sm:$0xff]  ;;  %v4904_v42 = vld [vmem:[%s7382_s7 + $0x2c] ss:$0 sm:$0xff] }
 0x162   : > { %v6159_v43 = vpop.permute.xlu1 %1414 }
 0x163   : > { %7497 = vst [vmem:[#allocation71_spill] sm:$0xff] %v6159_v43  ;;  %v6169_v27 = vpop.permute.xlu0 %2266 }
 0x164   : > { %2570 = vperm.xlu1 %5178, %v4842_v55   ;;  %3342 = vperm.xlu0 %5179, %v4913_v39   ;;  %7499 = vst [vmem:[#allocation73_spill] sm:$0xff] %v6169_v27  ;;  %v4866_v55 = vld [vmem:[%s7431_s5 + $0x26] ss:$0 sm:$0xff] }
 0x166   : > { %v6167_v2 = vpop.permute.xlu1 %1886 }
 0x167   : > { %7498 = vst [vmem:[#allocation72_spill] sm:$0xff] %v6167_v2  ;;  %v4932_v2 = vld [vmem:[%s7381_s6 + $0x34] ss:$0 sm:$0xff] }
 0x168   : > { %2870 = vperm.xlu1 %5178, %v4870_v41   ;;  %2270 = vperm.xlu0 %5179, %v4814_v59   ;;  %v4876_v41 = vld [vmem:[%s7383_s8 + $0x24] ss:$0 sm:$0xff] }
 0x16a   : > { %v6177_v39 = vpop.permute.xlu1 %2186 }
 0x16b   : > { %7500 = vst [vmem:[#allocation74_spill] sm:$0xff] %v6177_v39 }
 0x16c   : > { %3250 = vperm.xlu1 %5178, %v4904_v42   ;;  %2830 = vperm.xlu0 %5179, %v4866_v55   ;;  %v4843_v42 = vld [vmem:[%s7382_s7 + $0x1f] ss:$0 sm:$0xff]  ;;  %v4928_v55 = vld [vmem:[%s7431_s5 + $0x34] ss:$0 sm:$0xff] }
 0x16e   : > { %v5182_v59 = vpop.permute.xlu0 %5181  ;;  %v6185_v27 = vpop.permute.xlu1 %2566 }
 0x16f   : > { %7501 = vst [vmem:[#allocation75_spill] sm:$0xff] %v6185_v27  ;;  %v5183_v43 = vunpack.i.l.bf16 %v5182_v59  ;;  %v4815_v27 = vld [vmem:[%s7383_s8 + $0x17] ss:$0 sm:$0xff]  ;;  %v5184_v53 = vunpack.i.h.bf16 %v5182_v59  ;;  %v4867_v59 = vld [vmem:[%s7431_s5 + $0x27] ss:$0 sm:$0xff] }
 0x170   : > { %3550 = vperm.xlu1 %5178, %v4932_v2   ;;  %2950 = vperm.xlu0 %5179, %v4876_v41  }
 0x171   : > { %v6187_v19 = vpack.c.bf16 %v5183_v43, %v5183_v43  ;;  %v4871_v43 = vld [vmem:[%s7381_s6 + $0x27] ss:$0 sm:$0xff] }
 0x172   : > { %v5187_v15 = vpop.permute.xlu0 %5186  ;;  %v5192_v39 = vpop.permute.xlu1 %5191 }
 0x173   : > { %7502 = vst [vmem:[#allocation76_spill] sm:$0xff] %v6187_v19  ;;  %v5188_v48 = vunpack.i.l.bf16 %v5187_v15  ;;  %v5193_v9 = vunpack.i.l.bf16 %v5192_v39  ;;  %v862_v2 = vsel %vm811_vm2, %v6187_v19, 0 }
 0x174   : > { %2574 = vperm.xlu1 %5178, %v4843_v42   ;;  %3510 = vperm.xlu0 %5179, %v4928_v55   ;;  %v804_v55 = vpack.c.bf16 %v5184_v53, %v5184_v53  ;;  %v5194_v53 = vunpack.i.h.bf16 %v5192_v39  ;;  %v4858_v39 = vld [vmem:[%s7382_s7 + $0x22] ss:$0 sm:$0xff] }
 0x175   : > { %v6197_v41 = vpack.c.bf16 %v5188_v48, %v5188_v48  ;;  %5060 = vmatpush3.bf16.xpose.msra.mxu1 %v862_v2  ;;  %v6205_v33 = vpack.c.bf16 %v5193_v9, %v5193_v9  ;;  %v4905_v48 = vld [vmem:[%s7382_s7 + $0x2d] ss:$0 sm:$0xff]  ;;  %v5189_v2 = vunpack.i.h.bf16 %v5187_v15  ;;  %v4933_v15 = vld [vmem:[%s7381_s6 + $0x35] ss:$0 sm:$0xff] }
 0x176   : > { %5071 = vmatprep.subr.bf16.mxu1 %v7505_v38 }
 0x177   : > { %7503 = vst [vmem:[#allocation77_spill] sm:$0xff] %v6197_v41  ;;  %7504 = vst [vmem:[#allocation78_spill] sm:$0xff] %v6205_v33  ;;  %v908_v42 = vsel %vm811_vm2, %v6197_v41, 0  ;;  %v954_v9 = vsel %vm811_vm2, %v6205_v33, 0  ;;  %v4948_v41 = vld [vmem:[%s7381_s6 + $0x38] ss:$0 sm:$0xff] }
 0x178   : > { %2874 = vperm.xlu1 %5178, %v4871_v43   ;;  %2274 = vperm.xlu0 %5179, %v4815_v27   ;;  %v805_v27 = vpack.c.bf16 %v5189_v2, %v5189_v2  ;;  %v4877_v43 = vld [vmem:[%s7383_s8 + $0x25] ss:$0 sm:$0xff]  ;;  %v4929_v2 = vld [vmem:[%s7431_s5 + $0x35] ss:$0 sm:$0xff] }
 0x179   : > { %5066 = vmatpush3.bf16.xpose.msra.mxu0 %v908_v42 }
 0x17a   : > { %5077 = vmatprep.subr.bf16.mxu0 %v7505_v38 }
 0x17b   : > { %v6219_v19 = vpop.permute.xlu1 %2866 }
 0x17c   : > { %7506 = vst [vmem:[#allocation79_spill] sm:$0xff] %v6219_v19  ;;  %5062 = vmatmul.mubr.msk.bf16.vlgmr.msra.gmra.mxu1 %vm811_vm2, %v804_v55  ;;  %3254 = vperm.xlu1 %5178, %v4905_v48   ;;  %v806_v55 = vpack.c.bf16 %v5194_v53, %v5194_v53 }
 0x17d   : > { %2834 = vperm.xlu0 %5179, %v4867_v59   ;;  %5072 = vmatpush3.bf16.xpose.msra.mxu1 %v954_v9 }
 0x17e   : > { %5073 = vmatprep.mubr.msk.bf16.mxu1 %vm5293_vm0, %v7505_v38  ;;  %5083 = vmatprep.subr.bf16.mxu1 %v7505_v38 }
 0x17f   : > { %v6231_v42 = vpop.permute.xlu1 %2054  ;;  %v6233_v48 = vpop.permute.xlu0 %2826 }
 0x180   : > { %7507 = vst [vmem:[#allocation80_spill] sm:$0xff] %v6231_v42  ;;  %7508 = vst [vmem:[#allocation81_spill] sm:$0xff] %v6233_v48  ;;  %5068 = vmatmul.mubr.msk.bf16.vlgmr.msra.gmra.mxu0 %vm811_vm2, %v805_v27  ;;  %3554 = vperm.xlu1 %5178, %v4933_v15   ;;  %v4886_v15 = vld [vmem:[%s7381_s6 + $0x2a] ss:$0 sm:$0xff]  ;;  %v4830_v27 = vld [vmem:[%s7383_s8 + $0x1a] ss:$0 sm:$0xff] }
 0x181   : > { %2954 = vperm.xlu0 %5179, %v4877_v43   ;;  %5079 = vmatprep.mubr.msk.bf16.mxu0 %vm5293_vm0, %v7505_v38  ;;  %v4859_v48 = vld [vmem:[%s7382_s7 + $0x23] ss:$0 sm:$0xff] }
 0x183   : > { %v6244_v59 = vpop.permute.xlu1 %2354  ;;  %v6246_v9 = vpop.permute.xlu0 %1754 }
 0x184   : > { %7509 = vst [vmem:[#allocation82_spill] sm:$0xff] %v6244_v59  ;;  %7510 = vst [vmem:[#allocation83_spill] sm:$0xff] %v6246_v9  ;;  %5074 = vmatmul.mubr.msk.bf16.vlgmr.msra.gmra.mxu1 %vm811_vm2, %v806_v55  ;;  %2742 = vperm.xlu1 %5178, %v4858_v39   ;;  %v4920_v39 = vld [vmem:[%s7382_s7 + $0x30] ss:$0 sm:$0xff]  ;;  %v4882_v55 = vld [vmem:[%s7431_s5 + $0x2a] ss:$0 sm:$0xff] }
 0x185   : > { %3514 = vperm.xlu0 %5179, %v4929_v2   ;;  %5085 = vmatprep.mubr.msk.bf16.mxu1 %vm5293_vm0, %v7505_v38  ;;  %v4875_v59 = vld [vmem:[%s7382_s7 + $0x27] ss:$0 sm:$0xff] }
 0x187   : > { %v6257_v53 = vpop.permute.xlu1 %2734  ;;  %v6259_v43 = vpop.permute.xlu0 %2314 }
 0x188   : > { %7511 = vst [vmem:[#allocation84_spill] sm:$0xff] %v6259_v43  ;;  %3042 = vperm.xlu1 %5178, %v4886_v15   ;;  %v4892_v15 = vld [vmem:[%s7383_s8 + $0x28] ss:$0 sm:$0xff] }
 0x189   : > { %2442 = vperm.xlu0 %5179, %v4830_v27  }
 0x18b   : > { %v6267_v2 = vpop.permute.xlu1 %3034  ;;  %v6269_v33 = vpop.permute.xlu0 %2434 }
 0x18c   : > { %3422 = vperm.xlu1 %5178, %v4920_v39   ;;  %v4944_v39 = vld [vmem:[%s7431_s5 + $0x38] ss:$0 sm:$0xff] }
 0x18d   : > { %3002 = vperm.xlu0 %5179, %v4882_v55  }
 0x18f   : > { %v6277_v27 = vpop.permute.xlu1 %2058  ;;  %v6279_v38 = vpop.permute.xlu0 %2994 }
 0x190   : > { %7512 = vst [vmem:[#allocation85_spill] sm:$0xff] %v6277_v27  ;;  %3722 = vperm.xlu1 %5178, %v4948_v41   ;;  %v4887_v27 = vld [vmem:[%s7381_s6 + $0x2b] ss:$0 sm:$0xff]  ;;  %v4831_v41 = vld [vmem:[%s7383_s8 + $0x1b] ss:$0 sm:$0xff] }
 0x191   : > { %3122 = vperm.xlu0 %5179, %v4892_v15  }
 0x193   : > { %v6287_v55 = vpop.permute.xlu1 %2358  ;;  %v6289_v9 = vpop.permute.xlu0 %1758 }
 0x194   : > { %7513 = vst [vmem:[#allocation86_spill] sm:$0xff] %v6287_v55  ;;  %7514 = vst [vmem:[#allocation87_spill] sm:$0xff] %v6289_v9  ;;  %2746 = vperm.xlu1 %5178, %v4859_v48   ;;  %v4921_v9 = vld [vmem:[%s7382_s7 + $0x31] ss:$0 sm:$0xff]  ;;  %v4883_v48 = vld [vmem:[%s7431_s5 + $0x2b] ss:$0 sm:$0xff] }
 0x195   : > { %3682 = vperm.xlu0 %5179, %v4944_v39  }
 0x197   : > { %v6297_v15 = vpop.permute.xlu1 %2738  ;;  %v6299_v42 = vpop.permute.xlu0 %2318 }
 0x198   : > { %7515 = vst [vmem:[#allocation88_spill] sm:$0xff] %v6297_v15  ;;  %7516 = vst [vmem:[#allocation89_spill] sm:$0xff] %v6299_v42  ;;  %3046 = vperm.xlu1 %5178, %v4887_v27   ;;  %v4949_v15 = vld [vmem:[%s7381_s6 + $0x39] ss:$0 sm:$0xff]  ;;  %v4893_v27 = vld [vmem:[%s7383_s8 + $0x29] ss:$0 sm:$0xff] }
 0x199   : > { %2446 = vperm.xlu0 %5179, %v4831_v41  }
 0x19b   : > { %v6307_v39 = vpop.permute.xlu1 %3038  ;;  %v6309_v43 = vpop.permute.xlu0 %2438 }
 0x19c   : > { %7517 = vst [vmem:[#allocation90_spill] sm:$0xff] %v6307_v39  ;;  %7518 = vst [vmem:[#allocation91_spill] sm:$0xff] %v6309_v43  ;;  %3426 = vperm.xlu1 %5178, %v4921_v9   ;;  %v4874_v43 = vld [vmem:[%s7382_s7 + $0x26] ss:$0 sm:$0xff]  ;;  %v4945_v9 = vld [vmem:[%s7431_s5 + $0x39] ss:$0 sm:$0xff] }
 0x19d   : > { %3006 = vperm.xlu0 %5179, %v4883_v48  }
 0x19f   : > { %v6317_v41 = vpop.permute.xlu1 %2226  ;;  %v6319_v42 = vpop.permute.xlu0 %2998 }
 0x1a0   : > { %7519 = vst [vmem:[#allocation92_spill] sm:$0xff] %v6317_v41  ;;  %7520 = vst [vmem:[#allocation93_spill] sm:$0xff] %v6319_v42  ;;  %3726 = vperm.xlu1 %5178, %v4949_v15   ;;  %v4902_v42 = vld [vmem:[%s7381_s6 + $0x2e] ss:$0 sm:$0xff]  ;;  %v4846_v15 = vld [vmem:[%s7383_s8 + $0x1e] ss:$0 sm:$0xff] }
 0x1a1   : > { %3126 = vperm.xlu0 %5179, %v4893_v27  }
 0x1a3   : > { %v6327_v48 = vpop.permute.xlu1 %2526  ;;  %v6329_v39 = vpop.permute.xlu0 %1926 }
 0x1a4   : > { %7521 = vst [vmem:[#allocation94_spill] sm:$0xff] %v6327_v48  ;;  %7522 = vst [vmem:[#allocation95_spill] sm:$0xff] %v6329_v39  ;;  %2914 = vperm.xlu1 %5178, %v4874_v43   ;;  %v4936_v39 = vld [vmem:[%s7382_s7 + $0x34] ss:$0 sm:$0xff]  ;;  %v4898_v43 = vld [vmem:[%s7431_s5 + $0x2e] ss:$0 sm:$0xff] }
 0x1a5   : > { %3686 = vperm.xlu0 %5179, %v4945_v9  }
 0x1a7   : > { %v6337_v27 = vpop.permute.xlu1 %2906  ;;  %v6339_v41 = vpop.permute.xlu0 %2486 }
 0x1a8   : > { %7523 = vst [vmem:[#allocation96_spill] sm:$0xff] %v6339_v41  ;;  %3214 = vperm.xlu1 %5178, %v4902_v42   ;;  %v4964_v41 = vld [vmem:[%s7381_s6 + $0x3c] ss:$0 sm:$0xff]  ;;  %v4908_v42 = vld [vmem:[%s7383_s8 + $0x2c] ss:$0 sm:$0xff] }
 0x1a9   : > { %2614 = vperm.xlu0 %5179, %v4846_v15  }
 0x1ab   : > { %v6347_v9 = vpop.permute.xlu1 %3206  ;;  %v6349_v48 = vpop.permute.xlu0 %2606 }
 0x1ac   : > { %3594 = vperm.xlu1 %5178, %v4936_v39   ;;  %v4960_v39 = vld [vmem:[%s7431_s5 + $0x3c] ss:$0 sm:$0xff] }
 0x1ad   : > { %3174 = vperm.xlu0 %5179, %v4898_v43  }
 0x1af   : > { %v6357_v15 = vpop.permute.xlu1 %2230  ;;  %v6359_v55 = vpop.permute.xlu0 %3166 }
 0x1b0   : > { %7524 = vst [vmem:[#allocation97_spill] sm:$0xff] %v6357_v15  ;;  %3894 = vperm.xlu1 %5178, %v4964_v41   ;;  %v4903_v15 = vld [vmem:[%s7381_s6 + $0x2f] ss:$0 sm:$0xff]  ;;  %v4847_v41 = vld [vmem:[%s7383_s8 + $0x1f] ss:$0 sm:$0xff] }
 0x1b1   : > { %3294 = vperm.xlu0 %5179, %v4908_v42  }
 0x1b3   : > { %v6367_v43 = vpop.permute.xlu1 %2530  ;;  %v6369_v19 = vpop.permute.xlu0 %1930 }
 0x1b4   : > { %7525 = vst [vmem:[#allocation98_spill] sm:$0xff] %v6367_v43  ;;  %7526 = vst [vmem:[#allocation99_spill] sm:$0xff] %v6369_v19  ;;  %2918 = vperm.xlu1 %5178, %v4875_v59   ;;  %v4937_v19 = vld [vmem:[%s7382_s7 + $0x35] ss:$0 sm:$0xff]  ;;  %v4899_v59 = vld [vmem:[%s7431_s5 + $0x2f] ss:$0 sm:$0xff] }
 0x1b5   : > { %3854 = vperm.xlu0 %5179, %v4960_v39  }
 0x1b7   : > { %v6377_v42 = vpop.permute.xlu1 %2910  ;;  %v6379_v30 = vpop.permute.xlu0 %2490 }
 0x1b8   : > { %7527 = vst [vmem:[#allocation100_spill] sm:$0xff] %v6377_v42  ;;  %7528 = vst [vmem:[#allocation101_spill] sm:$0xff] %v6379_v30  ;;  %3218 = vperm.xlu1 %5178, %v4903_v15   ;;  %v4965_v42 = vld [vmem:[%s7381_s6 + $0x3d] ss:$0 sm:$0xff]  ;;  %v4909_v15 = vld [vmem:[%s7383_s8 + $0x2d] ss:$0 sm:$0xff] }
 0x1b9   : > { %2618 = vperm.xlu0 %5179, %v4847_v41  }
 0x1bb   : > { %v6387_v39 = vpop.permute.xlu1 %3210  ;;  %v6389_v43 = vpop.permute.xlu0 %2610 }
 0x1bc   : > { %7529 = vst [vmem:[#allocation102_spill] sm:$0xff] %v6387_v39  ;;  %7530 = vst [vmem:[#allocation103_spill] sm:$0xff] %v6389_v43  ;;  %3598 = vperm.xlu1 %5178, %v4937_v19   ;;  %v4890_v43 = vld [vmem:[%s7382_s7 + $0x2a] ss:$0 sm:$0xff]  ;;  %v4961_v19 = vld [vmem:[%s7431_s5 + $0x3d] ss:$0 sm:$0xff] }
 0x1bd   : > { %3178 = vperm.xlu0 %5179, %v4899_v59  }
 0x1bf   : > { %v6397_v41 = vpop.permute.xlu1 %2398  ;;  %v6399_v30 = vpop.permute.xlu0 %3170 }
 0x1c0   : > { %7531 = vst [vmem:[#allocation104_spill] sm:$0xff] %v6397_v41  ;;  %7532 = vst [vmem:[#allocation105_spill] sm:$0xff] %v6399_v30  ;;  %3898 = vperm.xlu1 %5178, %v4965_v42   ;;  %v4918_v42 = vld [vmem:[%s7381_s6 + $0x32] ss:$0 sm:$0xff] }
 0x1c1   : > { %3298 = vperm.xlu0 %5179, %v4909_v15   ;;  %v4862_v15 = vld [vmem:[%s7383_s8 + $0x22] ss:$0 sm:$0xff] }
 0x1c3   : > { %v6407_v59 = vpop.permute.xlu1 %2698  ;;  %v6409_v39 = vpop.permute.xlu0 %2098 }
 0x1c4   : > { %7533 = vst [vmem:[#allocation106_spill] sm:$0xff] %v6407_v59  ;;  %7534 = vst [vmem:[#allocation107_spill] sm:$0xff] %v6409_v39  ;;  %3086 = vperm.xlu1 %5178, %v4890_v43   ;;  %v4952_v43 = vld [vmem:[%s7382_s7 + $0x38] ss:$0 sm:$0xff] }
 0x1c5   : > { %3858 = vperm.xlu0 %5179, %v4961_v19   ;;  %v6411_v50 = vpop.f32.mrf.mxu0  ;;  %v4914_v19 = vld [vmem:[%s7431_s5 + $0x32] ss:$0 sm:$0xff] }
 0x1c7   : > { %v5057_v30 = vpop.f32.mrf.mxu0  ;;  %v6419_v41 = vpop.permute.xlu1 %3078 }
 0x1c8   : > { %v6421_v7 = vpop.permute.xlu0 %2658  ;;  %3386 = vperm.xlu1 %5178, %v4918_v42   ;;  %v4891_v30 = vld [vmem:[%s7382_s7 + $0x2b] ss:$0 sm:$0xff] }
 0x1c9   : > { %7535 = vst [vmem:[#allocation108_spill] sm:$0xff] %v6421_v7  ;;  %2786 = vperm.xlu0 %5179, %v4862_v15   ;;  %v855_v39 = vpop.f32.mrf.mxu0 }
 0x1ca   : > { %v4924_v39 = vld [vmem:[%s7383_s8 + $0x30] ss:$0 sm:$0xff] }
 0x1cb   : > { %v5058_v59 = vpop.f32.mrf.mxu0  ;;  %v6429_v13 = vpop.permute.xlu1 %3378 }
 0x1cc   : > { %7536 = vst [vmem:[#allocation109_spill] sm:$0xff] %v6429_v13  ;;  %v6431_v21 = vpop.permute.xlu0 %2778  ;;  %3766 = vperm.xlu1 %5178, %v4952_v43   ;;  %v4919_v59 = vld [vmem:[%s7381_s6 + $0x33] ss:$0 sm:$0xff]  ;;  %v4863_v43 = vld [vmem:[%s7383_s8 + $0x23] ss:$0 sm:$0xff] }
 0x1cd   : > { %3346 = vperm.xlu0 %5179, %v4914_v19  }
 0x1cf   : > { %v6439_v42 = vpop.permute.xlu1 %2402 }
 0x1d0   : > { %7537 = vst [vmem:[#allocation110_spill] sm:$0xff] %v6439_v42  ;;  %v6441_v15 = vpop.permute.xlu0 %3338  ;;  %3090 = vperm.xlu1 %5178, %v4891_v30   ;;  %v4953_v42 = vld [vmem:[%s7382_s7 + $0x39] ss:$0 sm:$0xff]  ;;  %v4915_v30 = vld [vmem:[%s7431_s5 + $0x33] ss:$0 sm:$0xff] }
 0x1d1   : > { %7538 = vst [vmem:[#allocation111_spill] sm:$0xff] %v6441_v15  ;;  %3466 = vperm.xlu0 %5179, %v4924_v39  }
 0x1d3   : > { %v6449_v19 = vpop.permute.xlu1 %2702 }
 0x1d4   : > { %7539 = vst [vmem:[#allocation112_spill] sm:$0xff] %v6449_v19  ;;  %v6451_v7 = vpop.permute.xlu0 %2102  ;;  %3390 = vperm.xlu1 %5178, %v4919_v59   ;;  %v4925_v59 = vld [vmem:[%s7383_s8 + $0x31] ss:$0 sm:$0xff] }
 0x1d5   : > { %7540 = vst [vmem:[#allocation113_spill] sm:$0xff] %v6451_v7  ;;  %2790 = vperm.xlu0 %5179, %v4863_v43   ;;  %v4906_v7 = vld [vmem:[%s7382_s7 + $0x2e] ss:$0 sm:$0xff] }
 0x1d7   : > { %v6459_v39 = vpop.permute.xlu1 %3082 }
 0x1d8   : > { %7541 = vst [vmem:[#allocation114_spill] sm:$0xff] %v6459_v39  ;;  %v6461_v13 = vpop.permute.xlu0 %2662  ;;  %3770 = vperm.xlu1 %5178, %v4953_v42   ;;  %v4934_v39 = vld [vmem:[%s7381_s6 + $0x36] ss:$0 sm:$0xff]  ;;  %v4878_v42 = vld [vmem:[%s7383_s8 + $0x26] ss:$0 sm:$0xff] }
 0x1d9   : > { %7542 = vst [vmem:[#allocation115_spill] sm:$0xff] %v6461_v13  ;;  %3350 = vperm.xlu0 %5179, %v4915_v30  }
 0x1db   : > { %v6469_v43 = vpop.permute.xlu1 %3382 }
 0x1dc   : > { %7543 = vst [vmem:[#allocation116_spill] sm:$0xff] %v6469_v43  ;;  %v6471_v19 = vpop.permute.xlu0 %2782  ;;  %3258 = vperm.xlu1 %5178, %v4906_v7   ;;  %v4930_v7 = vld [vmem:[%s7431_s5 + $0x36] ss:$0 sm:$0xff] }
 0x1dd   : > { %7544 = vst [vmem:[#allocation117_spill] sm:$0xff] %v6471_v19  ;;  %3470 = vperm.xlu0 %5179, %v4925_v59   ;;  %v4968_v19 = vld [vmem:[%s7382_s7 + $0x3c] ss:$0 sm:$0xff] }
 0x1df   : > { %v6479_v30 = vpop.permute.xlu1 %2570 }
 0x1e0   : > { %7545 = vst [vmem:[#allocation118_spill] sm:$0xff] %v6479_v30  ;;  %v6481_v13 = vpop.permute.xlu0 %3342  ;;  %3558 = vperm.xlu1 %5178, %v4934_v39   ;;  %v4940_v39 = vld [vmem:[%s7383_s8 + $0x34] ss:$0 sm:$0xff] }
 0x1e1   : > { %7546 = vst [vmem:[#allocation119_spill] sm:$0xff] %v6481_v13  ;;  %2958 = vperm.xlu0 %5179, %v4878_v42   ;;  %v4907_v13 = vld [vmem:[%s7382_s7 + $0x2f] ss:$0 sm:$0xff] }
 0x1e3   : > { %v6489_v59 = vpop.permute.xlu1 %2870 }
 0x1e4   : > { %7547 = vst [vmem:[#allocation120_spill] sm:$0xff] %v6489_v59  ;;  %v6491_v43 = vpop.permute.xlu0 %2270  ;;  %3938 = vperm.xlu1 %5178, %v4968_v19   ;;  %v4935_v59 = vld [vmem:[%s7381_s6 + $0x37] ss:$0 sm:$0xff]  ;;  %v4879_v19 = vld [vmem:[%s7383_s8 + $0x27] ss:$0 sm:$0xff] }
 0x1e5   : > { %7548 = vst [vmem:[#allocation121_spill] sm:$0xff] %v6491_v43  ;;  %3518 = vperm.xlu0 %5179, %v4930_v7  }
 0x1e7   : > { %v6499_v42 = vpop.permute.xlu1 %3250 }
 0x1e8   : > { %v6501_v30 = vpop.permute.xlu0 %2830  ;;  %3262 = vperm.xlu1 %5178, %v4907_v13   ;;  %v4969_v13 = vld [vmem:[%s7382_s7 + $0x3d] ss:$0 sm:$0xff] }
 0x1e9   : > { %7549 = vst [vmem:[#allocation122_spill] sm:$0xff] %v6501_v30  ;;  %3638 = vperm.xlu0 %5179, %v4940_v39   ;;  %v4931_v39 = vld [vmem:[%s7431_s5 + $0x37] ss:$0 sm:$0xff] }
 0x1eb   : > { %v6509_v7 = vpop.permute.xlu1 %3550 }
 0x1ec   : > { %v6511_v43 = vpop.permute.xlu0 %2950  ;;  %3562 = vperm.xlu1 %5178, %v4935_v59   ;;  %v4941_v59 = vld [vmem:[%s7383_s8 + $0x35] ss:$0 sm:$0xff] }
 0x1ed   : > { %2962 = vperm.xlu0 %5179, %v4879_v19  }
 0x1ef   : > { %v6519_v30 = vpop.permute.xlu1 %2574 }
 0x1f0   : > { %7550 = vst [vmem:[#allocation123_spill] sm:$0xff] %v6519_v30  ;;  %v6521_v15 = vpop.permute.xlu0 %3510  ;;  %3942 = vperm.xlu1 %5178, %v4969_v13   ;;  %v4950_v13 = vld [vmem:[%s7381_s6 + $0x3a] ss:$0 sm:$0xff] }
 0x1f1   : > { %3522 = vperm.xlu0 %5179, %v4931_v39   ;;  %v4894_v39 = vld [vmem:[%s7383_s8 + $0x2a] ss:$0 sm:$0xff] }
 0x1f3   : > { %v6529_v19 = vpop.permute.xlu1 %2874 }
 0x1f4   : > { %7551 = vst [vmem:[#allocation124_spill] sm:$0xff] %v6529_v19  ;;  %v6531_v46 = vpop.permute.xlu0 %2274  ;;  %3430 = vperm.xlu1 %5178, %v4922_v1   ;;  %v6548_v19 = vld [vmem:[%s6537_s19] sm:$0xff] }
 0x1f5   : > { %7552 = vst [vmem:[#allocation125_spill] sm:$0xff] %v6531_v46  ;;  %3642 = vperm.xlu0 %5179, %v4941_v59   ;;  %v1289_v46 = vmul.f32 %v5692_v12, %v6411_v50  ;;  %v1461_v59 = vmul.f32 %v5702_v16, %v6411_v50  ;;  %v1329_v4 = vmul.f32 %v5690_v11, %v6548_v19 }
 0x1f6   : > { %v1633_v11 = vmul.f32 %v5720_v23, %v6411_v50  ;;  %v4923_v23 = vld [vmem:[%s7382_s7 + $0x33] ss:$0 sm:$0xff] }
 0x1f7   : > { %v6545_v30 = vpop.permute.xlu1 %3254  ;;  %v1333_v16 = vadd.f32 %v1329_v4, %v1289_v46  ;;  %v1673_v4 = vmul.f32 %v5742_v32, %v6548_v19 }
 0x1f8   : > { %7554 = vst [vmem:[#allocation126_spill] sm:$0xff] %v6545_v30  ;;  %v6550_v1 = vpop.permute.xlu0 %2834  ;;  %3730 = vperm.xlu1 %5178, %v4950_v13   ;;  %v4946_v30 = vld [vmem:[%s7431_s5 + $0x3a] ss:$0 sm:$0xff]  ;;  %v1501_v13 = vmul.f32 %v5712_v20, %v6548_v19 }
 0x1f9   : > { %7555 = vst [vmem:[#allocation127_spill] sm:$0xff] %v6550_v1  ;;  %3130 = vperm.xlu0 %5179, %v4894_v39  }
 0x1fa   : > { %v1505_v39 = vadd.f32 %v1501_v13, %v1461_v59  ;;  %v1677_v59 = vadd.f32 %v1673_v4, %v1633_v11  ;;  %v1977_v4 = vmul.f32 %v5802_v56, %v6411_v50  ;;  %v4910_v56 = vld [vmem:[%s7383_s8 + $0x2e] ss:$0 sm:$0xff] }
 0x1fb   : > { %v6566_v1 = vpop.permute.xlu1 %3554 }
 0x1fc   : > { %7556 = vst [vmem:[#allocation128_spill] sm:$0xff] %v6566_v1  ;;  %v6568_v12 = vpop.permute.xlu0 %2954  ;;  %3134 = vperm.xlu1 %5178, %v4895_v22   ;;  %v1373_v22 = vadd.f32 %v5740_v31, %v1333_v16  ;;  %v1545_v46 = vadd.f32 %v5762_v40, %v1505_v39  ;;  %v1845_v31 = vmul.f32 %v5772_v44, %v6548_v19  ;;  %v4938_v16 = vld [vmem:[%s7382_s7 + $0x36] ss:$0 sm:$0xff]  ;;  %v4951_v39 = vld [vmem:[%s7381_s6 + $0x3b] ss:$0 sm:$0xff] }
 0x1fd   : > { %7557 = vst [vmem:[#allocation129_spill] sm:$0xff] %v6568_v12  ;;  %3690 = vperm.xlu0 %5179, %v4946_v30   ;;  %v4957_v30 = vld [vmem:[%s7383_s8 + $0x39] ss:$0 sm:$0xff] }
 0x1fe   : > { %v1377_v40 = vmax.f32 %v1373_v22, 0.0  ;;  %v2017_v22 = vmul.f32 %v5790_v51, %v6548_v19  ;;  %v2149_v51 = vmul.f32 %v5862_v25, %v6411_v50  ;;  %v4962_v25 = vld [vmem:[%s7431_s5 + $0x3e] ss:$0 sm:$0xff] }
 0x1ff   : > { %v6578_v20 = vpop.permute.xlu1 %2742 }
 0x200   : > { %v6580_v1 = vpop.permute.xlu0 %3514  ;;  %3694 = vperm.xlu1 %5178, %v4947_v3   ;;  %v1805_v3 = vmul.f32 %v5750_v35, %v6411_v50  ;;  %v1717_v35 = vadd.f32 %v5780_v47, %v1677_v59  ;;  %v4966_v47 = vld [vmem:[%s7381_s6 + $0x3e] ss:$0 sm:$0xff] }
 0x201   : > { %7558 = vst [vmem:[#allocation130_spill] sm:$0xff] %v6580_v1  ;;  %3810 = vperm.xlu0 %5179, %v4956_v0   ;;  %v1549_v0 = vmax.f32 %v1545_v46, 0.0  ;;  %v1417_v46 = vmul.f32 %v5820_v63, %v1377_v40 }
 0x202   : > { %v1849_v11 = vadd.f32 %v1845_v31, %v1805_v3  ;;  %v1721_v59 = vmax.f32 %v1717_v35, 0.0  ;;  %v2021_v31 = vadd.f32 %v2017_v22, %v1977_v4  ;;  %v2361_v22 = vmul.f32 %v5927_v6, %v6548_v19 }
 0x203   : > { %v6594_v13 = vpop.permute.xlu1 %3042  ;;  %v2493_v6 = vmul.f32 %v5977_v58, %v6411_v50  ;;  %v4939_v58 = vld [vmem:[%s7382_s7 + $0x37] ss:$0 sm:$0xff] }
 0x204   : > { %7559 = vst [vmem:[#allocation131_spill] sm:$0xff] %v6594_v13  ;;  %v6596_v32 = vpop.permute.xlu0 %2442  ;;  %3814 = vperm.xlu1 %5178, %v4957_v30   ;;  %v1889_v3 = vadd.f32 %v5840_v8, %v1849_v11  ;;  %v2321_v8 = vmul.f32 %v5903_v18, %v6411_v50  ;;  %v2061_v11 = vadd.f32 %v5916_v49, %v2021_v31  ;;  %v4963_v18 = vld [vmem:[%s7431_s5 + $0x3f] ss:$0 sm:$0xff]  ;;  %s4617_s5 = scalar_lea.hbm %s7734_s28, %s5001_s30 }
 0x205   : > { %3434 = vperm.xlu0 %5179, %v4923_v23   ;;  %v1589_v23 = vmul.f32 %v5852_v17, %v1549_v0  ;;  %v2189_v17 = vmul.f32 %v5850_v14, %v6548_v19  ;;  %v4911_v0 = vld [vmem:[%s7383_s8 + $0x2f] ss:$0 sm:$0xff] }
 0x206   : > { %v1893_v35 = vmax.f32 %v1889_v3, 0.0 }
 0x207   : > { %v6609_v30 = vpop.permute.xlu1 %3422  ;;  %v1593_v40 = vadd.f32 %v1589_v23, %v1417_v46  ;;  %v2193_v4 = vadd.f32 %v2189_v17, %v2149_v51  ;;  %v2533_v17 = vmul.f32 %v5999_v60, %v6548_v19 }
 0x208   : > { %v6611_v44 = vpop.permute.xlu0 %3002  ;;  %3602 = vperm.xlu1 %5178, %v4938_v16   ;;  %v1933_v49 = vmul.f32 %v5967_v29, %v1893_v35  ;;  %v4973_v29 = vld [vmem:[%s7383_s8 + $0x3d] ss:$0 sm:$0xff] }
 0x209   : > { %7560 = vst [vmem:[#allocation132_spill] sm:$0xff] %v6611_v44  ;;  %3734 = vperm.xlu0 %5179, %v4951_v39   ;;  %v1761_v39 = vmul.f32 %v5892_v62, %v1721_v59  ;;  %v4972_v62 = vld [vmem:[%s7383_s8 + $0x3c] ss:$0 sm:$0xff]  ;;  %v2233_v59 = vadd.f32 %v5989_v54, %v2193_v4  ;;  %v2837_v4 = vmul.f32 %v6149_v45, %v6411_v50 }
 0x20b   : > { %v6626_v16 = vpop.permute.xlu1 %3722  ;;  %v1765_v23 = vadd.f32 %v1761_v39, %v1593_v40  ;;  %v2665_v39 = vmul.f32 %v6069_v34, %v6411_v50  ;;  %v2877_v34 = vmul.f32 %v6137_v61, %v6548_v19 }
 0x20c   : > { %v6628_v63 = vpop.permute.xlu0 %3122  ;;  %3902 = vperm.xlu1 %5178, %v4966_v47   ;;  %v2365_v47 = vadd.f32 %v2361_v22, %v2321_v8  ;;  %v2237_v8 = vmax.f32 %v2233_v59, 0.0  ;;  %v3009_v22 = vmul.f32 %v6279_v38, %v6411_v50  ;;  %v3049_v38 = vmul.f32 %v6267_v2, %v6548_v19 }
 0x20d   : > { %3302 = vperm.xlu0 %5179, %v4910_v56   ;;  %v2065_v56 = vmax.f32 %v2061_v11, 0.0  ;;  %v1937_v40 = vadd.f32 %v1933_v49, %v1765_v23  ;;  %v2705_v11 = vmul.f32 %v6057_v57, %v6548_v19  ;;  %v4967_v23 = vld [vmem:[%s7381_s6 + $0x3f] ss:$0 sm:$0xff]  ;;  %v2881_v59 = vadd.f32 %v2877_v34, %v2837_v4 }
 0x20e   : > { %v2405_v54 = vadd.f32 %v6047_v26, %v2365_v47  ;;  %v2277_v57 = vmul.f32 %v6139_v10, %v2237_v8  ;;  %v4955_v10 = vld [vmem:[%s7382_s7 + $0x3b] ss:$0 sm:$0xff]  ;;  %v4970_v8 = vld [vmem:[%s7382_s7 + $0x3e] ss:$0 sm:$0xff] }
 0x20f   : > { %v6642_v14 = vpop.permute.xlu1 %2746  ;;  %v2709_v47 = vadd.f32 %v2705_v11, %v2665_v39 }
 0x210   : > { %v6646_v46 = vpop.permute.xlu0 %3682  ;;  %3306 = vperm.xlu1 %5178, %v4911_v0   ;;  %v2105_v0 = vmul.f32 %v6059_v37, %v2065_v56  ;;  %v4954_v37 = vld [vmem:[%s7382_s7 + $0x3a] ss:$0 sm:$0xff] }
 0x211   : > { %3862 = vperm.xlu0 %5179, %v4962_v25   ;;  %v2537_v25 = vadd.f32 %v2533_v17, %v2493_v6  ;;  %v3053_v6 = vadd.f32 %v3049_v38, %v3009_v22 }
 0x212   : > { %v2109_v26 = vadd.f32 %v2105_v0, %v1937_v40  ;;  %v2749_v40 = vadd.f32 %v6257_v53, %v2709_v47  ;;  %v2921_v0 = vadd.f32 %v6337_v27, %v2881_v59  ;;  %v4927_v53 = vld [vmem:[%s7383_s8 + $0x33] ss:$0 sm:$0xff]  ;;  %v4977_v59 = vld [vmem:[%s7384_s9 + $0x1] ss:$0 sm:$0xff] }
 0x213   : > { %v3047_v3 = vpop.permute.xlu1 %3046  ;;  %v2577_v45 = vadd.f32 %v6127_v5, %v2537_v25  ;;  %v4926_v5 = vld [vmem:[%s7383_s8 + $0x32] ss:$0 sm:$0xff]  ;;  %v3221_v25 = vmul.f32 %v6347_v9, %v6548_v19  ;;  %v3093_v39 = vadd.f32 %v6419_v41, %v3053_v6  ;;  %v4943_v9 = vld [vmem:[%s7383_s8 + $0x37] ss:$0 sm:$0xff]  ;;  %v4942_v41 = vld [vmem:[%s7383_s8 + $0x36] ss:$0 sm:$0xff] }
 0x214   : > { %v6659_v31 = vmul.f32 %v3047_v3, %v6548_v19  ;;  %v6661_v51 = vpop.permute.xlu0 %2446  ;;  %3866 = vperm.xlu1 %5178, %v4963_v18   ;;  %v2409_v18 = vmax.f32 %v2405_v54, 0.0  ;;  %v2281_v61 = vadd.f32 %v2277_v57, %v2109_v26  ;;  %v2753_v27 = vmax.f32 %v2749_v40, 0.0  ;;  %v4971_v40 = vld [vmem:[%s7382_s7 + $0x3f] ss:$0 sm:$0xff] }
 0x215   : > { %3982 = vperm.xlu0 %5179, %v4972_v62   ;;  %v2581_v17 = vmax.f32 %v2577_v45, 0.0  ;;  %v3565_v26 = vmul.f32 %v6509_v7, %v6548_v19  ;;  %v2925_v22 = vmax.f32 %v2921_v0, 0.0  ;;  %v3097_v7 = vmax.f32 %v3093_v39, 0.0 }
 0x216   : > { %v2449_v3 = vmul.f32 %v6269_v33, %v2409_v18  ;;  %v3525_v33 = vmul.f32 %v6521_v15, %v6411_v50 }
 0x217   : > { %v6675_v60 = vpop.permute.xlu1 %3426  ;;  %v2965_v18 = vmul.f32 %v6511_v43, %v2925_v22 }
 0x218   : > { %7561 = vst [vmem:[#allocation133_spill] sm:$0xff] %v6675_v60  ;;  %v6677_v35 = vpop.permute.xlu0 %3006  ;;  %3986 = vperm.xlu1 %5178, %v4973_v29   ;;  %v2453_v54 = vadd.f32 %v2449_v3, %v2281_v61  ;;  %v3137_v61 = vmul.f32 %v6628_v63, %v3097_v7  ;;  %v4959_v63 = vld [vmem:[%s7383_s8 + $0x3b] ss:$0 sm:$0xff]  ;;  %v4979_v7 = vld [vmem:[%s7384_s9 + $0x3] ss:$0 sm:$0xff] }
 0x219   : > { %3606 = vperm.xlu0 %5179, %v4939_v58   ;;  %v3181_v58 = vmul.f32 %v6359_v55, %v6411_v50  ;;  %v2621_v55 = vmul.f32 %v6349_v48, %v2581_v17  ;;  %v3569_v48 = vadd.f32 %v3565_v26, %v3525_v33  ;;  %v4975_v33 = vld [vmem:[%s7383_s8 + $0x3f] ss:$0 sm:$0xff]  ;;  %v6786_v26 = vmul.f32 %v5792_v52, %v6548_v19 }
 0x21a   : > { %v7571_v52 = vld [vmem:[#allocation24_spill] sm:$0xff] }
 0x21b   : > { %v3727_v62 = vpop.permute.xlu1 %3726  ;;  %v3225_v34 = vadd.f32 %v3221_v25, %v3181_v58  ;;  %v6776_v25 = vmul.f32 %v5722_v24, %v6548_v19  ;;  %v7568_v24 = vld [vmem:[#allocation20_spill] sm:$0xff] }
 0x21c   : > { %v6696_v49 = vmul.f32 %v3727_v62, %v6548_v19  ;;  %v6698_v56 = vpop.permute.xlu0 %3126  ;;  %3774 = vperm.xlu1 %5178, %v4954_v37   ;;  %v2625_v37 = vadd.f32 %v2621_v55, %v2453_v54  ;;  %v2018_v22 = vmul.f32 %v7568_v24, %v6548_v19  ;;  %v7584_v24 = vld [vmem:[#allocation61_spill] sm:$0xff] }
 0x21d   : > { %7562 = vst [vmem:[#allocation134_spill] sm:$0xff] %v6698_v56  ;;  %3906 = vperm.xlu0 %5179, %v4967_v23   ;;  %v2793_v23 = vmul.f32 %v6431_v21, %v2753_v27  ;;  %v3265_v57 = vadd.f32 %v6499_v42, %v3225_v34  ;;  %v4976_v21 = vld [vmem:[%s7384_s9] ss:$0 sm:$0xff]  ;;  %v1502_v27 = vmul.f32 %v5732_v28, %v6548_v19  ;;  %v7570_v28 = vld [vmem:[#allocation22_spill] sm:$0xff] }
 0x21f   : > { %v6710_v29 = vpop.permute.xlu1 %2914  ;;  %v2797_v38 = vadd.f32 %v2793_v23, %v2625_v37  ;;  %v3269_v42 = vmax.f32 %v3265_v57, 0.0  ;;  %v7572_v23 = vld [vmem:[#allocation30_spill] sm:$0xff] }
 0x220   : > { %7563 = vst [vmem:[#allocation135_spill] sm:$0xff] %v6710_v29  ;;  %v6712_v2 = vpop.permute.xlu0 %3686  ;;  %3778 = vperm.xlu1 %5178, %v4955_v10   ;;  %v6812_v57 = vmul.f32 %v7572_v23, %v6548_v19 }
 0x221   : > { %3474 = vperm.xlu0 %5179, %v4926_v5   ;;  %v2969_v43 = vadd.f32 %v2965_v18, %v2797_v38  ;;  %v7573_v18 = vld [vmem:[#allocation33_spill] sm:$0xff]  ;;  %v7574_v38 = vld [vmem:[#allocation35_spill] sm:$0xff] }
 0x223   : > { %v3215_v11 = vpop.permute.xlu1 %3214  ;;  %v3141_v3 = vadd.f32 %v3137_v61, %v2969_v43  ;;  %v6818_v61 = vmul.f32 %v7574_v38, %v6548_v19  ;;  %v7576_v43 = vld [vmem:[#allocation39_spill] sm:$0xff] }
 0x224   : > { %v6732_v4 = vmul.f32 %v3215_v11, %v6548_v19  ;;  %v6734_v15 = vpop.permute.xlu0 %2614  ;;  %3946 = vperm.xlu1 %5178, %v4970_v8   ;;  %v1674_v11 = vmul.f32 %v5752_v36, %v6548_v19  ;;  %v6801_v36 = vmul.f32 %v7570_v28, %v6548_v19  ;;  %v7585_v28 = vld [vmem:[#allocation109_spill] sm:$0xff] }
 0x225   : > { %3478 = vperm.xlu0 %5179, %v4927_v53   ;;  %v4958_v53 = vld [vmem:[%s7383_s8 + $0x3a] ss:$0 sm:$0xff] }
 0x227   : > { %v3595_v45 = vpop.permute.xlu1 %3594 }
 0x228   : > { %v6745_v47 = vadd.f32 %v3595_v45, %v3569_v48  ;;  %v6747_v62 = vpop.permute.xlu0 %3174  ;;  %3650 = vperm.xlu1 %5178, %v4943_v9   ;;  %v7569_v9 = vld [vmem:[#allocation21_spill] sm:$0xff]  ;;  %v2190_v45 = vmul.f32 %v7573_v18, %v6548_v19 }
 0x229   : > { %3646 = vperm.xlu0 %5179, %v4942_v41   ;;  %v6797_v48 = vmul.f32 %v7569_v9, %v6548_v19  ;;  %v6805_v41 = vmul.f32 %v7571_v52, %v6548_v19  ;;  %v6851_v9 = vmul.f32 %v7584_v24, %v6548_v19  ;;  %v3393_v52 = vmul.f32 %v7585_v28, %v6548_v19  ;;  %v7587_v18 = vld [vmem:[#allocation65_spill] sm:$0xff]  ;;  %v7594_v24 = vld [vmem:[#allocation86_spill] sm:$0xff] }
 0x22a   : > { %7564 = vst [vmem:[#allocation136_spill] sm:$0xff] %v6745_v47  ;;  %v6859_v38 = vmul.f32 %v7587_v18, %v6548_v19  ;;  %v6877_v28 = vmul.f32 %v7594_v24, %v6548_v19  ;;  %v7595_v18 = vld [vmem:[#allocation90_spill] sm:$0xff]  ;;  %v7630_v47 = vld [vmem:[#allocation44_spill] sm:$0xff] }
 0x22b   : > { %v3895_v10 = vpop.permute.xlu1 %3894 }
 0x22c   : > { %v3909_v5 = vmul.f32 %v3895_v10, %v6548_v19  ;;  %v3295_v6 = vpop.permute.xlu0 %3294  ;;  %4034 = vperm.xlu1 %5178, %v4977_v59   ;;  %v7575_v59 = vld [vmem:[#allocation111_spill] sm:$0xff]  ;;  %v6827_v10 = vmul.f32 %v7576_v43, %v6548_v19  ;;  %7588 = vst [vmem:[#allocation24_spill] sm:$0xff] %v6859_v38 }
 0x22d   : > { %v3309_v17 = vmul.f32 %v3295_v6, %v3269_v42  ;;  %4030 = vperm.xlu0 %5179, %v4976_v21   ;;  %v3353_v21 = vmul.f32 %v7575_v59, %v6411_v50  ;;  %v4974_v42 = vld [vmem:[%s7383_s8 + $0x3e] ss:$0 sm:$0xff]  ;;  %v7589_v59 = vld [vmem:[#allocation66_spill] sm:$0xff] }
 0x22e   : > { %v6863_v43 = vmul.f32 %v7589_v59, %v6548_v19  ;;  %v6881_v59 = vmul.f32 %v7595_v18, %v6548_v19 }
 0x22f   : > { %v6763_v54 = vadd.f32 %v3309_v17, %v3141_v3  ;;  %v6765_v58 = vpop.permute.xlu1 %2918  ;;  %v7578_v3 = vld [vmem:[#allocation45_spill] sm:$0xff] }
 0x230   : > { %7565 = vst [vmem:[#allocation137_spill] sm:$0xff] %v6765_v58  ;;  %v3855_v0 = vpop.permute.xlu0 %3854  ;;  %3822 = vperm.xlu1 %5178, %v4959_v63   ;;  %v6833_v17 = vmul.f32 %v7578_v3, %v6548_v19  ;;  %v7579_v63 = vld [vmem:[#allocation51_spill] sm:$0xff]  ;;  %7596 = vst [vmem:[#allocation33_spill] sm:$0xff] %v6881_v59  ;;  %v7601_v58 = vld [vmem:[#allocation106_spill] sm:$0xff] }
 0x231   : > { %v3869_v8 = vmul.f32 %v3855_v0, %v6411_v50  ;;  %3950 = vperm.xlu0 %5179, %v4971_v40   ;;  %v6837_v40 = vmul.f32 %v7579_v63, %v6548_v19  ;;  %v7591_v63 = vld [vmem:[#allocation79_spill] sm:$0xff]  ;;  %v6898_v18 = vmul.f32 %v7601_v58, %v6548_v19 }
 0x233   : > { %v3219_v39 = vpop.permute.xlu1 %3218  ;;  %v6778_v55 = vadd.f32 %v3909_v5, %v3869_v8  ;;  %v7577_v5 = vld [vmem:[#allocation43_spill] sm:$0xff]  ;;  %v7581_v8 = vld [vmem:[#allocation54_spill] sm:$0xff] }
 0x234   : > { %v6789_v37 = vmul.f32 %v3219_v39, %v6548_v19  ;;  %v6791_v34 = vpop.permute.xlu0 %2618  ;;  %3994 = vperm.xlu1 %5178, %v4975_v33   ;;  %v2362_v6 = vmul.f32 %v7577_v5, %v6548_v19  ;;  %v6843_v33 = vmul.f32 %v7581_v8, %v6548_v19  ;;  %v7590_v5 = vld [vmem:[#allocation74_spill] sm:$0xff]  ;;  %v6871_v8 = vmul.f32 %v7591_v63, %v6548_v19 }
 0x235   : > { %7566 = vst [vmem:[#allocation138_spill] sm:$0xff] %v6778_v55  ;;  %3818 = vperm.xlu0 %5179, %v4958_v53   ;;  %v7582_v53 = vld [vmem:[#allocation55_spill] sm:$0xff]  ;;  %v6867_v3 = vmul.f32 %v7590_v5, %v6548_v19  ;;  %v4978_v5 = vld [vmem:[%s7384_s9 + $0x2] ss:$0 sm:$0xff]  ;;  %v7597_v63 = vld [vmem:[#allocation94_spill] sm:$0xff] }
 0x236   : > { %7567 = vst [vmem:[#allocation139_spill] sm:$0xff] %v6789_v37  ;;  %v6847_v39 = vmul.f32 %v7582_v53, %v6548_v19  ;;  %7592 = vst [vmem:[#allocation30_spill] sm:$0xff] %v6871_v8  ;;  %v7593_v53 = vld [vmem:[#allocation82_spill] sm:$0xff]  ;;  %v2535_v44 = vmul.f32 %v7597_v63, %v6548_v19  ;;  %v7603_v37 = vld [vmem:[#allocation116_spill] sm:$0xff] }
 0x237   : > { %v6839_v0 = vpop.permute.xlu1 %3598  ;;  %v6906_v63 = vmul.f32 %v7603_v37, %v6548_v19  ;;  %v7609_v37 = vld [vmem:[#allocation12_spill] sm:$0xff] }
 0x238   : > { %7580 = vst [vmem:[#allocation20_spill] sm:$0xff] %v6839_v0  ;;  %7583 = vst [vmem:[#allocation21_spill] sm:$0xff] %v6847_v39  ;;  %v6855_v23 = vpop.permute.xlu0 %3178  ;;  %4042 = vperm.xlu1 %5178, %v4979_v7   ;;  %v2363_v7 = vmul.f32 %v7593_v53, %v6548_v19  ;;  %v3397_v0 = vadd.f32 %v3393_v52, %v3353_v21  ;;  %v7599_v53 = vld [vmem:[#allocation102_spill] sm:$0xff]  ;;  %v7602_v52 = vld [vmem:[#allocation112_spill] sm:$0xff] }
 0x239   : > { %7586 = vst [vmem:[#allocation22_spill] sm:$0xff] %v6855_v23  ;;  %3990 = vperm.xlu0 %5179, %v4974_v42   ;;  %v7598_v42 = vld [vmem:[#allocation98_spill] sm:$0xff]  ;;  %v6894_v24 = vmul.f32 %v7599_v53, %v6548_v19  ;;  %v6902_v1 = vmul.f32 %v7602_v52, %v6548_v19  ;;  %7604 = vst [vmem:[#allocation111_spill] sm:$0xff] %v6906_v63  ;;  %v7608_v52 = vld [vmem:[#allocation11_spill] sm:$0xff] }
 0x23a   : > { %v6890_v13 = vmul.f32 %v7598_v42, %v6548_v19  ;;  %v6909_v42 = vadd.f32 %v6609_v30, %v3397_v0  ;;  %v7610_v30 = vld [vmem:[#allocation13_spill] sm:$0xff] }
 0x23b   : > { %7600 = vst [vmem:[#allocation35_spill] sm:$0xff] %v6894_v24  ;;  %v3899_v21 = vpop.permute.xlu1 %3898 }
 0x23c   : > { %v6912_v56 = vmul.f32 %v3899_v21, %v6548_v19  ;;  %v6914_v53 = vpop.permute.xlu0 %3298  ;;  %v6916_v23 = vpop.f32.mrf.mxu1  ;;  %v7611_v21 = vld [vmem:[#allocation15_spill] sm:$0xff] }
 0x23d   : > { %7606 = vst [vmem:[#allocation43_spill] sm:$0xff] %v6914_v53  ;;  %7607 = vst [vmem:[#allocation45_spill] sm:$0xff] %v6916_v23  ;;  %4038 = vperm.xlu0 %5179, %v4978_v5   ;;  %v3698_v58 = vmul.f32 %v6712_v2, %v6916_v23  ;;  %v1290_v29 = vmul.f32 %v7608_v52, %v6916_v23  ;;  %v1462_v12 = vmul.f32 %v7609_v37, %v6916_v23  ;;  %v7612_v53 = vld [vmem:[#allocation17_spill] sm:$0xff]  ;;  %v7614_v2 = vld [vmem:[#allocation38_spill] sm:$0xff] }
 0x23e   : > { %7605 = vst [vmem:[#allocation39_spill] sm:$0xff] %v6912_v56  ;;  %v1634_v0 = vmul.f32 %v7610_v30, %v6916_v23  ;;  %v5063_v55 = vpop.f32.mrf.mxu1  ;;  %v1806_v56 = vmul.f32 %v7611_v21, %v6916_v23  ;;  %v1978_v60 = vmul.f32 %v7612_v53, %v6916_v23  ;;  %v7613_v5 = vld [vmem:[#allocation29_spill] sm:$0xff]  ;;  %v2322_v24 = vmul.f32 %v7614_v2, %v6916_v23 }
 0x23f   : > { %v2150_v63 = vmul.f32 %v7613_v5, %v6916_v23  ;;  %v6934_v52 = vpop.permute.xlu1 %3086  ;;  %v6937_v37 = vadd.f32 %v6696_v49, %v3698_v58  ;;  %v1334_v30 = vadd.f32 %v6776_v25, %v1290_v29  ;;  %v6940_v55 = vadd.f32 %v1502_v27, %v1462_v12  ;;  %v7625_v58 = vld [vmem:[#allocation68_spill] sm:$0xff] }
 0x240   : > { %7615 = vst [vmem:[#allocation51_spill] sm:$0xff] %v6934_v52  ;;  %v6942_v59 = vadd.f32 %v1674_v11, %v1634_v0  ;;  %v3859_v21 = vpop.permute.xlu0 %3858  ;;  %v901_v8 = vpop.f32.mrf.mxu1  ;;  %v6945_v53 = vadd.f32 %v6786_v26, %v1806_v56  ;;  %v6947_v5 = vadd.f32 %v2018_v22, %v1978_v60  ;;  %v6951_v2 = vadd.f32 %v2362_v6, %v2322_v24  ;;  %v7620_v60 = vld [vmem:[#allocation18_spill] sm:$0xff]  ;;  %v7621_v26 = vld [vmem:[#allocation23_spill] sm:$0xff] }
 0x241   : > { %v6949_v38 = vadd.f32 %v2190_v45, %v2150_v63  ;;  %v3737_v29 = vmul.f32 %v6626_v16, %v6548_v19  ;;  %v3697_v12 = vmul.f32 %v6646_v46, %v6411_v50  ;;  %v6959_v25 = vmul.f32 %v3859_v21, %v6916_v23  ;;  %v6961_v27 = vpop.f32.mrf.mxu0  ;;  %v7622_v45 = vld [vmem:[#allocation31_spill] sm:$0xff]  ;;  %v7623_v16 = vld [vmem:[#allocation42_spill] sm:$0xff]  ;;  %v7624_v46 = vld [vmem:[#allocation56_spill] sm:$0xff] }
 0x242   : > { %7616 = vst [vmem:[#allocation54_spill] sm:$0xff] %v6947_v5  ;;  %7618 = vst [vmem:[#allocation61_spill] sm:$0xff] %v6951_v2  ;;  %v5064_v56 = vpop.f32.mrf.mxu1  ;;  %v1291_v11 = vmul.f32 %v7620_v60, %v6961_v27  ;;  %v1463_v22 = vmul.f32 %v7621_v26, %v6961_v27  ;;  %v1635_v6 = vmul.f32 %v7622_v45, %v6961_v27  ;;  %v7626_v21 = vld [vmem:[#allocation84_spill] sm:$0xff] }
 0x243   : > { %7617 = vst [vmem:[#allocation55_spill] sm:$0xff] %v6949_v38  ;;  %7619 = vst [vmem:[#allocation109_spill] sm:$0xff] %v6959_v25  ;;  %v1807_v8 = vmul.f32 %v7623_v16, %v6961_v27  ;;  %v5069_v24 = vpop.f32.mrf.mxu0  ;;  %v3387_v50 = vpop.permute.xlu1 %3386  ;;  %v1979_v63 = vmul.f32 %v7624_v46, %v6961_v27  ;;  %v2151_v0 = vmul.f32 %v7625_v58, %v6961_v27  ;;  %v7627_v60 = vld [vmem:[#allocation96_spill] sm:$0xff] }
 0x244   : > { %v2323_v56 = vmul.f32 %v7626_v21, %v6961_v27  ;;  %v2495_v26 = vmul.f32 %v7627_v60, %v6961_v27  ;;  %v6980_v49 = vmul.f32 %v3387_v50, %v6548_v19  ;;  %v6982_v45 = vpop.permute.xlu0 %2786  ;;  %v1335_v16 = vadd.f32 %v6801_v36, %v1291_v11  ;;  %v6987_v52 = vpop.f32.mrf.mxu1  ;;  %v7629_v50 = vld [vmem:[#allocation40_spill] sm:$0xff] }
 0x245   : > { %v1507_v24 = vadd.f32 %v6797_v48, %v1463_v22  ;;  %v1679_v46 = vadd.f32 %v6818_v61, %v1635_v6  ;;  %v1851_v58 = vadd.f32 %v6833_v17, %v1807_v8  ;;  %v2023_v21 = vadd.f32 %v6843_v33, %v1979_v63  ;;  %v947_v39 = vpop.f32.mrf.mxu0  ;;  %v7631_v2 = vld [vmem:[#allocation52_spill] sm:$0xff] }
 0x246   : > { %7628 = vst [vmem:[#allocation65_spill] sm:$0xff] %v6980_v49  ;;  %v2195_v25 = vadd.f32 %v6863_v43, %v2151_v0  ;;  %v2367_v60 = vadd.f32 %v2363_v7, %v2323_v56  ;;  %v1375_v49 = vadd.f32 %v7629_v50, %v1335_v16  ;;  %v2539_v11 = vadd.f32 %v2535_v44, %v2495_v26  ;;  %v5075_v48 = vpop.f32.mrf.mxu1  ;;  %v7632_v22 = vld [vmem:[#allocation64_spill] sm:$0xff]  ;;  %v7636_v56 = vld [vmem:[#allocation118_spill] sm:$0xff] }
 0x247   : > { %v1547_v23 = vadd.f32 %v7630_v47, %v1507_v24  ;;  %v1719_v36 = vadd.f32 %v7631_v2, %v1679_v46  ;;  %v1891_v61 = vadd.f32 %v7632_v22, %v1851_v58  ;;  %v7633_v6 = vld [vmem:[#allocation80_spill] sm:$0xff]  ;;  %v5070_v63 = vpop.f32.mrf.mxu0  ;;  %v3767_v43 = vpop.permute.xlu1 %3766  ;;  %v3741_v24 = vadd.f32 %v3737_v29, %v3697_v12  ;;  %v7637_v46 = vld [vmem:[#allocation14_spill] sm:$0xff]  ;;  %v7641_v22 = vld [vmem:[#allocation95_spill] sm:$0xff] }
 0x248   : > { %v2063_v38 = vadd.f32 %v7633_v6, %v2023_v21  ;;  %v7634_v5 = vld [vmem:[#allocation92_spill] sm:$0xff]  ;;  %v1379_v7 = vmax.f32 %v1375_v49, 0.0  ;;  %v2579_v16 = vadd.f32 %v7636_v56, %v2539_v11  ;;  %v7000_v47 = vpop.permute.xlu0 %3346  ;;  %v993_v2 = vpop.f32.mrf.mxu1  ;;  %v7003_v58 = vadd.f32 %v7637_v46, %v1334_v30  ;;  %v7638_v21 = vld [vmem:[#allocation62_spill] sm:$0xff]  ;;  %v7647_v46 = vld [vmem:[#allocation121_spill] sm:$0xff] }
 0x249   : > { %v2235_v17 = vadd.f32 %v7634_v5, %v2195_v25  ;;  %v7635_v8 = vld [vmem:[#allocation104_spill] sm:$0xff]  ;;  %v1551_v39 = vmax.f32 %v1547_v23, 0.0  ;;  %v1723_v0 = vmax.f32 %v1719_v36, 0.0  ;;  %v1895_v44 = vmax.f32 %v1891_v61, 0.0  ;;  %v7639_v25 = vld [vmem:[#allocation67_spill] sm:$0xff] }
 0x24a   : > { %v2407_v33 = vadd.f32 %v7635_v8, %v2367_v60  ;;  %v2067_v26 = vmax.f32 %v2063_v38, 0.0  ;;  %v1419_v5 = vmul.f32 %v7638_v21, %v1379_v7  ;;  %v2583_v48 = vmax.f32 %v2579_v16, 0.0  ;;  %v5076_v49 = vpop.f32.mrf.mxu1  ;;  %v7640_v23 = vld [vmem:[#allocation83_spill] sm:$0xff]  ;;  %v7642_v61 = vld [vmem:[#allocation16_spill] sm:$0xff] }
 0x24b   : > { %v1591_v60 = vmul.f32 %v7639_v25, %v1551_v39  ;;  %v2239_v50 = vmax.f32 %v2235_v17, 0.0  ;;  %v1763_v36 = vmul.f32 %v7640_v23, %v1723_v0  ;;  %v1935_v11 = vmul.f32 %v7641_v22, %v1895_v44  ;;  %v3091_v8 = vpop.permute.xlu1 %3090  ;;  %v7643_v12 = vld [vmem:[#allocation108_spill] sm:$0xff]  ;;  %v7644_v39 = vld [vmem:[#allocation107_spill] sm:$0xff] }
 0x24c   : > { %v2411_v6 = vmax.f32 %v2407_v33, 0.0  ;;  %v7011_v38 = vadd.f32 %v7642_v61, %v6940_v55  ;;  %v2623_v30 = vmul.f32 %v6734_v15, %v2583_v48  ;;  %v2667_v63 = vmul.f32 %v7643_v12, %v6961_v27  ;;  %v3467_v17 = vpop.permute.xlu0 %3466  ;;  %v7646_v55 = vld [vmem:[#allocation26_spill] sm:$0xff]  ;;  %v7649_v25 = vld [vmem:[#allocation36_spill] sm:$0xff]  ;;  %v7652_v12 = vld [vmem:[#allocation49_spill] sm:$0xff] }
 0x24d   : > { %v1595_v29 = vadd.f32 %v1591_v60, %v1419_v5  ;;  %v7016_v7 = vadd.f32 %v3767_v43, %v3741_v24  ;;  %v2107_v56 = vmul.f32 %v7644_v39, %v2067_v26  ;;  %v3012_v0 = vmul.f32 %v6677_v35, %v6987_v52  ;;  %v7648_v43 = vld [vmem:[#allocation25_spill] sm:$0xff] }
 0x24e   : > { %v7645_v33 = vmax.f32 %v6909_v42, 0.0  ;;  %v1292_v2 = vmul.f32 %v7646_v55, %v6987_v52  ;;  %v2279_v15 = vmul.f32 %v7647_v46, %v2239_v50  ;;  %v2711_v21 = vadd.f32 %v6898_v18, %v2667_v63  ;;  %v7653_v63 = vld [vmem:[#allocation57_spill] sm:$0xff]  ;;  %v7655_v46 = vld [vmem:[#allocation71_spill] sm:$0xff] }
 0x24f   : > { %v1767_v44 = vadd.f32 %v1763_v36, %v1595_v29  ;;  %v1464_v24 = vmul.f32 %v7648_v43, %v6987_v52  ;;  %v3056_v5 = vadd.f32 %v6659_v31, %v3012_v0  ;;  %v3391_v35 = vpop.permute.xlu1 %3390  ;;  %v1636_v60 = vmul.f32 %v7649_v25, %v6987_v52  ;;  %v7659_v25 = vld [vmem:[#allocation85_spill] sm:$0xff] }
 0x250   : > { %v3481_v16 = vmul.f32 %v3467_v17, %v7645_v33  ;;  %v1336_v42 = vadd.f32 %v6805_v41, %v1292_v2  ;;  %v2751_v49 = vadd.f32 %v6578_v20, %v2711_v21  ;;  %v7038_v50 = vmul.f32 %v3391_v35, %v6548_v19  ;;  %v7040_v18 = vpop.permute.xlu0 %2790  ;;  %v7651_v41 = vld [vmem:[#allocation47_spill] sm:$0xff] }
 0x251   : > { %v1939_v48 = vadd.f32 %v1935_v11, %v1767_v44  ;;  %v1508_v23 = vadd.f32 %v6812_v57, %v1464_v24  ;;  %v7043_v31 = vadd.f32 %v3091_v8, %v3056_v5  ;;  %v1680_v22 = vadd.f32 %v6827_v10, %v1636_v60  ;;  %v7654_v57 = vld [vmem:[#allocation59_spill] sm:$0xff]  ;;  %v7656_v24 = vld [vmem:[#allocation72_spill] sm:$0xff] }
 0x252   : > { %v7031_v26 = vadd.f32 %v3481_v16, %v6763_v54  ;;  %v7650_v54 = vld [vmem:[#allocation46_spill] sm:$0xff]  ;;  %v1808_v61 = vmul.f32 %v7651_v41, %v6987_v52  ;;  %v2755_v11 = vmax.f32 %v2751_v49, 0.0  ;;  %v1980_v17 = vmul.f32 %v7653_v63, %v6987_v52 }
 0x253   : > { %v1376_v36 = vadd.f32 %v7650_v54, %v1336_v42  ;;  %v2111_v29 = vadd.f32 %v2107_v56, %v1939_v48  ;;  %v1548_v20 = vadd.f32 %v7652_v12, %v1508_v23  ;;  %v2451_v39 = vmul.f32 %v6596_v32, %v2411_v6  ;;  %v3771_v16 = vpop.permute.xlu1 %3770  ;;  %v7657_v32 = vld [vmem:[#allocation70_spill] sm:$0xff]  ;;  %v7658_v42 = vld [vmem:[#allocation69_spill] sm:$0xff]  ;;  %v7661_v48 = vld [vmem:[#allocation87_spill] sm:$0xff] }
 0x254   : > { %v1720_v8 = vadd.f32 %v7654_v57, %v1680_v22  ;;  %v1852_v33 = vadd.f32 %v6837_v40, %v1808_v61  ;;  %v2795_v10 = vmul.f32 %v6982_v45, %v2755_v11  ;;  %v2024_v56 = vadd.f32 %v6851_v9, %v1980_v17  ;;  %v7057_v44 = vpop.permute.xlu0 %3350  ;;  %v7660_v45 = vld [vmem:[#allocation89_spill] sm:$0xff] }
 0x255   : > { %v1380_v0 = vmax.f32 %v1376_v36, 0.0  ;;  %v2283_v55 = vadd.f32 %v2279_v15, %v2111_v29  ;;  %v1552_v2 = vmax.f32 %v1548_v20, 0.0  ;;  %v2152_v6 = vmul.f32 %v7657_v32, %v6987_v52  ;;  %v7662_v54 = vld [vmem:[#allocation101_spill] sm:$0xff] }
 0x256   : > { %v1724_v43 = vmax.f32 %v1720_v8, 0.0  ;;  %v1892_v5 = vadd.f32 %v7656_v24, %v1852_v33  ;;  %v2064_v15 = vadd.f32 %v7659_v25, %v2024_v56  ;;  %v2324_v60 = vmul.f32 %v7660_v45, %v6987_v52  ;;  %v7663_v20 = vld [vmem:[#allocation97_spill] sm:$0xff] }
 0x257   : > { %v1420_v21 = vmul.f32 %v7655_v46, %v1380_v0  ;;  %v2455_v35 = vadd.f32 %v2451_v39, %v2283_v55  ;;  %v1592_v40 = vmul.f32 %v7658_v42, %v1552_v2  ;;  %v2196_v23 = vadd.f32 %v6867_v3, %v2152_v6  ;;  %v3259_v22 = vpop.permute.xlu1 %3258  ;;  %v7664_v39 = vld [vmem:[#allocation115_spill] sm:$0xff]  ;;  %v7667_v2 = vld [vmem:[#allocation110_spill] sm:$0xff]  ;;  %v7669_v32 = vld [vmem:[#allocation113_spill] sm:$0xff] }
 0x258   : > { %v1764_v9 = vmul.f32 %v7661_v48, %v1724_v43  ;;  %v1896_v49 = vmax.f32 %v1892_v5, 0.0  ;;  %v2496_v36 = vmul.f32 %v7662_v54, %v6987_v52  ;;  %v2068_v29 = vmax.f32 %v2064_v15, 0.0  ;;  %v7072_v12 = vpop.permute.xlu0 %3470  ;;  %v7665_v3 = vld [vmem:[#allocation19_spill] sm:$0xff]  ;;  %v7670_v42 = vld [vmem:[#allocation120_spill] sm:$0xff]  ;;  %v7671_v25 = vld [vmem:[#allocation125_spill] sm:$0xff] }
 0x259   : > { %v2627_v41 = vadd.f32 %v2623_v30, %v2455_v35  ;;  %v1596_v61 = vadd.f32 %v1592_v40, %v1420_v21  ;;  %v2368_v11 = vadd.f32 %v6877_v28, %v2324_v60  ;;  %v2236_v63 = vadd.f32 %v7663_v20, %v2196_v23  ;;  %v7666_v30 = vld [vmem:[#allocation99_spill] sm:$0xff] }
 0x25a   : > { %v2540_v17 = vadd.f32 %v6890_v13, %v2496_v36  ;;  %v2668_v0 = vmul.f32 %v7664_v39, %v6987_v52  ;;  %v1718_v57 = vadd.f32 %v7665_v3, %v6942_v59  ;;  %v1936_v55 = vmul.f32 %v7666_v30, %v1896_v49  ;;  %v7668_v46 = vld [vmem:[#allocation123_spill] sm:$0xff]  ;;  %v7680_v30 = vld [vmem:[#allocation53_spill] sm:$0xff] }
 0x25b   : > { %v7080_v8 = vadd.f32 %v2795_v10, %v2627_v41  ;;  %v1768_v33 = vadd.f32 %v1764_v9, %v1596_v61  ;;  %v2408_v56 = vadd.f32 %v7667_v2, %v2368_v11  ;;  %v2240_v28 = vmax.f32 %v2236_v63, 0.0  ;;  %v7089_v24 = vpop.permute.xlu1 %3558  ;;  %v7672_v61 = vld [vmem:[#allocation28_spill] sm:$0xff]  ;;  %v7676_v63 = vld [vmem:[#allocation54_spill] sm:$0xff] }
 0x25c   : > { %v2580_v21 = vadd.f32 %v7668_v46, %v2540_v17  ;;  %v2712_v43 = vadd.f32 %v6902_v1, %v2668_v0  ;;  %v7087_v13 = vadd.f32 %v3771_v16, %v6937_v37  ;;  %v2108_v59 = vmul.f32 %v7669_v32, %v2068_v29  ;;  %v7094_v35 = vpop.permute.xlu0 %2958  ;;  %v7673_v29 = vld [vmem:[#allocation32_spill] sm:$0xff]  ;;  %v7677_v17 = vld [vmem:[#allocation41_spill] sm:$0xff] }
 0x25d   : > { %v1940_v5 = vadd.f32 %v1936_v55, %v1768_v33  ;;  %v2412_v10 = vmax.f32 %v2408_v56, 0.0  ;;  %v3183_v6 = vmul.f32 %v6747_v62, %v6961_v27  ;;  %v7098_v40 = vmul.f32 %v7670_v42, %v6548_v19  ;;  %v7678_v0 = vld [vmem:[#allocation37_spill] sm:$0xff]  ;;  %v7679_v33 = vld [vmem:[#allocation55_spill] sm:$0xff]  ;;  %v7685_v32 = vld [vmem:[#allocation136_spill] sm:$0xff] }
 0x25e   : > { %v2280_v1 = vmul.f32 %v7671_v25, %v2240_v28  ;;  %v2584_v15 = vmax.f32 %v2580_v21, 0.0  ;;  %v2752_v37 = vadd.f32 %v6642_v14, %v2712_v43  ;;  %v1378_v48 = vmax.f32 %v7003_v58, 0.0  ;;  %v7681_v56 = vld [vmem:[#allocation61_spill] sm:$0xff]  ;;  %v7682_v28 = vld [vmem:[#allocation63_spill] sm:$0xff]  ;;  %v7684_v43 = vld [vmem:[#allocation50_spill] sm:$0xff] }
 0x25f   : > { %v2112_v16 = vadd.f32 %v2108_v59, %v1940_v5  ;;  %v2452_v45 = vmul.f32 %v6661_v51, %v2412_v10  ;;  %v3227_v60 = vadd.f32 %v6732_v4, %v3183_v6  ;;  %v1550_v49 = vmax.f32 %v7011_v38, 0.0  ;;  %v7107_v54 = vpop.permute.xlu1 %3938  ;;  %v7674_v4 = vld [vmem:[#allocation124_spill] sm:$0xff]  ;;  %v7675_v38 = vld [vmem:[#allocation27_spill] sm:$0xff]  ;;  %v7683_v21 = vld [vmem:[#allocation45_spill] sm:$0xff] }
 0x260   : > { %v2624_v62 = vmul.f32 %v6791_v34, %v2584_v15  ;;  %v2756_v9 = vmax.f32 %v2752_v37, 0.0  ;;  %v1722_v23 = vmax.f32 %v1718_v57, 0.0  ;;  %v1418_v14 = vmul.f32 %v7672_v61, %v1378_v48  ;;  %v7114_v11 = vpop.permute.xlu0 %3518  ;;  %v7686_v42 = vld [vmem:[#allocation60_spill] sm:$0xff]  ;;  %v7689_v48 = vld [vmem:[#allocation21_spill] sm:$0xff] }
 0x261   : > { %v2284_v36 = vadd.f32 %v2280_v1, %v2112_v16  ;;  %v7109_v41 = vadd.f32 %v3259_v22, %v3227_v60  ;;  %v1890_v51 = vadd.f32 %v7673_v29, %v6945_v53  ;;  %v7118_v58 = vmul.f32 %v7674_v4, %v6548_v19  ;;  %v7687_v37 = vld [vmem:[#allocation48_spill] sm:$0xff] }
 0x262   : > { %v2796_v34 = vmul.f32 %v7040_v18, %v2756_v9  ;;  %v1590_v20 = vmul.f32 %v7675_v38, %v1550_v49  ;;  %v2062_v39 = vadd.f32 %v7677_v17, %v7676_v63  ;;  %v1762_v3 = vmul.f32 %v7678_v0, %v1722_v23  ;;  %v7693_v38 = vld [vmem:[#allocation75_spill] sm:$0xff]  ;;  %v7694_v63 = vld [vmem:[#allocation93_spill] sm:$0xff] }
 0x263   : > { %v2456_v22 = vadd.f32 %v2452_v45, %v2284_v36  ;;  %v1894_v57 = vmax.f32 %v1890_v51, 0.0  ;;  %v2234_v53 = vadd.f32 %v7680_v30, %v7679_v33  ;;  %v2406_v46 = vadd.f32 %v7682_v28, %v7681_v56  ;;  %v7131_v5 = vpop.permute.xlu1 %3262  ;;  %v7688_v45 = vld [vmem:[#allocation58_spill] sm:$0xff]  ;;  %v7690_v36 = vld [vmem:[#allocation24_spill] sm:$0xff]  ;;  %v7692_v51 = vld [vmem:[#allocation73_spill] sm:$0xff] }
 0x264   : > { %v1594_v55 = vadd.f32 %v1590_v20, %v1418_v14  ;;  %v2066_v2 = vmax.f32 %v2062_v39, 0.0  ;;  %v2494_v18 = vmul.f32 %v7684_v43, %v7683_v21  ;;  %v3613_v59 = vmax.f32 %v7685_v32, 0.0  ;;  %v3639_v1 = vpop.permute.xlu0 %3638  ;;  %v7691_v14 = vld [vmem:[#allocation81_spill] sm:$0xff]  ;;  %v7698_v30 = vld [vmem:[#allocation119_spill] sm:$0xff] }
 0x265   : > { %v2628_v10 = vadd.f32 %v2624_v62, %v2456_v22  ;;  %v2238_v6 = vmax.f32 %v2234_v53, 0.0  ;;  %v2666_v25 = vmul.f32 %v7686_v42, %v7683_v21  ;;  %v1934_v16 = vmul.f32 %v7687_v37, %v1894_v57  ;;  %v7695_v22 = vld [vmem:[#allocation88_spill] sm:$0xff]  ;;  %v7697_v57 = vld [vmem:[#allocation105_spill] sm:$0xff]  ;;  %v7702_v42 = vld [vmem:[#allocation35_spill] sm:$0xff] }
 0x266   : > { %v1766_v15 = vadd.f32 %v1762_v3, %v1594_v55  ;;  %v2106_v60 = vmul.f32 %v7688_v45, %v2066_v2  ;;  %v2538_v9 = vadd.f32 %v7689_v48, %v2494_v18  ;;  %v2410_v23 = vmax.f32 %v2406_v46, 0.0  ;;  %v7696_v3 = vld [vmem:[#allocation30_spill] sm:$0xff]  ;;  %v7699_v28 = vld [vmem:[#allocation33_spill] sm:$0xff]  ;;  %v7700_v18 = vld [vmem:[#allocation91_spill] sm:$0xff] }
 0x267   : > { %v7139_v49 = vadd.f32 %v2796_v34, %v2628_v10  ;;  %v2710_v61 = vadd.f32 %v7690_v36, %v2666_v25  ;;  %v2838_v62 = vmul.f32 %v7691_v14, %v7683_v21  ;;  %v2278_v4 = vmul.f32 %v7692_v51, %v2238_v6  ;;  %v3563_v39 = vpop.permute.xlu1 %3562  ;;  %v7701_v10 = vld [vmem:[#allocation100_spill] sm:$0xff]  ;;  %v7704_v48 = vld [vmem:[#allocation114_spill] sm:$0xff] }
 0x268   : > { %v1938_v29 = vadd.f32 %v1934_v16, %v1766_v15  ;;  %v2578_v20 = vadd.f32 %v7693_v38, %v2538_v9  ;;  %v3010_v17 = vmul.f32 %v7694_v63, %v7683_v21  ;;  %v3182_v33 = vmul.f32 %v7697_v57, %v7683_v21  ;;  %v7154_v55 = vpop.permute.xlu0 %2962  ;;  %v7703_v15 = vld [vmem:[#allocation111_spill] sm:$0xff] }
 0x269   : > { %v2750_v0 = vadd.f32 %v7695_v22, %v2710_v61  ;;  %v2882_v34 = vadd.f32 %v7696_v3, %v2838_v62  ;;  %v3354_v53 = vmul.f32 %v7698_v30, %v7683_v21  ;;  %v7159_v43 = vmul.f32 %v7089_v24, %v6548_v19  ;;  %v7708_v63 = vld [vmem:[#allocation103_spill] sm:$0xff]  ;;  %v7709_v22 = vld [vmem:[#allocation138_spill] sm:$0xff]  ;;  %v7710_v30 = vld [vmem:[#allocation117_spill] sm:$0xff] }
 0x26a   : > { %v2110_v2 = vadd.f32 %v2106_v60, %v1938_v29  ;;  %v2582_v56 = vmax.f32 %v2578_v20, 0.0  ;;  %v3054_v46 = vadd.f32 %v7699_v28, %v3010_v17  ;;  %v2450_v32 = vmul.f32 %v7700_v18, %v2410_v23  ;;  %v7705_v60 = vld [vmem:[#allocation122_spill] sm:$0xff]  ;;  %v7707_v29 = vld [vmem:[#allocation133_spill] sm:$0xff] }
 0x26b   : > { %v2922_v6 = vadd.f32 %v7701_v10, %v2882_v34  ;;  %v3226_v25 = vadd.f32 %v7702_v42, %v3182_v33  ;;  %v3398_v37 = vadd.f32 %v7703_v15, %v3354_v53  ;;  %v2754_v45 = vmax.f32 %v2750_v0, 0.0  ;;  %v7168_v61 = vpop.permute.xlu1 %3942  ;;  %v7706_v23 = vld [vmem:[#allocation126_spill] sm:$0xff] }
 0x26c   : > { %v2282_v16 = vadd.f32 %v2278_v4, %v2110_v2  ;;  %v3094_v9 = vadd.f32 %v7704_v48, %v3054_v46  ;;  %v2839_v36 = vmul.f32 %v7705_v60, %v6961_v27  ;;  %v3355_v24 = vmul.f32 %v7000_v47, %v6961_v27  ;;  %v3523_v38 = vpop.permute.xlu0 %3522  ;;  %v7711_v2 = vld [vmem:[#allocation129_spill] sm:$0xff]  ;;  %v7712_v46 = vld [vmem:[#allocation135_spill] sm:$0xff]  ;;  %v7714_v10 = vld [vmem:[#allocation22_spill] sm:$0xff] }
 0x26d   : > { %v2926_v14 = vmax.f32 %v2922_v6, 0.0  ;;  %v3266_v62 = vadd.f32 %v7706_v23, %v3226_v25  ;;  %v3438_v51 = vadd.f32 %v7707_v29, %v3398_v37  ;;  %v2622_v4 = vmul.f32 %v7708_v63, %v2582_v56  ;;  %v7716_v48 = vld [vmem:[#allocation134_spill] sm:$0xff]  ;;  %v7717_v60 = vld [vmem:[#allocation139_spill] sm:$0xff]  ;;  %v7718_v23 = vld [vmem:[#allocation109_spill] sm:$0xff] }
 0x26e   : > { %v2454_v20 = vadd.f32 %v2450_v32, %v2282_v16  ;;  %v2883_v17 = vadd.f32 %v7098_v40, %v2839_v36  ;;  %v7178_v0 = vadd.f32 %v7107_v54, %v7709_v22  ;;  %v3356_v3 = vmul.f32 %v7057_v44, %v6987_v52  ;;  %v7713_v40 = vld [vmem:[#allocation43_spill] sm:$0xff]  ;;  %v7721_v63 = vld [vmem:[#allocation128_spill] sm:$0xff]  ;;  %v7722_v22 = vld [vmem:[#allocation130_spill] sm:$0xff] }
 0x26f   : > { %v3098_v34 = vmax.f32 %v3094_v9, 0.0  ;;  %v3270_v47 = vmax.f32 %v3266_v62, 0.0  ;;  %v3442_v57 = vmax.f32 %v3438_v51, 0.0  ;;  %v2794_v53 = vmul.f32 %v7710_v30, %v2754_v45  ;;  %v7185_v56 = vpop.permute.xlu1 %3430  ;;  %v7715_v16 = vld [vmem:[#allocation127_spill] sm:$0xff]  ;;  %v7720_v51 = vld [vmem:[#allocation65_spill] sm:$0xff] }
 0x270   : > { %v2626_v33 = vadd.f32 %v2622_v4, %v2454_v20  ;;  %v2966_v28 = vmul.f32 %v7711_v2, %v2926_v14  ;;  %v2923_v18 = vadd.f32 %v7712_v46, %v2883_v17  ;;  %v3184_v6 = vmul.f32 %v7714_v10, %v6987_v52  ;;  %v3643_v42 = vpop.permute.xlu0 %3642  ;;  %v7724_v30 = vld [vmem:[#allocation131_spill] sm:$0xff]  ;;  %v7726_v10 = vld [vmem:[#allocation20_spill] sm:$0xff] }
 0x271   : > { %v3310_v32 = vmul.f32 %v7713_v40, %v3270_v47  ;;  %v3482_v54 = vmul.f32 %v7072_v12, %v3442_v57  ;;  %v3653_v44 = vmul.f32 %v3639_v1, %v3613_v59  ;;  %v3568_v37 = vmul.f32 %v3563_v39, %v6548_v19  ;;  %v7719_v12 = vld [vmem:[#allocation39_spill] sm:$0xff]  ;;  %v7723_v57 = vld [vmem:[#allocation137_spill] sm:$0xff] }
 0x272   : > { %v2798_v25 = vadd.f32 %v2794_v53, %v2626_v33  ;;  %v2927_v15 = vmax.f32 %v2923_v18, 0.0  ;;  %v2840_v45 = vmul.f32 %v7715_v16, %v6987_v52  ;;  %v3138_v9 = vmul.f32 %v7716_v48, %v3098_v34  ;;  %v7727_v48 = vld [vmem:[#allocation51_spill] sm:$0xff] }
 0x273   : > { %v3228_v36 = vadd.f32 %v7717_v60, %v3184_v6  ;;  %v3657_v14 = vadd.f32 %v3653_v44, %v7031_v26  ;;  %v3914_v62 = vadd.f32 %v7719_v12, %v7718_v23  ;;  %v7202_v20 = vadd.f32 %v7720_v51, %v3355_v24  ;;  %v7204_v39 = vpop.permute.xlu1 %3730 }
 0x274   : > { %v2970_v29 = vadd.f32 %v2966_v28, %v2798_v25  ;;  %v2967_v59 = vmul.f32 %v7094_v35, %v2927_v15  ;;  %v2884_v1 = vadd.f32 %v7118_v58, %v2840_v45  ;;  %v3566_v4 = vmul.f32 %v7721_v63, %v6548_v19  ;;  %v3131_v47 = vpop.permute.xlu0 %3130  ;;  %v7725_v28 = vld [vmem:[#allocation132_spill] sm:$0xff] }
 0x275   : > { %v3527_v17 = vmul.f32 %v7114_v11, %v6961_v27  ;;  %v3268_v26 = vadd.f32 %v7131_v5, %v3228_v36  ;;  %v3526_v34 = vmul.f32 %v7722_v22, %v7683_v21  ;;  %v3528_v33 = vmul.f32 %v3523_v38, %v6987_v52 }
 0x276   : > { %v3142_v35 = vadd.f32 %v3138_v9, %v2970_v29  ;;  %v2971_v58 = vadd.f32 %v2967_v59, %v7080_v8  ;;  %v2924_v24 = vadd.f32 %v7723_v57, %v2884_v1  ;;  %v3051_v53 = vmul.f32 %v7724_v30, %v6548_v19 }
 0x277   : > { %v3570_v2 = vadd.f32 %v3566_v4, %v3526_v34  ;;  %v3011_v11 = vmul.f32 %v7725_v28, %v6961_v27  ;;  %v3100_v5 = vmax.f32 %v7043_v31, 0.0  ;;  %v3135_v21 = vpop.permute.xlu1 %3134  ;;  %v3400_v40 = vadd.f32 %v7038_v50, %v3356_v3 }
 0x278   : > { %v3314_v46 = vadd.f32 %v3310_v32, %v3142_v35  ;;  %v2928_v18 = vmax.f32 %v2924_v24, 0.0  ;;  %v7223_v44 = vpop.permute.xlu0 %3690  ;;  %v3571_v38 = vadd.f32 %v7159_v43, %v3527_v17  ;;  %v3572_v16 = vadd.f32 %v3568_v37, %v3528_v33 }
 0x279   : > { %v3610_v8 = vadd.f32 %v7726_v10, %v3570_v2  ;;  %v3055_v6 = vadd.f32 %v3051_v53, %v3011_v11  ;;  %v3140_v15 = vmul.f32 %v3135_v21, %v3100_v5  ;;  %v3785_v32 = vmax.f32 %v7016_v7, 0.0 }
 0x27a   : > { %v3486_v25 = vadd.f32 %v3482_v54, %v3314_v46  ;;  %v2968_v19 = vmul.f32 %v7154_v55, %v2928_v18  ;;  %v3786_v43 = vmax.f32 %v7087_v13, 0.0  ;;  %v3272_v34 = vmax.f32 %v3268_v26, 0.0 }
 0x27b   : > { %v3614_v45 = vmax.f32 %v3610_v8, 0.0  ;;  %v3095_v31 = vadd.f32 %v7727_v48, %v3055_v6  ;;  %v3695_v50 = vpop.permute.xlu1 %3694  ;;  %v3439_v26 = vadd.f32 %v7185_v56, %v7202_v20  ;;  %v5227_v48 = vld [vmem:[%s6537_s19] sm:$0xff]  ;;  %s5297_s19 = smov 96  }
 0x27c   : > { %v2972_v9 = vadd.f32 %v2968_v19, %v7139_v49  ;;  %v3811_v36 = vpop.permute.xlu0 %3810  ;;  %v3271_v49 = vmax.f32 %v7109_v41, 0.0 }
 0x27d   : > { %v3654_v3 = vmul.f32 %v3643_v42, %v3614_v45  ;;  %v3099_v60 = vmax.f32 %v3095_v31, 0.0  ;;  %v3825_v12 = vmul.f32 %v3811_v36, %v3785_v32  ;;  %v3443_v10 = vmax.f32 %v3439_v26, 0.0 }
 0x27e   : > { %v3144_v23 = vadd.f32 %v3140_v15, %v2972_v9 }
 0x27f   : > { %v3658_v54 = vadd.f32 %v3654_v3, %v3486_v25  ;;  %v3139_v29 = vmul.f32 %v3131_v47, %v3099_v60  ;;  %v3829_v55 = vadd.f32 %v3825_v12, %v3657_v14  ;;  %v3815_v59 = vpop.permute.xlu1 %3814  ;;  %v3954_v47 = vadd.f32 %v7168_v61, %v3914_v62 }
 0x280   : > { %v3826_v1 = vmul.f32 %v3815_v59, %v3786_v43  ;;  %v3435_v51 = vpop.permute.xlu0 %3434  ;;  %v3700_v3 = vmul.f32 %v3695_v50, %v6987_v52 }
 0x281   : > { %v3143_v37 = vadd.f32 %v3139_v29, %v2971_v58  ;;  %v3957_v58 = vmax.f32 %v7178_v0, 0.0  ;;  %v3958_v2 = vmax.f32 %v3954_v47, 0.0  ;;  %v3440_v61 = vadd.f32 %v3435_v51, %v3400_v40 }
 0x282   : > { %v3830_v63 = vadd.f32 %v3826_v1, %v3658_v54  ;;  %v3739_v29 = vmul.f32 %v5227_v48, %v7204_v39 }
 0x283   : > { %v3603_v4 = vpop.permute.xlu1 %3602  ;;  %v3444_v25 = vmax.f32 %v3440_v61, 0.0 }
 0x284   : > { %v3735_v7 = vpop.permute.xlu0 %3734  ;;  %v3611_v19 = vadd.f32 %v3603_v4, %v3571_v38 }
 0x285   : > { %v3740_v31 = vmul.f32 %v5227_v48, %v3735_v7 }
 0x286   : > { %v3615_v56 = vmax.f32 %v3611_v19, 0.0 }
 0x287   : > { %v3903_v17 = vpop.permute.xlu1 %3902 }
 0x288   : > { %v3303_v42 = vpop.permute.xlu0 %3302 }
 0x289   : > { %v3311_v22 = vmul.f32 %v3303_v42, %v3271_v49 }
 0x28b   : > { %v3315_v35 = vadd.f32 %v3311_v22, %v3143_v37  ;;  %v3307_v57 = vpop.permute.xlu1 %3306 }
 0x28c   : > { %v3312_v24 = vmul.f32 %v3307_v57, %v3272_v34  ;;  %v3863_v13 = vpop.permute.xlu0 %3862 }
 0x28d   : > { %v3871_v51 = vmul.f32 %v3863_v13, %v6961_v27 }
 0x28e   : > { %v3316_v14 = vadd.f32 %v3312_v24, %v3144_v23  ;;  %v3744_v23 = vadd.f32 %v3740_v31, %v3700_v3 }
 0x28f   : > { %v3867_v33 = vpop.permute.xlu1 %3866 }
 0x290   : > { %v3983_v30 = vpop.permute.xlu0 %3982 }
 0x291   : > { %v3997_v53 = vmul.f32 %v3983_v30, %v3957_v58 }
 0x293   : > { %v3987_v28 = vpop.permute.xlu1 %3986  ;;  %v4001_v11 = vadd.f32 %v3997_v53, %v3829_v55 }
 0x294   : > { %v3998_v41 = vmul.f32 %v3987_v28, %v3958_v2  ;;  %v3607_v5 = vpop.permute.xlu0 %3606 }
 0x295   : > { %v3612_v6 = vadd.f32 %v3607_v5, %v3572_v16  ;;  %v3699_v16 = vmul.f32 %v7223_v44, %v6961_v27  ;;  %v3911_v44 = vmul.f32 %v5227_v48, %v3903_v17 }
 0x296   : > { %v4002_v46 = vadd.f32 %v3998_v41, %v3830_v63  ;;  %v3872_v63 = vmul.f32 %v3867_v33, %v6987_v52 }
 0x297   : > { %v3775_v18 = vpop.permute.xlu1 %3774  ;;  %v3616_v60 = vmax.f32 %v3612_v6, 0.0  ;;  %v3743_v4 = vadd.f32 %v3739_v29, %v3699_v16  ;;  %v3915_v47 = vadd.f32 %v3911_v44, %v3871_v51 }
 0x298   : > { %v3907_v21 = vpop.permute.xlu0 %3906 }
 0x299   : > { %v3912_v55 = vmul.f32 %v5227_v48, %v3907_v21  ;;  %v3783_v22 = vadd.f32 %v3775_v18, %v3743_v4 }
 0x29b   : > { %v3779_v62 = vpop.permute.xlu1 %3778  ;;  %v3787_v13 = vmax.f32 %v3783_v22, 0.0 }
 0x29c   : > { %v3475_v8 = vpop.permute.xlu0 %3474  ;;  %v3784_v38 = vadd.f32 %v3779_v62, %v3744_v23  ;;  %v7728_v62 = vld [vmem:[#allocation34_spill] sm:$0xff] }
 0x29d   : > { %v3483_v0 = vmul.f32 %v3475_v8, %v3443_v10 }
 0x29e   : > { %v3788_v49 = vmax.f32 %v3784_v38, 0.0 }
 0x29f   : > { %v3487_v15 = vadd.f32 %v3483_v0, %v3315_v35  ;;  %v3947_v45 = vpop.permute.xlu1 %3946  ;;  %v3916_v35 = vadd.f32 %v3912_v55, %v3872_v63  ;;  %v7730_v55 = vld [vmem:[#allocation77_spill] sm:$0xff] }
 0x2a0   : > { %v3479_v32 = vpop.permute.xlu0 %3478  ;;  %v3955_v52 = vadd.f32 %v3947_v45, %v3915_v47 }
 0x2a1   : > { %v3484_v9 = vmul.f32 %v3479_v32, %v3444_v25  ;;  %v7729_v32 = vmov 0.0  }
 0x2a2   : > { %v3959_v17 = vmax.f32 %v3955_v52, 0.0 }
 0x2a3   : > { %v3488_v20 = vadd.f32 %v3484_v9, %v3316_v14  ;;  %v3651_v36 = vpop.permute.xlu1 %3650 }
 0x2a4   : > { %v3656_v40 = vmul.f32 %v3651_v36, %v3616_v60  ;;  %v3647_v12 = vpop.permute.xlu0 %3646 }
 0x2a5   : > { %v3655_v43 = vmul.f32 %v3647_v12, %v3615_v56 }
 0x2a6   : > { %v3660_v54 = vadd.f32 %v3656_v40, %v3488_v20 }
 0x2a7   : > { %v3659_v59 = vadd.f32 %v3655_v43, %v3487_v15  ;;  %v4035_v37 = vpop.permute.xlu1 %4034 }
 0x2a8   : > { %v4046_v1 = vadd.f32 %v4035_v37, %v4002_v46  ;;  %v4031_v50 = vpop.permute.xlu0 %4030  ;;  %v7732_v37 = vld [vmem:[#allocation76_spill] sm:$0xff] }
 0x2a9   : > { %v4045_v7 = vadd.f32 %v4031_v50, %v4001_v11 }
 0x2aa   : > { %v4052_v42 = vsel %vm811_vm2, %v4046_v1, -inf }
 0x2ab   : > { %v3823_v34 = vpop.permute.xlu1 %3822  ;;  %v4049_v39 = vsel %vm811_vm2, %v4045_v7, -inf  ;;  %4053 = vmax.xlane.f32.xlu1 %v4052_v42 }
 0x2ac   : > { %v3828_v57 = vmul.f32 %v3823_v34, %v3788_v49  ;;  %v3951_v24 = vpop.permute.xlu0 %3950  ;;  %4050 = vmax.xlane.f32.xlu0 %v4049_v39 }
 0x2ad   : > { %v3956_v14 = vadd.f32 %v3951_v24, %v3916_v35 }
 0x2ae   : > { %v3832_v27 = vadd.f32 %v3828_v57, %v3660_v54 }
 0x2af   : > { %v3960_v58 = vmax.f32 %v3956_v14, 0.0  ;;  %v3995_v33 = vpop.permute.xlu1 %3994 }
 0x2b0   : > { %v3819_v30 = vpop.permute.xlu0 %3818 }
 0x2b1   : > { %v4000_v53 = vmul.f32 %v3995_v33, %v3960_v58  ;;  %v3827_v2 = vmul.f32 %v3819_v30, %v3787_v13 }
 0x2b3   : > { %v3831_v28 = vadd.f32 %v3827_v2, %v3659_v59  ;;  %v4004_v11 = vadd.f32 %v4000_v53, %v3832_v27  ;;  %v4043_v26 = vpop.permute.xlu1 %4042  ;;  %v7731_v59 = vld [vmem:[#allocation78_spill] sm:$0xff] }
 0x2b4   : > { %v3991_v41 = vpop.permute.xlu0 %3990 }
 0x2b5   : > { %v3999_v5 = vmul.f32 %v3991_v41, %v3959_v17  ;;  %v4048_v10 = vadd.f32 %v4043_v26, %v4004_v11  ;;  %v5199_v17 = vld [vmem:[%s7385_s10 + $0x8] sm:$0xff]   ;;  %v5200_v11 = vld [vmem:[%s7385_s10] sm:$0xff]  }
 0x2b7   : > { %v4003_v46 = vadd.f32 %v3999_v5, %v3831_v28  ;;  %v4058_v8 = vsel %vm811_vm2, %v4048_v10, -inf }
 0x2b8   : > { %v4039_v18 = vpop.permute.xlu0 %4038 }
 0x2b9   : > { %v4047_v21 = vadd.f32 %v4039_v18, %v4003_v46 }
 0x2bb   : > { %v4055_v61 = vsel %vm811_vm2, %v4047_v21, -inf }
 0x2bc   : > { %4056 = vmax.xlane.f32.xlu0 %v4055_v61  ;;  %4098 = vrot.lane.b32.xlu1 %v7728_v62, %s5297_s19 }
 0x2c0   : > { %4059 = vmax.xlane.f32.xlu0 %v4058_v8 }
 0x334   : > { %v4054_v0 = vpop.xlane.xlu1 %4053 }
 0x335   : > { %v4051_v6 = vpop.xlane.xlu0 %4050  ;;  %v4062_v25 = vsub.f32 %v4046_v1, %v4054_v0 }
 0x336   : > { %v4061_v19 = vsub.f32 %v4045_v7, %v4051_v6 }
 0x337   : > { %v4067_v15 = vmul.f32 1.442695, %v4062_v25 }
 0x338   : > { %v4065_v45 = vmul.f32 1.442695, %v4061_v19  ;;  %v4099_v48 = vpop.permute.xlu1 %4098 }
 0x339   : > { %5207 = vpow2.f32 %v4067_v15  ;;  %v4105_v31 = vsel %vm4103_vm3, %v4099_v48, 0 }
 0x33a   : > { %5209 = vpow2.f32 %v4065_v45  ;;  %5078 = vmatpush3.bf16.msra.mxu0 %v4105_v31 }
 0x33b   : > { %5089 = vmatprep.subr.bf16.mxu0 %v7729_v32 }
 0x345   : > { %v4057_v9 = vpop.xlane.xlu0 %4056 }
 0x346   : > { %v5208_v3 = vpop.eup %5207  ;;  %v4063_v60 = vsub.f32 %v4047_v21, %v4057_v9 }
 0x347   : > { %v5210_v56 = vpop.eup %5209  ;;  %v4076_v20 = vsel %vm811_vm2, %v5208_v3, 0.0 }
 0x348   : > { %v4069_v36 = vmul.f32 1.442695, %v4063_v60  ;;  %v4073_v23 = vsel %vm811_vm2, %v5210_v56, 0.0  ;;  %4077 = vadd.xlane.f32.xlu0 %v4076_v20  ;;  %v5202_v60 = vld [vmem:[%s7389_s14] sm:$0xff]   ;;  %v5204_v20 = vld [vmem:[%s7391_s16 + $0x10] sm:$0xff]  }
 0x349   : > { %4074 = vadd.xlane.f32.xlu1 %v4073_v23  ;;  %v4060_v40 = vpop.xlane.xlu0 %4059 }
 0x34a   : > { %5211 = vpow2.f32 %v4069_v36  ;;  %v4064_v12 = vsub.f32 %v4048_v10, %v4060_v40  ;;  %v4987_v36 = vld [vmem:[%s7386_s11] ss:$0 sm:$0xff] }
 0x34c   : > { %v4071_v16 = vmul.f32 1.442695, %v4064_v12 }
 0x34e   : > { %5213 = vpow2.f32 %v4071_v16  ;;  %v5228_v16 = vld [vmem:[%s5494_s29] sm:$0xff] }
 0x357   : > { %v5212_v43 = vpop.eup %5211 }
 0x358   : > { %v4079_v38 = vsel %vm811_vm2, %v5212_v43, 0.0 }
 0x359   : > { %4080 = vadd.xlane.f32.xlu1 %v4079_v38 }
 0x35b   : > { %v5214_v54 = vpop.eup %5213 }
 0x35c   : > { %v4082_v29 = vsel %vm811_vm2, %v5214_v54, 0.0 }
 0x35d   : > { %4083 = vadd.xlane.f32.xlu0 %v4082_v29 }
 0x36a   : > { %4197 = vrot.lane.b32.xlu1 %v7730_v55, %s5297_s19 }
 0x36e   : > { %4246 = vrot.lane.b32.xlu1 %v7731_v59, %s5297_s19 }
 0x373   : > { %4148 = vrot.lane.b32.xlu0 %v7732_v37, %s5297_s19 }
 0x3d1   : > { %v4078_v50 = vpop.xlane.xlu0 %4077 }
 0x3d2   : > { %v4075_v1 = vpop.xlane.xlu1 %4074 }
 0x3d3   : > { %5215 = vrcp.f32 %v4075_v1 }
 0x3d4   : > { %5217 = vrcp.f32 %v4078_v50 }
 0x3e0   : > { %v5216_v51 = vpop.eup %5215 }
 0x3e1   : > { %v4089_v63 = vmul.f32 %v5216_v51, %v5210_v56  ;;  %v5218_v49 = vpop.eup %5217  ;;  %v5203_v56 = vld [vmem:[%s7391_s16 + $0x18] sm:$0xff]  }
 0x3e2   : > { %v4081_v4 = vpop.xlane.xlu1 %4080  ;;  %v4090_v34 = vmul.f32 %v5218_v49, %v5208_v3  ;;  %v5201_v3 = vld [vmem:[%s7389_s14 + $0x8] sm:$0xff]  }
 0x3e3   : > { %5219 = vrcp.f32 %v4081_v4  ;;  %v4093_v7 = vpack.c.bf16 %v4089_v63, %v4089_v63 }
 0x3e4   : > { %v4094_v24 = vpack.c.bf16 %v4090_v34, %v4090_v34 }
 0x3e5   : > { %5080 = vmatmul.mubr.msk.bf16.vlgmr.msra.gmra.mxu0 %vm811_vm2, %v4093_v7 }
 0x3e6   : > { %v4198_v42 = vpop.permute.xlu1 %4197  ;;  %v4084_v44 = vpop.xlane.xlu0 %4083  ;;  %5091 = vmatprep.mubr.msk.bf16.mxu0 %vm5293_vm0, %v7729_v32 }
 0x3e7   : > { %v4203_v22 = vsel %vm4103_vm3, %v4198_v42, 0  ;;  %5221 = vrcp.f32 %v4084_v44 }
 0x3e8   : > { %5090 = vmatpush3.bf16.msra.mxu0 %v4203_v22 }
 0x3e9   : > { %5101 = vmatprep.subr.bf16.mxu0 %v7729_v32 }
 0x3ea   : > { %v4149_v35 = vpop.permute.xlu0 %4148  ;;  %v4247_v57 = vpop.permute.xlu1 %4246 }
 0x3eb   : > { %v4154_v39 = vsel %vm4103_vm3, %v4149_v35, 0  ;;  %v4252_v47 = vsel %vm4103_vm3, %v4247_v57, 0 }
 0x3ec   : > { %5084 = vmatpush3.bf16.msra.mxu1 %v4154_v39 }
 0x3ed   : > { %5095 = vmatprep.subr.bf16.mxu1 %v7729_v32 }
 0x3ef   : > { %5086 = vmatmul.mubr.msk.bf16.vlgmr.msra.gmra.mxu1 %vm811_vm2, %v4094_v24 }
 0x3f0   : > { %v5220_v14 = vpop.eup %5219  ;;  %5096 = vmatpush3.bf16.msra.mxu1 %v4252_v47  ;;  %5097 = vmatprep.mubr.msk.bf16.mxu1 %vm5293_vm0, %v7729_v32  ;;  %v4403_v47 = vlaneseq }
 0x3f1   : > { %v4091_v27 = vmul.f32 %v5220_v14, %v5212_v43  ;;  %5109 = vmatprep.subr.bf16.mxu1 %v7729_v32 }
 0x3f2   : > { %v4404_v14 = vshrl.u32 %v4403_v47, 7 }
 0x3f3   : > { %v4095_v13 = vpack.c.bf16 %v4091_v27, %v4091_v27  ;;  %v4401_v27 = vld [vmem:[%s7387_s12] sm:$0x1] }
 0x3f4   : > { %v5222_v52 = vpop.eup %5221 }
 0x3f5   : > { %5092 = vmatmul.mubr.msk.bf16.vlgmr.msra.gmra.mxu0 %vm811_vm2, %v4095_v13  ;;  %v4092_v58 = vmul.f32 %v5222_v52, %v5214_v54  ;;  %v4405_v13 = vsub.s32 0, %v4404_v14 }
 0x3f6   : > { %5105 = vmatprep.mubr.msk.bf16.mxu0 %vm5293_vm0, %v7729_v32  ;;  %5102 = vmatpush3.bf16.msra.mxu0 %v5199_v17 }
 0x3f7   : > { %v4096_v33 = vpack.c.bf16 %v4092_v58, %v4092_v58  ;;  %5103 = vmatprep.subr.bf16.mxu0 %v7729_v32 }
 0x3f9   : > { %5098 = vmatmul.mubr.msk.bf16.vlgmr.msra.gmra.mxu1 %vm811_vm2, %v4096_v33 }
 0x3fa   : > { %5113 = vmatprep.mubr.msk.bf16.mxu1 %vm5293_vm0, %v7729_v32  ;;  %5104 = vmatpush3.bf16.msra.mxu0 %v5200_v11  ;;  %v5206_v11 = vld [vmem:[%s7391_s16] sm:$0xff]  }
 0x3fb   : > { %5117 = vmatprep.subr.bf16.mxu0 %v7729_v32  ;;  %5110 = vmatpush3.bf16.msra.mxu1 %v5201_v3 }
 0x3fc   : > { %5111 = vmatprep.subr.bf16.mxu1 %v7729_v32 }
 0x3ff   : > { %5112 = vmatpush3.bf16.msra.mxu1 %v5202_v60 }
 0x4a5   : > { %v4141_v30 = vpop.f32.mrf.mxu0 }
 0x4a7   : > { %v5081_v53 = vpop.f32.mrf.mxu0 }
 0x4a9   : > { %v4144_v2 = vpop.f32.mrf.mxu0 }
 0x4ab   : > { %v5082_v28 = vpop.f32.mrf.mxu0 }
 0x4ac   : > { %v5205_v28 = vld [vmem:[%s7391_s16 + $0x8] sm:$0xff]  }
 0x4af   : > { %v4190_v41 = vpop.f32.mrf.mxu1 }
 0x4b0   : > { %4295 = vrot.lane.b32.xlu0 %v4190_v41, %s5298_s25  ;;  %v4989_v41 = vld [vmem:[%s7390_s15] ss:$0 sm:$0xff]  ;;  %s644_s25 = sand.u32 1, %s5281_s22  }
 0x4b1   : > { %v5087_v5 = vpop.f32.mrf.mxu1  ;;  %s4606_s29 = scalar_lea.sflag [#allocation3], %s644_s25 }
 0x4b3   : > { %v4193_v46 = vpop.f32.mrf.mxu1 }
 0x4b5   : > { %v5088_v26 = vpop.f32.mrf.mxu1  ;;  %v4239_v18 = vpop.f32.mrf.mxu0 }
 0x4b6   : > { %4299 = vrot.lane.b32.xlu1 %v4239_v18, %s5299_s3 }
 0x4b7   : > { %v5093_v21 = vpop.f32.mrf.mxu0 }
 0x4b9   : > { %v4242_v10 = vpop.f32.mrf.mxu0  ;;  %v4288_v61 = vpop.f32.mrf.mxu1 }
 0x4ba   : > { %4303 = vrot.lane.b32.xlu0 %v4288_v61, %s5300_s1  ;;  %s4706_s1 = sshll.u32 %s644_s25, 3 }
 0x4bb   : > { %v5094_v62 = vpop.f32.mrf.mxu0  ;;  %v5099_v8 = vpop.f32.mrf.mxu1  ;;  %s646_s19 = scalar_lea.vmem [#allocation2], %s4706_s1 }
 0x4bc   : > { %v4993_v62 = vld [vmem:[%s7392_s17] ss:$0 sm:$0xff]  ;;  %s4619_s0 = sshll.u32 %s646_s19, 4  ;;  %s4620_s0 = int_to_ptr.vmem [resolvable:$true] %s4619_s0 }
 0x4bd   : > { %v4291_v0 = vpop.f32.mrf.mxu1  ;;  %s5229_s3 = scalar_lea.vmem %s4620_s0, 128  ;;  %p5236_p0 = scmp.lt.s32.totalorder %s4620_s0, %s5234_s23 }
 0x4be   : > { %p5230_p11 = scmp.ne.s32.totalorder %s4620_s0, %s5229_s3  ;;  %p5237_p1 = scmp.lt.s32.totalorder %s5235_s2, %s5229_s3 }
 0x4bf   : > { %v5100_v6 = vpop.f32.mrf.mxu1 }
 0x4c0   : > { %p5231_p12 = pnand %p5230_p11, %p5445_p5  ;;  %p5238_p2 = por %p5237_p1, %p5236_p0 }
 0x4c2   : > { %p5232_p13 = pneg %p5231_p12 }
 0x4c4   : > { %p5239_p3 = pnand %p5238_p2, %p5232_p13 }
 0x522   : > { %v4296_v25 = vpop.permute.xlu0 %4295 }
 0x523   : > { %v4306_v15 = vsel %vm811_vm2, %v4141_v30, %v4296_v25  ;;  %v4988_v30 = vld [vmem:[%s7388_s13] ss:$0 sm:$0xff] }
 0x528   : > { %v4300_v19 = vpop.permute.xlu1 %4299 }
 0x529   : > { %v4308_v45 = vsel %vm4307_vm4, %v4306_v15, %v4300_v19 }
 0x52c   : > { %v4304_v48 = vpop.permute.xlu0 %4303 }
 0x52d   : > { %v4310_v31 = vsel %vm4309_vm5, %v4308_v45, %v4304_v48 }
 0x52e   : > { %v4311_v9 = vpack.c.bf16 %v4310_v31, %v4310_v31 }
 0x530   : > { %5106 = vmatmul.mubr.msk.bf16.vlgmr.msra.gmra.mxu0 %vm679_vm1, %v4311_v9 }
 0x531   : > { %5125 = vmatprep.mubr.msk.bf16.mxu0 %vm5293_vm0, %v7729_v32  ;;  %5118 = vmatpush3.bf16.msra.mxu0 %v5203_v56 }
 0x532   : > { %5119 = vmatprep.subr.bf16.mxu0 %v7729_v32 }
 0x535   : > { %5120 = vmatpush3.bf16.msra.mxu0 %v5204_v20 }
 0x536   : > { %5121 = vmatprep.subr.bf16.mxu0 %v7729_v32 }
 0x539   : > { %5122 = vmatpush3.bf16.msra.mxu0 %v5205_v28 }
 0x53a   : > { %5123 = vmatprep.subr.bf16.mxu0 %v7729_v32 }
 0x53d   : > { %5124 = vmatpush3.bf16.msra.mxu0 %v5206_v11 }
 0x5f0   : > { %v4365_v23 = vpop.f32.mrf.mxu0 }
 0x5f1   : > { %v4378_v40 = vadd.f32 %v4987_v36, %v4365_v23 }
 0x5f2   : > { %v5107_v12 = vpop.f32.mrf.mxu0 }
 0x5f3   : > { %v4379_v43 = vadd.f32 %v5228_v16, %v4378_v40 }
 0x5f4   : > { %v4368_v38 = vpop.f32.mrf.mxu0 }
 0x5f5   : > { %v4380_v54 = vsel %vm679_vm1, %v4379_v43, 0.0 }
 0x5f6   : > { %v4381_v29 = vrot.slane %v4380_v54, 4  ;;  %v5108_v55 = vpop.f32.mrf.mxu0 }
 0x5f8   : > { %v4382_v59 = vadd.f32 %v4381_v29, %v4380_v54 }
 0x5fa   : > { %v4383_v37 = vrot.slane %v4382_v59, 2 }
 0x5fc   : > { %v4384_v1 = vadd.f32 %v4383_v37, %v4382_v59  ;;  %v4589_v59 = vld [vmem:[%s7393_s18] sm:$0x1] }
 0x5fe   : > { %v4385_v50 = vrot.slane %v4384_v1, 1 }
 0x600   : > { %v4386_v51 = vadd.f32 %v4385_v50, %v4384_v1 }
 0x602   : > { %v4388_v63 = vmul.f32 0.125, %v4386_v51  ;;  %v4999_v51 = vld [vmem:[%s7733_s27] ss:$0 sm:$0xff] }
 0x604   : > { %v4389_v4 = vsub.f32 %v4379_v43, %v4388_v63 }
 0x606   : > { %v4390_v7 = vmul.f32 %v4389_v4, %v4389_v4 }
 0x608   : > { %v4391_v49 = vsel %vm679_vm1, %v4390_v7, 0.0 }
 0x609   : > { %v4392_v42 = vrot.slane %v4391_v49, 4 }
 0x60b   : > { %v4393_v44 = vadd.f32 %v4392_v42, %v4391_v49 }
 0x60d   : > { %v4394_v22 = vrot.slane %v4393_v44, 2 }
 0x60f   : > { %v4395_v34 = vadd.f32 %v4394_v22, %v4393_v44 }
 0x611   : > { %v4396_v35 = vrot.slane %v4395_v34, 1 }
 0x613   : > { %v4397_v39 = vadd.f32 %v4396_v35, %v4395_v34 }
 0x615   : > { %v4398_v57 = vmul.f32 0.125, %v4397_v39 }
 0x617   : > { %v4399_v24 = vadd.f32 1e-05, %v4398_v57 }
 0x619   : > { %5223 = vrsqrt.f32 %v4399_v24 }
 0x626   : > { %v5224_v52 = vpop.eup %5223 }
 0x627   : > { %v4402_v58 = vmul.f32 %v5224_v52, %v4401_v27 }
 0x629   : > { %v4406_v33 = vrot.slane %v4402_v58, %v4405_v13 }
 0x62b   : > { %v4407_v53 = vmul.f32 %v4406_v33, %v4389_v4 }
 0x62d   : > { %v4415_v2 = vadd.f32 %v4988_v30, %v4407_v53 }
 0x62f   : > { %v4416_v17 = vpack.c.bf16 %v4415_v2, %v4415_v2 }
 0x631   : > { %5114 = vmatmul.mubr.msk.bf16.vlgmr.msra.gmra.mxu1 %vm679_vm1, %v4416_v17 }
 0x6f1   : > { %v4477_v5 = vpop.f32.mrf.mxu1 }
 0x6f2   : > { %v4478_v46 = vadd.f32 %v4989_v41, %v4477_v5 }
 0x6f3   : > { %v5115_v26 = vpop.f32.mrf.mxu1 }
 0x6f4   : > { %v4483_v18 = vmax.f32 %v4478_v46, 0.0 }
 0x6f5   : > { %v4480_v21 = vpop.f32.mrf.mxu1 }
 0x6f6   : > { %v4484_v10 = vpack.c.bf16 %v4483_v18, %v4483_v18 }
 0x6f7   : > { %v5116_v61 = vpop.f32.mrf.mxu1 }
 0x6f8   : > { %5126 = vmatmul.mubr.msk.bf16.vlgmr.msra.gmra.mxu0 %vm4524_vm6, %v4484_v10 }
 0x7b8   : > { %v4562_v8 = vpop.f32.mrf.mxu0 }
 0x7b9   : > { %v4563_v32 = vadd.f32 %v4993_v62, %v4562_v8 }
 0x7ba   : > { %v5127_v0 = vpop.f32.mrf.mxu0 }
 0x7bb   : > { %v4568_v6 = vadd.f32 %v4563_v32, %v4415_v2 }
 0x7bc   : > { %v4565_v25 = vpop.f32.mrf.mxu0 }
 0x7bd   : > { %v4569_v19 = vsel %vm679_vm1, %v4568_v6, 0.0 }
 0x7be   : > { %v4570_v15 = vrot.slane %v4569_v19, 4  ;;  %v5128_v45 = vpop.f32.mrf.mxu0 }
 0x7c0   : > { %v4571_v48 = vadd.f32 %v4570_v15, %v4569_v19 }
 0x7c2   : > { %v4572_v31 = vrot.slane %v4571_v48, 2 }
 0x7c4   : > { %v4573_v9 = vadd.f32 %v4572_v31, %v4571_v48 }
 0x7c6   : > { %v4574_v3 = vrot.slane %v4573_v9, 1 }
 0x7c8   : > { %v4575_v60 = vadd.f32 %v4574_v3, %v4573_v9 }
 0x7ca   : > { %v4576_v56 = vmul.f32 0.125, %v4575_v60 }
 0x7cc   : > { %v4577_v20 = vsub.f32 %v4568_v6, %v4576_v56 }
 0x7ce   : > { %v4578_v36 = vmul.f32 %v4577_v20, %v4577_v20 }
 0x7d0   : > { %v4579_v23 = vsel %vm679_vm1, %v4578_v36, 0.0 }
 0x7d1   : > { %v4580_v40 = vrot.slane %v4579_v23, 4 }
 0x7d3   : > { %v4581_v12 = vadd.f32 %v4580_v40, %v4579_v23 }
 0x7d5   : > { %v4582_v16 = vrot.slane %v4581_v12, 2 }
 0x7d7   : > { %v4583_v43 = vadd.f32 %v4582_v16, %v4581_v12 }
 0x7d9   : > { %v4584_v38 = vrot.slane %v4583_v43, 1 }
 0x7db   : > { %v4585_v54 = vadd.f32 %v4584_v38, %v4583_v43 }
 0x7dd   : > { %v4586_v29 = vmul.f32 0.125, %v4585_v54 }
 0x7df   : > { %v4587_v55 = vadd.f32 1e-05, %v4586_v29 }
 0x7e1   : > { %5225 = vrsqrt.f32 %v4587_v55 }
 0x7ee   : > { %v5226_v37 = vpop.eup %5225 }
 0x7ef   : > { %v4590_v1 = vmul.f32 %v5226_v37, %v4589_v59 }
 0x7f1   : > { %v4594_v50 = vrot.slane %v4590_v1, %v4405_v13 }
 0x7f3   : > { %v4595_v63 = vmul.f32 %v4594_v50, %v4577_v20 }
 0x7f5   : > { %v4603_v4 = vadd.f32 %v4999_v51, %v4595_v63 }
 0x7f7   : > { %4604 = vst.msk [vmem:[%s646_s19] sm:$0xff] %vm679_vm1, %v4603_v4 }
 0x7f8   : > { %5242 = shalt.err (!%p5239_p3)
}
 0x7f9   : > { %s5243_s1 = scalar_lea.hbm %s4617_s5, 128  ;;  %s5247_s30 = scalar_lea.hbm %s7734_s28, 256 }
 0x7fa   : > { %p5244_p4 = scmp.ne.s32.totalorder %s4617_s5, %s5243_s1  ;;  %p5248_p9 = scmp.lt.s32.totalorder %s4617_s5, %s7734_s28 }
 0x7fb   : > { %p5249_p10 = scmp.lt.s32.totalorder %s5247_s30, %s5243_s1 }
 0x7fc   : > { %p5245_p7 = pnand %p5244_p4, %p5445_p5 }
 0x7fd   : > { %p5250_p11 = por %p5249_p10, %p5248_p9 }
 0x7fe   : > { %p5246_p8 = pneg %p5245_p7 }
 0x800   : > { %p5251_p12 = pnand %p5250_p11, %p5246_p8 }
 0x802   : > { %5254 = shalt.err (!%p5251_p12)
}
 0x803   : > { %5129 = dma.vmem_to_hbm [thread:$0]  (%p5445_p5), %s4620_s0, 128, %s4617_s5, %s4606_s29  }
 0x804 PF: > { %s7735_s24 = sld [smem:[#allocation7_spill]] }
 0x805   : > { %s7736_s3 = sld [smem:[#allocation5_spill]] }
 0x80a   : > { %p5135_p13 = scmp.ge.s32.totalorder %s7735_s24, 2 }
 0x80b   : > { %s4631_s23 = sand.u32 1, %s7736_s3  }
 0x80c   : > { %p5132_p0 = pnand %p5135_p13, %p5449_p6  ;;  %s4632_s2 = scalar_lea.sflag [#allocation3], %s4631_s23 }
 0x80e   : > { %p5133_p1 = pneg %p5132_p0 }
 0x810   : > { %5272 = dma.done.wait (%p5133_p1), %s4632_s2, 128  }
 0x811   : > { %5274 = vsyncadd (%p5133_p1), %s4632_s2, 4294967168  ;;  %s7738_s24 = sld [smem:[#allocation8_spill]]  ;;  %s7741_s1 = smov %s5281_s22 }
 0x812   : > { %s7739_s25 = sld [smem:[#allocation6_spill]] }
 0x813   : > { %s7740_s23 = sld [smem:[#allocation9_spill]] }
 0x817   : > { %p30_p2 = scmp.ge.s32.totalorder %s7738_s24, 4  }
 0x818   : > { %s7742_s22 = smov %s7739_s25 }
 0x819   :  { %32 = sbr.rel (!%p30_p2) target bundleno = 12 (0xc), region = 141 }
 0x81e   :  { %4637 = vsyncpa [#allocation3], 1 }
 0x81f   :  { %4639 = vsyncpa [#allocation3 + $0x1], 1 }

// kernel: tpu_custom_call.1
= control target key start
LH: loop header
LB: loop body
LE: loop exit
PB: predicated region body
PF: predicated region fallthrough
CT: control target
= control target key end

     0   :  { %s7375_s0 = inlined_call_operand.vmem [shape: f32[2,8,32], index: 0, kind: input, shape index: {}]   ;;  %s7376_s1 = inlined_call_operand.vmem [shape: f32[2,8,32], index: 1, kind: input, shape index: {}]   ;;  %s7377_s2 = inlined_call_operand.vmem [shape: f32[2,8,8], index: 2, kind: input, shape index: {}]   ;;  %s7378_s3 = inlined_call_operand.vmem [shape: bf16[32,32], index: 3, kind: input, shape index: {}]   ;;  %s7379_s4 = inlined_call_operand.vmem [shape: bf16[32,64], index: 4, kind: input, shape index: {}]   ;;  %s7380_s5 = inlined_call_operand.vmem [shape: f32[16,4,1,1], index: 5, kind: input, shape index: {}]   ;;  %s7381_s6 = inlined_call_operand.vmem [shape: f32[16,4,1,1], index: 6, kind: input, shape index: {}]   ;;  %s7382_s7 = inlined_call_operand.vmem [shape: f32[16,4,1,1], index: 7, kind: input, shape index: {}]   ;;  %s7383_s8 = inlined_call_operand.vmem [shape: f32[16,4,1,1], index: 8, kind: input, shape index: {}]   ;;  %s7384_s9 = inlined_call_operand.vmem [shape: f32[4,1,1], index: 9, kind: input, shape index: {}]   ;;  %s7385_s10 = inlined_call_operand.vmem [shape: bf16[32,32], index: 10, kind: input, shape index: {}]   ;;  %s7386_s11 = inlined_call_operand.vmem [shape: f32[1,32], index: 11, kind: input, shape index: {}]   ;;  %s7387_s12 = inlined_call_operand.vmem [shape: f32[1,32], index: 12, kind: input, shape index: {}]   ;;  %s7388_s13 = inlined_call_operand.vmem [shape: f32[1,32], index: 13, kind: input, shape index: {}]   ;;  %s7389_s14 = inlined_call_operand.vmem [shape: bf16[32,64], index: 14, kind: input, shape index: {}]   ;;  %s7390_s15 = inlined_call_operand.vmem [shape: f32[1,64], index: 15, kind: input, shape index: {}]   ;;  %s7391_s16 = inlined_call_operand.vmem [shape: bf16[64,32], index: 16, kind: input, shape index: {}]   ;;  %s7392_s17 = inlined_call_operand.vmem [shape: f32[1,32], index: 17, kind: input, shape index: {}]   ;;  %s7393_s18 = inlined_call_operand.vmem [shape: f32[1,32], index: 18, kind: input, shape index: {}]   ;;  %s7394_s19 = inlined_call_operand.vmem [shape: f32[1,32], index: 19, kind: input, shape index: {}]   ;;  %s7395_s20 = inlined_call_operand.hbm [shape: f32[2,8,32], index: 20, kind: output, shape index: {}]  }
   0x1   :  { %7415 = sst [smem:[#allocation140_spill]] %s7375_s0 }
   0x2   :  { %7416 = sst [smem:[#allocation141_spill]] %s7376_s1 }
   0x3   :  { %7417 = sst [smem:[#allocation142_spill]] %s7377_s2 }
   0x4   :  { %7418 = sst [smem:[#allocation143_spill]] %s7378_s3 }
   0x5   :  { %7419 = sst [smem:[#allocation144_spill]] %s7379_s4 }
   0x6   :  { %7420 = sst [smem:[#allocation145_spill]] %s7380_s5 }
   0x7   :  { %7421 = sst [smem:[#allocation146_spill]] %s7394_s19 }
   0x8   :  { %7422 = sst [smem:[#allocation147_spill]] %s7395_s20 }
   0x9   :  { %25 = vsyncpa [#allocation3], 0 }
   0xa   :  { %27 = vsyncpa [#allocation3 + $0x1], 0  ;;  %s5407_s1 = smov 0   ;;  %s5409_s22 = smov 0  }
   0xb   :  { %s5411_s23 = smov 0   ;;  %s5413_s24 = smov 0  }
   0xc LB: > { %7423 = sst [smem:[#allocation5_spill]] %s5277_s1  ;;  %s5428_s2 = sadd.s32 4294967295, %s5289_s24   ;;  %s5289_s24 = sphi %s5413_s24, %s7738_s24   ;;  %s5285_s23 = sphi %s5411_s23, %s7740_s23   ;;  %s5281_s22 = sphi %s5409_s22, %s7742_s22   ;;  %s5277_s1 = sphi %s5407_s1, %s7741_s1  }
   0xd   : > { %7424 = sst [smem:[#allocation6_spill]] %s5285_s23  ;;  %s4702_s25 = sadd.s32 4294967294, %s5289_s24  }
   0xe   : > { %7425 = sst [smem:[#allocation7_spill]] %s5289_s24  ;;  %s5432_s3 = sadd.s32 1, %s5289_s24  }
   0xf   : > { %7426 = sst [smem:[#allocation8_spill]] %s5432_s3  ;;  %s475_s26 = sadd.s32 1, %s5285_s23 }
  0x10   : > { %s472_s27 = ssub.s32 %s5289_s24, %s5432_s3  ;;  %p485_p0 = scmp.ne.s32.totalorder %s5285_s23, %s5281_s22 }
  0x11   : > { %p473_p1 = scmp.eq.s32.totalorder %s472_s27, 0  ;;  %p486_p2 = scmp.eq.s32.totalorder %s5428_s2, 1 }
  0x12   : > { %p491_p3 = scmp.ne.s32.totalorder %s5281_s22, %s5277_s1  ;;  %p492_p4 = scmp.eq.s32.totalorder %s4702_s25, 1 }
  0x13   : > { %s5443_s28 = scalar_select %p473_p1, %s5285_s23, %s475_s26  }
  0x14   : > { %p5445_p5 = por %p486_p2, %p485_p0  ;;  %p5449_p6 = por %p492_p4, %p491_p3 }
  0x15   : > { %7427 = sst [smem:[#allocation9_spill]] %s5443_s28  ;;  %p4705_p7 = scmp.ge.s32.totalorder %s5289_s24, 1 }
  0x16   : > { %s7429_s29 = scalar_select %p5449_p6, 1, 0 }
  0x17   : > { %p582_p8 = scmp.lt.s32.totalorder %s5289_s24, 3 }
  0x18   : > { %7430 = sst [smem:[#allocation10_spill]] %s7429_s29 }
  0x19   : > { %p583_p9 = pnand %p4705_p7, %p582_p8 }
  0x1b   : > { %586 = sbr.rel (%p583_p9) target bundleno = 2052 (0x804), region = 100 }
  0x20   : > { %v4724_v0 = vld [vmem:[%s7381_s6] ss:$0 sm:$0xff]  ;;  %s7431_s5 = sld [smem:[#allocation145_spill]]  ;;  %v5291_v2 = vmov 0   ;;  %v7406_v5 = vmov 0.0   ;;  %vm5293_vm0 = vmmov 0  }
  0x21   : > { %5179 = vset.pattern.permute.xlu0 %v5291_v2  ;;  %5178 = vset.pattern.permute.xlu1 %v5291_v2  ;;  %s7432_s28 = sld [smem:[#allocation143_spill]]  ;;  %p647_p10 = scmp.lt.s32.totalorder %s5428_s2, 1  ;;  %v4740_v9 = vld [vmem:[%s7381_s6 + $0x4] ss:$0 sm:$0xff]  ;;  %vm679_vm1 = vcmask 261120   ;;  %vm811_vm2 = vcmask 64512  }
  0x22   : > { %1314 = vperm.xlu0 %5179, %v4724_v0   ;;  %5037 = vmatprep.subr.bf16.mxu1 %v7406_v5  ;;  %s7434_s1 = sld [smem:[#allocation144_spill]]  ;;  %v4725_v14 = vld [vmem:[%s7381_s6 + $0x1] ss:$0 sm:$0xff]  ;;  %v4741_v18 = vld [vmem:[%s7381_s6 + $0x5] ss:$0 sm:$0xff]  ;;  %s5294_s26 = smov 104  }
  0x23   : > { %5041 = vmatprep.mubr.msk.bf16.mxu1 %vm5293_vm0, %v7406_v5  ;;  %5053 = vmatprep.subr.bf16.mxu0 %v7406_v5  ;;  %s648_s23 = scalar_select %p647_p10, %s5428_s2, 1  ;;  %v4728_v20 = vld [vmem:[%s7382_s7] ss:$0 sm:$0xff]  ;;  %v4756_v21 = vld [vmem:[%s7381_s6 + $0x8] ss:$0 sm:$0xff]  ;;  %vm4103_vm3 = vcmask 1043456  }
  0x24   : > { %5055 = vmatprep.mubr.msk.bf16.mxu0 %vm5293_vm0, %v7406_v5  ;;  %s7436_s30 = sld [smem:[#allocation141_spill]]  ;;  %v4757_v23 = vld [vmem:[%s7381_s6 + $0x9] ss:$0 sm:$0xff]  ;;  %v4729_v24 = vld [vmem:[%s7382_s7 + $0x1] ss:$0 sm:$0xff]  ;;  %s5296_s21 = smov 112  }
  0x25   : > { %s5488_s0 = sshll.u32 %s648_s23, 3  ;;  %v4744_v25 = vld [vmem:[%s7382_s7 + $0x4] ss:$0 sm:$0xff]  ;;  %v4772_v27 = vld [vmem:[%s7381_s6 + $0xc] ss:$0 sm:$0xff]  ;;  %s5295_s23 = smov 120  }
  0x26   : > { %v4720_v1 = vld [vmem:[%s7431_s5] ss:$0 sm:$0xff]  ;;  %v4721_v4 = vld [vmem:[%s7431_s5 + $0x1] ss:$0 sm:$0xff]  ;;  %v4736_v6 = vld [vmem:[%s7431_s5 + $0x4] ss:$0 sm:$0xff] }
  0x27   : > { %v5195_v3 = vld [vmem:[%s7432_s28 + $0x8] sm:$0xff]   ;;  %1274 = vperm.xlu1 %5178, %v4720_v1   ;;  %v5196_v7 = vld [vmem:[%s7432_s28] sm:$0xff]   ;;  %1278 = vperm.xlu0 %5179, %v4721_v4   ;;  %s7433_s28 = sld [smem:[#allocation140_spill]]  ;;  %v4788_v30 = vld [vmem:[%s7381_s6 + $0x10] ss:$0 sm:$0xff]  ;;  %s5298_s25 = smov 8  }
  0x28   : > { %5038 = vmatpush3.bf16.msra.mxu1 %v5195_v3  ;;  %v4737_v8 = vld [vmem:[%s7431_s5 + $0x5] ss:$0 sm:$0xff]  ;;  %s7435_s20 = smov %s7434_s1  ;;  %v5197_v11 = vld [vmem:[%s7434_s1 + $0x8] sm:$0xff]   ;;  %v4785_v32 = vld [vmem:[%s7431_s5 + $0x11] ss:$0 sm:$0xff]  ;;  %s7553_s1 = sld [smem:[#allocation142_spill]] }
  0x29   : > { %5039 = vmatprep.subr.bf16.mxu1 %v7406_v5  ;;  %v4752_v13 = vld [vmem:[%s7431_s5 + $0x8] ss:$0 sm:$0xff]  ;;  %v5198_v15 = vld [vmem:[%s7435_s20] sm:$0xff]   ;;  %v4753_v17 = vld [vmem:[%s7431_s5 + $0x9] ss:$0 sm:$0xff]  ;;  %s5299_s3 = smov 16  }
  0x2a   : > { %s654_s24 = scalar_lea.vmem %s7436_s30, %s5488_s0  ;;  %v4768_v22 = vld [vmem:[%s7431_s5 + $0xc] ss:$0 sm:$0xff]  ;;  %v4769_v26 = vld [vmem:[%s7431_s5 + $0xd] ss:$0 sm:$0xff]  ;;  %v4760_v28 = vld [vmem:[%s7382_s7 + $0x8] ss:$0 sm:$0xff] }
  0x2b   : > { %1446 = vperm.xlu1 %5178, %v4736_v6   ;;  %1450 = vperm.xlu0 %5179, %v4737_v8   ;;  %v661_v16 = vld [vmem:[%s654_s24] sm:$0xff]  ;;  %v4773_v31 = vld [vmem:[%s7381_s6 + $0xd] ss:$0 sm:$0xff]  ;;  %v4784_v33 = vld [vmem:[%s7431_s5 + $0x10] ss:$0 sm:$0xff]  ;;  %vm4307_vm4 = vcmask 130048  }
  0x2c   : > { %5040 = vmatpush3.bf16.msra.mxu1 %v5196_v7  ;;  %v723_v19 = vpack.c.bf16 %v661_v16, %v661_v16  ;;  %v4745_v29 = vld [vmem:[%s7382_s7 + $0x5] ss:$0 sm:$0xff]  ;;  %v4722_v34 = vld [vmem:[%s7431_s5 + $0x2] ss:$0 sm:$0xff]  ;;  %v4761_v35 = vld [vmem:[%s7382_s7 + $0x9] ss:$0 sm:$0xff] }
  0x2d   : > { %s5494_s29 = scalar_lea.vmem %s7433_s28, %s5488_s0  ;;  %5045 = vmatprep.subr.bf16.mxu1 %v7406_v5  ;;  %v4732_v36 = vld [vmem:[%s7383_s8] ss:$0 sm:$0xff]  ;;  %v4789_v37 = vld [vmem:[%s7381_s6 + $0x11] ss:$0 sm:$0xff]  ;;  %v4742_v38 = vld [vmem:[%s7381_s6 + $0x6] ss:$0 sm:$0xff] }
  0x2e   : > { %v660_v10 = vld [vmem:[%s5494_s29] sm:$0xff]  ;;  %v4776_v40 = vld [vmem:[%s7382_s7 + $0xc] ss:$0 sm:$0xff]  ;;  %v4804_v42 = vld [vmem:[%s7381_s6 + $0x14] ss:$0 sm:$0xff]  ;;  %s6537_s19 = scalar_lea.vmem %s7553_s1, %s5488_s0  ;;  %s5300_s1 = smov 24  }
  0x2f   : > { %1486 = vperm.xlu1 %5178, %v4740_v9   ;;  %v662_v12 = vpack.c.bf16 %v660_v10, %v660_v10  ;;  %1618 = vperm.xlu0 %5179, %v4752_v13   ;;  %v4726_v39 = vld [vmem:[%s7381_s6 + $0x2] ss:$0 sm:$0xff]  ;;  %v4738_v41 = vld [vmem:[%s7431_s5 + $0x6] ss:$0 sm:$0xff]  ;;  %v4748_v43 = vld [vmem:[%s7383_s8 + $0x4] ss:$0 sm:$0xff] }
  0x30   : > { %v4727_v44 = vld [vmem:[%s7381_s6 + $0x3] ss:$0 sm:$0xff]  ;;  %v4800_v45 = vld [vmem:[%s7431_s5 + $0x14] ss:$0 sm:$0xff]  ;;  %v4739_v46 = vld [vmem:[%s7431_s5 + $0x7] ss:$0 sm:$0xff] }
  0x31   : > { %5042 = vmatmul.mubr.msk.bf16.vlgmr.msra.gmra.mxu1 %vm679_vm1, %v662_v12  ;;  %v4723_v47 = vld [vmem:[%s7431_s5 + $0x3] ss:$0 sm:$0xff]  ;;  %v4749_v48 = vld [vmem:[%s7383_s8 + $0x5] ss:$0 sm:$0xff]  ;;  %v4733_v49 = vld [vmem:[%s7383_s8 + $0x1] ss:$0 sm:$0xff] }
  0x32   : > { %5046 = vmatpush3.bf16.msra.mxu1 %v5197_v11  ;;  %5049 = vmatprep.mubr.msk.bf16.mxu1 %vm5293_vm0, %v7406_v5  ;;  %v4801_v50 = vld [vmem:[%s7431_s5 + $0x15] ss:$0 sm:$0xff]  ;;  %v4743_v51 = vld [vmem:[%s7381_s6 + $0x7] ss:$0 sm:$0xff]  ;;  %v4754_v52 = vld [vmem:[%s7431_s5 + $0xa] ss:$0 sm:$0xff] }
  0x33   : > { %1318 = vperm.xlu1 %5178, %v4725_v14   ;;  %5047 = vmatprep.subr.bf16.mxu1 %v7406_v5  ;;  %v4777_v53 = vld [vmem:[%s7382_s7 + $0xd] ss:$0 sm:$0xff]  ;;  %v4764_v54 = vld [vmem:[%s7383_s8 + $0x8] ss:$0 sm:$0xff]  ;;  %v4805_v55 = vld [vmem:[%s7381_s6 + $0x15] ss:$0 sm:$0xff] }
  0x34   : > { %1622 = vperm.xlu0 %5179, %v4753_v17   ;;  %v4816_v56 = vld [vmem:[%s7431_s5 + $0x18] ss:$0 sm:$0xff]  ;;  %v4758_v57 = vld [vmem:[%s7381_s6 + $0xa] ss:$0 sm:$0xff]  ;;  %v4755_v58 = vld [vmem:[%s7431_s5 + $0xb] ss:$0 sm:$0xff] }
  0x35   : > { %v4792_v59 = vld [vmem:[%s7382_s7 + $0x10] ss:$0 sm:$0xff]  ;;  %v4765_v60 = vld [vmem:[%s7383_s8 + $0x9] ss:$0 sm:$0xff]  ;;  %v4820_v61 = vld [vmem:[%s7381_s6 + $0x18] ss:$0 sm:$0xff] }
  0x36   : > { %5048 = vmatpush3.bf16.msra.mxu1 %v5198_v15  ;;  %v4817_v62 = vld [vmem:[%s7431_s5 + $0x19] ss:$0 sm:$0xff]  ;;  %v4759_v63 = vld [vmem:[%s7381_s6 + $0xb] ss:$0 sm:$0xff]  ;;  %v4730_v0 = vld [vmem:[%s7382_s7 + $0x2] ss:$0 sm:$0xff] }
  0x37   : > { %1490 = vperm.xlu1 %5178, %v4741_v18   ;;  %5059 = vmatprep.subr.bf16.mxu1 %v7406_v5  ;;  %v4793_v1 = vld [vmem:[%s7382_s7 + $0x11] ss:$0 sm:$0xff]  ;;  %v4770_v2 = vld [vmem:[%s7431_s5 + $0xe] ss:$0 sm:$0xff]  ;;  %v4821_v3 = vld [vmem:[%s7381_s6 + $0x19] ss:$0 sm:$0xff] }
  0x38   : > { %1358 = vperm.xlu0 %5179, %v4728_v20   ;;  %v4780_v4 = vld [vmem:[%s7383_s8 + $0xc] ss:$0 sm:$0xff]  ;;  %v4746_v6 = vld [vmem:[%s7382_s7 + $0x6] ss:$0 sm:$0xff]  ;;  %v4832_v7 = vld [vmem:[%s7431_s5 + $0x1c] ss:$0 sm:$0xff] }
  0x39   : > { %5050 = vmatmul.mubr.msk.bf16.vlgmr.msra.gmra.mxu1 %vm679_vm1, %v723_v19  ;;  %v4774_v8 = vld [vmem:[%s7381_s6 + $0xe] ss:$0 sm:$0xff]  ;;  %v4731_v9 = vld [vmem:[%s7382_s7 + $0x3] ss:$0 sm:$0xff]  ;;  %v4808_v10 = vld [vmem:[%s7382_s7 + $0x14] ss:$0 sm:$0xff] }
  0x3a   : > { %5061 = vmatprep.mubr.msk.bf16.mxu1 %vm5293_vm0, %v7406_v5  ;;  %v4771_v13 = vld [vmem:[%s7431_s5 + $0xf] ss:$0 sm:$0xff]  ;;  %v4836_v14 = vld [vmem:[%s7381_s6 + $0x1c] ss:$0 sm:$0xff]  ;;  %v4781_v17 = vld [vmem:[%s7383_s8 + $0xd] ss:$0 sm:$0xff] }
  0x3b   : > { %1658 = vperm.xlu1 %5178, %v4756_v21   ;;  %v4747_v18 = vld [vmem:[%s7382_s7 + $0x7] ss:$0 sm:$0xff]  ;;  %v4833_v21 = vld [vmem:[%s7431_s5 + $0x1d] ss:$0 sm:$0xff]  ;;  %vm4309_vm5 = vcmask 195584   ;;  %vm4524_vm6 = vcmask 523264  }
  0x3c   : > { %1790 = vperm.xlu0 %5179, %v4768_v22   ;;  %v4775_v22 = vld [vmem:[%s7381_s6 + $0xf] ss:$0 sm:$0xff]  ;;  %s7733_s27 = sld [smem:[#allocation146_spill]]  ;;  %s5001_s30 = sshll.u32 %s5428_s2, 7 }
  0x3d   : > { %s7734_s28 = sld [smem:[#allocation147_spill]] }
  0x3f   : > { %1662 = vperm.xlu1 %5178, %v4757_v23  }
  0x40   : > { %1362 = vperm.xlu0 %5179, %v4729_v24  }
  0x43   : > { %1530 = vperm.xlu1 %5178, %v4744_v25   ;;  %v4762_v25 = vld [vmem:[%s7382_s7 + $0xa] ss:$0 sm:$0xff] }
  0x44   : > { %1794 = vperm.xlu0 %5179, %v4769_v26   ;;  %v4809_v26 = vld [vmem:[%s7382_s7 + $0x15] ss:$0 sm:$0xff] }
  0x47   : > { %1830 = vperm.xlu1 %5178, %v4772_v27  }
  0x48   : > { %1702 = vperm.xlu0 %5179, %v4760_v28  }
  0x4b   : > { %1534 = vperm.xlu1 %5178, %v4745_v29   ;;  %v4790_v29 = vld [vmem:[%s7381_s6 + $0x12] ss:$0 sm:$0xff] }
  0x4c   : > { %2002 = vperm.xlu0 %5179, %v4788_v30   ;;  %v4837_v30 = vld [vmem:[%s7381_s6 + $0x1d] ss:$0 sm:$0xff] }
  0x4f   : > { %1834 = vperm.xlu1 %5178, %v4773_v31  }
  0x50   : > { %1966 = vperm.xlu0 %5179, %v4785_v32  }
  0x53   : > { %1962 = vperm.xlu1 %5178, %v4784_v33   ;;  %v4824_v33 = vld [vmem:[%s7382_s7 + $0x18] ss:$0 sm:$0xff] }
  0x54   : > { %1282 = vperm.xlu0 %5179, %v4722_v34   ;;  %v4786_v34 = vld [vmem:[%s7431_s5 + $0x12] ss:$0 sm:$0xff] }
  0x57   : > { %1706 = vperm.xlu1 %5178, %v4761_v35  }
  0x58   : > { %1402 = vperm.xlu0 %5179, %v4732_v36  }
  0x5b   : > { %2006 = vperm.xlu1 %5178, %v4789_v37   ;;  %v4852_v37 = vld [vmem:[%s7381_s6 + $0x20] ss:$0 sm:$0xff] }
  0x5c   : > { %1494 = vperm.xlu0 %5179, %v4742_v38   ;;  %v4796_v38 = vld [vmem:[%s7383_s8 + $0x10] ss:$0 sm:$0xff] }
  0x5f   : > { %1322 = vperm.xlu1 %5178, %v4726_v39  }
  0x60   : > { %1874 = vperm.xlu0 %5179, %v4776_v40  }
  0x63   : > { %1454 = vperm.xlu1 %5178, %v4738_v41   ;;  %v4787_v41 = vld [vmem:[%s7431_s5 + $0x13] ss:$0 sm:$0xff] }
  0x64   : > { %2174 = vperm.xlu0 %5179, %v4804_v42   ;;  %v4848_v42 = vld [vmem:[%s7431_s5 + $0x20] ss:$0 sm:$0xff] }
  0x67   : > { %1574 = vperm.xlu1 %5178, %v4748_v43  }
  0x68   : > { %1326 = vperm.xlu0 %5179, %v4727_v44  }
  0x6b   : > { %2134 = vperm.xlu1 %5178, %v4800_v45   ;;  %v4797_v45 = vld [vmem:[%s7383_s8 + $0x11] ss:$0 sm:$0xff] }
  0x6c   : > { %1458 = vperm.xlu0 %5179, %v4739_v46   ;;  %v4763_v46 = vld [vmem:[%s7382_s7 + $0xb] ss:$0 sm:$0xff] }
  0x6f   : > { %1286 = vperm.xlu1 %5178, %v4723_v47  }
  0x70   : > { %1578 = vperm.xlu0 %5179, %v4749_v48  }
  0x73   : > { %1406 = vperm.xlu1 %5178, %v4733_v49   ;;  %v4849_v49 = vld [vmem:[%s7431_s5 + $0x21] ss:$0 sm:$0xff] }
  0x74   : > { %2138 = vperm.xlu0 %5179, %v4801_v50   ;;  %v4791_v50 = vld [vmem:[%s7381_s6 + $0x13] ss:$0 sm:$0xff] }
  0x77   : > { %1498 = vperm.xlu1 %5178, %v4743_v51  }
  0x78   : > { %1626 = vperm.xlu0 %5179, %v4754_v52  }
  0x7b   : > { %1878 = vperm.xlu1 %5178, %v4777_v53   ;;  %v4734_v53 = vld [vmem:[%s7383_s8 + $0x2] ss:$0 sm:$0xff] }
  0x7c   : > { %1746 = vperm.xlu0 %5179, %v4764_v54   ;;  %v4825_v54 = vld [vmem:[%s7382_s7 + $0x19] ss:$0 sm:$0xff] }
  0x7f   : > { %2178 = vperm.xlu1 %5178, %v4805_v55  }
  0x80   : > { %2306 = vperm.xlu0 %5179, %v4816_v56  }
  0x83   : > { %1666 = vperm.xlu1 %5178, %v4758_v57   ;;  %v4778_v57 = vld [vmem:[%s7382_s7 + $0xe] ss:$0 sm:$0xff] }
  0x84   : > { %1630 = vperm.xlu0 %5179, %v4755_v58   ;;  %v4853_v58 = vld [vmem:[%s7381_s6 + $0x21] ss:$0 sm:$0xff] }
  0x87   : > { %2046 = vperm.xlu1 %5178, %v4792_v59  }
  0x88   : > { %1750 = vperm.xlu0 %5179, %v4765_v60  }
  0x8b   : > { %2346 = vperm.xlu1 %5178, %v4820_v61   ;;  %v4806_v61 = vld [vmem:[%s7381_s6 + $0x16] ss:$0 sm:$0xff] }
  0x8c   : > { %2310 = vperm.xlu0 %5179, %v4817_v62   ;;  %v4750_v62 = vld [vmem:[%s7383_s8 + $0x6] ss:$0 sm:$0xff] }
  0x8f   : > { %1670 = vperm.xlu1 %5178, %v4759_v63  }
  0x90   : > { %1366 = vperm.xlu0 %5179, %v4730_v0  }
  0x93   : > { %2050 = vperm.xlu1 %5178, %v4793_v1   ;;  %v4840_v1 = vld [vmem:[%s7382_s7 + $0x1c] ss:$0 sm:$0xff] }
  0x94   : > { %1798 = vperm.xlu0 %5179, %v4770_v2   ;;  %v4802_v2 = vld [vmem:[%s7431_s5 + $0x16] ss:$0 sm:$0xff] }
  0x97   : > { %2350 = vperm.xlu1 %5178, %v4821_v3  }
  0x98   : > { %1918 = vperm.xlu0 %5179, %v4780_v4  }
  0x9b   : > { %1538 = vperm.xlu1 %5178, %v4746_v6   ;;  %v4868_v6 = vld [vmem:[%s7381_s6 + $0x24] ss:$0 sm:$0xff] }
  0x9c   : > { %2478 = vperm.xlu0 %5179, %v4832_v7   ;;  %v4812_v7 = vld [vmem:[%s7383_s8 + $0x14] ss:$0 sm:$0xff] }
  0x9d   : > { %v5690_v11 = vpop.permute.xlu0 %1314 }
  0x9f   : > { %1838 = vperm.xlu1 %5178, %v4774_v8  }
  0xa0   : > { %1370 = vperm.xlu0 %5179, %v4731_v9  }
  0xa2   : > { %v5692_v12 = vpop.permute.xlu1 %1274  ;;  %v5700_v15 = vpop.permute.xlu0 %1278 }
  0xa3   : > { %2218 = vperm.xlu1 %5178, %v4808_v10   ;;  %7437 = vst [vmem:[#allocation11_spill] sm:$0xff] %v5700_v15  ;;  %v4751_v10 = vld [vmem:[%s7383_s8 + $0x7] ss:$0 sm:$0xff] }
  0xa4   : > { %1802 = vperm.xlu0 %5179, %v4771_v13   ;;  %v4864_v13 = vld [vmem:[%s7431_s5 + $0x24] ss:$0 sm:$0xff] }
  0xa6   : > { %v5702_v16 = vpop.permute.xlu1 %1446  ;;  %v5710_v19 = vpop.permute.xlu0 %1450 }
  0xa7   : > { %2518 = vperm.xlu1 %5178, %v4836_v14   ;;  %7438 = vst [vmem:[#allocation12_spill] sm:$0xff] %v5710_v19 }
  0xa8   : > { %1922 = vperm.xlu0 %5179, %v4781_v17  }
  0xaa   : > { %v5712_v20 = vpop.permute.xlu1 %1486  ;;  %v5720_v23 = vpop.permute.xlu0 %1618 }
  0xab   : > { %1542 = vperm.xlu1 %5178, %v4747_v18   ;;  %v4803_v18 = vld [vmem:[%s7431_s5 + $0x17] ss:$0 sm:$0xff] }
  0xac   : > { %2482 = vperm.xlu0 %5179, %v4833_v21   ;;  %v4735_v21 = vld [vmem:[%s7383_s8 + $0x3] ss:$0 sm:$0xff] }
  0xae   : > { %v5722_v24 = vpop.permute.xlu1 %1318 }
  0xaf   : > { %1842 = vperm.xlu1 %5178, %v4775_v22   ;;  %v5730_v27 = vpop.permute.xlu0 %1622 }
  0xb0   : > { %7439 = vst [vmem:[#allocation13_spill] sm:$0xff] %v5730_v27  ;;  %1710 = vperm.xlu0 %5179, %v4762_v25  }
  0xb2   : > { %v5732_v28 = vpop.permute.xlu1 %1490 }
  0xb3   : > { %2222 = vperm.xlu1 %5178, %v4809_v26   ;;  %v5740_v31 = vpop.permute.xlu0 %1358  ;;  %v4813_v26 = vld [vmem:[%s7383_s8 + $0x15] ss:$0 sm:$0xff] }
  0xb4   : > { %2010 = vperm.xlu0 %5179, %v4790_v29   ;;  %v4779_v29 = vld [vmem:[%s7382_s7 + $0xf] ss:$0 sm:$0xff] }
  0xb6   : > { %v5742_v32 = vpop.permute.xlu1 %1658 }
  0xb7   : > { %2522 = vperm.xlu1 %5178, %v4837_v30   ;;  %v5750_v35 = vpop.permute.xlu0 %1790 }
  0xb8   : > { %2390 = vperm.xlu0 %5179, %v4824_v33  }
  0xba   : > { %v5752_v36 = vpop.permute.xlu1 %1662 }
  0xbb   : > { %1970 = vperm.xlu1 %5178, %v4786_v34   ;;  %v5760_v39 = vpop.permute.xlu0 %1362  ;;  %v4807_v34 = vld [vmem:[%s7381_s6 + $0x17] ss:$0 sm:$0xff] }
  0xbc   : > { %7440 = vst [vmem:[#allocation14_spill] sm:$0xff] %v5760_v39  ;;  %2690 = vperm.xlu0 %5179, %v4852_v37   ;;  %v4873_v39 = vld [vmem:[%s7382_s7 + $0x25] ss:$0 sm:$0xff] }
  0xbe   : > { %v5762_v40 = vpop.permute.xlu1 %1530 }
  0xbf   : > { %2090 = vperm.xlu1 %5178, %v4796_v38   ;;  %v5770_v43 = vpop.permute.xlu0 %1794 }
  0xc0   : > { %7441 = vst [vmem:[#allocation15_spill] sm:$0xff] %v5770_v43  ;;  %1974 = vperm.xlu0 %5179, %v4787_v41   ;;  %v4841_v41 = vld [vmem:[%s7382_s7 + $0x1d] ss:$0 sm:$0xff] }
  0xc2   : > { %v5772_v44 = vpop.permute.xlu1 %1830 }
  0xc3   : > { %2650 = vperm.xlu1 %5178, %v4848_v42   ;;  %v5780_v47 = vpop.permute.xlu0 %1702 }
  0xc4   : > { %2094 = vperm.xlu0 %5179, %v4797_v45  }
  0xc6   : > { %v5782_v48 = vpop.permute.xlu1 %1534 }
  0xc7   : > { %7442 = vst [vmem:[#allocation16_spill] sm:$0xff] %v5782_v48  ;;  %1714 = vperm.xlu1 %5178, %v4763_v46   ;;  %v5790_v51 = vpop.permute.xlu0 %2002 }
  0xc8   : > { %2654 = vperm.xlu0 %5179, %v4849_v49  }
  0xca   : > { %v5792_v52 = vpop.permute.xlu1 %1834 }
  0xcb   : > { %2014 = vperm.xlu1 %5178, %v4791_v50   ;;  %v5800_v55 = vpop.permute.xlu0 %1966 }
  0xcc   : > { %7443 = vst [vmem:[#allocation17_spill] sm:$0xff] %v5800_v55  ;;  %1410 = vperm.xlu0 %5179, %v4734_v53   ;;  %v4842_v55 = vld [vmem:[%s7382_s7 + $0x1e] ss:$0 sm:$0xff] }
  0xce   : > { %v5802_v56 = vpop.permute.xlu1 %1962 }
  0xcf   : > { %2394 = vperm.xlu1 %5178, %v4825_v54   ;;  %v5810_v59 = vpop.permute.xlu0 %1282 }
  0xd0   : > { %7444 = vst [vmem:[#allocation18_spill] sm:$0xff] %v5810_v59  ;;  %1882 = vperm.xlu0 %5179, %v4778_v57  }
  0xd2   : > { %v5812_v60 = vpop.permute.xlu1 %1706 }
  0xd3   : > { %7445 = vst [vmem:[#allocation19_spill] sm:$0xff] %v5812_v60  ;;  %2694 = vperm.xlu1 %5178, %v4853_v58   ;;  %v5820_v63 = vpop.permute.xlu0 %1402 }
  0xd4   : > { %2182 = vperm.xlu0 %5179, %v4806_v61  }
  0xd6   : > { %v5822_v0 = vpop.permute.xlu1 %2006 }
  0xd7   : > { %7446 = vst [vmem:[#allocation20_spill] sm:$0xff] %v5822_v0  ;;  %1582 = vperm.xlu1 %5178, %v4750_v62   ;;  %v5830_v3 = vpop.permute.xlu0 %1494  ;;  %v4956_v0 = vld [vmem:[%s7383_s8 + $0x38] ss:$0 sm:$0xff] }
  0xd8   : > { %7447 = vst [vmem:[#allocation21_spill] sm:$0xff] %v5830_v3  ;;  %2562 = vperm.xlu0 %5179, %v4840_v1   ;;  %v4947_v3 = vld [vmem:[%s7431_s5 + $0x3b] ss:$0 sm:$0xff] }
  0xda   : > { %v5832_v4 = vpop.permute.xlu1 %1322 }
  0xdb   : > { %7448 = vst [vmem:[#allocation22_spill] sm:$0xff] %v5832_v4  ;;  %2142 = vperm.xlu1 %5178, %v4802_v2   ;;  %v5840_v8 = vpop.permute.xlu0 %1874 }
  0xdc   : > { %2862 = vperm.xlu0 %5179, %v4868_v6  }
  0xde   : > { %v5842_v9 = vpop.permute.xlu1 %1454 }
  0xdf   : > { %7449 = vst [vmem:[#allocation23_spill] sm:$0xff] %v5842_v9  ;;  %2262 = vperm.xlu1 %5178, %v4812_v7   ;;  %v5850_v14 = vpop.permute.xlu0 %2174 }
  0xe0   : > { %1586 = vperm.xlu0 %5179, %v4751_v10  }
  0xe2   : > { %v5852_v17 = vpop.permute.xlu1 %1574 }
  0xe3   : > { %2822 = vperm.xlu1 %5178, %v4864_v13   ;;  %v5860_v22 = vpop.permute.xlu0 %1326  ;;  %v4869_v13 = vld [vmem:[%s7381_s6 + $0x25] ss:$0 sm:$0xff] }
  0xe4   : > { %7450 = vst [vmem:[#allocation24_spill] sm:$0xff] %v5860_v22  ;;  %2146 = vperm.xlu0 %5179, %v4803_v18   ;;  %v4895_v22 = vld [vmem:[%s7383_s8 + $0x2b] ss:$0 sm:$0xff] }
  0xe6   : > { %v5862_v25 = vpop.permute.xlu1 %2134 }
  0xe7   : > { %1414 = vperm.xlu1 %5178, %v4735_v21   ;;  %v5870_v30 = vpop.permute.xlu0 %1458 }
  0xe8   : > { %7451 = vst [vmem:[#allocation25_spill] sm:$0xff] %v5870_v30  ;;  %2266 = vperm.xlu0 %5179, %v4813_v26  }
  0xea   : > { %v5872_v33 = vpop.permute.xlu1 %1286 }
  0xeb   : > { %7452 = vst [vmem:[#allocation26_spill] sm:$0xff] %v5872_v33  ;;  %1886 = vperm.xlu1 %5178, %v4779_v29   ;;  %v5877_v37 = vpop.permute.xlu0 %1578  ;;  %v4794_v29 = vld [vmem:[%s7382_s7 + $0x12] ss:$0 sm:$0xff] }
  0xec   : > { %7453 = vst [vmem:[#allocation27_spill] sm:$0xff] %v5877_v37  ;;  %v4885_v37 = vld [vmem:[%s7381_s6 + $0x29] ss:$0 sm:$0xff] }
  0xee   : > { %v5879_v38 = vpop.permute.xlu1 %1406 }
  0xef   : > { %7454 = vst [vmem:[#allocation28_spill] sm:$0xff] %v5879_v38  ;;  %2186 = vperm.xlu1 %5178, %v4807_v34   ;;  %v5884_v45 = vpop.permute.xlu0 %2138  ;;  %v4865_v34 = vld [vmem:[%s7431_s5 + $0x25] ss:$0 sm:$0xff]  ;;  %v4810_v38 = vld [vmem:[%s7382_s7 + $0x16] ss:$0 sm:$0xff] }
  0xf0   : > { %7455 = vst [vmem:[#allocation29_spill] sm:$0xff] %v5884_v45 }
  0xf1   : > { %v717_v42 = vpop.f32.mrf.mxu1 }
  0xf2   : > { %v5886_v46 = vpop.permute.xlu1 %1498 }
  0xf3   : > { %7456 = vst [vmem:[#allocation30_spill] sm:$0xff] %v5886_v46  ;;  %v5043_v49 = vpop.f32.mrf.mxu1  ;;  %2566 = vperm.xlu1 %5178, %v4841_v41   ;;  %v5888_v53 = vpop.permute.xlu0 %1626 }
  0xf4   : > { %7457 = vst [vmem:[#allocation31_spill] sm:$0xff] %v5888_v53 }
  0xf5   : > { %v720_v50 = vpop.f32.mrf.mxu1 }
  0xf6   : > { %v5890_v54 = vpop.permute.xlu1 %1878  ;;  %v803_v50 = vpack.c.bf16 %v717_v42, %v717_v42 }
  0xf7   : > { %7458 = vst [vmem:[#allocation32_spill] sm:$0xff] %v5890_v54  ;;  %v5044_v57 = vpop.f32.mrf.mxu1  ;;  %v5892_v62 = vpop.permute.xlu0 %1746 }
  0xf8   : > { %v4822_v57 = vld [vmem:[%s7381_s6 + $0x1a] ss:$0 sm:$0xff] }
  0xf9   : > { %v777_v58 = vpop.f32.mrf.mxu1 }
  0xfa   : > { %v5190_v61 = vpack.i.bf16 %v717_v42, %v777_v58  ;;  %v5894_v1 = vpop.permute.xlu1 %2178  ;;  %v5896_v2 = vpack.c.bf16 %v777_v58, %v777_v58  ;;  %v4766_v58 = vld [vmem:[%s7383_s8 + $0xa] ss:$0 sm:$0xff]  ;;  %v4856_v42 = vld [vmem:[%s7382_s7 + $0x20] ss:$0 sm:$0xff] }
  0xfb   : > { %7459 = vst [vmem:[#allocation33_spill] sm:$0xff] %v5894_v1  ;;  %v5051_v6 = vpop.f32.mrf.mxu1  ;;  %v5903_v18 = vpop.permute.xlu0 %2306  ;;  %v4922_v1 = vld [vmem:[%s7382_s7 + $0x32] ss:$0 sm:$0xff] }
  0xfc   : > { %7460 = vst [vmem:[#allocation34_spill] sm:$0xff] %v5896_v2  ;;  %5191 = vrot.lane.b32.xlu1 %v5190_v61, %s5294_s26  ;;  %5181 = vrot.lane.b32.xlu0 %v5190_v61, %s5295_s23  ;;  %v816_v7 = vsel %vm811_vm2, %v5896_v2, 0  ;;  %s5301_s26 = smov [#allocation2]  }
  0xfd   : > { %v780_v10 = vpop.f32.mrf.mxu1  ;;  %5054 = vmatpush3.bf16.xpose.msra.mxu0 %v816_v7  ;;  %v4818_v7 = vld [vmem:[%s7431_s5 + $0x1a] ss:$0 sm:$0xff]  ;;  %s5233_s23 = sshll.u32 %s5301_s26, 4  ;;  %s5234_s23 = int_to_ptr.vmem [resolvable:$false] %s5233_s23 }
  0xfe   : > { %v5905_v21 = vpop.permute.xlu1 %1666  ;;  %5065 = vmatprep.subr.bf16.mxu0 %v7406_v5  ;;  %s5235_s2 = scalar_lea.vmem %s5234_s23, 256 }
  0xff   : > { %7461 = vst [vmem:[#allocation35_spill] sm:$0xff] %v5905_v21  ;;  %v5052_v26 = vpop.f32.mrf.mxu1  ;;  %v5914_v41 = vpop.permute.xlu0 %1630 }
 0x100   : > { %2866 = vperm.xlu1 %5178, %v4869_v13   ;;  %5186 = vrot.lane.b32.xlu0 %v5190_v61, %s5296_s21  ;;  %7462 = vst [vmem:[#allocation36_spill] sm:$0xff] %v5914_v41  ;;  %v4884_v26 = vld [vmem:[%s7381_s6 + $0x28] ss:$0 sm:$0xff] }
 0x102   : > { %v5916_v49 = vpop.permute.xlu1 %2046 }
 0x103   : > { %v5925_v61 = vpop.permute.xlu0 %1750 }
 0x104   : > { %2054 = vperm.xlu1 %5178, %v4794_v29   ;;  %2826 = vperm.xlu0 %5179, %v4865_v34   ;;  %7463 = vst [vmem:[#allocation37_spill] sm:$0xff] %v5925_v61  ;;  %v4828_v29 = vld [vmem:[%s7383_s8 + $0x18] ss:$0 sm:$0xff]  ;;  %v4857_v61 = vld [vmem:[%s7382_s7 + $0x21] ss:$0 sm:$0xff] }
 0x105   : > { %5056 = vmatmul.mubr.msk.bf16.vlgmr.msra.gmra.mxu0 %vm811_vm2, %v803_v50 }
 0x106   : > { %v5927_v6 = vpop.permute.xlu1 %2346  ;;  %5067 = vmatprep.mubr.msk.bf16.mxu0 %vm5293_vm0, %v7406_v5  ;;  %v4823_v5 = vld [vmem:[%s7381_s6 + $0x1b] ss:$0 sm:$0xff] }
 0x107   : > { %v5937_v10 = vpop.permute.xlu0 %2310 }
 0x108   : > { %2354 = vperm.xlu1 %5178, %v4822_v57   ;;  %1754 = vperm.xlu0 %5179, %v4766_v58   ;;  %7464 = vst [vmem:[#allocation38_spill] sm:$0xff] %v5937_v10  ;;  %v4795_v57 = vld [vmem:[%s7382_s7 + $0x13] ss:$0 sm:$0xff]  ;;  %v4880_v58 = vld [vmem:[%s7431_s5 + $0x28] ss:$0 sm:$0xff] }
 0x10a   : > { %v5939_v13 = vpop.permute.xlu1 %1670 }
 0x10b   : > { %7465 = vst [vmem:[#allocation39_spill] sm:$0xff] %v5939_v13  ;;  %v5947_v34 = vpop.permute.xlu0 %1366 }
 0x10c   : > { %2734 = vperm.xlu1 %5178, %v4856_v42   ;;  %2314 = vperm.xlu0 %5179, %v4818_v7   ;;  %7466 = vst [vmem:[#allocation40_spill] sm:$0xff] %v5947_v34 }
 0x10e   : > { %v5949_v50 = vpop.permute.xlu1 %2050 }
 0x10f   : > { %7467 = vst [vmem:[#allocation41_spill] sm:$0xff] %v5949_v50  ;;  %v5957_v42 = vpop.permute.xlu0 %1798 }
 0x110   : > { %3034 = vperm.xlu1 %5178, %v4884_v26   ;;  %2434 = vperm.xlu0 %5179, %v4828_v29   ;;  %7468 = vst [vmem:[#allocation42_spill] sm:$0xff] %v5957_v42  ;;  %v4767_v26 = vld [vmem:[%s7383_s8 + $0xb] ss:$0 sm:$0xff] }
 0x112   : > { %v5959_v7 = vpop.permute.xlu1 %2350 }
 0x113   : > { %7469 = vst [vmem:[#allocation43_spill] sm:$0xff] %v5959_v7  ;;  %v5967_v29 = vpop.permute.xlu0 %1918 }
 0x114   : > { %2058 = vperm.xlu1 %5178, %v4795_v57   ;;  %2994 = vperm.xlu0 %5179, %v4880_v58   ;;  %v4819_v57 = vld [vmem:[%s7431_s5 + $0x1b] ss:$0 sm:$0xff] }
 0x116   : > { %v5969_v2 = vpop.permute.xlu1 %1538 }
 0x117   : > { %7470 = vst [vmem:[#allocation44_spill] sm:$0xff] %v5969_v2  ;;  %v5977_v58 = vpop.permute.xlu0 %2478  ;;  %v4901_v2 = vld [vmem:[%s7381_s6 + $0x2d] ss:$0 sm:$0xff] }
 0x118   : > { %2358 = vperm.xlu1 %5178, %v4823_v5   ;;  %1758 = vperm.xlu0 %5179, %v4767_v26   ;;  %v4829_v5 = vld [vmem:[%s7383_s8 + $0x19] ss:$0 sm:$0xff] }
 0x11a   : > { %v5979_v50 = vpop.permute.xlu1 %1838 }
 0x11b   : > { %7471 = vst [vmem:[#allocation45_spill] sm:$0xff] %v5979_v50  ;;  %v5987_v26 = vpop.permute.xlu0 %1370 }
 0x11c   : > { %2738 = vperm.xlu1 %5178, %v4857_v61   ;;  %2318 = vperm.xlu0 %5179, %v4819_v57   ;;  %7472 = vst [vmem:[#allocation46_spill] sm:$0xff] %v5987_v26  ;;  %v4881_v61 = vld [vmem:[%s7431_s5 + $0x29] ss:$0 sm:$0xff]  ;;  %v4838_v26 = vld [vmem:[%s7381_s6 + $0x1e] ss:$0 sm:$0xff] }
 0x11e   : > { %v5989_v54 = vpop.permute.xlu1 %2218 }
 0x11f   : > { %v5997_v57 = vpop.permute.xlu0 %1802 }
 0x120   : > { %3038 = vperm.xlu1 %5178, %v4885_v37   ;;  %2438 = vperm.xlu0 %5179, %v4829_v5   ;;  %7473 = vst [vmem:[#allocation47_spill] sm:$0xff] %v5997_v57  ;;  %v4782_v37 = vld [vmem:[%s7383_s8 + $0xe] ss:$0 sm:$0xff]  ;;  %v4872_v57 = vld [vmem:[%s7382_s7 + $0x24] ss:$0 sm:$0xff] }
 0x122   : > { %v5999_v60 = vpop.permute.xlu1 %2518 }
 0x123   : > { %v6007_v5 = vpop.permute.xlu0 %1922 }
 0x124   : > { %2226 = vperm.xlu1 %5178, %v4810_v38   ;;  %2998 = vperm.xlu0 %5179, %v4881_v61   ;;  %7474 = vst [vmem:[#allocation48_spill] sm:$0xff] %v6007_v5  ;;  %v4834_v38 = vld [vmem:[%s7431_s5 + $0x1e] ss:$0 sm:$0xff]  ;;  %v4900_v5 = vld [vmem:[%s7381_s6 + $0x2c] ss:$0 sm:$0xff] }
 0x126   : > { %v6009_v41 = vpop.permute.xlu1 %1542 }
 0x127   : > { %7475 = vst [vmem:[#allocation49_spill] sm:$0xff] %v6009_v41  ;;  %v6017_v61 = vpop.permute.xlu0 %2482 }
 0x128   : > { %2526 = vperm.xlu1 %5178, %v4838_v26   ;;  %1926 = vperm.xlu0 %5179, %v4782_v37   ;;  %7476 = vst [vmem:[#allocation50_spill] sm:$0xff] %v6017_v61  ;;  %v4844_v26 = vld [vmem:[%s7383_s8 + $0x1c] ss:$0 sm:$0xff]  ;;  %v4811_v61 = vld [vmem:[%s7382_s7 + $0x17] ss:$0 sm:$0xff] }
 0x12a   : > { %v6019_v30 = vpop.permute.xlu1 %1842 }
 0x12b   : > { %7477 = vst [vmem:[#allocation51_spill] sm:$0xff] %v6019_v30  ;;  %v6027_v37 = vpop.permute.xlu0 %1710 }
 0x12c   : > { %2906 = vperm.xlu1 %5178, %v4872_v57   ;;  %2486 = vperm.xlu0 %5179, %v4834_v38   ;;  %7478 = vst [vmem:[#allocation52_spill] sm:$0xff] %v6027_v37  ;;  %v4896_v57 = vld [vmem:[%s7431_s5 + $0x2c] ss:$0 sm:$0xff] }
 0x12e   : > { %v6029_v41 = vpop.permute.xlu1 %2222 }
 0x12f   : > { %7479 = vst [vmem:[#allocation53_spill] sm:$0xff] %v6029_v41  ;;  %v6037_v38 = vpop.permute.xlu0 %2010  ;;  %v4839_v41 = vld [vmem:[%s7381_s6 + $0x1f] ss:$0 sm:$0xff] }
 0x130   : > { %3206 = vperm.xlu1 %5178, %v4900_v5   ;;  %2606 = vperm.xlu0 %5179, %v4844_v26   ;;  %7480 = vst [vmem:[#allocation54_spill] sm:$0xff] %v6037_v38  ;;  %v4783_v5 = vld [vmem:[%s7383_s8 + $0xf] ss:$0 sm:$0xff]  ;;  %v7505_v38 = vmov 0.0  }
 0x132   : > { %v6039_v33 = vpop.permute.xlu1 %2522 }
 0x133   : > { %7481 = vst [vmem:[#allocation55_spill] sm:$0xff] %v6039_v33  ;;  %v6047_v26 = vpop.permute.xlu0 %2390 }
 0x134   : > { %2230 = vperm.xlu1 %5178, %v4811_v61   ;;  %3166 = vperm.xlu0 %5179, %v4896_v57   ;;  %v4835_v61 = vld [vmem:[%s7431_s5 + $0x1f] ss:$0 sm:$0xff] }
 0x136   : > { %v6049_v48 = vpop.permute.xlu1 %1970 }
 0x137   : > { %7482 = vst [vmem:[#allocation56_spill] sm:$0xff] %v6049_v48  ;;  %v6057_v57 = vpop.permute.xlu0 %2690  ;;  %v4826_v48 = vld [vmem:[%s7382_s7 + $0x1a] ss:$0 sm:$0xff] }
 0x138   : > { %2530 = vperm.xlu1 %5178, %v4839_v41   ;;  %1930 = vperm.xlu0 %5179, %v4783_v5   ;;  %v4845_v41 = vld [vmem:[%s7383_s8 + $0x1d] ss:$0 sm:$0xff] }
 0x13a   : > { %v6059_v37 = vpop.permute.xlu1 %2090 }
 0x13b   : > { %v6067_v5 = vpop.permute.xlu0 %1974 }
 0x13c   : > { %2910 = vperm.xlu1 %5178, %v4873_v39   ;;  %2490 = vperm.xlu0 %5179, %v4835_v61   ;;  %7483 = vst [vmem:[#allocation57_spill] sm:$0xff] %v6067_v5  ;;  %v4897_v39 = vld [vmem:[%s7431_s5 + $0x2d] ss:$0 sm:$0xff]  ;;  %v4854_v5 = vld [vmem:[%s7381_s6 + $0x22] ss:$0 sm:$0xff] }
 0x13e   : > { %v6069_v34 = vpop.permute.xlu1 %2650 }
 0x13f   : > { %v6077_v61 = vpop.permute.xlu0 %2094 }
 0x140   : > { %3210 = vperm.xlu1 %5178, %v4901_v2   ;;  %2610 = vperm.xlu0 %5179, %v4845_v41   ;;  %7484 = vst [vmem:[#allocation58_spill] sm:$0xff] %v6077_v61  ;;  %v4798_v2 = vld [vmem:[%s7383_s8 + $0x12] ss:$0 sm:$0xff]  ;;  %v4888_v61 = vld [vmem:[%s7382_s7 + $0x28] ss:$0 sm:$0xff] }
 0x142   : > { %v6079_v42 = vpop.permute.xlu1 %1714 }
 0x143   : > { %7485 = vst [vmem:[#allocation59_spill] sm:$0xff] %v6079_v42  ;;  %v6087_v41 = vpop.permute.xlu0 %2654 }
 0x144   : > { %2398 = vperm.xlu1 %5178, %v4826_v48   ;;  %3170 = vperm.xlu0 %5179, %v4897_v39   ;;  %7486 = vst [vmem:[#allocation60_spill] sm:$0xff] %v6087_v41  ;;  %v4850_v48 = vld [vmem:[%s7431_s5 + $0x22] ss:$0 sm:$0xff]  ;;  %v4916_v41 = vld [vmem:[%s7381_s6 + $0x30] ss:$0 sm:$0xff] }
 0x146   : > { %v6089_v53 = vpop.permute.xlu1 %2014 }
 0x147   : > { %7487 = vst [vmem:[#allocation61_spill] sm:$0xff] %v6089_v53  ;;  %v6097_v39 = vpop.permute.xlu0 %1410 }
 0x148   : > { %2698 = vperm.xlu1 %5178, %v4854_v5   ;;  %2098 = vperm.xlu0 %5179, %v4798_v2   ;;  %7488 = vst [vmem:[#allocation62_spill] sm:$0xff] %v6097_v39  ;;  %v4860_v5 = vld [vmem:[%s7383_s8 + $0x20] ss:$0 sm:$0xff] }
 0x14a   : > { %v6099_v42 = vpop.permute.xlu1 %2394 }
 0x14b   : > { %7489 = vst [vmem:[#allocation63_spill] sm:$0xff] %v6099_v42  ;;  %v6107_v2 = vpop.permute.xlu0 %1882  ;;  %v4827_v42 = vld [vmem:[%s7382_s7 + $0x1b] ss:$0 sm:$0xff] }
 0x14c   : > { %3078 = vperm.xlu1 %5178, %v4888_v61   ;;  %2658 = vperm.xlu0 %5179, %v4850_v48   ;;  %7490 = vst [vmem:[#allocation64_spill] sm:$0xff] %v6107_v2  ;;  %v4912_v61 = vld [vmem:[%s7431_s5 + $0x30] ss:$0 sm:$0xff]  ;;  %v4855_v2 = vld [vmem:[%s7381_s6 + $0x23] ss:$0 sm:$0xff] }
 0x14e   : > { %v6109_v9 = vpop.permute.xlu1 %2694 }
 0x14f   : > { %7491 = vst [vmem:[#allocation65_spill] sm:$0xff] %v6109_v9  ;;  %v6117_v48 = vpop.permute.xlu0 %2182 }
 0x150   : > { %3378 = vperm.xlu1 %5178, %v4916_v41   ;;  %2778 = vperm.xlu0 %5179, %v4860_v5   ;;  %7492 = vst [vmem:[#allocation66_spill] sm:$0xff] %v6117_v48  ;;  %v4799_v41 = vld [vmem:[%s7383_s8 + $0x13] ss:$0 sm:$0xff] }
 0x152   : > { %v6119_v39 = vpop.permute.xlu1 %1582 }
 0x153   : > { %7493 = vst [vmem:[#allocation67_spill] sm:$0xff] %v6119_v39  ;;  %v6127_v5 = vpop.permute.xlu0 %2562  ;;  %v4889_v39 = vld [vmem:[%s7382_s7 + $0x29] ss:$0 sm:$0xff] }
 0x154   : > { %2402 = vperm.xlu1 %5178, %v4827_v42   ;;  %3338 = vperm.xlu0 %5179, %v4912_v61   ;;  %v4851_v42 = vld [vmem:[%s7431_s5 + $0x23] ss:$0 sm:$0xff] }
 0x156   : > { %v6129_v59 = vpop.permute.xlu1 %2142 }
 0x157   : > { %7494 = vst [vmem:[#allocation68_spill] sm:$0xff] %v6129_v59  ;;  %v6137_v61 = vpop.permute.xlu0 %2862  ;;  %v4917_v59 = vld [vmem:[%s7381_s6 + $0x31] ss:$0 sm:$0xff] }
 0x158   : > { %2702 = vperm.xlu1 %5178, %v4855_v2   ;;  %2102 = vperm.xlu0 %5179, %v4799_v41   ;;  %v4861_v2 = vld [vmem:[%s7383_s8 + $0x21] ss:$0 sm:$0xff] }
 0x15a   : > { %v6139_v10 = vpop.permute.xlu1 %2262 }
 0x15b   : > { %v6147_v41 = vpop.permute.xlu0 %1586 }
 0x15c   : > { %3082 = vperm.xlu1 %5178, %v4889_v39   ;;  %2662 = vperm.xlu0 %5179, %v4851_v42   ;;  %7495 = vst [vmem:[#allocation69_spill] sm:$0xff] %v6147_v41  ;;  %v4913_v39 = vld [vmem:[%s7431_s5 + $0x31] ss:$0 sm:$0xff]  ;;  %v4870_v41 = vld [vmem:[%s7381_s6 + $0x26] ss:$0 sm:$0xff] }
 0x15e   : > { %v6149_v45 = vpop.permute.xlu1 %2822 }
 0x15f   : > { %v6157_v42 = vpop.permute.xlu0 %2146 }
 0x160   : > { %3382 = vperm.xlu1 %5178, %v4917_v59   ;;  %2782 = vperm.xlu0 %5179, %v4861_v2   ;;  %7496 = vst [vmem:[#allocation70_spill] sm:$0xff] %v6157_v42  ;;  %v4814_v59 = vld [vmem:[%s7383_s8 + $0x16] ss:$0 sm:$0xff]  ;;  %v4904_v42 = vld [vmem:[%s7382_s7 + $0x2c] ss:$0 sm:$0xff] }
 0x162   : > { %v6159_v43 = vpop.permute.xlu1 %1414 }
 0x163   : > { %7497 = vst [vmem:[#allocation71_spill] sm:$0xff] %v6159_v43  ;;  %v6169_v27 = vpop.permute.xlu0 %2266 }
 0x164   : > { %2570 = vperm.xlu1 %5178, %v4842_v55   ;;  %3342 = vperm.xlu0 %5179, %v4913_v39   ;;  %7499 = vst [vmem:[#allocation73_spill] sm:$0xff] %v6169_v27  ;;  %v4866_v55 = vld [vmem:[%s7431_s5 + $0x26] ss:$0 sm:$0xff] }
 0x166   : > { %v6167_v2 = vpop.permute.xlu1 %1886 }
 0x167   : > { %7498 = vst [vmem:[#allocation72_spill] sm:$0xff] %v6167_v2  ;;  %v4932_v2 = vld [vmem:[%s7381_s6 + $0x34] ss:$0 sm:$0xff] }
 0x168   : > { %2870 = vperm.xlu1 %5178, %v4870_v41   ;;  %2270 = vperm.xlu0 %5179, %v4814_v59   ;;  %v4876_v41 = vld [vmem:[%s7383_s8 + $0x24] ss:$0 sm:$0xff] }
 0x16a   : > { %v6177_v39 = vpop.permute.xlu1 %2186 }
 0x16b   : > { %7500 = vst [vmem:[#allocation74_spill] sm:$0xff] %v6177_v39 }
 0x16c   : > { %3250 = vperm.xlu1 %5178, %v4904_v42   ;;  %2830 = vperm.xlu0 %5179, %v4866_v55   ;;  %v4843_v42 = vld [vmem:[%s7382_s7 + $0x1f] ss:$0 sm:$0xff]  ;;  %v4928_v55 = vld [vmem:[%s7431_s5 + $0x34] ss:$0 sm:$0xff] }
 0x16e   : > { %v5182_v59 = vpop.permute.xlu0 %5181  ;;  %v6185_v27 = vpop.permute.xlu1 %2566 }
 0x16f   : > { %7501 = vst [vmem:[#allocation75_spill] sm:$0xff] %v6185_v27  ;;  %v5183_v43 = vunpack.i.l.bf16 %v5182_v59  ;;  %v4815_v27 = vld [vmem:[%s7383_s8 + $0x17] ss:$0 sm:$0xff]  ;;  %v5184_v53 = vunpack.i.h.bf16 %v5182_v59  ;;  %v4867_v59 = vld [vmem:[%s7431_s5 + $0x27] ss:$0 sm:$0xff] }
 0x170   : > { %3550 = vperm.xlu1 %5178, %v4932_v2   ;;  %2950 = vperm.xlu0 %5179, %v4876_v41  }
 0x171   : > { %v6187_v19 = vpack.c.bf16 %v5183_v43, %v5183_v43  ;;  %v4871_v43 = vld [vmem:[%s7381_s6 + $0x27] ss:$0 sm:$0xff] }
 0x172   : > { %v5187_v15 = vpop.permute.xlu0 %5186  ;;  %v5192_v39 = vpop.permute.xlu1 %5191 }
 0x173   : > { %7502 = vst [vmem:[#allocation76_spill] sm:$0xff] %v6187_v19  ;;  %v5188_v48 = vunpack.i.l.bf16 %v5187_v15  ;;  %v5193_v9 = vunpack.i.l.bf16 %v5192_v39  ;;  %v862_v2 = vsel %vm811_vm2, %v6187_v19, 0 }
 0x174   : > { %2574 = vperm.xlu1 %5178, %v4843_v42   ;;  %3510 = vperm.xlu0 %5179, %v4928_v55   ;;  %v804_v55 = vpack.c.bf16 %v5184_v53, %v5184_v53  ;;  %v5194_v53 = vunpack.i.h.bf16 %v5192_v39  ;;  %v4858_v39 = vld [vmem:[%s7382_s7 + $0x22] ss:$0 sm:$0xff] }
 0x175   : > { %v6197_v41 = vpack.c.bf16 %v5188_v48, %v5188_v48  ;;  %5060 = vmatpush3.bf16.xpose.msra.mxu1 %v862_v2  ;;  %v6205_v33 = vpack.c.bf16 %v5193_v9, %v5193_v9  ;;  %v4905_v48 = vld [vmem:[%s7382_s7 + $0x2d] ss:$0 sm:$0xff]  ;;  %v5189_v2 = vunpack.i.h.bf16 %v5187_v15  ;;  %v4933_v15 = vld [vmem:[%s7381_s6 + $0x35] ss:$0 sm:$0xff] }
 0x176   : > { %5071 = vmatprep.subr.bf16.mxu1 %v7505_v38 }
 0x177   : > { %7503 = vst [vmem:[#allocation77_spill] sm:$0xff] %v6197_v41  ;;  %7504 = vst [vmem:[#allocation78_spill] sm:$0xff] %v6205_v33  ;;  %v908_v42 = vsel %vm811_vm2, %v6197_v41, 0  ;;  %v954_v9 = vsel %vm811_vm2, %v6205_v33, 0  ;;  %v4948_v41 = vld [vmem:[%s7381_s6 + $0x38] ss:$0 sm:$0xff] }
 0x178   : > { %2874 = vperm.xlu1 %5178, %v4871_v43   ;;  %2274 = vperm.xlu0 %5179, %v4815_v27   ;;  %v805_v27 = vpack.c.bf16 %v5189_v2, %v5189_v2  ;;  %v4877_v43 = vld [vmem:[%s7383_s8 + $0x25] ss:$0 sm:$0xff]  ;;  %v4929_v2 = vld [vmem:[%s7431_s5 + $0x35] ss:$0 sm:$0xff] }
 0x179   : > { %5066 = vmatpush3.bf16.xpose.msra.mxu0 %v908_v42 }
 0x17a   : > { %5077 = vmatprep.subr.bf16.mxu0 %v7505_v38 }
 0x17b   : > { %v6219_v19 = vpop.permute.xlu1 %2866 }
 0x17c   : > { %7506 = vst [vmem:[#allocation79_spill] sm:$0xff] %v6219_v19  ;;  %5062 = vmatmul.mubr.msk.bf16.vlgmr.msra.gmra.mxu1 %vm811_vm2, %v804_v55  ;;  %3254 = vperm.xlu1 %5178, %v4905_v48   ;;  %v806_v55 = vpack.c.bf16 %v5194_v53, %v5194_v53 }
 0x17d   : > { %2834 = vperm.xlu0 %5179, %v4867_v59   ;;  %5072 = vmatpush3.bf16.xpose.msra.mxu1 %v954_v9 }
 0x17e   : > { %5073 = vmatprep.mubr.msk.bf16.mxu1 %vm5293_vm0, %v7505_v38  ;;  %5083 = vmatprep.subr.bf16.mxu1 %v7505_v38 }
 0x17f   : > { %v6231_v42 = vpop.permute.xlu1 %2054  ;;  %v6233_v48 = vpop.permute.xlu0 %2826 }
 0x180   : > { %7507 = vst [vmem:[#allocation80_spill] sm:$0xff] %v6231_v42  ;;  %7508 = vst [vmem:[#allocation81_spill] sm:$0xff] %v6233_v48  ;;  %5068 = vmatmul.mubr.msk.bf16.vlgmr.msra.gmra.mxu0 %vm811_vm2, %v805_v27  ;;  %3554 = vperm.xlu1 %5178, %v4933_v15   ;;  %v4886_v15 = vld [vmem:[%s7381_s6 + $0x2a] ss:$0 sm:$0xff]  ;;  %v4830_v27 = vld [vmem:[%s7383_s8 + $0x1a] ss:$0 sm:$0xff] }
 0x181   : > { %2954 = vperm.xlu0 %5179, %v4877_v43   ;;  %5079 = vmatprep.mubr.msk.bf16.mxu0 %vm5293_vm0, %v7505_v38  ;;  %v4859_v48 = vld [vmem:[%s7382_s7 + $0x23] ss:$0 sm:$0xff] }
 0x183   : > { %v6244_v59 = vpop.permute.xlu1 %2354  ;;  %v6246_v9 = vpop.permute.xlu0 %1754 }
 0x184   : > { %7509 = vst [vmem:[#allocation82_spill] sm:$0xff] %v6244_v59  ;;  %7510 = vst [vmem:[#allocation83_spill] sm:$0xff] %v6246_v9  ;;  %5074 = vmatmul.mubr.msk.bf16.vlgmr.msra.gmra.mxu1 %vm811_vm2, %v806_v55  ;;  %2742 = vperm.xlu1 %5178, %v4858_v39   ;;  %v4920_v39 = vld [vmem:[%s7382_s7 + $0x30] ss:$0 sm:$0xff]  ;;  %v4882_v55 = vld [vmem:[%s7431_s5 + $0x2a] ss:$0 sm:$0xff] }
 0x185   : > { %3514 = vperm.xlu0 %5179, %v4929_v2   ;;  %5085 = vmatprep.mubr.msk.bf16.mxu1 %vm5293_vm0, %v7505_v38  ;;  %v4875_v59 = vld [vmem:[%s7382_s7 + $0x27] ss:$0 sm:$0xff] }
 0x187   : > { %v6257_v53 = vpop.permute.xlu1 %2734  ;;  %v6259_v43 = vpop.permute.xlu0 %2314 }
 0x188   : > { %7511 = vst [vmem:[#allocation84_spill] sm:$0xff] %v6259_v43  ;;  %3042 = vperm.xlu1 %5178, %v4886_v15   ;;  %v4892_v15 = vld [vmem:[%s7383_s8 + $0x28] ss:$0 sm:$0xff] }
 0x189   : > { %2442 = vperm.xlu0 %5179, %v4830_v27  }
 0x18b   : > { %v6267_v2 = vpop.permute.xlu1 %3034  ;;  %v6269_v33 = vpop.permute.xlu0 %2434 }
 0x18c   : > { %3422 = vperm.xlu1 %5178, %v4920_v39   ;;  %v4944_v39 = vld [vmem:[%s7431_s5 + $0x38] ss:$0 sm:$0xff] }
 0x18d   : > { %3002 = vperm.xlu0 %5179, %v4882_v55  }
 0x18f   : > { %v6277_v27 = vpop.permute.xlu1 %2058  ;;  %v6279_v38 = vpop.permute.xlu0 %2994 }
 0x190   : > { %7512 = vst [vmem:[#allocation85_spill] sm:$0xff] %v6277_v27  ;;  %3722 = vperm.xlu1 %5178, %v4948_v41   ;;  %v4887_v27 = vld [vmem:[%s7381_s6 + $0x2b] ss:$0 sm:$0xff]  ;;  %v4831_v41 = vld [vmem:[%s7383_s8 + $0x1b] ss:$0 sm:$0xff] }
 0x191   : > { %3122 = vperm.xlu0 %5179, %v4892_v15  }
 0x193   : > { %v6287_v55 = vpop.permute.xlu1 %2358  ;;  %v6289_v9 = vpop.permute.xlu0 %1758 }
 0x194   : > { %7513 = vst [vmem:[#allocation86_spill] sm:$0xff] %v6287_v55  ;;  %7514 = vst [vmem:[#allocation87_spill] sm:$0xff] %v6289_v9  ;;  %2746 = vperm.xlu1 %5178, %v4859_v48   ;;  %v4921_v9 = vld [vmem:[%s7382_s7 + $0x31] ss:$0 sm:$0xff]  ;;  %v4883_v48 = vld [vmem:[%s7431_s5 + $0x2b] ss:$0 sm:$0xff] }
 0x195   : > { %3682 = vperm.xlu0 %5179, %v4944_v39  }
 0x197   : > { %v6297_v15 = vpop.permute.xlu1 %2738  ;;  %v6299_v42 = vpop.permute.xlu0 %2318 }
 0x198   : > { %7515 = vst [vmem:[#allocation88_spill] sm:$0xff] %v6297_v15  ;;  %7516 = vst [vmem:[#allocation89_spill] sm:$0xff] %v6299_v42  ;;  %3046 = vperm.xlu1 %5178, %v4887_v27   ;;  %v4949_v15 = vld [vmem:[%s7381_s6 + $0x39] ss:$0 sm:$0xff]  ;;  %v4893_v27 = vld [vmem:[%s7383_s8 + $0x29] ss:$0 sm:$0xff] }
 0x199   : > { %2446 = vperm.xlu0 %5179, %v4831_v41  }
 0x19b   : > { %v6307_v39 = vpop.permute.xlu1 %3038  ;;  %v6309_v43 = vpop.permute.xlu0 %2438 }
 0x19c   : > { %7517 = vst [vmem:[#allocation90_spill] sm:$0xff] %v6307_v39  ;;  %7518 = vst [vmem:[#allocation91_spill] sm:$0xff] %v6309_v43  ;;  %3426 = vperm.xlu1 %5178, %v4921_v9   ;;  %v4874_v43 = vld [vmem:[%s7382_s7 + $0x26] ss:$0 sm:$0xff]  ;;  %v4945_v9 = vld [vmem:[%s7431_s5 + $0x39] ss:$0 sm:$0xff] }
 0x19d   : > { %3006 = vperm.xlu0 %5179, %v4883_v48  }
 0x19f   : > { %v6317_v41 = vpop.permute.xlu1 %2226  ;;  %v6319_v42 = vpop.permute.xlu0 %2998 }
 0x1a0   : > { %7519 = vst [vmem:[#allocation92_spill] sm:$0xff] %v6317_v41  ;;  %7520 = vst [vmem:[#allocation93_spill] sm:$0xff] %v6319_v42  ;;  %3726 = vperm.xlu1 %5178, %v4949_v15   ;;  %v4902_v42 = vld [vmem:[%s7381_s6 + $0x2e] ss:$0 sm:$0xff]  ;;  %v4846_v15 = vld [vmem:[%s7383_s8 + $0x1e] ss:$0 sm:$0xff] }
 0x1a1   : > { %3126 = vperm.xlu0 %5179, %v4893_v27  }
 0x1a3   : > { %v6327_v48 = vpop.permute.xlu1 %2526  ;;  %v6329_v39 = vpop.permute.xlu0 %1926 }
 0x1a4   : > { %7521 = vst [vmem:[#allocation94_spill] sm:$0xff] %v6327_v48  ;;  %7522 = vst [vmem:[#allocation95_spill] sm:$0xff] %v6329_v39  ;;  %2914 = vperm.xlu1 %5178, %v4874_v43   ;;  %v4936_v39 = vld [vmem:[%s7382_s7 + $0x34] ss:$0 sm:$0xff]  ;;  %v4898_v43 = vld [vmem:[%s7431_s5 + $0x2e] ss:$0 sm:$0xff] }
 0x1a5   : > { %3686 = vperm.xlu0 %5179, %v4945_v9  }
 0x1a7   : > { %v6337_v27 = vpop.permute.xlu1 %2906  ;;  %v6339_v41 = vpop.permute.xlu0 %2486 }
 0x1a8   : > { %7523 = vst [vmem:[#allocation96_spill] sm:$0xff] %v6339_v41  ;;  %3214 = vperm.xlu1 %5178, %v4902_v42   ;;  %v4964_v41 = vld [vmem:[%s7381_s6 + $0x3c] ss:$0 sm:$0xff]  ;;  %v4908_v42 = vld [vmem:[%s7383_s8 + $0x2c] ss:$0 sm:$0xff] }
 0x1a9   : > { %2614 = vperm.xlu0 %5179, %v4846_v15  }
 0x1ab   : > { %v6347_v9 = vpop.permute.xlu1 %3206  ;;  %v6349_v48 = vpop.permute.xlu0 %2606 }
 0x1ac   : > { %3594 = vperm.xlu1 %5178, %v4936_v39   ;;  %v4960_v39 = vld [vmem:[%s7431_s5 + $0x3c] ss:$0 sm:$0xff] }
 0x1ad   : > { %3174 = vperm.xlu0 %5179, %v4898_v43  }
 0x1af   : > { %v6357_v15 = vpop.permute.xlu1 %2230  ;;  %v6359_v55 = vpop.permute.xlu0 %3166 }
 0x1b0   : > { %7524 = vst [vmem:[#allocation97_spill] sm:$0xff] %v6357_v15  ;;  %3894 = vperm.xlu1 %5178, %v4964_v41   ;;  %v4903_v15 = vld [vmem:[%s7381_s6 + $0x2f] ss:$0 sm:$0xff]  ;;  %v4847_v41 = vld [vmem:[%s7383_s8 + $0x1f] ss:$0 sm:$0xff] }
 0x1b1   : > { %3294 = vperm.xlu0 %5179, %v4908_v42  }
 0x1b3   : > { %v6367_v43 = vpop.permute.xlu1 %2530  ;;  %v6369_v19 = vpop.permute.xlu0 %1930 }
 0x1b4   : > { %7525 = vst [vmem:[#allocation98_spill] sm:$0xff] %v6367_v43  ;;  %7526 = vst [vmem:[#allocation99_spill] sm:$0xff] %v6369_v19  ;;  %2918 = vperm.xlu1 %5178, %v4875_v59   ;;  %v4937_v19 = vld [vmem:[%s7382_s7 + $0x35] ss:$0 sm:$0xff]  ;;  %v4899_v59 = vld [vmem:[%s7431_s5 + $0x2f] ss:$0 sm:$0xff] }
 0x1b5   : > { %3854 = vperm.xlu0 %5179, %v4960_v39  }
 0x1b7   : > { %v6377_v42 = vpop.permute.xlu1 %2910  ;;  %v6379_v30 = vpop.permute.xlu0 %2490 }
 0x1b8   : > { %7527 = vst [vmem:[#allocation100_spill] sm:$0xff] %v6377_v42  ;;  %7528 = vst [vmem:[#allocation101_spill] sm:$0xff] %v6379_v30  ;;  %3218 = vperm.xlu1 %5178, %v4903_v15   ;;  %v4965_v42 = vld [vmem:[%s7381_s6 + $0x3d] ss:$0 sm:$0xff]  ;;  %v4909_v15 = vld [vmem:[%s7383_s8 + $0x2d] ss:$0 sm:$0xff] }
 0x1b9   : > { %2618 = vperm.xlu0 %5179, %v4847_v41  }
 0x1bb   : > { %v6387_v39 = vpop.permute.xlu1 %3210  ;;  %v6389_v43 = vpop.permute.xlu0 %2610 }
 0x1bc   : > { %7529 = vst [vmem:[#allocation102_spill] sm:$0xff] %v6387_v39  ;;  %7530 = vst [vmem:[#allocation103_spill] sm:$0xff] %v6389_v43  ;;  %3598 = vperm.xlu1 %5178, %v4937_v19   ;;  %v4890_v43 = vld [vmem:[%s7382_s7 + $0x2a] ss:$0 sm:$0xff]  ;;  %v4961_v19 = vld [vmem:[%s7431_s5 + $0x3d] ss:$0 sm:$0xff] }
 0x1bd   : > { %3178 = vperm.xlu0 %5179, %v4899_v59  }
 0x1bf   : > { %v6397_v41 = vpop.permute.xlu1 %2398  ;;  %v6399_v30 = vpop.permute.xlu0 %3170 }
 0x1c0   : > { %7531 = vst [vmem:[#allocation104_spill] sm:$0xff] %v6397_v41  ;;  %7532 = vst [vmem:[#allocation105_spill] sm:$0xff] %v6399_v30  ;;  %3898 = vperm.xlu1 %5178, %v4965_v42   ;;  %v4918_v42 = vld [vmem:[%s7381_s6 + $0x32] ss:$0 sm:$0xff] }
 0x1c1   : > { %3298 = vperm.xlu0 %5179, %v4909_v15   ;;  %v4862_v15 = vld [vmem:[%s7383_s8 + $0x22] ss:$0 sm:$0xff] }
 0x1c3   : > { %v6407_v59 = vpop.permute.xlu1 %2698  ;;  %v6409_v39 = vpop.permute.xlu0 %2098 }
 0x1c4   : > { %7533 = vst [vmem:[#allocation106_spill] sm:$0xff] %v6407_v59  ;;  %7534 = vst [vmem:[#allocation107_spill] sm:$0xff] %v6409_v39  ;;  %3086 = vperm.xlu1 %5178, %v4890_v43   ;;  %v4952_v43 = vld [vmem:[%s7382_s7 + $0x38] ss:$0 sm:$0xff] }
 0x1c5   : > { %3858 = vperm.xlu0 %5179, %v4961_v19   ;;  %v6411_v50 = vpop.f32.mrf.mxu0  ;;  %v4914_v19 = vld [vmem:[%s7431_s5 + $0x32] ss:$0 sm:$0xff] }
 0x1c7   : > { %v5057_v30 = vpop.f32.mrf.mxu0  ;;  %v6419_v41 = vpop.permute.xlu1 %3078 }
 0x1c8   : > { %v6421_v7 = vpop.permute.xlu0 %2658  ;;  %3386 = vperm.xlu1 %5178, %v4918_v42   ;;  %v4891_v30 = vld [vmem:[%s7382_s7 + $0x2b] ss:$0 sm:$0xff] }
 0x1c9   : > { %7535 = vst [vmem:[#allocation108_spill] sm:$0xff] %v6421_v7  ;;  %2786 = vperm.xlu0 %5179, %v4862_v15   ;;  %v855_v39 = vpop.f32.mrf.mxu0 }
 0x1ca   : > { %v4924_v39 = vld [vmem:[%s7383_s8 + $0x30] ss:$0 sm:$0xff] }
 0x1cb   : > { %v5058_v59 = vpop.f32.mrf.mxu0  ;;  %v6429_v13 = vpop.permute.xlu1 %3378 }
 0x1cc   : > { %7536 = vst [vmem:[#allocation109_spill] sm:$0xff] %v6429_v13  ;;  %v6431_v21 = vpop.permute.xlu0 %2778  ;;  %3766 = vperm.xlu1 %5178, %v4952_v43   ;;  %v4919_v59 = vld [vmem:[%s7381_s6 + $0x33] ss:$0 sm:$0xff]  ;;  %v4863_v43 = vld [vmem:[%s7383_s8 + $0x23] ss:$0 sm:$0xff] }
 0x1cd   : > { %3346 = vperm.xlu0 %5179, %v4914_v19  }
 0x1cf   : > { %v6439_v42 = vpop.permute.xlu1 %2402 }
 0x1d0   : > { %7537 = vst [vmem:[#allocation110_spill] sm:$0xff] %v6439_v42  ;;  %v6441_v15 = vpop.permute.xlu0 %3338  ;;  %3090 = vperm.xlu1 %5178, %v4891_v30   ;;  %v4953_v42 = vld [vmem:[%s7382_s7 + $0x39] ss:$0 sm:$0xff]  ;;  %v4915_v30 = vld [vmem:[%s7431_s5 + $0x33] ss:$0 sm:$0xff] }
 0x1d1   : > { %7538 = vst [vmem:[#allocation111_spill] sm:$0xff] %v6441_v15  ;;  %3466 = vperm.xlu0 %5179, %v4924_v39  }
 0x1d3   : > { %v6449_v19 = vpop.permute.xlu1 %2702 }
 0x1d4   : > { %7539 = vst [vmem:[#allocation112_spill] sm:$0xff] %v6449_v19  ;;  %v6451_v7 = vpop.permute.xlu0 %2102  ;;  %3390 = vperm.xlu1 %5178, %v4919_v59   ;;  %v4925_v59 = vld [vmem:[%s7383_s8 + $0x31] ss:$0 sm:$0xff] }
 0x1d5   : > { %7540 = vst [vmem:[#allocation113_spill] sm:$0xff] %v6451_v7  ;;  %2790 = vperm.xlu0 %5179, %v4863_v43   ;;  %v4906_v7 = vld [vmem:[%s7382_s7 + $0x2e] ss:$0 sm:$0xff] }
 0x1d7   : > { %v6459_v39 = vpop.permute.xlu1 %3082 }
 0x1d8   : > { %7541 = vst [vmem:[#allocation114_spill] sm:$0xff] %v6459_v39  ;;  %v6461_v13 = vpop.permute.xlu0 %2662  ;;  %3770 = vperm.xlu1 %5178, %v4953_v42   ;;  %v4934_v39 = vld [vmem:[%s7381_s6 + $0x36] ss:$0 sm:$0xff]  ;;  %v4878_v42 = vld [vmem:[%s7383_s8 + $0x26] ss:$0 sm:$0xff] }
 0x1d9   : > { %7542 = vst [vmem:[#allocation115_spill] sm:$0xff] %v6461_v13  ;;  %3350 = vperm.xlu0 %5179, %v4915_v30  }
 0x1db   : > { %v6469_v43 = vpop.permute.xlu1 %3382 }
 0x1dc   : > { %7543 = vst [vmem:[#allocation116_spill] sm:$0xff] %v6469_v43  ;;  %v6471_v19 = vpop.permute.xlu0 %2782  ;;  %3258 = vperm.xlu1 %5178, %v4906_v7   ;;  %v4930_v7 = vld [vmem:[%s7431_s5 + $0x36] ss:$0 sm:$0xff] }
 0x1dd   : > { %7544 = vst [vmem:[#allocation117_spill] sm:$0xff] %v6471_v19  ;;  %3470 = vperm.xlu0 %5179, %v4925_v59   ;;  %v4968_v19 = vld [vmem:[%s7382_s7 + $0x3c] ss:$0 sm:$0xff] }
 0x1df   : > { %v6479_v30 = vpop.permute.xlu1 %2570 }
 0x1e0   : > { %7545 = vst [vmem:[#allocation118_spill] sm:$0xff] %v6479_v30  ;;  %v6481_v13 = vpop.permute.xlu0 %3342  ;;  %3558 = vperm.xlu1 %5178, %v4934_v39   ;;  %v4940_v39 = vld [vmem:[%s7383_s8 + $0x34] ss:$0 sm:$0xff] }
 0x1e1   : > { %7546 = vst [vmem:[#allocation119_spill] sm:$0xff] %v6481_v13  ;;  %2958 = vperm.xlu0 %5179, %v4878_v42   ;;  %v4907_v13 = vld [vmem:[%s7382_s7 + $0x2f] ss:$0 sm:$0xff] }
 0x1e3   : > { %v6489_v59 = vpop.permute.xlu1 %2870 }
 0x1e4   : > { %7547 = vst [vmem:[#allocation120_spill] sm:$0xff] %v6489_v59  ;;  %v6491_v43 = vpop.permute.xlu0 %2270  ;;  %3938 = vperm.xlu1 %5178, %v4968_v19   ;;  %v4935_v59 = vld [vmem:[%s7381_s6 + $0x37] ss:$0 sm:$0xff]  ;;  %v4879_v19 = vld [vmem:[%s7383_s8 + $0x27] ss:$0 sm:$0xff] }
 0x1e5   : > { %7548 = vst [vmem:[#allocation121_spill] sm:$0xff] %v6491_v43  ;;  %3518 = vperm.xlu0 %5179, %v4930_v7  }
 0x1e7   : > { %v6499_v42 = vpop.permute.xlu1 %3250 }
 0x1e8   : > { %v6501_v30 = vpop.permute.xlu0 %2830  ;;  %3262 = vperm.xlu1 %5178, %v4907_v13   ;;  %v4969_v13 = vld [vmem:[%s7382_s7 + $0x3d] ss:$0 sm:$0xff] }
 0x1e9   : > { %7549 = vst [vmem:[#allocation122_spill] sm:$0xff] %v6501_v30  ;;  %3638 = vperm.xlu0 %5179, %v4940_v39   ;;  %v4931_v39 = vld [vmem:[%s7431_s5 + $0x37] ss:$0 sm:$0xff] }
 0x1eb   : > { %v6509_v7 = vpop.permute.xlu1 %3550 }
 0x1ec   : > { %v6511_v43 = vpop.permute.xlu0 %2950  ;;  %3562 = vperm.xlu1 %5178, %v4935_v59   ;;  %v4941_v59 = vld [vmem:[%s7383_s8 + $0x35] ss:$0 sm:$0xff] }
 0x1ed   : > { %2962 = vperm.xlu0 %5179, %v4879_v19  }
 0x1ef   : > { %v6519_v30 = vpop.permute.xlu1 %2574 }
 0x1f0   : > { %7550 = vst [vmem:[#allocation123_spill] sm:$0xff] %v6519_v30  ;;  %v6521_v15 = vpop.permute.xlu0 %3510  ;;  %3942 = vperm.xlu1 %5178, %v4969_v13   ;;  %v4950_v13 = vld [vmem:[%s7381_s6 + $0x3a] ss:$0 sm:$0xff] }
 0x1f1   : > { %3522 = vperm.xlu0 %5179, %v4931_v39   ;;  %v4894_v39 = vld [vmem:[%s7383_s8 + $0x2a] ss:$0 sm:$0xff] }
 0x1f3   : > { %v6529_v19 = vpop.permute.xlu1 %2874 }
 0x1f4   : > { %7551 = vst [vmem:[#allocation124_spill] sm:$0xff] %v6529_v19  ;;  %v6531_v46 = vpop.permute.xlu0 %2274  ;;  %3430 = vperm.xlu1 %5178, %v4922_v1   ;;  %v6548_v19 = vld [vmem:[%s6537_s19] sm:$0xff] }
 0x1f5   : > { %7552 = vst [vmem:[#allocation125_spill] sm:$0xff] %v6531_v46  ;;  %3642 = vperm.xlu0 %5179, %v4941_v59   ;;  %v1289_v46 = vmul.f32 %v5692_v12, %v6411_v50  ;;  %v1461_v59 = vmul.f32 %v5702_v16, %v6411_v50  ;;  %v1329_v4 = vmul.f32 %v5690_v11, %v6548_v19 }
 0x1f6   : > { %v1633_v11 = vmul.f32 %v5720_v23, %v6411_v50  ;;  %v4923_v23 = vld [vmem:[%s7382_s7 + $0x33] ss:$0 sm:$0xff] }
 0x1f7   : > { %v6545_v30 = vpop.permute.xlu1 %3254  ;;  %v1333_v16 = vadd.f32 %v1329_v4, %v1289_v46  ;;  %v1673_v4 = vmul.f32 %v5742_v32, %v6548_v19 }
 0x1f8   : > { %7554 = vst [vmem:[#allocation126_spill] sm:$0xff] %v6545_v30  ;;  %v6550_v1 = vpop.permute.xlu0 %2834  ;;  %3730 = vperm.xlu1 %5178, %v4950_v13   ;;  %v4946_v30 = vld [vmem:[%s7431_s5 + $0x3a] ss:$0 sm:$0xff]  ;;  %v1501_v13 = vmul.f32 %v5712_v20, %v6548_v19 }
 0x1f9   : > { %7555 = vst [vmem:[#allocation127_spill] sm:$0xff] %v6550_v1  ;;  %3130 = vperm.xlu0 %5179, %v4894_v39  }
 0x1fa   : > { %v1505_v39 = vadd.f32 %v1501_v13, %v1461_v59  ;;  %v1677_v59 = vadd.f32 %v1673_v4, %v1633_v11  ;;  %v1977_v4 = vmul.f32 %v5802_v56, %v6411_v50  ;;  %v4910_v56 = vld [vmem:[%s7383_s8 + $0x2e] ss:$0 sm:$0xff] }
 0x1fb   : > { %v6566_v1 = vpop.permute.xlu1 %3554 }
 0x1fc   : > { %7556 = vst [vmem:[#allocation128_spill] sm:$0xff] %v6566_v1  ;;  %v6568_v12 = vpop.permute.xlu0 %2954  ;;  %3134 = vperm.xlu1 %5178, %v4895_v22   ;;  %v1373_v22 = vadd.f32 %v5740_v31, %v1333_v16  ;;  %v1545_v46 = vadd.f32 %v5762_v40, %v1505_v39  ;;  %v1845_v31 = vmul.f32 %v5772_v44, %v6548_v19  ;;  %v4938_v16 = vld [vmem:[%s7382_s7 + $0x36] ss:$0 sm:$0xff]  ;;  %v4951_v39 = vld [vmem:[%s7381_s6 + $0x3b] ss:$0 sm:$0xff] }
 0x1fd   : > { %7557 = vst [vmem:[#allocation129_spill] sm:$0xff] %v6568_v12  ;;  %3690 = vperm.xlu0 %5179, %v4946_v30   ;;  %v4957_v30 = vld [vmem:[%s7383_s8 + $0x39] ss:$0 sm:$0xff] }
 0x1fe   : > { %v1377_v40 = vmax.f32 %v1373_v22, 0.0  ;;  %v2017_v22 = vmul.f32 %v5790_v51, %v6548_v19  ;;  %v2149_v51 = vmul.f32 %v5862_v25, %v6411_v50  ;;  %v4962_v25 = vld [vmem:[%s7431_s5 + $0x3e] ss:$0 sm:$0xff] }
 0x1ff   : > { %v6578_v20 = vpop.permute.xlu1 %2742 }
 0x200   : > { %v6580_v1 = vpop.permute.xlu0 %3514  ;;  %3694 = vperm.xlu1 %5178, %v4947_v3   ;;  %v1805_v3 = vmul.f32 %v5750_v35, %v6411_v50  ;;  %v1717_v35 = vadd.f32 %v5780_v47, %v1677_v59  ;;  %v4966_v47 = vld [vmem:[%s7381_s6 + $0x3e] ss:$0 sm:$0xff] }
 0x201   : > { %7558 = vst [vmem:[#allocation130_spill] sm:$0xff] %v6580_v1  ;;  %3810 = vperm.xlu0 %5179, %v4956_v0   ;;  %v1549_v0 = vmax.f32 %v1545_v46, 0.0  ;;  %v1417_v46 = vmul.f32 %v5820_v63, %v1377_v40 }
 0x202   : > { %v1849_v11 = vadd.f32 %v1845_v31, %v1805_v3  ;;  %v1721_v59 = vmax.f32 %v1717_v35, 0.0  ;;  %v2021_v31 = vadd.f32 %v2017_v22, %v1977_v4  ;;  %v2361_v22 = vmul.f32 %v5927_v6, %v6548_v19 }
 0x203   : > { %v6594_v13 = vpop.permute.xlu1 %3042  ;;  %v2493_v6 = vmul.f32 %v5977_v58, %v6411_v50  ;;  %v4939_v58 = vld [vmem:[%s7382_s7 + $0x37] ss:$0 sm:$0xff] }
 0x204   : > { %7559 = vst [vmem:[#allocation131_spill] sm:$0xff] %v6594_v13  ;;  %v6596_v32 = vpop.permute.xlu0 %2442  ;;  %3814 = vperm.xlu1 %5178, %v4957_v30   ;;  %v1889_v3 = vadd.f32 %v5840_v8, %v1849_v11  ;;  %v2321_v8 = vmul.f32 %v5903_v18, %v6411_v50  ;;  %v2061_v11 = vadd.f32 %v5916_v49, %v2021_v31  ;;  %v4963_v18 = vld [vmem:[%s7431_s5 + $0x3f] ss:$0 sm:$0xff]  ;;  %s4617_s5 = scalar_lea.hbm %s7734_s28, %s5001_s30 }
 0x205   : > { %3434 = vperm.xlu0 %5179, %v4923_v23   ;;  %v1589_v23 = vmul.f32 %v5852_v17, %v1549_v0  ;;  %v2189_v17 = vmul.f32 %v5850_v14, %v6548_v19  ;;  %v4911_v0 = vld [vmem:[%s7383_s8 + $0x2f] ss:$0 sm:$0xff] }
 0x206   : > { %v1893_v35 = vmax.f32 %v1889_v3, 0.0 }
 0x207   : > { %v6609_v30 = vpop.permute.xlu1 %3422  ;;  %v1593_v40 = vadd.f32 %v1589_v23, %v1417_v46  ;;  %v2193_v4 = vadd.f32 %v2189_v17, %v2149_v51  ;;  %v2533_v17 = vmul.f32 %v5999_v60, %v6548_v19 }
 0x208   : > { %v6611_v44 = vpop.permute.xlu0 %3002  ;;  %3602 = vperm.xlu1 %5178, %v4938_v16   ;;  %v1933_v49 = vmul.f32 %v5967_v29, %v1893_v35  ;;  %v4973_v29 = vld [vmem:[%s7383_s8 + $0x3d] ss:$0 sm:$0xff] }
 0x209   : > { %7560 = vst [vmem:[#allocation132_spill] sm:$0xff] %v6611_v44  ;;  %3734 = vperm.xlu0 %5179, %v4951_v39   ;;  %v1761_v39 = vmul.f32 %v5892_v62, %v1721_v59  ;;  %v4972_v62 = vld [vmem:[%s7383_s8 + $0x3c] ss:$0 sm:$0xff]  ;;  %v2233_v59 = vadd.f32 %v5989_v54, %v2193_v4  ;;  %v2837_v4 = vmul.f32 %v6149_v45, %v6411_v50 }
 0x20b   : > { %v6626_v16 = vpop.permute.xlu1 %3722  ;;  %v1765_v23 = vadd.f32 %v1761_v39, %v1593_v40  ;;  %v2665_v39 = vmul.f32 %v6069_v34, %v6411_v50  ;;  %v2877_v34 = vmul.f32 %v6137_v61, %v6548_v19 }
 0x20c   : > { %v6628_v63 = vpop.permute.xlu0 %3122  ;;  %3902 = vperm.xlu1 %5178, %v4966_v47   ;;  %v2365_v47 = vadd.f32 %v2361_v22, %v2321_v8  ;;  %v2237_v8 = vmax.f32 %v2233_v59, 0.0  ;;  %v3009_v22 = vmul.f32 %v6279_v38, %v6411_v50  ;;  %v3049_v38 = vmul.f32 %v6267_v2, %v6548_v19 }
 0x20d   : > { %3302 = vperm.xlu0 %5179, %v4910_v56   ;;  %v2065_v56 = vmax.f32 %v2061_v11, 0.0  ;;  %v1937_v40 = vadd.f32 %v1933_v49, %v1765_v23  ;;  %v2705_v11 = vmul.f32 %v6057_v57, %v6548_v19  ;;  %v4967_v23 = vld [vmem:[%s7381_s6 + $0x3f] ss:$0 sm:$0xff]  ;;  %v2881_v59 = vadd.f32 %v2877_v34, %v2837_v4 }
 0x20e   : > { %v2405_v54 = vadd.f32 %v6047_v26, %v2365_v47  ;;  %v2277_v57 = vmul.f32 %v6139_v10, %v2237_v8  ;;  %v4955_v10 = vld [vmem:[%s7382_s7 + $0x3b] ss:$0 sm:$0xff]  ;;  %v4970_v8 = vld [vmem:[%s7382_s7 + $0x3e] ss:$0 sm:$0xff] }
 0x20f   : > { %v6642_v14 = vpop.permute.xlu1 %2746  ;;  %v2709_v47 = vadd.f32 %v2705_v11, %v2665_v39 }
 0x210   : > { %v6646_v46 = vpop.permute.xlu0 %3682  ;;  %3306 = vperm.xlu1 %5178, %v4911_v0   ;;  %v2105_v0 = vmul.f32 %v6059_v37, %v2065_v56  ;;  %v4954_v37 = vld [vmem:[%s7382_s7 + $0x3a] ss:$0 sm:$0xff] }
 0x211   : > { %3862 = vperm.xlu0 %5179, %v4962_v25   ;;  %v2537_v25 = vadd.f32 %v2533_v17, %v2493_v6  ;;  %v3053_v6 = vadd.f32 %v3049_v38, %v3009_v22 }
 0x212   : > { %v2109_v26 = vadd.f32 %v2105_v0, %v1937_v40  ;;  %v2749_v40 = vadd.f32 %v6257_v53, %v2709_v47  ;;  %v2921_v0 = vadd.f32 %v6337_v27, %v2881_v59  ;;  %v4927_v53 = vld [vmem:[%s7383_s8 + $0x33] ss:$0 sm:$0xff]  ;;  %v4977_v59 = vld [vmem:[%s7384_s9 + $0x1] ss:$0 sm:$0xff] }
 0x213   : > { %v3047_v3 = vpop.permute.xlu1 %3046  ;;  %v2577_v45 = vadd.f32 %v6127_v5, %v2537_v25  ;;  %v4926_v5 = vld [vmem:[%s7383_s8 + $0x32] ss:$0 sm:$0xff]  ;;  %v3221_v25 = vmul.f32 %v6347_v9, %v6548_v19  ;;  %v3093_v39 = vadd.f32 %v6419_v41, %v3053_v6  ;;  %v4943_v9 = vld [vmem:[%s7383_s8 + $0x37] ss:$0 sm:$0xff]  ;;  %v4942_v41 = vld [vmem:[%s7383_s8 + $0x36] ss:$0 sm:$0xff] }
 0x214   : > { %v6659_v31 = vmul.f32 %v3047_v3, %v6548_v19  ;;  %v6661_v51 = vpop.permute.xlu0 %2446  ;;  %3866 = vperm.xlu1 %5178, %v4963_v18   ;;  %v2409_v18 = vmax.f32 %v2405_v54, 0.0  ;;  %v2281_v61 = vadd.f32 %v2277_v57, %v2109_v26  ;;  %v2753_v27 = vmax.f32 %v2749_v40, 0.0  ;;  %v4971_v40 = vld [vmem:[%s7382_s7 + $0x3f] ss:$0 sm:$0xff] }
 0x215   : > { %3982 = vperm.xlu0 %5179, %v4972_v62   ;;  %v2581_v17 = vmax.f32 %v2577_v45, 0.0  ;;  %v3565_v26 = vmul.f32 %v6509_v7, %v6548_v19  ;;  %v2925_v22 = vmax.f32 %v2921_v0, 0.0  ;;  %v3097_v7 = vmax.f32 %v3093_v39, 0.0 }
 0x216   : > { %v2449_v3 = vmul.f32 %v6269_v33, %v2409_v18  ;;  %v3525_v33 = vmul.f32 %v6521_v15, %v6411_v50 }
 0x217   : > { %v6675_v60 = vpop.permute.xlu1 %3426  ;;  %v2965_v18 = vmul.f32 %v6511_v43, %v2925_v22 }
 0x218   : > { %7561 = vst [vmem:[#allocation133_spill] sm:$0xff] %v6675_v60  ;;  %v6677_v35 = vpop.permute.xlu0 %3006  ;;  %3986 = vperm.xlu1 %5178, %v4973_v29   ;;  %v2453_v54 = vadd.f32 %v2449_v3, %v2281_v61  ;;  %v3137_v61 = vmul.f32 %v6628_v63, %v3097_v7  ;;  %v4959_v63 = vld [vmem:[%s7383_s8 + $0x3b] ss:$0 sm:$0xff]  ;;  %v4979_v7 = vld [vmem:[%s7384_s9 + $0x3] ss:$0 sm:$0xff] }
 0x219   : > { %3606 = vperm.xlu0 %5179, %v4939_v58   ;;  %v3181_v58 = vmul.f32 %v6359_v55, %v6411_v50  ;;  %v2621_v55 = vmul.f32 %v6349_v48, %v2581_v17  ;;  %v3569_v48 = vadd.f32 %v3565_v26, %v3525_v33  ;;  %v4975_v33 = vld [vmem:[%s7383_s8 + $0x3f] ss:$0 sm:$0xff]  ;;  %v6786_v26 = vmul.f32 %v5792_v52, %v6548_v19 }
 0x21a   : > { %v7571_v52 = vld [vmem:[#allocation24_spill] sm:$0xff] }
 0x21b   : > { %v3727_v62 = vpop.permute.xlu1 %3726  ;;  %v3225_v34 = vadd.f32 %v3221_v25, %v3181_v58  ;;  %v6776_v25 = vmul.f32 %v5722_v24, %v6548_v19  ;;  %v7568_v24 = vld [vmem:[#allocation20_spill] sm:$0xff] }
 0x21c   : > { %v6696_v49 = vmul.f32 %v3727_v62, %v6548_v19  ;;  %v6698_v56 = vpop.permute.xlu0 %3126  ;;  %3774 = vperm.xlu1 %5178, %v4954_v37   ;;  %v2625_v37 = vadd.f32 %v2621_v55, %v2453_v54  ;;  %v2018_v22 = vmul.f32 %v7568_v24, %v6548_v19  ;;  %v7584_v24 = vld [vmem:[#allocation61_spill] sm:$0xff] }
 0x21d   : > { %7562 = vst [vmem:[#allocation134_spill] sm:$0xff] %v6698_v56  ;;  %3906 = vperm.xlu0 %5179, %v4967_v23   ;;  %v2793_v23 = vmul.f32 %v6431_v21, %v2753_v27  ;;  %v3265_v57 = vadd.f32 %v6499_v42, %v3225_v34  ;;  %v4976_v21 = vld [vmem:[%s7384_s9] ss:$0 sm:$0xff]  ;;  %v1502_v27 = vmul.f32 %v5732_v28, %v6548_v19  ;;  %v7570_v28 = vld [vmem:[#allocation22_spill] sm:$0xff] }
 0x21f   : > { %v6710_v29 = vpop.permute.xlu1 %2914  ;;  %v2797_v38 = vadd.f32 %v2793_v23, %v2625_v37  ;;  %v3269_v42 = vmax.f32 %v3265_v57, 0.0  ;;  %v7572_v23 = vld [vmem:[#allocation30_spill] sm:$0xff] }
 0x220   : > { %7563 = vst [vmem:[#allocation135_spill] sm:$0xff] %v6710_v29  ;;  %v6712_v2 = vpop.permute.xlu0 %3686  ;;  %3778 = vperm.xlu1 %5178, %v4955_v10   ;;  %v6812_v57 = vmul.f32 %v7572_v23, %v6548_v19 }
 0x221   : > { %3474 = vperm.xlu0 %5179, %v4926_v5   ;;  %v2969_v43 = vadd.f32 %v2965_v18, %v2797_v38  ;;  %v7573_v18 = vld [vmem:[#allocation33_spill] sm:$0xff]  ;;  %v7574_v38 = vld [vmem:[#allocation35_spill] sm:$0xff] }
 0x223   : > { %v3215_v11 = vpop.permute.xlu1 %3214  ;;  %v3141_v3 = vadd.f32 %v3137_v61, %v2969_v43  ;;  %v6818_v61 = vmul.f32 %v7574_v38, %v6548_v19  ;;  %v7576_v43 = vld [vmem:[#allocation39_spill] sm:$0xff] }
 0x224   : > { %v6732_v4 = vmul.f32 %v3215_v11, %v6548_v19  ;;  %v6734_v15 = vpop.permute.xlu0 %2614  ;;  %3946 = vperm.xlu1 %5178, %v4970_v8   ;;  %v1674_v11 = vmul.f32 %v5752_v36, %v6548_v19  ;;  %v6801_v36 = vmul.f32 %v7570_v28, %v6548_v19  ;;  %v7585_v28 = vld [vmem:[#allocation109_spill] sm:$0xff] }
 0x225   : > { %3478 = vperm.xlu0 %5179, %v4927_v53   ;;  %v4958_v53 = vld [vmem:[%s7383_s8 + $0x3a] ss:$0 sm:$0xff] }
 0x227   : > { %v3595_v45 = vpop.permute.xlu1 %3594 }
 0x228   : > { %v6745_v47 = vadd.f32 %v3595_v45, %v3569_v48  ;;  %v6747_v62 = vpop.permute.xlu0 %3174  ;;  %3650 = vperm.xlu1 %5178, %v4943_v9   ;;  %v7569_v9 = vld [vmem:[#allocation21_spill] sm:$0xff]  ;;  %v2190_v45 = vmul.f32 %v7573_v18, %v6548_v19 }
 0x229   : > { %3646 = vperm.xlu0 %5179, %v4942_v41   ;;  %v6797_v48 = vmul.f32 %v7569_v9, %v6548_v19  ;;  %v6805_v41 = vmul.f32 %v7571_v52, %v6548_v19  ;;  %v6851_v9 = vmul.f32 %v7584_v24, %v6548_v19  ;;  %v3393_v52 = vmul.f32 %v7585_v28, %v6548_v19  ;;  %v7587_v18 = vld [vmem:[#allocation65_spill] sm:$0xff]  ;;  %v7594_v24 = vld [vmem:[#allocation86_spill] sm:$0xff] }
 0x22a   : > { %7564 = vst [vmem:[#allocation136_spill] sm:$0xff] %v6745_v47  ;;  %v6859_v38 = vmul.f32 %v7587_v18, %v6548_v19  ;;  %v6877_v28 = vmul.f32 %v7594_v24, %v6548_v19  ;;  %v7595_v18 = vld [vmem:[#allocation90_spill] sm:$0xff]  ;;  %v7630_v47 = vld [vmem:[#allocation44_spill] sm:$0xff] }
 0x22b   : > { %v3895_v10 = vpop.permute.xlu1 %3894 }
 0x22c   : > { %v3909_v5 = vmul.f32 %v3895_v10, %v6548_v19  ;;  %v3295_v6 = vpop.permute.xlu0 %3294  ;;  %4034 = vperm.xlu1 %5178, %v4977_v59   ;;  %v7575_v59 = vld [vmem:[#allocation111_spill] sm:$0xff]  ;;  %v6827_v10 = vmul.f32 %v7576_v43, %v6548_v19  ;;  %7588 = vst [vmem:[#allocation24_spill] sm:$0xff] %v6859_v38 }
 0x22d   : > { %v3309_v17 = vmul.f32 %v3295_v6, %v3269_v42  ;;  %4030 = vperm.xlu0 %5179, %v4976_v21   ;;  %v3353_v21 = vmul.f32 %v7575_v59, %v6411_v50  ;;  %v4974_v42 = vld [vmem:[%s7383_s8 + $0x3e] ss:$0 sm:$0xff]  ;;  %v7589_v59 = vld [vmem:[#allocation66_spill] sm:$0xff] }
 0x22e   : > { %v6863_v43 = vmul.f32 %v7589_v59, %v6548_v19  ;;  %v6881_v59 = vmul.f32 %v7595_v18, %v6548_v19 }
 0x22f   : > { %v6763_v54 = vadd.f32 %v3309_v17, %v3141_v3  ;;  %v6765_v58 = vpop.permute.xlu1 %2918  ;;  %v7578_v3 = vld [vmem:[#allocation45_spill] sm:$0xff] }
 0x230   : > { %7565 = vst [vmem:[#allocation137_spill] sm:$0xff] %v6765_v58  ;;  %v3855_v0 = vpop.permute.xlu0 %3854  ;;  %3822 = vperm.xlu1 %5178, %v4959_v63   ;;  %v6833_v17 = vmul.f32 %v7578_v3, %v6548_v19  ;;  %v7579_v63 = vld [vmem:[#allocation51_spill] sm:$0xff]  ;;  %7596 = vst [vmem:[#allocation33_spill] sm:$0xff] %v6881_v59  ;;  %v7601_v58 = vld [vmem:[#allocation106_spill] sm:$0xff] }
 0x231   : > { %v3869_v8 = vmul.f32 %v3855_v0, %v6411_v50  ;;  %3950 = vperm.xlu0 %5179, %v4971_v40   ;;  %v6837_v40 = vmul.f32 %v7579_v63, %v6548_v19  ;;  %v7591_v63 = vld [vmem:[#allocation79_spill] sm:$0xff]  ;;  %v6898_v18 = vmul.f32 %v7601_v58, %v6548_v19 }
 0x233   : > { %v3219_v39 = vpop.permute.xlu1 %3218  ;;  %v6778_v55 = vadd.f32 %v3909_v5, %v3869_v8  ;;  %v7577_v5 = vld [vmem:[#allocation43_spill] sm:$0xff]  ;;  %v7581_v8 = vld [vmem:[#allocation54_spill] sm:$0xff] }
 0x234   : > { %v6789_v37 = vmul.f32 %v3219_v39, %v6548_v19  ;;  %v6791_v34 = vpop.permute.xlu0 %2618  ;;  %3994 = vperm.xlu1 %5178, %v4975_v33   ;;  %v2362_v6 = vmul.f32 %v7577_v5, %v6548_v19  ;;  %v6843_v33 = vmul.f32 %v7581_v8, %v6548_v19  ;;  %v7590_v5 = vld [vmem:[#allocation74_spill] sm:$0xff]  ;;  %v6871_v8 = vmul.f32 %v7591_v63, %v6548_v19 }
 0x235   : > { %7566 = vst [vmem:[#allocation138_spill] sm:$0xff] %v6778_v55  ;;  %3818 = vperm.xlu0 %5179, %v4958_v53   ;;  %v7582_v53 = vld [vmem:[#allocation55_spill] sm:$0xff]  ;;  %v6867_v3 = vmul.f32 %v7590_v5, %v6548_v19  ;;  %v4978_v5 = vld [vmem:[%s7384_s9 + $0x2] ss:$0 sm:$0xff]  ;;  %v7597_v63 = vld [vmem:[#allocation94_spill] sm:$0xff] }
 0x236   : > { %7567 = vst [vmem:[#allocation139_spill] sm:$0xff] %v6789_v37  ;;  %v6847_v39 = vmul.f32 %v7582_v53, %v6548_v19  ;;  %7592 = vst [vmem:[#allocation30_spill] sm:$0xff] %v6871_v8  ;;  %v7593_v53 = vld [vmem:[#allocation82_spill] sm:$0xff]  ;;  %v2535_v44 = vmul.f32 %v7597_v63, %v6548_v19  ;;  %v7603_v37 = vld [vmem:[#allocation116_spill] sm:$0xff] }
 0x237   : > { %v6839_v0 = vpop.permute.xlu1 %3598  ;;  %v6906_v63 = vmul.f32 %v7603_v37, %v6548_v19  ;;  %v7609_v37 = vld [vmem:[#allocation12_spill] sm:$0xff] }
 0x238   : > { %7580 = vst [vmem:[#allocation20_spill] sm:$0xff] %v6839_v0  ;;  %7583 = vst [vmem:[#allocation21_spill] sm:$0xff] %v6847_v39  ;;  %v6855_v23 = vpop.permute.xlu0 %3178  ;;  %4042 = vperm.xlu1 %5178, %v4979_v7   ;;  %v2363_v7 = vmul.f32 %v7593_v53, %v6548_v19  ;;  %v3397_v0 = vadd.f32 %v3393_v52, %v3353_v21  ;;  %v7599_v53 = vld [vmem:[#allocation102_spill] sm:$0xff]  ;;  %v7602_v52 = vld [vmem:[#allocation112_spill] sm:$0xff] }
 0x239   : > { %7586 = vst [vmem:[#allocation22_spill] sm:$0xff] %v6855_v23  ;;  %3990 = vperm.xlu0 %5179, %v4974_v42   ;;  %v7598_v42 = vld [vmem:[#allocation98_spill] sm:$0xff]  ;;  %v6894_v24 = vmul.f32 %v7599_v53, %v6548_v19  ;;  %v6902_v1 = vmul.f32 %v7602_v52, %v6548_v19  ;;  %7604 = vst [vmem:[#allocation111_spill] sm:$0xff] %v6906_v63  ;;  %v7608_v52 = vld [vmem:[#allocation11_spill] sm:$0xff] }
 0x23a   : > { %v6890_v13 = vmul.f32 %v7598_v42, %v6548_v19  ;;  %v6909_v42 = vadd.f32 %v6609_v30, %v3397_v0  ;;  %v7610_v30 = vld [vmem:[#allocation13_spill] sm:$0xff] }
 0x23b   : > { %7600 = vst [vmem:[#allocation35_spill] sm:$0xff] %v6894_v24  ;;  %v3899_v21 = vpop.permute.xlu1 %3898 }
 0x23c   : > { %v6912_v56 = vmul.f32 %v3899_v21, %v6548_v19  ;;  %v6914_v53 = vpop.permute.xlu0 %3298  ;;  %v6916_v23 = vpop.f32.mrf.mxu1  ;;  %v7611_v21 = vld [vmem:[#allocation15_spill] sm:$0xff] }
 0x23d   : > { %7606 = vst [vmem:[#allocation43_spill] sm:$0xff] %v6914_v53  ;;  %7607 = vst [vmem:[#allocation45_spill] sm:$0xff] %v6916_v23  ;;  %4038 = vperm.xlu0 %5179, %v4978_v5   ;;  %v3698_v58 = vmul.f32 %v6712_v2, %v6916_v23  ;;  %v1290_v29 = vmul.f32 %v7608_v52, %v6916_v23  ;;  %v1462_v12 = vmul.f32 %v7609_v37, %v6916_v23  ;;  %v7612_v53 = vld [vmem:[#allocation17_spill] sm:$0xff]  ;;  %v7614_v2 = vld [vmem:[#allocation38_spill] sm:$0xff] }
 0x23e   : > { %7605 = vst [vmem:[#allocation39_spill] sm:$0xff] %v6912_v56  ;;  %v1634_v0 = vmul.f32 %v7610_v30, %v6916_v23  ;;  %v5063_v55 = vpop.f32.mrf.mxu1  ;;  %v1806_v56 = vmul.f32 %v7611_v21, %v6916_v23  ;;  %v1978_v60 = vmul.f32 %v7612_v53, %v6916_v23  ;;  %v7613_v5 = vld [vmem:[#allocation29_spill] sm:$0xff]  ;;  %v2322_v24 = vmul.f32 %v7614_v2, %v6916_v23 }
 0x23f   : > { %v2150_v63 = vmul.f32 %v7613_v5, %v6916_v23  ;;  %v6934_v52 = vpop.permute.xlu1 %3086  ;;  %v6937_v37 = vadd.f32 %v6696_v49, %v3698_v58  ;;  %v1334_v30 = vadd.f32 %v6776_v25, %v1290_v29  ;;  %v6940_v55 = vadd.f32 %v1502_v27, %v1462_v12  ;;  %v7625_v58 = vld [vmem:[#allocation68_spill] sm:$0xff] }
 0x240   : > { %7615 = vst [vmem:[#allocation51_spill] sm:$0xff] %v6934_v52  ;;  %v6942_v59 = vadd.f32 %v1674_v11, %v1634_v0  ;;  %v3859_v21 = vpop.permute.xlu0 %3858  ;;  %v901_v8 = vpop.f32.mrf.mxu1  ;;  %v6945_v53 = vadd.f32 %v6786_v26, %v1806_v56  ;;  %v6947_v5 = vadd.f32 %v2018_v22, %v1978_v60  ;;  %v6951_v2 = vadd.f32 %v2362_v6, %v2322_v24  ;;  %v7620_v60 = vld [vmem:[#allocation18_spill] sm:$0xff]  ;;  %v7621_v26 = vld [vmem:[#allocation23_spill] sm:$0xff] }
 0x241   : > { %v6949_v38 = vadd.f32 %v2190_v45, %v2150_v63  ;;  %v3737_v29 = vmul.f32 %v6626_v16, %v6548_v19  ;;  %v3697_v12 = vmul.f32 %v6646_v46, %v6411_v50  ;;  %v6959_v25 = vmul.f32 %v3859_v21, %v6916_v23  ;;  %v6961_v27 = vpop.f32.mrf.mxu0  ;;  %v7622_v45 = vld [vmem:[#allocation31_spill] sm:$0xff]  ;;  %v7623_v16 = vld [vmem:[#allocation42_spill] sm:$0xff]  ;;  %v7624_v46 = vld [vmem:[#allocation56_spill] sm:$0xff] }
 0x242   : > { %7616 = vst [vmem:[#allocation54_spill] sm:$0xff] %v6947_v5  ;;  %7618 = vst [vmem:[#allocation61_spill] sm:$0xff] %v6951_v2  ;;  %v5064_v56 = vpop.f32.mrf.mxu1  ;;  %v1291_v11 = vmul.f32 %v7620_v60, %v6961_v27  ;;  %v1463_v22 = vmul.f32 %v7621_v26, %v6961_v27  ;;  %v1635_v6 = vmul.f32 %v7622_v45, %v6961_v27  ;;  %v7626_v21 = vld [vmem:[#allocation84_spill] sm:$0xff] }
 0x243   : > { %7617 = vst [vmem:[#allocation55_spill] sm:$0xff] %v6949_v38  ;;  %7619 = vst [vmem:[#allocation109_spill] sm:$0xff] %v6959_v25  ;;  %v1807_v8 = vmul.f32 %v7623_v16, %v6961_v27  ;;  %v5069_v24 = vpop.f32.mrf.mxu0  ;;  %v3387_v50 = vpop.permute.xlu1 %3386  ;;  %v1979_v63 = vmul.f32 %v7624_v46, %v6961_v27  ;;  %v2151_v0 = vmul.f32 %v7625_v58, %v6961_v27  ;;  %v7627_v60 = vld [vmem:[#allocation96_spill] sm:$0xff] }
 0x244   : > { %v2323_v56 = vmul.f32 %v7626_v21, %v6961_v27  ;;  %v2495_v26 = vmul.f32 %v7627_v60, %v6961_v27  ;;  %v6980_v49 = vmul.f32 %v3387_v50, %v6548_v19  ;;  %v6982_v45 = vpop.permute.xlu0 %2786  ;;  %v1335_v16 = vadd.f32 %v6801_v36, %v1291_v11  ;;  %v6987_v52 = vpop.f32.mrf.mxu1  ;;  %v7629_v50 = vld [vmem:[#allocation40_spill] sm:$0xff] }
 0x245   : > { %v1507_v24 = vadd.f32 %v6797_v48, %v1463_v22  ;;  %v1679_v46 = vadd.f32 %v6818_v61, %v1635_v6  ;;  %v1851_v58 = vadd.f32 %v6833_v17, %v1807_v8  ;;  %v2023_v21 = vadd.f32 %v6843_v33, %v1979_v63  ;;  %v947_v39 = vpop.f32.mrf.mxu0  ;;  %v7631_v2 = vld [vmem:[#allocation52_spill] sm:$0xff] }
 0x246   : > { %7628 = vst [vmem:[#allocation65_spill] sm:$0xff] %v6980_v49  ;;  %v2195_v25 = vadd.f32 %v6863_v43, %v2151_v0  ;;  %v2367_v60 = vadd.f32 %v2363_v7, %v2323_v56  ;;  %v1375_v49 = vadd.f32 %v7629_v50, %v1335_v16  ;;  %v2539_v11 = vadd.f32 %v2535_v44, %v2495_v26  ;;  %v5075_v48 = vpop.f32.mrf.mxu1  ;;  %v7632_v22 = vld [vmem:[#allocation64_spill] sm:$0xff]  ;;  %v7636_v56 = vld [vmem:[#allocation118_spill] sm:$0xff] }
 0x247   : > { %v1547_v23 = vadd.f32 %v7630_v47, %v1507_v24  ;;  %v1719_v36 = vadd.f32 %v7631_v2, %v1679_v46  ;;  %v1891_v61 = vadd.f32 %v7632_v22, %v1851_v58  ;;  %v7633_v6 = vld [vmem:[#allocation80_spill] sm:$0xff]  ;;  %v5070_v63 = vpop.f32.mrf.mxu0  ;;  %v3767_v43 = vpop.permute.xlu1 %3766  ;;  %v3741_v24 = vadd.f32 %v3737_v29, %v3697_v12  ;;  %v7637_v46 = vld [vmem:[#allocation14_spill] sm:$0xff]  ;;  %v7641_v22 = vld [vmem:[#allocation95_spill] sm:$0xff] }
 0x248   : > { %v2063_v38 = vadd.f32 %v7633_v6, %v2023_v21  ;;  %v7634_v5 = vld [vmem:[#allocation92_spill] sm:$0xff]  ;;  %v1379_v7 = vmax.f32 %v1375_v49, 0.0  ;;  %v2579_v16 = vadd.f32 %v7636_v56, %v2539_v11  ;;  %v7000_v47 = vpop.permute.xlu0 %3346  ;;  %v993_v2 = vpop.f32.mrf.mxu1  ;;  %v7003_v58 = vadd.f32 %v7637_v46, %v1334_v30  ;;  %v7638_v21 = vld [vmem:[#allocation62_spill] sm:$0xff]  ;;  %v7647_v46 = vld [vmem:[#allocation121_spill] sm:$0xff] }
 0x249   : > { %v2235_v17 = vadd.f32 %v7634_v5, %v2195_v25  ;;  %v7635_v8 = vld [vmem:[#allocation104_spill] sm:$0xff]  ;;  %v1551_v39 = vmax.f32 %v1547_v23, 0.0  ;;  %v1723_v0 = vmax.f32 %v1719_v36, 0.0  ;;  %v1895_v44 = vmax.f32 %v1891_v61, 0.0  ;;  %v7639_v25 = vld [vmem:[#allocation67_spill] sm:$0xff] }
 0x24a   : > { %v2407_v33 = vadd.f32 %v7635_v8, %v2367_v60  ;;  %v2067_v26 = vmax.f32 %v2063_v38, 0.0  ;;  %v1419_v5 = vmul.f32 %v7638_v21, %v1379_v7  ;;  %v2583_v48 = vmax.f32 %v2579_v16, 0.0  ;;  %v5076_v49 = vpop.f32.mrf.mxu1  ;;  %v7640_v23 = vld [vmem:[#allocation83_spill] sm:$0xff]  ;;  %v7642_v61 = vld [vmem:[#allocation16_spill] sm:$0xff] }
 0x24b   : > { %v1591_v60 = vmul.f32 %v7639_v25, %v1551_v39  ;;  %v2239_v50 = vmax.f32 %v2235_v17, 0.0  ;;  %v1763_v36 = vmul.f32 %v7640_v23, %v1723_v0  ;;  %v1935_v11 = vmul.f32 %v7641_v22, %v1895_v44  ;;  %v3091_v8 = vpop.permute.xlu1 %3090  ;;  %v7643_v12 = vld [vmem:[#allocation108_spill] sm:$0xff]  ;;  %v7644_v39 = vld [vmem:[#allocation107_spill] sm:$0xff] }
 0x24c   : > { %v2411_v6 = vmax.f32 %v2407_v33, 0.0  ;;  %v7011_v38 = vadd.f32 %v7642_v61, %v6940_v55  ;;  %v2623_v30 = vmul.f32 %v6734_v15, %v2583_v48  ;;  %v2667_v63 = vmul.f32 %v7643_v12, %v6961_v27  ;;  %v3467_v17 = vpop.permute.xlu0 %3466  ;;  %v7646_v55 = vld [vmem:[#allocation26_spill] sm:$0xff]  ;;  %v7649_v25 = vld [vmem:[#allocation36_spill] sm:$0xff]  ;;  %v7652_v12 = vld [vmem:[#allocation49_spill] sm:$0xff] }
 0x24d   : > { %v1595_v29 = vadd.f32 %v1591_v60, %v1419_v5  ;;  %v7016_v7 = vadd.f32 %v3767_v43, %v3741_v24  ;;  %v2107_v56 = vmul.f32 %v7644_v39, %v2067_v26  ;;  %v3012_v0 = vmul.f32 %v6677_v35, %v6987_v52  ;;  %v7648_v43 = vld [vmem:[#allocation25_spill] sm:$0xff] }
 0x24e   : > { %v7645_v33 = vmax.f32 %v6909_v42, 0.0  ;;  %v1292_v2 = vmul.f32 %v7646_v55, %v6987_v52  ;;  %v2279_v15 = vmul.f32 %v7647_v46, %v2239_v50  ;;  %v2711_v21 = vadd.f32 %v6898_v18, %v2667_v63  ;;  %v7653_v63 = vld [vmem:[#allocation57_spill] sm:$0xff]  ;;  %v7655_v46 = vld [vmem:[#allocation71_spill] sm:$0xff] }
 0x24f   : > { %v1767_v44 = vadd.f32 %v1763_v36, %v1595_v29  ;;  %v1464_v24 = vmul.f32 %v7648_v43, %v6987_v52  ;;  %v3056_v5 = vadd.f32 %v6659_v31, %v3012_v0  ;;  %v3391_v35 = vpop.permute.xlu1 %3390  ;;  %v1636_v60 = vmul.f32 %v7649_v25, %v6987_v52  ;;  %v7659_v25 = vld [vmem:[#allocation85_spill] sm:$0xff] }
 0x250   : > { %v3481_v16 = vmul.f32 %v3467_v17, %v7645_v33  ;;  %v1336_v42 = vadd.f32 %v6805_v41, %v1292_v2  ;;  %v2751_v49 = vadd.f32 %v6578_v20, %v2711_v21  ;;  %v7038_v50 = vmul.f32 %v3391_v35, %v6548_v19  ;;  %v7040_v18 = vpop.permute.xlu0 %2790  ;;  %v7651_v41 = vld [vmem:[#allocation47_spill] sm:$0xff] }
 0x251   : > { %v1939_v48 = vadd.f32 %v1935_v11, %v1767_v44  ;;  %v1508_v23 = vadd.f32 %v6812_v57, %v1464_v24  ;;  %v7043_v31 = vadd.f32 %v3091_v8, %v3056_v5  ;;  %v1680_v22 = vadd.f32 %v6827_v10, %v1636_v60  ;;  %v7654_v57 = vld [vmem:[#allocation59_spill] sm:$0xff]  ;;  %v7656_v24 = vld [vmem:[#allocation72_spill] sm:$0xff] }
 0x252   : > { %v7031_v26 = vadd.f32 %v3481_v16, %v6763_v54  ;;  %v7650_v54 = vld [vmem:[#allocation46_spill] sm:$0xff]  ;;  %v1808_v61 = vmul.f32 %v7651_v41, %v6987_v52  ;;  %v2755_v11 = vmax.f32 %v2751_v49, 0.0  ;;  %v1980_v17 = vmul.f32 %v7653_v63, %v6987_v52 }
 0x253   : > { %v1376_v36 = vadd.f32 %v7650_v54, %v1336_v42  ;;  %v2111_v29 = vadd.f32 %v2107_v56, %v1939_v48  ;;  %v1548_v20 = vadd.f32 %v7652_v12, %v1508_v23  ;;  %v2451_v39 = vmul.f32 %v6596_v32, %v2411_v6  ;;  %v3771_v16 = vpop.permute.xlu1 %3770  ;;  %v7657_v32 = vld [vmem:[#allocation70_spill] sm:$0xff]  ;;  %v7658_v42 = vld [vmem:[#allocation69_spill] sm:$0xff]  ;;  %v7661_v48 = vld [vmem:[#allocation87_spill] sm:$0xff] }
 0x254   : > { %v1720_v8 = vadd.f32 %v7654_v57, %v1680_v22  ;;  %v1852_v33 = vadd.f32 %v6837_v40, %v1808_v61  ;;  %v2795_v10 = vmul.f32 %v6982_v45, %v2755_v11  ;;  %v2024_v56 = vadd.f32 %v6851_v9, %v1980_v17  ;;  %v7057_v44 = vpop.permute.xlu0 %3350  ;;  %v7660_v45 = vld [vmem:[#allocation89_spill] sm:$0xff] }
 0x255   : > { %v1380_v0 = vmax.f32 %v1376_v36, 0.0  ;;  %v2283_v55 = vadd.f32 %v2279_v15, %v2111_v29  ;;  %v1552_v2 = vmax.f32 %v1548_v20, 0.0  ;;  %v2152_v6 = vmul.f32 %v7657_v32, %v6987_v52  ;;  %v7662_v54 = vld [vmem:[#allocation101_spill] sm:$0xff] }
 0x256   : > { %v1724_v43 = vmax.f32 %v1720_v8, 0.0  ;;  %v1892_v5 = vadd.f32 %v7656_v24, %v1852_v33  ;;  %v2064_v15 = vadd.f32 %v7659_v25, %v2024_v56  ;;  %v2324_v60 = vmul.f32 %v7660_v45, %v6987_v52  ;;  %v7663_v20 = vld [vmem:[#allocation97_spill] sm:$0xff] }
 0x257   : > { %v1420_v21 = vmul.f32 %v7655_v46, %v1380_v0  ;;  %v2455_v35 = vadd.f32 %v2451_v39, %v2283_v55  ;;  %v1592_v40 = vmul.f32 %v7658_v42, %v1552_v2  ;;  %v2196_v23 = vadd.f32 %v6867_v3, %v2152_v6  ;;  %v3259_v22 = vpop.permute.xlu1 %3258  ;;  %v7664_v39 = vld [vmem:[#allocation115_spill] sm:$0xff]  ;;  %v7667_v2 = vld [vmem:[#allocation110_spill] sm:$0xff]  ;;  %v7669_v32 = vld [vmem:[#allocation113_spill] sm:$0xff] }
 0x258   : > { %v1764_v9 = vmul.f32 %v7661_v48, %v1724_v43  ;;  %v1896_v49 = vmax.f32 %v1892_v5, 0.0  ;;  %v2496_v36 = vmul.f32 %v7662_v54, %v6987_v52  ;;  %v2068_v29 = vmax.f32 %v2064_v15, 0.0  ;;  %v7072_v12 = vpop.permute.xlu0 %3470  ;;  %v7665_v3 = vld [vmem:[#allocation19_spill] sm:$0xff]  ;;  %v7670_v42 = vld [vmem:[#allocation120_spill] sm:$0xff]  ;;  %v7671_v25 = vld [vmem:[#allocation125_spill] sm:$0xff] }
 0x259   : > { %v2627_v41 = vadd.f32 %v2623_v30, %v2455_v35  ;;  %v1596_v61 = vadd.f32 %v1592_v40, %v1420_v21  ;;  %v2368_v11 = vadd.f32 %v6877_v28, %v2324_v60  ;;  %v2236_v63 = vadd.f32 %v7663_v20, %v2196_v23  ;;  %v7666_v30 = vld [vmem:[#allocation99_spill] sm:$0xff] }
 0x25a   : > { %v2540_v17 = vadd.f32 %v6890_v13, %v2496_v36  ;;  %v2668_v0 = vmul.f32 %v7664_v39, %v6987_v52  ;;  %v1718_v57 = vadd.f32 %v7665_v3, %v6942_v59  ;;  %v1936_v55 = vmul.f32 %v7666_v30, %v1896_v49  ;;  %v7668_v46 = vld [vmem:[#allocation123_spill] sm:$0xff]  ;;  %v7680_v30 = vld [vmem:[#allocation53_spill] sm:$0xff] }
 0x25b   : > { %v7080_v8 = vadd.f32 %v2795_v10, %v2627_v41  ;;  %v1768_v33 = vadd.f32 %v1764_v9, %v1596_v61  ;;  %v2408_v56 = vadd.f32 %v7667_v2, %v2368_v11  ;;  %v2240_v28 = vmax.f32 %v2236_v63, 0.0  ;;  %v7089_v24 = vpop.permute.xlu1 %3558  ;;  %v7672_v61 = vld [vmem:[#allocation28_spill] sm:$0xff]  ;;  %v7676_v63 = vld [vmem:[#allocation54_spill] sm:$0xff] }
 0x25c   : > { %v2580_v21 = vadd.f32 %v7668_v46, %v2540_v17  ;;  %v2712_v43 = vadd.f32 %v6902_v1, %v2668_v0  ;;  %v7087_v13 = vadd.f32 %v3771_v16, %v6937_v37  ;;  %v2108_v59 = vmul.f32 %v7669_v32, %v2068_v29  ;;  %v7094_v35 = vpop.permute.xlu0 %2958  ;;  %v7673_v29 = vld [vmem:[#allocation32_spill] sm:$0xff]  ;;  %v7677_v17 = vld [vmem:[#allocation41_spill] sm:$0xff] }
 0x25d   : > { %v1940_v5 = vadd.f32 %v1936_v55, %v1768_v33  ;;  %v2412_v10 = vmax.f32 %v2408_v56, 0.0  ;;  %v3183_v6 = vmul.f32 %v6747_v62, %v6961_v27  ;;  %v7098_v40 = vmul.f32 %v7670_v42, %v6548_v19  ;;  %v7678_v0 = vld [vmem:[#allocation37_spill] sm:$0xff]  ;;  %v7679_v33 = vld [vmem:[#allocation55_spill] sm:$0xff]  ;;  %v7685_v32 = vld [vmem:[#allocation136_spill] sm:$0xff] }
 0x25e   : > { %v2280_v1 = vmul.f32 %v7671_v25, %v2240_v28  ;;  %v2584_v15 = vmax.f32 %v2580_v21, 0.0  ;;  %v2752_v37 = vadd.f32 %v6642_v14, %v2712_v43  ;;  %v1378_v48 = vmax.f32 %v7003_v58, 0.0  ;;  %v7681_v56 = vld [vmem:[#allocation61_spill] sm:$0xff]  ;;  %v7682_v28 = vld [vmem:[#allocation63_spill] sm:$0xff]  ;;  %v7684_v43 = vld [vmem:[#allocation50_spill] sm:$0xff] }
 0x25f   : > { %v2112_v16 = vadd.f32 %v2108_v59, %v1940_v5  ;;  %v2452_v45 = vmul.f32 %v6661_v51, %v2412_v10  ;;  %v3227_v60 = vadd.f32 %v6732_v4, %v3183_v6  ;;  %v1550_v49 = vmax.f32 %v7011_v38, 0.0  ;;  %v7107_v54 = vpop.permute.xlu1 %3938  ;;  %v7674_v4 = vld [vmem:[#allocation124_spill] sm:$0xff]  ;;  %v7675_v38 = vld [vmem:[#allocation27_spill] sm:$0xff]  ;;  %v7683_v21 = vld [vmem:[#allocation45_spill] sm:$0xff] }
 0x260   : > { %v2624_v62 = vmul.f32 %v6791_v34, %v2584_v15  ;;  %v2756_v9 = vmax.f32 %v2752_v37, 0.0  ;;  %v1722_v23 = vmax.f32 %v1718_v57, 0.0  ;;  %v1418_v14 = vmul.f32 %v7672_v61, %v1378_v48  ;;  %v7114_v11 = vpop.permute.xlu0 %3518  ;;  %v7686_v42 = vld [vmem:[#allocation60_spill] sm:$0xff]  ;;  %v7689_v48 = vld [vmem:[#allocation21_spill] sm:$0xff] }
 0x261   : > { %v2284_v36 = vadd.f32 %v2280_v1, %v2112_v16  ;;  %v7109_v41 = vadd.f32 %v3259_v22, %v3227_v60  ;;  %v1890_v51 = vadd.f32 %v7673_v29, %v6945_v53  ;;  %v7118_v58 = vmul.f32 %v7674_v4, %v6548_v19  ;;  %v7687_v37 = vld [vmem:[#allocation48_spill] sm:$0xff] }
 0x262   : > { %v2796_v34 = vmul.f32 %v7040_v18, %v2756_v9  ;;  %v1590_v20 = vmul.f32 %v7675_v38, %v1550_v49  ;;  %v2062_v39 = vadd.f32 %v7677_v17, %v7676_v63  ;;  %v1762_v3 = vmul.f32 %v7678_v0, %v1722_v23  ;;  %v7693_v38 = vld [vmem:[#allocation75_spill] sm:$0xff]  ;;  %v7694_v63 = vld [vmem:[#allocation93_spill] sm:$0xff] }
 0x263   : > { %v2456_v22 = vadd.f32 %v2452_v45, %v2284_v36  ;;  %v1894_v57 = vmax.f32 %v1890_v51, 0.0  ;;  %v2234_v53 = vadd.f32 %v7680_v30, %v7679_v33  ;;  %v2406_v46 = vadd.f32 %v7682_v28, %v7681_v56  ;;  %v7131_v5 = vpop.permute.xlu1 %3262  ;;  %v7688_v45 = vld [vmem:[#allocation58_spill] sm:$0xff]  ;;  %v7690_v36 = vld [vmem:[#allocation24_spill] sm:$0xff]  ;;  %v7692_v51 = vld [vmem:[#allocation73_spill] sm:$0xff] }
 0x264   : > { %v1594_v55 = vadd.f32 %v1590_v20, %v1418_v14  ;;  %v2066_v2 = vmax.f32 %v2062_v39, 0.0  ;;  %v2494_v18 = vmul.f32 %v7684_v43, %v7683_v21  ;;  %v3613_v59 = vmax.f32 %v7685_v32, 0.0  ;;  %v3639_v1 = vpop.permute.xlu0 %3638  ;;  %v7691_v14 = vld [vmem:[#allocation81_spill] sm:$0xff]  ;;  %v7698_v30 = vld [vmem:[#allocation119_spill] sm:$0xff] }
 0x265   : > { %v2628_v10 = vadd.f32 %v2624_v62, %v2456_v22  ;;  %v2238_v6 = vmax.f32 %v2234_v53, 0.0  ;;  %v2666_v25 = vmul.f32 %v7686_v42, %v7683_v21  ;;  %v1934_v16 = vmul.f32 %v7687_v37, %v1894_v57  ;;  %v7695_v22 = vld [vmem:[#allocation88_spill] sm:$0xff]  ;;  %v7697_v57 = vld [vmem:[#allocation105_spill] sm:$0xff]  ;;  %v7702_v42 = vld [vmem:[#allocation35_spill] sm:$0xff] }
 0x266   : > { %v1766_v15 = vadd.f32 %v1762_v3, %v1594_v55  ;;  %v2106_v60 = vmul.f32 %v7688_v45, %v2066_v2  ;;  %v2538_v9 = vadd.f32 %v7689_v48, %v2494_v18  ;;  %v2410_v23 = vmax.f32 %v2406_v46, 0.0  ;;  %v7696_v3 = vld [vmem:[#allocation30_spill] sm:$0xff]  ;;  %v7699_v28 = vld [vmem:[#allocation33_spill] sm:$0xff]  ;;  %v7700_v18 = vld [vmem:[#allocation91_spill] sm:$0xff] }
 0x267   : > { %v7139_v49 = vadd.f32 %v2796_v34, %v2628_v10  ;;  %v2710_v61 = vadd.f32 %v7690_v36, %v2666_v25  ;;  %v2838_v62 = vmul.f32 %v7691_v14, %v7683_v21  ;;  %v2278_v4 = vmul.f32 %v7692_v51, %v2238_v6  ;;  %v3563_v39 = vpop.permute.xlu1 %3562  ;;  %v7701_v10 = vld [vmem:[#allocation100_spill] sm:$0xff]  ;;  %v7704_v48 = vld [vmem:[#allocation114_spill] sm:$0xff] }
 0x268   : > { %v1938_v29 = vadd.f32 %v1934_v16, %v1766_v15  ;;  %v2578_v20 = vadd.f32 %v7693_v38, %v2538_v9  ;;  %v3010_v17 = vmul.f32 %v7694_v63, %v7683_v21  ;;  %v3182_v33 = vmul.f32 %v7697_v57, %v7683_v21  ;;  %v7154_v55 = vpop.permute.xlu0 %2962  ;;  %v7703_v15 = vld [vmem:[#allocation111_spill] sm:$0xff] }
 0x269   : > { %v2750_v0 = vadd.f32 %v7695_v22, %v2710_v61  ;;  %v2882_v34 = vadd.f32 %v7696_v3, %v2838_v62  ;;  %v3354_v53 = vmul.f32 %v7698_v30, %v7683_v21  ;;  %v7159_v43 = vmul.f32 %v7089_v24, %v6548_v19  ;;  %v7708_v63 = vld [vmem:[#allocation103_spill] sm:$0xff]  ;;  %v7709_v22 = vld [vmem:[#allocation138_spill] sm:$0xff]  ;;  %v7710_v30 = vld [vmem:[#allocation117_spill] sm:$0xff] }
 0x26a   : > { %v2110_v2 = vadd.f32 %v2106_v60, %v1938_v29  ;;  %v2582_v56 = vmax.f32 %v2578_v20, 0.0  ;;  %v3054_v46 = vadd.f32 %v7699_v28, %v3010_v17  ;;  %v2450_v32 = vmul.f32 %v7700_v18, %v2410_v23  ;;  %v7705_v60 = vld [vmem:[#allocation122_spill] sm:$0xff]  ;;  %v7707_v29 = vld [vmem:[#allocation133_spill] sm:$0xff] }
 0x26b   : > { %v2922_v6 = vadd.f32 %v7701_v10, %v2882_v34  ;;  %v3226_v25 = vadd.f32 %v7702_v42, %v3182_v33  ;;  %v3398_v37 = vadd.f32 %v7703_v15, %v3354_v53  ;;  %v2754_v45 = vmax.f32 %v2750_v0, 0.0  ;;  %v7168_v61 = vpop.permute.xlu1 %3942  ;;  %v7706_v23 = vld [vmem:[#allocation126_spill] sm:$0xff] }
 0x26c   : > { %v2282_v16 = vadd.f32 %v2278_v4, %v2110_v2  ;;  %v3094_v9 = vadd.f32 %v7704_v48, %v3054_v46  ;;  %v2839_v36 = vmul.f32 %v7705_v60, %v6961_v27  ;;  %v3355_v24 = vmul.f32 %v7000_v47, %v6961_v27  ;;  %v3523_v38 = vpop.permute.xlu0 %3522  ;;  %v7711_v2 = vld [vmem:[#allocation129_spill] sm:$0xff]  ;;  %v7712_v46 = vld [vmem:[#allocation135_spill] sm:$0xff]  ;;  %v7714_v10 = vld [vmem:[#allocation22_spill] sm:$0xff] }
 0x26d   : > { %v2926_v14 = vmax.f32 %v2922_v6, 0.0  ;;  %v3266_v62 = vadd.f32 %v7706_v23, %v3226_v25  ;;  %v3438_v51 = vadd.f32 %v7707_v29, %v3398_v37  ;;  %v2622_v4 = vmul.f32 %v7708_v63, %v2582_v56  ;;  %v7716_v48 = vld [vmem:[#allocation134_spill] sm:$0xff]  ;;  %v7717_v60 = vld [vmem:[#allocation139_spill] sm:$0xff]  ;;  %v7718_v23 = vld [vmem:[#allocation109_spill] sm:$0xff] }
 0x26e   : > { %v2454_v20 = vadd.f32 %v2450_v32, %v2282_v16  ;;  %v2883_v17 = vadd.f32 %v7098_v40, %v2839_v36  ;;  %v7178_v0 = vadd.f32 %v7107_v54, %v7709_v22  ;;  %v3356_v3 = vmul.f32 %v7057_v44, %v6987_v52  ;;  %v7713_v40 = vld [vmem:[#allocation43_spill] sm:$0xff]  ;;  %v7721_v63 = vld [vmem:[#allocation128_spill] sm:$0xff]  ;;  %v7722_v22 = vld [vmem:[#allocation130_spill] sm:$0xff] }
 0x26f   : > { %v3098_v34 = vmax.f32 %v3094_v9, 0.0  ;;  %v3270_v47 = vmax.f32 %v3266_v62, 0.0  ;;  %v3442_v57 = vmax.f32 %v3438_v51, 0.0  ;;  %v2794_v53 = vmul.f32 %v7710_v30, %v2754_v45  ;;  %v7185_v56 = vpop.permute.xlu1 %3430  ;;  %v7715_v16 = vld [vmem:[#allocation127_spill] sm:$0xff]  ;;  %v7720_v51 = vld [vmem:[#allocation65_spill] sm:$0xff] }
 0x270   : > { %v2626_v33 = vadd.f32 %v2622_v4, %v2454_v20  ;;  %v2966_v28 = vmul.f32 %v7711_v2, %v2926_v14  ;;  %v2923_v18 = vadd.f32 %v7712_v46, %v2883_v17  ;;  %v3184_v6 = vmul.f32 %v7714_v10, %v6987_v52  ;;  %v3643_v42 = vpop.permute.xlu0 %3642  ;;  %v7724_v30 = vld [vmem:[#allocation131_spill] sm:$0xff]  ;;  %v7726_v10 = vld [vmem:[#allocation20_spill] sm:$0xff] }
 0x271   : > { %v3310_v32 = vmul.f32 %v7713_v40, %v3270_v47  ;;  %v3482_v54 = vmul.f32 %v7072_v12, %v3442_v57  ;;  %v3653_v44 = vmul.f32 %v3639_v1, %v3613_v59  ;;  %v3568_v37 = vmul.f32 %v3563_v39, %v6548_v19  ;;  %v7719_v12 = vld [vmem:[#allocation39_spill] sm:$0xff]  ;;  %v7723_v57 = vld [vmem:[#allocation137_spill] sm:$0xff] }
 0x272   : > { %v2798_v25 = vadd.f32 %v2794_v53, %v2626_v33  ;;  %v2927_v15 = vmax.f32 %v2923_v18, 0.0  ;;  %v2840_v45 = vmul.f32 %v7715_v16, %v6987_v52  ;;  %v3138_v9 = vmul.f32 %v7716_v48, %v3098_v34  ;;  %v7727_v48 = vld [vmem:[#allocation51_spill] sm:$0xff] }
 0x273   : > { %v3228_v36 = vadd.f32 %v7717_v60, %v3184_v6  ;;  %v3657_v14 = vadd.f32 %v3653_v44, %v7031_v26  ;;  %v3914_v62 = vadd.f32 %v7719_v12, %v7718_v23  ;;  %v7202_v20 = vadd.f32 %v7720_v51, %v3355_v24  ;;  %v7204_v39 = vpop.permute.xlu1 %3730 }
 0x274   : > { %v2970_v29 = vadd.f32 %v2966_v28, %v2798_v25  ;;  %v2967_v59 = vmul.f32 %v7094_v35, %v2927_v15  ;;  %v2884_v1 = vadd.f32 %v7118_v58, %v2840_v45  ;;  %v3566_v4 = vmul.f32 %v7721_v63, %v6548_v19  ;;  %v3131_v47 = vpop.permute.xlu0 %3130  ;;  %v7725_v28 = vld [vmem:[#allocation132_spill] sm:$0xff] }
 0x275   : > { %v3527_v17 = vmul.f32 %v7114_v11, %v6961_v27  ;;  %v3268_v26 = vadd.f32 %v7131_v5, %v3228_v36  ;;  %v3526_v34 = vmul.f32 %v7722_v22, %v7683_v21  ;;  %v3528_v33 = vmul.f32 %v3523_v38, %v6987_v52 }
 0x276   : > { %v3142_v35 = vadd.f32 %v3138_v9, %v2970_v29  ;;  %v2971_v58 = vadd.f32 %v2967_v59, %v7080_v8  ;;  %v2924_v24 = vadd.f32 %v7723_v57, %v2884_v1  ;;  %v3051_v53 = vmul.f32 %v7724_v30, %v6548_v19 }
 0x277   : > { %v3570_v2 = vadd.f32 %v3566_v4, %v3526_v34  ;;  %v3011_v11 = vmul.f32 %v7725_v28, %v6961_v27  ;;  %v3100_v5 = vmax.f32 %v7043_v31, 0.0  ;;  %v3135_v21 = vpop.permute.xlu1 %3134  ;;  %v3400_v40 = vadd.f32 %v7038_v50, %v3356_v3 }
 0x278   : > { %v3314_v46 = vadd.f32 %v3310_v32, %v3142_v35  ;;  %v2928_v18 = vmax.f32 %v2924_v24, 0.0  ;;  %v7223_v44 = vpop.permute.xlu0 %3690  ;;  %v3571_v38 = vadd.f32 %v7159_v43, %v3527_v17  ;;  %v3572_v16 = vadd.f32 %v3568_v37, %v3528_v33 }
 0x279   : > { %v3610_v8 = vadd.f32 %v7726_v10, %v3570_v2  ;;  %v3055_v6 = vadd.f32 %v3051_v53, %v3011_v11  ;;  %v3140_v15 = vmul.f32 %v3135_v21, %v3100_v5  ;;  %v3785_v32 = vmax.f32 %v7016_v7, 0.0 }
 0x27a   : > { %v3486_v25 = vadd.f32 %v3482_v54, %v3314_v46  ;;  %v2968_v19 = vmul.f32 %v7154_v55, %v2928_v18  ;;  %v3786_v43 = vmax.f32 %v7087_v13, 0.0  ;;  %v3272_v34 = vmax.f32 %v3268_v26, 0.0 }
 0x27b   : > { %v3614_v45 = vmax.f32 %v3610_v8, 0.0  ;;  %v3095_v31 = vadd.f32 %v7727_v48, %v3055_v6  ;;  %v3695_v50 = vpop.permute.xlu1 %3694  ;;  %v3439_v26 = vadd.f32 %v7185_v56, %v7202_v20  ;;  %v5227_v48 = vld [vmem:[%s6537_s19] sm:$0xff]  ;;  %s5297_s19 = smov 96  }
 0x27c   : > { %v2972_v9 = vadd.f32 %v2968_v19, %v7139_v49  ;;  %v3811_v36 = vpop.permute.xlu0 %3810  ;;  %v3271_v49 = vmax.f32 %v7109_v41, 0.0 }
 0x27d   : > { %v3654_v3 = vmul.f32 %v3643_v42, %v3614_v45  ;;  %v3099_v60 = vmax.f32 %v3095_v31, 0.0  ;;  %v3825_v12 = vmul.f32 %v3811_v36, %v3785_v32  ;;  %v3443_v10 = vmax.f32 %v3439_v26, 0.0 }
 0x27e   : > { %v3144_v23 = vadd.f32 %v3140_v15, %v2972_v9 }
 0x27f   : > { %v3658_v54 = vadd.f32 %v3654_v3, %v3486_v25  ;;  %v3139_v29 = vmul.f32 %v3131_v47, %v3099_v60  ;;  %v3829_v55 = vadd.f32 %v3825_v12, %v3657_v14  ;;  %v3815_v59 = vpop.permute.xlu1 %3814  ;;  %v3954_v47 = vadd.f32 %v7168_v61, %v3914_v62 }
 0x280   : > { %v3826_v1 = vmul.f32 %v3815_v59, %v3786_v43  ;;  %v3435_v51 = vpop.permute.xlu0 %3434  ;;  %v3700_v3 = vmul.f32 %v3695_v50, %v6987_v52 }
 0x281   : > { %v3143_v37 = vadd.f32 %v3139_v29, %v2971_v58  ;;  %v3957_v58 = vmax.f32 %v7178_v0, 0.0  ;;  %v3958_v2 = vmax.f32 %v3954_v47, 0.0  ;;  %v3440_v61 = vadd.f32 %v3435_v51, %v3400_v40 }
 0x282   : > { %v3830_v63 = vadd.f32 %v3826_v1, %v3658_v54  ;;  %v3739_v29 = vmul.f32 %v5227_v48, %v7204_v39 }
 0x283   : > { %v3603_v4 = vpop.permute.xlu1 %3602  ;;  %v3444_v25 = vmax.f32 %v3440_v61, 0.0 }
 0x284   : > { %v3735_v7 = vpop.permute.xlu0 %3734  ;;  %v3611_v19 = vadd.f32 %v3603_v4, %v3571_v38 }
 0x285   : > { %v3740_v31 = vmul.f32 %v5227_v48, %v3735_v7 }
 0x286   : > { %v3615_v56 = vmax.f32 %v3611_v19, 0.0 }
 0x287   : > { %v3903_v17 = vpop.permute.xlu1 %3902 }
 0x288   : > { %v3303_v42 = vpop.permute.xlu0 %3302 }
 0x289   : > { %v3311_v22 = vmul.f32 %v3303_v42, %v3271_v49 }
 0x28b   : > { %v3315_v35 = vadd.f32 %v3311_v22, %v3143_v37  ;;  %v3307_v57 = vpop.permute.xlu1 %3306 }
 0x28c   : > { %v3312_v24 = vmul.f32 %v3307_v57, %v3272_v34  ;;  %v3863_v13 = vpop.permute.xlu0 %3862 }
 0x28d   : > { %v3871_v51 = vmul.f32 %v3863_v13, %v6961_v27 }
 0x28e   : > { %v3316_v14 = vadd.f32 %v3312_v24, %v3144_v23  ;;  %v3744_v23 = vadd.f32 %v3740_v31, %v3700_v3 }
 0x28f   : > { %v3867_v33 = vpop.permute.xlu1 %3866 }
 0x290   : > { %v3983_v30 = vpop.permute.xlu0 %3982 }
 0x291   : > { %v3997_v53 = vmul.f32 %v3983_v30, %v3957_v58 }
 0x293   : > { %v3987_v28 = vpop.permute.xlu1 %3986  ;;  %v4001_v11 = vadd.f32 %v3997_v53, %v3829_v55 }
 0x294   : > { %v3998_v41 = vmul.f32 %v3987_v28, %v3958_v2  ;;  %v3607_v5 = vpop.permute.xlu0 %3606 }
 0x295   : > { %v3612_v6 = vadd.f32 %v3607_v5, %v3572_v16  ;;  %v3699_v16 = vmul.f32 %v7223_v44, %v6961_v27  ;;  %v3911_v44 = vmul.f32 %v5227_v48, %v3903_v17 }
 0x296   : > { %v4002_v46 = vadd.f32 %v3998_v41, %v3830_v63  ;;  %v3872_v63 = vmul.f32 %v3867_v33, %v6987_v52 }
 0x297   : > { %v3775_v18 = vpop.permute.xlu1 %3774  ;;  %v3616_v60 = vmax.f32 %v3612_v6, 0.0  ;;  %v3743_v4 = vadd.f32 %v3739_v29, %v3699_v16  ;;  %v3915_v47 = vadd.f32 %v3911_v44, %v3871_v51 }
 0x298   : > { %v3907_v21 = vpop.permute.xlu0 %3906 }
 0x299   : > { %v3912_v55 = vmul.f32 %v5227_v48, %v3907_v21  ;;  %v3783_v22 = vadd.f32 %v3775_v18, %v3743_v4 }
 0x29b   : > { %v3779_v62 = vpop.permute.xlu1 %3778  ;;  %v3787_v13 = vmax.f32 %v3783_v22, 0.0 }
 0x29c   : > { %v3475_v8 = vpop.permute.xlu0 %3474  ;;  %v3784_v38 = vadd.f32 %v3779_v62, %v3744_v23  ;;  %v7728_v62 = vld [vmem:[#allocation34_spill] sm:$0xff] }
 0x29d   : > { %v3483_v0 = vmul.f32 %v3475_v8, %v3443_v10 }
 0x29e   : > { %v3788_v49 = vmax.f32 %v3784_v38, 0.0 }
 0x29f   : > { %v3487_v15 = vadd.f32 %v3483_v0, %v3315_v35  ;;  %v3947_v45 = vpop.permute.xlu1 %3946  ;;  %v3916_v35 = vadd.f32 %v3912_v55, %v3872_v63  ;;  %v7730_v55 = vld [vmem:[#allocation77_spill] sm:$0xff] }
 0x2a0   : > { %v3479_v32 = vpop.permute.xlu0 %3478  ;;  %v3955_v52 = vadd.f32 %v3947_v45, %v3915_v47 }
 0x2a1   : > { %v3484_v9 = vmul.f32 %v3479_v32, %v3444_v25  ;;  %v7729_v32 = vmov 0.0  }
 0x2a2   : > { %v3959_v17 = vmax.f32 %v3955_v52, 0.0 }
 0x2a3   : > { %v3488_v20 = vadd.f32 %v3484_v9, %v3316_v14  ;;  %v3651_v36 = vpop.permute.xlu1 %3650 }
 0x2a4   : > { %v3656_v40 = vmul.f32 %v3651_v36, %v3616_v60  ;;  %v3647_v12 = vpop.permute.xlu0 %3646 }
 0x2a5   : > { %v3655_v43 = vmul.f32 %v3647_v12, %v3615_v56 }
 0x2a6   : > { %v3660_v54 = vadd.f32 %v3656_v40, %v3488_v20 }
 0x2a7   : > { %v3659_v59 = vadd.f32 %v3655_v43, %v3487_v15  ;;  %v4035_v37 = vpop.permute.xlu1 %4034 }
 0x2a8   : > { %v4046_v1 = vadd.f32 %v4035_v37, %v4002_v46  ;;  %v4031_v50 = vpop.permute.xlu0 %4030  ;;  %v7732_v37 = vld [vmem:[#allocation76_spill] sm:$0xff] }
 0x2a9   : > { %v4045_v7 = vadd.f32 %v4031_v50, %v4001_v11 }
 0x2aa   : > { %v4052_v42 = vsel %vm811_vm2, %v4046_v1, -inf }
 0x2ab   : > { %v3823_v34 = vpop.permute.xlu1 %3822  ;;  %v4049_v39 = vsel %vm811_vm2, %v4045_v7, -inf  ;;  %4053 = vmax.xlane.f32.xlu1 %v4052_v42 }
 0x2ac   : > { %v3828_v57 = vmul.f32 %v3823_v34, %v3788_v49  ;;  %v3951_v24 = vpop.permute.xlu0 %3950  ;;  %4050 = vmax.xlane.f32.xlu0 %v4049_v39 }
 0x2ad   : > { %v3956_v14 = vadd.f32 %v3951_v24, %v3916_v35 }
 0x2ae   : > { %v3832_v27 = vadd.f32 %v3828_v57, %v3660_v54 }
 0x2af   : > { %v3960_v58 = vmax.f32 %v3956_v14, 0.0  ;;  %v3995_v33 = vpop.permute.xlu1 %3994 }
 0x2b0   : > { %v3819_v30 = vpop.permute.xlu0 %3818 }
 0x2b1   : > { %v4000_v53 = vmul.f32 %v3995_v33, %v3960_v58  ;;  %v3827_v2 = vmul.f32 %v3819_v30, %v3787_v13 }
 0x2b3   : > { %v3831_v28 = vadd.f32 %v3827_v2, %v3659_v59  ;;  %v4004_v11 = vadd.f32 %v4000_v53, %v3832_v27  ;;  %v4043_v26 = vpop.permute.xlu1 %4042  ;;  %v7731_v59 = vld [vmem:[#allocation78_spill] sm:$0xff] }
 0x2b4   : > { %v3991_v41 = vpop.permute.xlu0 %3990 }
 0x2b5   : > { %v3999_v5 = vmul.f32 %v3991_v41, %v3959_v17  ;;  %v4048_v10 = vadd.f32 %v4043_v26, %v4004_v11  ;;  %v5199_v17 = vld [vmem:[%s7385_s10 + $0x8] sm:$0xff]   ;;  %v5200_v11 = vld [vmem:[%s7385_s10] sm:$0xff]  }
 0x2b7   : > { %v4003_v46 = vadd.f32 %v3999_v5, %v3831_v28  ;;  %v4058_v8 = vsel %vm811_vm2, %v4048_v10, -inf }
 0x2b8   : > { %v4039_v18 = vpop.permute.xlu0 %4038 }
 0x2b9   : > { %v4047_v21 = vadd.f32 %v4039_v18, %v4003_v46 }
 0x2bb   : > { %v4055_v61 = vsel %vm811_vm2, %v4047_v21, -inf }
 0x2bc   : > { %4056 = vmax.xlane.f32.xlu0 %v4055_v61  ;;  %4098 = vrot.lane.b32.xlu1 %v7728_v62, %s5297_s19 }
 0x2c0   : > { %4059 = vmax.xlane.f32.xlu0 %v4058_v8 }
 0x334   : > { %v4054_v0 = vpop.xlane.xlu1 %4053 }
 0x335   : > { %v4051_v6 = vpop.xlane.xlu0 %4050  ;;  %v4062_v25 = vsub.f32 %v4046_v1, %v4054_v0 }
 0x336   : > { %v4061_v19 = vsub.f32 %v4045_v7, %v4051_v6 }
 0x337   : > { %v4067_v15 = vmul.f32 1.442695, %v4062_v25 }
 0x338   : > { %v4065_v45 = vmul.f32 1.442695, %v4061_v19  ;;  %v4099_v48 = vpop.permute.xlu1 %4098 }
 0x339   : > { %5207 = vpow2.f32 %v4067_v15  ;;  %v4105_v31 = vsel %vm4103_vm3, %v4099_v48, 0 }
 0x33a   : > { %5209 = vpow2.f32 %v4065_v45  ;;  %5078 = vmatpush3.bf16.msra.mxu0 %v4105_v31 }
 0x33b   : > { %5089 = vmatprep.subr.bf16.mxu0 %v7729_v32 }
 0x345   : > { %v4057_v9 = vpop.xlane.xlu0 %4056 }
 0x346   : > { %v5208_v3 = vpop.eup %5207  ;;  %v4063_v60 = vsub.f32 %v4047_v21, %v4057_v9 }
 0x347   : > { %v5210_v56 = vpop.eup %5209  ;;  %v4076_v20 = vsel %vm811_vm2, %v5208_v3, 0.0 }
 0x348   : > { %v4069_v36 = vmul.f32 1.442695, %v4063_v60  ;;  %v4073_v23 = vsel %vm811_vm2, %v5210_v56, 0.0  ;;  %4077 = vadd.xlane.f32.xlu0 %v4076_v20  ;;  %v5202_v60 = vld [vmem:[%s7389_s14] sm:$0xff]   ;;  %v5204_v20 = vld [vmem:[%s7391_s16 + $0x10] sm:$0xff]  }
 0x349   : > { %4074 = vadd.xlane.f32.xlu1 %v4073_v23  ;;  %v4060_v40 = vpop.xlane.xlu0 %4059 }
 0x34a   : > { %5211 = vpow2.f32 %v4069_v36  ;;  %v4064_v12 = vsub.f32 %v4048_v10, %v4060_v40  ;;  %v4987_v36 = vld [vmem:[%s7386_s11] ss:$0 sm:$0xff] }
 0x34c   : > { %v4071_v16 = vmul.f32 1.442695, %v4064_v12 }
 0x34e   : > { %5213 = vpow2.f32 %v4071_v16  ;;  %v5228_v16 = vld [vmem:[%s5494_s29] sm:$0xff] }
 0x357   : > { %v5212_v43 = vpop.eup %5211 }
 0x358   : > { %v4079_v38 = vsel %vm811_vm2, %v5212_v43, 0.0 }
 0x359   : > { %4080 = vadd.xlane.f32.xlu1 %v4079_v38 }
 0x35b   : > { %v5214_v54 = vpop.eup %5213 }
 0x35c   : > { %v4082_v29 = vsel %vm811_vm2, %v5214_v54, 0.0 }
 0x35d   : > { %4083 = vadd.xlane.f32.xlu0 %v4082_v29 }
 0x36a   : > { %4197 = vrot.lane.b32.xlu1 %v7730_v55, %s5297_s19 }
 0x36e   : > { %4246 = vrot.lane.b32.xlu1 %v7731_v59, %s5297_s19 }
 0x373   : > { %4148 = vrot.lane.b32.xlu0 %v7732_v37, %s5297_s19 }
 0x3d1   : > { %v4078_v50 = vpop.xlane.xlu0 %4077 }
 0x3d2   : > { %v4075_v1 = vpop.xlane.xlu1 %4074 }
 0x3d3   : > { %5215 = vrcp.f32 %v4075_v1 }
 0x3d4   : > { %5217 = vrcp.f32 %v4078_v50 }
 0x3e0   : > { %v5216_v51 = vpop.eup %5215 }
 0x3e1   : > { %v4089_v63 = vmul.f32 %v5216_v51, %v5210_v56  ;;  %v5218_v49 = vpop.eup %5217  ;;  %v5203_v56 = vld [vmem:[%s7391_s16 + $0x18] sm:$0xff]  }
 0x3e2   : > { %v4081_v4 = vpop.xlane.xlu1 %4080  ;;  %v4090_v34 = vmul.f32 %v5218_v49, %v5208_v3  ;;  %v5201_v3 = vld [vmem:[%s7389_s14 + $0x8] sm:$0xff]  }
 0x3e3   : > { %5219 = vrcp.f32 %v4081_v4  ;;  %v4093_v7 = vpack.c.bf16 %v4089_v63, %v4089_v63 }
 0x3e4   : > { %v4094_v24 = vpack.c.bf16 %v4090_v34, %v4090_v34 }
 0x3e5   : > { %5080 = vmatmul.mubr.msk.bf16.vlgmr.msra.gmra.mxu0 %vm811_vm2, %v4093_v7 }
 0x3e6   : > { %v4198_v42 = vpop.permute.xlu1 %4197  ;;  %v4084_v44 = vpop.xlane.xlu0 %4083  ;;  %5091 = vmatprep.mubr.msk.bf16.mxu0 %vm5293_vm0, %v7729_v32 }
 0x3e7   : > { %v4203_v22 = vsel %vm4103_vm3, %v4198_v42, 0  ;;  %5221 = vrcp.f32 %v4084_v44 }
 0x3e8   : > { %5090 = vmatpush3.bf16.msra.mxu0 %v4203_v22 }
 0x3e9   : > { %5101 = vmatprep.subr.bf16.mxu0 %v7729_v32 }
 0x3ea   : > { %v4149_v35 = vpop.permute.xlu0 %4148  ;;  %v4247_v57 = vpop.permute.xlu1 %4246 }
 0x3eb   : > { %v4154_v39 = vsel %vm4103_vm3, %v4149_v35, 0  ;;  %v4252_v47 = vsel %vm4103_vm3, %v4247_v57, 0 }
 0x3ec   : > { %5084 = vmatpush3.bf16.msra.mxu1 %v4154_v39 }
 0x3ed   : > { %5095 = vmatprep.subr.bf16.mxu1 %v7729_v32 }
 0x3ef   : > { %5086 = vmatmul.mubr.msk.bf16.vlgmr.msra.gmra.mxu1 %vm811_vm2, %v4094_v24 }
 0x3f0   : > { %v5220_v14 = vpop.eup %5219  ;;  %5096 = vmatpush3.bf16.msra.mxu1 %v4252_v47  ;;  %5097 = vmatprep.mubr.msk.bf16.mxu1 %vm5293_vm0, %v7729_v32  ;;  %v4403_v47 = vlaneseq }
 0x3f1   : > { %v4091_v27 = vmul.f32 %v5220_v14, %v5212_v43  ;;  %5109 = vmatprep.subr.bf16.mxu1 %v7729_v32 }
 0x3f2   : > { %v4404_v14 = vshrl.u32 %v4403_v47, 7 }
 0x3f3   : > { %v4095_v13 = vpack.c.bf16 %v4091_v27, %v4091_v27  ;;  %v4401_v27 = vld [vmem:[%s7387_s12] sm:$0x1] }
 0x3f4   : > { %v5222_v52 = vpop.eup %5221 }
 0x3f5   : > { %5092 = vmatmul.mubr.msk.bf16.vlgmr.msra.gmra.mxu0 %vm811_vm2, %v4095_v13  ;;  %v4092_v58 = vmul.f32 %v5222_v52, %v5214_v54  ;;  %v4405_v13 = vsub.s32 0, %v4404_v14 }
 0x3f6   : > { %5105 = vmatprep.mubr.msk.bf16.mxu0 %vm5293_vm0, %v7729_v32  ;;  %5102 = vmatpush3.bf16.msra.mxu0 %v5199_v17 }
 0x3f7   : > { %v4096_v33 = vpack.c.bf16 %v4092_v58, %v4092_v58  ;;  %5103 = vmatprep.subr.bf16.mxu0 %v7729_v32 }
 0x3f9   : > { %5098 = vmatmul.mubr.msk.bf16.vlgmr.msra.gmra.mxu1 %vm811_vm2, %v4096_v33 }
 0x3fa   : > { %5113 = vmatprep.mubr.msk.bf16.mxu1 %vm5293_vm0, %v7729_v32  ;;  %5104 = vmatpush3.bf16.msra.mxu0 %v5200_v11  ;;  %v5206_v11 = vld [vmem:[%s7391_s16] sm:$0xff]  }
 0x3fb   : > { %5117 = vmatprep.subr.bf16.mxu0 %v7729_v32  ;;  %5110 = vmatpush3.bf16.msra.mxu1 %v5201_v3 }
 0x3fc   : > { %5111 = vmatprep.subr.bf16.mxu1 %v7729_v32 }
 0x3ff   : > { %5112 = vmatpush3.bf16.msra.mxu1 %v5202_v60 }
 0x4a5   : > { %v4141_v30 = vpop.f32.mrf.mxu0 }
 0x4a7   : > { %v5081_v53 = vpop.f32.mrf.mxu0 }
 0x4a9   : > { %v4144_v2 = vpop.f32.mrf.mxu0 }
 0x4ab   : > { %v5082_v28 = vpop.f32.mrf.mxu0 }
 0x4ac   : > { %v5205_v28 = vld [vmem:[%s7391_s16 + $0x8] sm:$0xff]  }
 0x4af   : > { %v4190_v41 = vpop.f32.mrf.mxu1 }
 0x4b0   : > { %4295 = vrot.lane.b32.xlu0 %v4190_v41, %s5298_s25  ;;  %v4989_v41 = vld [vmem:[%s7390_s15] ss:$0 sm:$0xff]  ;;  %s644_s25 = sand.u32 1, %s5281_s22  }
 0x4b1   : > { %v5087_v5 = vpop.f32.mrf.mxu1  ;;  %s4606_s29 = scalar_lea.sflag [#allocation3], %s644_s25 }
 0x4b3   : > { %v4193_v46 = vpop.f32.mrf.mxu1 }
 0x4b5   : > { %v5088_v26 = vpop.f32.mrf.mxu1  ;;  %v4239_v18 = vpop.f32.mrf.mxu0 }
 0x4b6   : > { %4299 = vrot.lane.b32.xlu1 %v4239_v18, %s5299_s3 }
 0x4b7   : > { %v5093_v21 = vpop.f32.mrf.mxu0 }
 0x4b9   : > { %v4242_v10 = vpop.f32.mrf.mxu0  ;;  %v4288_v61 = vpop.f32.mrf.mxu1 }
 0x4ba   : > { %4303 = vrot.lane.b32.xlu0 %v4288_v61, %s5300_s1  ;;  %s4706_s1 = sshll.u32 %s644_s25, 3 }
 0x4bb   : > { %v5094_v62 = vpop.f32.mrf.mxu0  ;;  %v5099_v8 = vpop.f32.mrf.mxu1  ;;  %s646_s19 = scalar_lea.vmem [#allocation2], %s4706_s1 }
 0x4bc   : > { %v4993_v62 = vld [vmem:[%s7392_s17] ss:$0 sm:$0xff]  ;;  %s4619_s0 = sshll.u32 %s646_s19, 4  ;;  %s4620_s0 = int_to_ptr.vmem [resolvable:$true] %s4619_s0 }
 0x4bd   : > { %v4291_v0 = vpop.f32.mrf.mxu1  ;;  %s5229_s3 = scalar_lea.vmem %s4620_s0, 128  ;;  %p5236_p0 = scmp.lt.s32.totalorder %s4620_s0, %s5234_s23 }
 0x4be   : > { %p5230_p11 = scmp.ne.s32.totalorder %s4620_s0, %s5229_s3  ;;  %p5237_p1 = scmp.lt.s32.totalorder %s5235_s2, %s5229_s3 }
 0x4bf   : > { %v5100_v6 = vpop.f32.mrf.mxu1 }
 0x4c0   : > { %p5231_p12 = pnand %p5230_p11, %p5445_p5  ;;  %p5238_p2 = por %p5237_p1, %p5236_p0 }
 0x4c2   : > { %p5232_p13 = pneg %p5231_p12 }
 0x4c4   : > { %p5239_p3 = pnand %p5238_p2, %p5232_p13 }
 0x522   : > { %v4296_v25 = vpop.permute.xlu0 %4295 }
 0x523   : > { %v4306_v15 = vsel %vm811_vm2, %v4141_v30, %v4296_v25  ;;  %v4988_v30 = vld [vmem:[%s7388_s13] ss:$0 sm:$0xff] }
 0x528   : > { %v4300_v19 = vpop.permute.xlu1 %4299 }
 0x529   : > { %v4308_v45 = vsel %vm4307_vm4, %v4306_v15, %v4300_v19 }
 0x52c   : > { %v4304_v48 = vpop.permute.xlu0 %4303 }
 0x52d   : > { %v4310_v31 = vsel %vm4309_vm5, %v4308_v45, %v4304_v48 }
 0x52e   : > { %v4311_v9 = vpack.c.bf16 %v4310_v31, %v4310_v31 }
 0x530   : > { %5106 = vmatmul.mubr.msk.bf16.vlgmr.msra.gmra.mxu0 %vm679_vm1, %v4311_v9 }
 0x531   : > { %5125 = vmatprep.mubr.msk.bf16.mxu0 %vm5293_vm0, %v7729_v32  ;;  %5118 = vmatpush3.bf16.msra.mxu0 %v5203_v56 }
 0x532   : > { %5119 = vmatprep.subr.bf16.mxu0 %v7729_v32 }
 0x535   : > { %5120 = vmatpush3.bf16.msra.mxu0 %v5204_v20 }
 0x536   : > { %5121 = vmatprep.subr.bf16.mxu0 %v7729_v32 }
 0x539   : > { %5122 = vmatpush3.bf16.msra.mxu0 %v5205_v28 }
 0x53a   : > { %5123 = vmatprep.subr.bf16.mxu0 %v7729_v32 }
 0x53d   : > { %5124 = vmatpush3.bf16.msra.mxu0 %v5206_v11 }
 0x5f0   : > { %v4365_v23 = vpop.f32.mrf.mxu0 }
 0x5f1   : > { %v4378_v40 = vadd.f32 %v4987_v36, %v4365_v23 }
 0x5f2   : > { %v5107_v12 = vpop.f32.mrf.mxu0 }
 0x5f3   : > { %v4379_v43 = vadd.f32 %v5228_v16, %v4378_v40 }
 0x5f4   : > { %v4368_v38 = vpop.f32.mrf.mxu0 }
 0x5f5   : > { %v4380_v54 = vsel %vm679_vm1, %v4379_v43, 0.0 }
 0x5f6   : > { %v4381_v29 = vrot.slane %v4380_v54, 4  ;;  %v5108_v55 = vpop.f32.mrf.mxu0 }
 0x5f8   : > { %v4382_v59 = vadd.f32 %v4381_v29, %v4380_v54 }
 0x5fa   : > { %v4383_v37 = vrot.slane %v4382_v59, 2 }
 0x5fc   : > { %v4384_v1 = vadd.f32 %v4383_v37, %v4382_v59  ;;  %v4589_v59 = vld [vmem:[%s7393_s18] sm:$0x1] }
 0x5fe   : > { %v4385_v50 = vrot.slane %v4384_v1, 1 }
 0x600   : > { %v4386_v51 = vadd.f32 %v4385_v50, %v4384_v1 }
 0x602   : > { %v4388_v63 = vmul.f32 0.125, %v4386_v51  ;;  %v4999_v51 = vld [vmem:[%s7733_s27] ss:$0 sm:$0xff] }
 0x604   : > { %v4389_v4 = vsub.f32 %v4379_v43, %v4388_v63 }
 0x606   : > { %v4390_v7 = vmul.f32 %v4389_v4, %v4389_v4 }
 0x608   : > { %v4391_v49 = vsel %vm679_vm1, %v4390_v7, 0.0 }
 0x609   : > { %v4392_v42 = vrot.slane %v4391_v49, 4 }
 0x60b   : > { %v4393_v44 = vadd.f32 %v4392_v42, %v4391_v49 }
 0x60d   : > { %v4394_v22 = vrot.slane %v4393_v44, 2 }
 0x60f   : > { %v4395_v34 = vadd.f32 %v4394_v22, %v4393_v44 }
 0x611   : > { %v4396_v35 = vrot.slane %v4395_v34, 1 }
 0x613   : > { %v4397_v39 = vadd.f32 %v4396_v35, %v4395_v34 }
 0x615   : > { %v4398_v57 = vmul.f32 0.125, %v4397_v39 }
 0x617   : > { %v4399_v24 = vadd.f32 1e-05, %v4398_v57 }
 0x619   : > { %5223 = vrsqrt.f32 %v4399_v24 }
 0x626   : > { %v5224_v52 = vpop.eup %5223 }
 0x627   : > { %v4402_v58 = vmul.f32 %v5224_v52, %v4401_v27 }
 0x629   : > { %v4406_v33 = vrot.slane %v4402_v58, %v4405_v13 }
 0x62b   : > { %v4407_v53 = vmul.f32 %v4406_v33, %v4389_v4 }
 0x62d   : > { %v4415_v2 = vadd.f32 %v4988_v30, %v4407_v53 }
 0x62f   : > { %v4416_v17 = vpack.c.bf16 %v4415_v2, %v4415_v2 }
 0x631   : > { %5114 = vmatmul.mubr.msk.bf16.vlgmr.msra.gmra.mxu1 %vm679_vm1, %v4416_v17 }
 0x6f1   : > { %v4477_v5 = vpop.f32.mrf.mxu1 }
 0x6f2   : > { %v4478_v46 = vadd.f32 %v4989_v41, %v4477_v5 }
 0x6f3   : > { %v5115_v26 = vpop.f32.mrf.mxu1 }
 0x6f4   : > { %v4483_v18 = vmax.f32 %v4478_v46, 0.0 }
 0x6f5   : > { %v4480_v21 = vpop.f32.mrf.mxu1 }
 0x6f6   : > { %v4484_v10 = vpack.c.bf16 %v4483_v18, %v4483_v18 }
 0x6f7   : > { %v5116_v61 = vpop.f32.mrf.mxu1 }
 0x6f8   : > { %5126 = vmatmul.mubr.msk.bf16.vlgmr.msra.gmra.mxu0 %vm4524_vm6, %v4484_v10 }
 0x7b8   : > { %v4562_v8 = vpop.f32.mrf.mxu0 }
 0x7b9   : > { %v4563_v32 = vadd.f32 %v4993_v62, %v4562_v8 }
 0x7ba   : > { %v5127_v0 = vpop.f32.mrf.mxu0 }
 0x7bb   : > { %v4568_v6 = vadd.f32 %v4563_v32, %v4415_v2 }
 0x7bc   : > { %v4565_v25 = vpop.f32.mrf.mxu0 }
 0x7bd   : > { %v4569_v19 = vsel %vm679_vm1, %v4568_v6, 0.0 }
 0x7be   : > { %v4570_v15 = vrot.slane %v4569_v19, 4  ;;  %v5128_v45 = vpop.f32.mrf.mxu0 }
 0x7c0   : > { %v4571_v48 = vadd.f32 %v4570_v15, %v4569_v19 }
 0x7c2   : > { %v4572_v31 = vrot.slane %v4571_v48, 2 }
 0x7c4   : > { %v4573_v9 = vadd.f32 %v4572_v31, %v4571_v48 }
 0x7c6   : > { %v4574_v3 = vrot.slane %v4573_v9, 1 }
 0x7c8   : > { %v4575_v60 = vadd.f32 %v4574_v3, %v4573_v9 }
 0x7ca   : > { %v4576_v56 = vmul.f32 0.125, %v4575_v60 }
 0x7cc   : > { %v4577_v20 = vsub.f32 %v4568_v6, %v4576_v56 }
 0x7ce   : > { %v4578_v36 = vmul.f32 %v4577_v20, %v4577_v20 }
 0x7d0   : > { %v4579_v23 = vsel %vm679_vm1, %v4578_v36, 0.0 }
 0x7d1   : > { %v4580_v40 = vrot.slane %v4579_v23, 4 }
 0x7d3   : > { %v4581_v12 = vadd.f32 %v4580_v40, %v4579_v23 }
 0x7d5   : > { %v4582_v16 = vrot.slane %v4581_v12, 2 }
 0x7d7   : > { %v4583_v43 = vadd.f32 %v4582_v16, %v4581_v12 }
 0x7d9   : > { %v4584_v38 = vrot.slane %v4583_v43, 1 }
 0x7db   : > { %v4585_v54 = vadd.f32 %v4584_v38, %v4583_v43 }
 0x7dd   : > { %v4586_v29 = vmul.f32 0.125, %v4585_v54 }
 0x7df   : > { %v4587_v55 = vadd.f32 1e-05, %v4586_v29 }
 0x7e1   : > { %5225 = vrsqrt.f32 %v4587_v55 }
 0x7ee   : > { %v5226_v37 = vpop.eup %5225 }
 0x7ef   : > { %v4590_v1 = vmul.f32 %v5226_v37, %v4589_v59 }
 0x7f1   : > { %v4594_v50 = vrot.slane %v4590_v1, %v4405_v13 }
 0x7f3   : > { %v4595_v63 = vmul.f32 %v4594_v50, %v4577_v20 }
 0x7f5   : > { %v4603_v4 = vadd.f32 %v4999_v51, %v4595_v63 }
 0x7f7   : > { %4604 = vst.msk [vmem:[%s646_s19] sm:$0xff] %vm679_vm1, %v4603_v4 }
 0x7f8   : > { %5242 = shalt.err (!%p5239_p3)
}
 0x7f9   : > { %s5243_s1 = scalar_lea.hbm %s4617_s5, 128  ;;  %s5247_s30 = scalar_lea.hbm %s7734_s28, 256 }
 0x7fa   : > { %p5244_p4 = scmp.ne.s32.totalorder %s4617_s5, %s5243_s1  ;;  %p5248_p9 = scmp.lt.s32.totalorder %s4617_s5, %s7734_s28 }
 0x7fb   : > { %p5249_p10 = scmp.lt.s32.totalorder %s5247_s30, %s5243_s1 }
 0x7fc   : > { %p5245_p7 = pnand %p5244_p4, %p5445_p5 }
 0x7fd   : > { %p5250_p11 = por %p5249_p10, %p5248_p9 }
 0x7fe   : > { %p5246_p8 = pneg %p5245_p7 }
 0x800   : > { %p5251_p12 = pnand %p5250_p11, %p5246_p8 }
 0x802   : > { %5254 = shalt.err (!%p5251_p12)
}
 0x803   : > { %5129 = dma.vmem_to_hbm [thread:$0]  (%p5445_p5), %s4620_s0, 128, %s4617_s5, %s4606_s29  }
 0x804 PF: > { %s7735_s24 = sld [smem:[#allocation7_spill]] }
 0x805   : > { %s7736_s3 = sld [smem:[#allocation5_spill]] }
 0x80a   : > { %p5135_p13 = scmp.ge.s32.totalorder %s7735_s24, 2 }
 0x80b   : > { %s4631_s23 = sand.u32 1, %s7736_s3  }
 0x80c   : > { %p5132_p0 = pnand %p5135_p13, %p5449_p6  ;;  %s4632_s2 = scalar_lea.sflag [#allocation3], %s4631_s23 }
 0x80e   : > { %p5133_p1 = pneg %p5132_p0 }
 0x810   : > { %5272 = dma.done.wait (%p5133_p1), %s4632_s2, 128  }
 0x811   : > { %5274 = vsyncadd (%p5133_p1), %s4632_s2, 4294967168  ;;  %s7738_s24 = sld [smem:[#allocation8_spill]]  ;;  %s7741_s1 = smov %s5281_s22 }
 0x812   : > { %s7739_s25 = sld [smem:[#allocation6_spill]] }
 0x813   : > { %s7740_s23 = sld [smem:[#allocation9_spill]] }
 0x817   : > { %p30_p2 = scmp.ge.s32.totalorder %s7738_s24, 4  }
 0x818   : > { %s7742_s22 = smov %s7739_s25 }
 0x819   :  { %32 = sbr.rel (!%p30_p2) target bundleno = 12 (0xc), region = 141 }
 0x81e   :  { %4637 = vsyncpa [#allocation3], 1 }
 0x81f   :  { %4639 = vsyncpa [#allocation3 + $0x1], 1 }

</bundles_post_ra>
